<compile_context>
chip_gen: v7x
topology: tpu7x:2x2x1
jax: 0.10.0
libtpu: 0.0.40
codegen_flags: <defaults>
</compile_context>

<pallas_src>
import functools
import math

import numpy as np
import jax
import jax.numpy as jnp
from jax.experimental import pallas as pl
from jax.experimental.pallas import tpu as pltpu

_HALF_LOG_2PI = 0.5 * math.log(2.0 * math.pi)
_INV_SQRT2 = 1.0 / math.sqrt(2.0)
_PACK_LANES = 128          # lane-dense packing width of the parameter buffer
_NEG_INF = -1e30


# ----------------------------- in-kernel math helpers -----------------------------
def _erf(x):
    # Abramowitz & Stegun 7.1.26 rational approximation (|err| < 1.5e-7).
    # The divide is moved to the (otherwise idle) EUP slot.
    a1, a2, a3, a4, a5 = 0.254829592, -0.284496736, 1.421413741, -1.453152027, 1.061405429
    p = 0.3275911
    ax = jnp.abs(x)
    t = pl.reciprocal(1.0 + p * ax, approx=True)
    poly = ((((a5 * t + a4) * t + a3) * t + a2) * t + a1) * t
    y = 1.0 - poly * jnp.exp(-ax * ax)
    return jnp.where(x >= 0.0, y, -y)


def _gelu(x):
    # exact (erf) GELU, matching torch.nn.GELU() default
    return 0.5 * x * (1.0 + _erf(x * _INV_SQRT2))


def _sigmoid(x):
    return pl.reciprocal(1.0 + jnp.exp(-x), approx=True)


def _mha_block(h, get, prefix, *, num_heads, head_dim, bias=None):
    # One Attention block: x = x + MHA(x,x,x); x = x + Linear(x); x = GELU(x).
    # Per-head weights are pre-split at pack time, so there is no lane slicing of
    # a fused qkv and no concat of per-head contexts.
    scale = 1.0 / math.sqrt(head_dim)
    acc = None
    for hh in range(num_heads):
        q = jnp.dot(h, get(f"{prefix}.wq{hh}"), preferred_element_type=jnp.float32) + get(f"{prefix}.bq{hh}")
        k = jnp.dot(h, get(f"{prefix}.wk{hh}"), preferred_element_type=jnp.float32) + get(f"{prefix}.bk{hh}")
        v = jnp.dot(h, get(f"{prefix}.wv{hh}"), preferred_element_type=jnp.float32) + get(f"{prefix}.bv{hh}")
        # q @ k.T without an explicit transpose op
        s = jax.lax.dot_general(q * scale, k, (((1,), (1,)), ((), ())),
                                preferred_element_type=jnp.float32)
        if bias is not None:
            s = s + bias                                   # additive block-diag mask
        s = s - jnp.max(s, axis=-1, keepdims=True)
        ex = jnp.exp(s)
        pr = ex * pl.reciprocal(jnp.sum(ex, axis=-1, keepdims=True), approx=True)
        ctx = jnp.dot(pr, v, preferred_element_type=jnp.float32)
        contrib = jnp.dot(ctx, get(f"{prefix}.wo{hh}"), preferred_element_type=jnp.float32)
        acc = contrib if acc is None else acc + contrib
    # TODO(synk): nn.MultiheadAttention dropout(p=0.05) omitted (eval-mode identity).
    x1 = h + acc + get(f"{prefix}.bo")
    x2 = x1 + jnp.dot(x1, get(f"{prefix}.wl"), preferred_element_type=jnp.float32) + get(f"{prefix}.bl")
    return _gelu(x2)


# ----------------------------- the single fused kernel -----------------------------
def _space_transformer_kernel(x_ref, eps_ref, pk_ref, out_ref, *, layout,
                              vertex_heads, vertex_hd, vertex_layers,
                              poly_heads, poly_hd, poly_layers):
    def get(name):
        off, r, c = layout[name]
        return pk_ref[off:off + r, :c]

    # ---- PolygonTransformer over all P polygons at once (block-diag attention) ----
    x = x_ref[...]                                         # (P*V, 2)
    w1a = get("pt.w1a")                                    # (2, vd)
    # Linear(2, vd) on the VPU (K=2 MXU pass is a waste)
    h = x[:, 0:1] * w1a[0:1, :] + x[:, 1:2] * w1a[1:2, :] + get("pt.b1a")
    h = jnp.tanh(h)
    h = _gelu(jnp.dot(h, get("pt.w1b"), preferred_element_type=jnp.float32) + get("pt.b1b"))

    mask_bias = get("pt.mask_bias")                        # (PV, PV) baked additive bias
    for layer in range(vertex_layers):
        h = _mha_block(h, get, f"pt.attn{layer}",
                       num_heads=vertex_heads, head_dim=vertex_hd, bias=mask_bias)

    h = _gelu(jnp.dot(h, get("pt.w2"), preferred_element_type=jnp.float32) + get("pt.b2"))   # (PV, pd)
    # per-polygon mean as one (P, PV) @ (PV, pd) matmul (matrix baked at pack time)
    hp = jnp.dot(get("pt.avg"), h, preferred_element_type=jnp.float32)                       # (P, pd)

    # ---- polygon-level transformer stack + VAE head ----
    g = jnp.tanh(jnp.dot(hp, get("st.w1a"), preferred_element_type=jnp.float32) + get("st.b1a"))
    g = _gelu(jnp.dot(g, get("st.w1b"), preferred_element_type=jnp.float32) + get("st.b1b"))
    for layer in range(poly_layers):
        g = _mha_block(g, get, f"st.attn{layer}",
                       num_heads=poly_heads, head_dim=poly_hd, bias=None)

    g = jnp.maximum(jnp.dot(g, get("st.w2a"), preferred_element_type=jnp.float32) + get("st.b2a"), 0.0)
    g = jnp.maximum(jnp.dot(g, get("st.w2b"), preferred_element_type=jnp.float32) + get("st.b2b"), 0.0)

    mu = _sigmoid(jnp.dot(g, get("st.wmu"), preferred_element_type=jnp.float32) + get("st.bmu"))
    lv = _sigmoid(jnp.dot(g, get("st.wlv"), preferred_element_type=jnp.float32) + get("st.blv"))

    eps = eps_ref[...]
    std = jnp.exp(0.5 * lv)
    val = mu + std * eps                                   # Normal(mu, std).rsample()
    # log N(val; mu, std) with (val - mu) = std * eps  ->  -0.5*eps^2 - 0.5*log_var - 0.5*log(2pi)
    logprob = -0.5 * eps * eps - 0.5 * lv - _HALF_LOG_2PI
    out_ref[...] = jnp.concatenate([val, logprob, std], axis=-1)   # single lane-packed output


# ----------------------------- parameter init (torch-like layouts) -----------------------------
def _init_linear(key, din, dout):
    kw, kb = jax.random.split(key)
    bound = 1.0 / math.sqrt(din)
    w = np.asarray(jax.random.uniform(kw, (dout, din), jnp.float32, -bound, bound))
    b = np.asarray(jax.random.uniform(kb, (dout,), jnp.float32, -bound, bound))
    return w.T, b[None, :]                                 # (Din, Dout), (1, Dout)


def _init_attention_stack(key, e, n_layers):
    keys = jax.random.split(key, n_layers)
    wqkv, bqkv, wo, bo, wl, bl = [], [], [], [], [], []
    for k in keys:
        k1, k2, k3 = jax.random.split(k, 3)
        xb = math.sqrt(6.0 / (e + 3 * e))                  # xavier_uniform_ (torch MHA in_proj)
        wq = np.asarray(jax.random.uniform(k1, (3 * e, e), jnp.float32, -xb, xb))
        wqkv.append(wq.T)                                   # (E, 3E)
        bqkv.append(np.zeros((1, 3 * e), np.float32))       # in_proj_bias = 0
        ow, _ = _init_linear(k2, e, e)                       # out_proj (bias = 0 in torch)
        wo.append(ow); bo.append(np.zeros((1, e), np.float32))
        lw, lb = _init_linear(k3, e, e)                      # Attention.linear
        wl.append(lw); bl.append(lb)
    return {"wqkv": np.stack(wqkv), "bqkv": np.stack(bqkv),
            "wo": np.stack(wo), "bo": np.stack(bo),
            "wl": np.stack(wl), "bl": np.stack(bl)}


def init_params(key, vertex_dim, poly_dim, scales):
    cod = (1 + scales * 2) * 2
    keys = jax.random.split(key, 12)
    pw1a, pb1a = _init_linear(keys[0], 2, vertex_dim)
    pw1b, pb1b = _init_linear(keys[1], vertex_dim, vertex_dim)
    pw2, pb2 = _init_linear(keys[3], vertex_dim, poly_dim)
    poly = {"w1a": pw1a, "b1a": pb1a, "w1b": pw1b, "b1b": pb1b,
            "attn": _init_attention_stack(keys[2], vertex_dim, 3),
            "w2": pw2, "b2": pb2}
    sw1a, sb1a = _init_linear(keys[4], poly_dim, poly_dim)
    sw1b, sb1b = _init_linear(keys[5], poly_dim, poly_dim)
    w2a, b2a = _init_linear(keys[7], poly_dim, cod)
    w2b, b2b = _init_linear(keys[8], cod, cod)
    wmu, bmu = _init_linear(keys[9], cod, cod // 2)
    wlv, blv = _init_linear(keys[10], cod, cod // 2)
    return {"poly": poly,
            "w1a": sw1a, "b1a": sb1a, "w1b": sw1b, "b1b": sb1b,
            "attn": _init_attention_stack(keys[6], poly_dim, 4),
            "w2a": w2a, "b2a": b2a, "w2b": w2b, "b2b": b2b,
            "wmu": wmu, "bmu": bmu, "wlv": wlv, "blv": blv}


# ----------------------------- host-side parameter packing -----------------------------
def _split_attention_stack(add, prefix, stack, num_heads):
    wqkv, bqkv = stack["wqkv"], stack["bqkv"]
    wo, bo, wl, bl = stack["wo"], stack["bo"], stack["wl"], stack["bl"]
    n_layers, e, _ = wqkv.shape
    hd = e // num_heads
    for layer in range(n_layers):
        p = f"{prefix}{layer}"
        for h in range(num_heads):
            lo = h * hd
            add(f"{p}.wq{h}", wqkv[layer][:, lo:lo + hd])
            add(f"{p}.wk{h}", wqkv[layer][:, e + lo:e + lo + hd])
            add(f"{p}.wv{h}", wqkv[layer][:, 2 * e + lo:2 * e + lo + hd])
            add(f"{p}.bq{h}", bqkv[layer][:, lo:lo + hd])
            add(f"{p}.bk{h}", bqkv[layer][:, e + lo:e + lo + hd])
            add(f"{p}.bv{h}", bqkv[layer][:, 2 * e + lo:2 * e + lo + hd])
            add(f"{p}.wo{h}", wo[layer][lo:lo + hd, :])
        add(f"{p}.bo", bo[layer])
        add(f"{p}.wl", wl[layer])
        add(f"{p}.bl", bl[layer])
    return n_layers, hd


def pack_params(params, P, V, vertex_heads, poly_heads):
    """Pack every parameter (plus mask-bias / mean-matrix constants) into ONE
    lane-dense (rows, 128) f32 buffer; every entry starts at an 8-row-aligned
    offset and lane 0, so in-kernel carving is tile-aligned."""
    entries = []

    def add(name, arr):
        arr = np.asarray(arr, np.float32)
        assert arr.ndim == 2 and arr.shape[1] <= _PACK_LANES
        entries.append((name, arr))

    pt = params["poly"]
    add("pt.w1a", pt["w1a"]); add("pt.b1a", pt["b1a"])
    add("pt.w1b", pt["w1b"]); add("pt.b1b", pt["b1b"])
    vertex_layers, vertex_hd = _split_attention_stack(add, "pt.attn", pt["attn"], vertex_heads)
    add("pt.w2", pt["w2"]); add("pt.b2", pt["b2"])

    PV = P * V
    same_poly = (np.arange(PV)[:, None] // V) == (np.arange(PV)[None, :] // V)
    add("pt.mask_bias", np.where(same_poly, 0.0, _NEG_INF).astype(np.float32))
    mean_rows = np.arange(P)[:, None] == (np.arange(PV)[None, :] // V)
    add("pt.avg", np.where(mean_rows, 1.0 / V, 0.0).astype(np.float32))

    add("st.w1a", params["w1a"]); add("st.b1a", params["b1a"])
    add("st.w1b", params["w1b"]); add("st.b1b", params["b1b"])
    poly_layers, poly_hd = _split_attention_stack(add, "st.attn", params["attn"], poly_heads)
    add("st.w2a", params["w2a"]); add("st.b2a", params["b2a"])
    add("st.w2b", params["w2b"]); add("st.b2b", params["b2b"])
    add("st.wmu", params["wmu"]); add("st.bmu", params["bmu"])
    add("st.wlv", params["wlv"]); add("st.blv", params["blv"])

    layout, blocks, off = {}, [], 0
    for name, arr in entries:
        r, c = arr.shape
        rpad = ((r + 7) // 8) * 8
        block = np.zeros((rpad, _PACK_LANES), np.float32)
        block[:r, :c] = arr
        layout[name] = (off, r, c)
        blocks.append(block)
        off += rpad

    meta = dict(vertex_layers=vertex_layers, vertex_hd=vertex_hd,
                poly_layers=poly_layers, poly_hd=poly_hd,
                dz=params["wmu"].shape[1])
    return jnp.asarray(np.concatenate(blocks, axis=0)), layout, meta


# ----------------------------- end-to-end (jit-able) forward -----------------------------
def make_space_transformer(layout, meta, *, P, V, vertex_heads, poly_heads):
    dz = meta["dz"]
    kern = functools.partial(
        _space_transformer_kernel, layout=layout,
        vertex_heads=vertex_heads, vertex_hd=meta["vertex_hd"], vertex_layers=meta["vertex_layers"],
        poly_heads=poly_heads, poly_hd=meta["poly_hd"], poly_layers=meta["poly_layers"])
    vmem = pl.BlockSpec(memory_space=pltpu.MemorySpace.VMEM)
    call = pl.pallas_call(
        kern,
        out_shape=jax.ShapeDtypeStruct((P, 3 * dz), jnp.float32),
        in_specs=[vmem, vmem, vmem],          # x, eps, packed params: 3 DMAs total
        out_specs=vmem,
    )

    def forward(packed, x, eps_key):
        eps = jax.random.normal(eps_key, (P, dz), jnp.float32)
        out = call(x.reshape(P * V, 2), eps, packed)
        values, log_prob, std = out[:, :dz], out[:, dz:2 * dz], out[:, 2 * dz:]
        # post-processing glue (mirrors clip / split / view); stays on device.
        dvalues = jnp.clip(jax.lax.stop_gradient(values), 0.0, 1.0)
        turns = dvalues[:, 0]
        positions = dvalues[:, 1:].reshape(-1, 2, (dz - 1) // 2)
        # TODO(synk): torch's .detach().cpu().numpy() host transfer is left to the caller.
        return turns, positions, log_prob, std

    return jax.jit(forward)


# ----------------------------- demo -----------------------------
if __name__ == "__main__":
    vertex_dim, vertex_heads = 32, 2
    poly_dim, poly_heads = 32, 4
    scales = 3
    P, V = 8, 8                       # 8 polygons, 8 vertices each, xy coords

    root = jax.random.PRNGKey(0)
    kparams, kx, keps = jax.random.split(root, 3)
    params = init_params(kparams, vertex_dim, poly_dim, scales)
    packed, layout, meta = pack_params(params, P, V, vertex_heads, poly_heads)
    x = jax.random.normal(kx, (P, V, 2), jnp.float32)

    fwd = make_space_transformer(layout, meta, P=P, V=V,
                                 vertex_heads=vertex_heads, poly_heads=poly_heads)
    turns, positions, log_prob, std = fwd(packed, x, keps)
    jax.block_until_ready((turns, positions, log_prob, std))

    turns_np = np.asarray(turns)
    positions_np = np.asarray(positions)
    assert turns_np.shape == (P,)
    assert positions_np.shape == (P, 2, scales)
    assert log_prob.shape == (P, 1 + 2 * scales)
    assert std.shape == (P, 1 + 2 * scales)
    assert np.all(np.isfinite(np.asarray(log_prob)))
    assert np.all(np.asarray(std) > 0.0)
    print("KERNEL_OK")
</pallas_src>

<mosaic_0001>
module attributes {stable_mosaic.version = 11 : i64} {
  func.func @_space_transformer_kernel(%arg0: memref<64x2xf32, #tpu.memory_space<vmem>>, %arg1: memref<8x7xf32, #tpu.memory_space<vmem>>, %arg2: memref<3560x128xf32, #tpu.memory_space<vmem>>, %arg3: memref<8x21xf32, #tpu.memory_space<vmem>>) attributes {dimension_semantics = [], scalar_prefetch = 0 : i64, scratch_operands = 0 : i64, tpu.core_type = #tpu.core_type<tc>} {
    %c0 = arith.constant 0 : index
    %c0_0 = arith.constant 0 : index
    %0 = vector.load %arg0[%c0, %c0_0] : memref<64x2xf32, #tpu.memory_space<vmem>>, vector<64x2xf32>
    %c0_1 = arith.constant 0 : index
    %c0_2 = arith.constant 0 : index
    %1 = vector.load %arg2[%c0_1, %c0_2] : memref<3560x128xf32, #tpu.memory_space<vmem>>, vector<2x32xf32>
    %2 = vector.extract_strided_slice %0 {offsets = [0, 0], sizes = [64, 1], strides = [1, 1]} : vector<64x2xf32> to vector<64x1xf32>
    %3 = vector.extract_strided_slice %1 {offsets = [0, 0], sizes = [1, 32], strides = [1, 1]} : vector<2x32xf32> to vector<1x32xf32>
    %4 = vector.broadcast %2 : vector<64x1xf32> to vector<64x32xf32>
    %5 = vector.broadcast %3 : vector<1x32xf32> to vector<64x32xf32>
    %6 = arith.mulf %4, %5 : vector<64x32xf32>
    %7 = vector.extract_strided_slice %0 {offsets = [0, 1], sizes = [64, 1], strides = [1, 1]} : vector<64x2xf32> to vector<64x1xf32>
    %8 = vector.extract_strided_slice %1 {offsets = [1, 0], sizes = [1, 32], strides = [1, 1]} : vector<2x32xf32> to vector<1x32xf32>
    %9 = vector.broadcast %7 : vector<64x1xf32> to vector<64x32xf32>
    %10 = vector.broadcast %8 : vector<1x32xf32> to vector<64x32xf32>
    %11 = arith.mulf %9, %10 : vector<64x32xf32>
    %12 = arith.addf %6, %11 : vector<64x32xf32>
    %c8 = arith.constant 8 : index
    %c0_3 = arith.constant 0 : index
    %13 = vector.load %arg2[%c8, %c0_3] : memref<3560x128xf32, #tpu.memory_space<vmem>>, vector<1x32xf32>
    %14 = vector.broadcast %13 : vector<1x32xf32> to vector<64x32xf32>
    %15 = arith.addf %12, %14 : vector<64x32xf32>
    %16 = math.tanh %15 : vector<64x32xf32>
    %c16 = arith.constant 16 : index
    %c0_4 = arith.constant 0 : index
    %17 = vector.load %arg2[%c16, %c0_4] : memref<3560x128xf32, #tpu.memory_space<vmem>>, vector<32x32xf32>
    %cst = arith.constant dense<0.000000e+00> : vector<64x32xf32>
    %18 = tpu.matmul %16, %17, %cst {dimension_numbers = #tpu.dot_dimension_numbers<[1], [0], [0], [1], [0, 0, 1, 1], [], []>} : vector<64x32xf32>, vector<32x32xf32>, vector<64x32xf32> -> vector<64x32xf32>
    %c48 = arith.constant 48 : index
    %c0_5 = arith.constant 0 : index
    %19 = vector.load %arg2[%c48, %c0_5] : memref<3560x128xf32, #tpu.memory_space<vmem>>, vector<1x32xf32>
    %20 = vector.broadcast %19 : vector<1x32xf32> to vector<64x32xf32>
    %21 = arith.addf %18, %20 : vector<64x32xf32>
    %cst_6 = arith.constant 5.000000e-01 : f32
    %22 = vector.broadcast %cst_6 : f32 to vector<64x32xf32>
    %23 = arith.mulf %22, %21 : vector<64x32xf32>
    %cst_7 = arith.constant 0.707106769 : f32
    %24 = vector.broadcast %cst_7 : f32 to vector<64x32xf32>
    %25 = arith.mulf %21, %24 : vector<64x32xf32>
    %26 = math.absf %25 : vector<64x32xf32>
    %cst_8 = arith.constant 0.327591091 : f32
    %27 = vector.broadcast %cst_8 : f32 to vector<64x32xf32>
    %28 = arith.mulf %27, %26 : vector<64x32xf32>
    %cst_9 = arith.constant 1.000000e+00 : f32
    %29 = vector.broadcast %cst_9 : f32 to vector<64x32xf32>
    %30 = arith.addf %29, %28 : vector<64x32xf32>
    %31 = tpu.reciprocal %30 {approx = true} : vector<64x32xf32> -> vector<64x32xf32>
    %cst_10 = arith.constant 1.06140542 : f32
    %32 = vector.broadcast %cst_10 : f32 to vector<64x32xf32>
    %33 = arith.mulf %32, %31 : vector<64x32xf32>
    %cst_11 = arith.constant -1.45315206 : f32
    %34 = vector.broadcast %cst_11 : f32 to vector<64x32xf32>
    %35 = arith.addf %33, %34 : vector<64x32xf32>
    %36 = arith.mulf %35, %31 : vector<64x32xf32>
    %cst_12 = arith.constant 1.42141378 : f32
    %37 = vector.broadcast %cst_12 : f32 to vector<64x32xf32>
    %38 = arith.addf %36, %37 : vector<64x32xf32>
    %39 = arith.mulf %38, %31 : vector<64x32xf32>
    %cst_13 = arith.constant -0.284496725 : f32
    %40 = vector.broadcast %cst_13 : f32 to vector<64x32xf32>
    %41 = arith.addf %39, %40 : vector<64x32xf32>
    %42 = arith.mulf %41, %31 : vector<64x32xf32>
    %cst_14 = arith.constant 0.254829586 : f32
    %43 = vector.broadcast %cst_14 : f32 to vector<64x32xf32>
    %44 = arith.addf %42, %43 : vector<64x32xf32>
    %45 = arith.mulf %44, %31 : vector<64x32xf32>
    %cst_15 = arith.constant 0.000000e+00 : f32
    %46 = vector.broadcast %cst_15 : f32 to vector<64x32xf32>
    %47 = arith.subf %46, %26 : vector<64x32xf32>
    %48 = arith.mulf %47, %26 : vector<64x32xf32>
    %49 = math.exp %48 : vector<64x32xf32>
    %50 = arith.mulf %45, %49 : vector<64x32xf32>
    %cst_16 = arith.constant 1.000000e+00 : f32
    %51 = vector.broadcast %cst_16 : f32 to vector<64x32xf32>
    %52 = arith.subf %51, %50 : vector<64x32xf32>
    %cst_17 = arith.constant 0.000000e+00 : f32
    %53 = vector.broadcast %cst_17 : f32 to vector<64x32xf32>
    %54 = arith.cmpf oge, %25, %53 : vector<64x32xf32>
    %cst_18 = arith.constant 0.000000e+00 : f32
    %55 = vector.broadcast %cst_18 : f32 to vector<64x32xf32>
    %56 = arith.subf %55, %52 : vector<64x32xf32>
    %57 = arith.select %54, %52, %56 : vector<64x32xi1>, vector<64x32xf32>
    %cst_19 = arith.constant 1.000000e+00 : f32
    %58 = vector.broadcast %cst_19 : f32 to vector<64x32xf32>
    %59 = arith.addf %58, %57 : vector<64x32xf32>
    %60 = arith.mulf %23, %59 : vector<64x32xf32>
    %c1056 = arith.constant 1056 : index
    %c0_20 = arith.constant 0 : index
    %61 = vector.load %arg2[%c1056, %c0_20] : memref<3560x128xf32, #tpu.memory_space<vmem>>, vector<64x64xf32>
    %c56 = arith.constant 56 : index
    %c0_21 = arith.constant 0 : index
    %62 = vector.load %arg2[%c56, %c0_21] : memref<3560x128xf32, #tpu.memory_space<vmem>>, vector<32x16xf32>
    %cst_22 = arith.constant dense<0.000000e+00> : vector<64x16xf32>
    %63 = tpu.matmul %60, %62, %cst_22 {dimension_numbers = #tpu.dot_dimension_numbers<[1], [0], [0], [1], [0, 0, 1, 1], [], []>} : vector<64x32xf32>, vector<32x16xf32>, vector<64x16xf32> -> vector<64x16xf32>
    %c152 = arith.constant 152 : index
    %c0_23 = arith.constant 0 : index
    %64 = vector.load %arg2[%c152, %c0_23] : memref<3560x128xf32, #tpu.memory_space<vmem>>, vector<1x16xf32>
    %65 = vector.broadcast %64 : vector<1x16xf32> to vector<64x16xf32>
    %66 = arith.addf %63, %65 : vector<64x16xf32>
    %c88 = arith.constant 88 : index
    %c0_24 = arith.constant 0 : index
    %67 = vector.load %arg2[%c88, %c0_24] : memref<3560x128xf32, #tpu.memory_space<vmem>>, vector<32x16xf32>
    %cst_25 = arith.constant dense<0.000000e+00> : vector<64x16xf32>
    %68 = tpu.matmul %60, %67, %cst_25 {dimension_numbers = #tpu.dot_dimension_numbers<[1], [0], [0], [1], [0, 0, 1, 1], [], []>} : vector<64x32xf32>, vector<32x16xf32>, vector<64x16xf32> -> vector<64x16xf32>
    %c160 = arith.constant 160 : index
    %c0_26 = arith.constant 0 : index
    %69 = vector.load %arg2[%c160, %c0_26] : memref<3560x128xf32, #tpu.memory_space<vmem>>, vector<1x16xf32>
    %70 = vector.broadcast %69 : vector<1x16xf32> to vector<64x16xf32>
    %71 = arith.addf %68, %70 : vector<64x16xf32>
    %c120 = arith.constant 120 : index
    %c0_27 = arith.constant 0 : index
    %72 = vector.load %arg2[%c120, %c0_27] : memref<3560x128xf32, #tpu.memory_space<vmem>>, vector<32x16xf32>
    %cst_28 = arith.constant dense<0.000000e+00> : vector<64x16xf32>
    %73 = tpu.matmul %60, %72, %cst_28 {dimension_numbers = #tpu.dot_dimension_numbers<[1], [0], [0], [1], [0, 0, 1, 1], [], []>} : vector<64x32xf32>, vector<32x16xf32>, vector<64x16xf32> -> vector<64x16xf32>
    %c168 = arith.constant 168 : index
    %c0_29 = arith.constant 0 : index
    %74 = vector.load %arg2[%c168, %c0_29] : memref<3560x128xf32, #tpu.memory_space<vmem>>, vector<1x16xf32>
    %75 = vector.broadcast %74 : vector<1x16xf32> to vector<64x16xf32>
    %76 = arith.addf %73, %75 : vector<64x16xf32>
    %cst_30 = arith.constant 2.500000e-01 : f32
    %77 = vector.broadcast %cst_30 : f32 to vector<64x16xf32>
    %78 = arith.mulf %66, %77 : vector<64x16xf32>
    %cst_31 = arith.constant dense<0.000000e+00> : vector<64x64xf32>
    %79 = tpu.matmul %78, %71, %cst_31 {dimension_numbers = #tpu.dot_dimension_numbers<[1], [1], [0], [0], [0, 0, 1, 0], [], []>} : vector<64x16xf32>, vector<64x16xf32>, vector<64x64xf32> -> vector<64x64xf32>
    %80 = arith.addf %79, %61 : vector<64x64xf32>
    %cst_32 = arith.constant dense<0xFF800000> : vector<64xf32>
    %81 = vector.multi_reduction <maximumf>, %80, %cst_32 [1] : vector<64x64xf32> to vector<64xf32>
    %82 = vector.shape_cast %81 : vector<64xf32> to vector<64x1xf32>
    %83 = vector.broadcast %82 : vector<64x1xf32> to vector<64x64xf32>
    %84 = arith.subf %80, %83 : vector<64x64xf32>
    %85 = math.exp %84 : vector<64x64xf32>
    %cst_33 = arith.constant dense<0.000000e+00> : vector<64xf32>
    %86 = vector.multi_reduction <add>, %85, %cst_33 [1] : vector<64x64xf32> to vector<64xf32>
    %87 = vector.shape_cast %86 : vector<64xf32> to vector<64x1xf32>
    %88 = tpu.reciprocal %87 {approx = true} : vector<64x1xf32> -> vector<64x1xf32>
    %89 = vector.broadcast %88 : vector<64x1xf32> to vector<64x64xf32>
    %90 = arith.mulf %85, %89 : vector<64x64xf32>
    %cst_34 = arith.constant dense<0.000000e+00> : vector<64x16xf32>
    %91 = tpu.matmul %90, %76, %cst_34 {dimension_numbers = #tpu.dot_dimension_numbers<[1], [0], [0], [1], [0, 0, 1, 1], [], []>} : vector<64x64xf32>, vector<64x16xf32>, vector<64x16xf32> -> vector<64x16xf32>
    %c176 = arith.constant 176 : index
    %c0_35 = arith.constant 0 : index
    %92 = vector.load %arg2[%c176, %c0_35] : memref<3560x128xf32, #tpu.memory_space<vmem>>, vector<16x32xf32>
    %cst_36 = arith.constant dense<0.000000e+00> : vector<64x32xf32>
    %93 = tpu.matmul %91, %92, %cst_36 {dimension_numbers = #tpu.dot_dimension_numbers<[1], [0], [0], [1], [0, 0, 1, 1], [], []>} : vector<64x16xf32>, vector<16x32xf32>, vector<64x32xf32> -> vector<64x32xf32>
    %c192 = arith.constant 192 : index
    %c0_37 = arith.constant 0 : index
    %94 = vector.load %arg2[%c192, %c0_37] : memref<3560x128xf32, #tpu.memory_space<vmem>>, vector<32x16xf32>
    %cst_38 = arith.constant dense<0.000000e+00> : vector<64x16xf32>
    %95 = tpu.matmul %60, %94, %cst_38 {dimension_numbers = #tpu.dot_dimension_numbers<[1], [0], [0], [1], [0, 0, 1, 1], [], []>} : vector<64x32xf32>, vector<32x16xf32>, vector<64x16xf32> -> vector<64x16xf32>
    %c288 = arith.constant 288 : index
    %c0_39 = arith.constant 0 : index
    %96 = vector.load %arg2[%c288, %c0_39] : memref<3560x128xf32, #tpu.memory_space<vmem>>, vector<1x16xf32>
    %97 = vector.broadcast %96 : vector<1x16xf32> to vector<64x16xf32>
    %98 = arith.addf %95, %97 : vector<64x16xf32>
    %c224 = arith.constant 224 : index
    %c0_40 = arith.constant 0 : index
    %99 = vector.load %arg2[%c224, %c0_40] : memref<3560x128xf32, #tpu.memory_space<vmem>>, vector<32x16xf32>
    %cst_41 = arith.constant dense<0.000000e+00> : vector<64x16xf32>
    %100 = tpu.matmul %60, %99, %cst_41 {dimension_numbers = #tpu.dot_dimension_numbers<[1], [0], [0], [1], [0, 0, 1, 1], [], []>} : vector<64x32xf32>, vector<32x16xf32>, vector<64x16xf32> -> vector<64x16xf32>
    %c296 = arith.constant 296 : index
    %c0_42 = arith.constant 0 : index
    %101 = vector.load %arg2[%c296, %c0_42] : memref<3560x128xf32, #tpu.memory_space<vmem>>, vector<1x16xf32>
    %102 = vector.broadcast %101 : vector<1x16xf32> to vector<64x16xf32>
    %103 = arith.addf %100, %102 : vector<64x16xf32>
    %c256 = arith.constant 256 : index
    %c0_43 = arith.constant 0 : index
    %104 = vector.load %arg2[%c256, %c0_43] : memref<3560x128xf32, #tpu.memory_space<vmem>>, vector<32x16xf32>
    %cst_44 = arith.constant dense<0.000000e+00> : vector<64x16xf32>
    %105 = tpu.matmul %60, %104, %cst_44 {dimension_numbers = #tpu.dot_dimension_numbers<[1], [0], [0], [1], [0, 0, 1, 1], [], []>} : vector<64x32xf32>, vector<32x16xf32>, vector<64x16xf32> -> vector<64x16xf32>
    %c304 = arith.constant 304 : index
    %c0_45 = arith.constant 0 : index
    %106 = vector.load %arg2[%c304, %c0_45] : memref<3560x128xf32, #tpu.memory_space<vmem>>, vector<1x16xf32>
    %107 = vector.broadcast %106 : vector<1x16xf32> to vector<64x16xf32>
    %108 = arith.addf %105, %107 : vector<64x16xf32>
    %cst_46 = arith.constant 2.500000e-01 : f32
    %109 = vector.broadcast %cst_46 : f32 to vector<64x16xf32>
    %110 = arith.mulf %98, %109 : vector<64x16xf32>
    %cst_47 = arith.constant dense<0.000000e+00> : vector<64x64xf32>
    %111 = tpu.matmul %110, %103, %cst_47 {dimension_numbers = #tpu.dot_dimension_numbers<[1], [1], [0], [0], [0, 0, 1, 0], [], []>} : vector<64x16xf32>, vector<64x16xf32>, vector<64x64xf32> -> vector<64x64xf32>
    %112 = arith.addf %111, %61 : vector<64x64xf32>
    %cst_48 = arith.constant dense<0xFF800000> : vector<64xf32>
    %113 = vector.multi_reduction <maximumf>, %112, %cst_48 [1] : vector<64x64xf32> to vector<64xf32>
    %114 = vector.shape_cast %113 : vector<64xf32> to vector<64x1xf32>
    %115 = vector.broadcast %114 : vector<64x1xf32> to vector<64x64xf32>
    %116 = arith.subf %112, %115 : vector<64x64xf32>
    %117 = math.exp %116 : vector<64x64xf32>
    %cst_49 = arith.constant dense<0.000000e+00> : vector<64xf32>
    %118 = vector.multi_reduction <add>, %117, %cst_49 [1] : vector<64x64xf32> to vector<64xf32>
    %119 = vector.shape_cast %118 : vector<64xf32> to vector<64x1xf32>
    %120 = tpu.reciprocal %119 {approx = true} : vector<64x1xf32> -> vector<64x1xf32>
    %121 = vector.broadcast %120 : vector<64x1xf32> to vector<64x64xf32>
    %122 = arith.mulf %117, %121 : vector<64x64xf32>
    %cst_50 = arith.constant dense<0.000000e+00> : vector<64x16xf32>
    %123 = tpu.matmul %122, %108, %cst_50 {dimension_numbers = #tpu.dot_dimension_numbers<[1], [0], [0], [1], [0, 0, 1, 1], [], []>} : vector<64x64xf32>, vector<64x16xf32>, vector<64x16xf32> -> vector<64x16xf32>
    %c312 = arith.constant 312 : index
    %c0_51 = arith.constant 0 : index
    %124 = vector.load %arg2[%c312, %c0_51] : memref<3560x128xf32, #tpu.memory_space<vmem>>, vector<16x32xf32>
    %cst_52 = arith.constant dense<0.000000e+00> : vector<64x32xf32>
    %125 = tpu.matmul %123, %124, %cst_52 {dimension_numbers = #tpu.dot_dimension_numbers<[1], [0], [0], [1], [0, 0, 1, 1], [], []>} : vector<64x16xf32>, vector<16x32xf32>, vector<64x32xf32> -> vector<64x32xf32>
    %126 = arith.addf %93, %125 : vector<64x32xf32>
    %127 = arith.addf %60, %126 : vector<64x32xf32>
    %c328 = arith.constant 328 : index
    %c0_53 = arith.constant 0 : index
    %128 = vector.load %arg2[%c328, %c0_53] : memref<3560x128xf32, #tpu.memory_space<vmem>>, vector<1x32xf32>
    %129 = vector.broadcast %128 : vector<1x32xf32> to vector<64x32xf32>
    %130 = arith.addf %127, %129 : vector<64x32xf32>
    %c336 = arith.constant 336 : index
    %c0_54 = arith.constant 0 : index
    %131 = vector.load %arg2[%c336, %c0_54] : memref<3560x128xf32, #tpu.memory_space<vmem>>, vector<32x32xf32>
    %cst_55 = arith.constant dense<0.000000e+00> : vector<64x32xf32>
    %132 = tpu.matmul %130, %131, %cst_55 {dimension_numbers = #tpu.dot_dimension_numbers<[1], [0], [0], [1], [0, 0, 1, 1], [], []>} : vector<64x32xf32>, vector<32x32xf32>, vector<64x32xf32> -> vector<64x32xf32>
    %133 = arith.addf %130, %132 : vector<64x32xf32>
    %c368 = arith.constant 368 : index
    %c0_56 = arith.constant 0 : index
    %134 = vector.load %arg2[%c368, %c0_56] : memref<3560x128xf32, #tpu.memory_space<vmem>>, vector<1x32xf32>
    %135 = vector.broadcast %134 : vector<1x32xf32> to vector<64x32xf32>
    %136 = arith.addf %133, %135 : vector<64x32xf32>
    %cst_57 = arith.constant 5.000000e-01 : f32
    %137 = vector.broadcast %cst_57 : f32 to vector<64x32xf32>
    %138 = arith.mulf %137, %136 : vector<64x32xf32>
    %cst_58 = arith.constant 0.707106769 : f32
    %139 = vector.broadcast %cst_58 : f32 to vector<64x32xf32>
    %140 = arith.mulf %136, %139 : vector<64x32xf32>
    %141 = math.absf %140 : vector<64x32xf32>
    %cst_59 = arith.constant 0.327591091 : f32
    %142 = vector.broadcast %cst_59 : f32 to vector<64x32xf32>
    %143 = arith.mulf %142, %141 : vector<64x32xf32>
    %cst_60 = arith.constant 1.000000e+00 : f32
    %144 = vector.broadcast %cst_60 : f32 to vector<64x32xf32>
    %145 = arith.addf %144, %143 : vector<64x32xf32>
    %146 = tpu.reciprocal %145 {approx = true} : vector<64x32xf32> -> vector<64x32xf32>
    %cst_61 = arith.constant 1.06140542 : f32
    %147 = vector.broadcast %cst_61 : f32 to vector<64x32xf32>
    %148 = arith.mulf %147, %146 : vector<64x32xf32>
    %cst_62 = arith.constant -1.45315206 : f32
    %149 = vector.broadcast %cst_62 : f32 to vector<64x32xf32>
    %150 = arith.addf %148, %149 : vector<64x32xf32>
    %151 = arith.mulf %150, %146 : vector<64x32xf32>
    %cst_63 = arith.constant 1.42141378 : f32
    %152 = vector.broadcast %cst_63 : f32 to vector<64x32xf32>
    %153 = arith.addf %151, %152 : vector<64x32xf32>
    %154 = arith.mulf %153, %146 : vector<64x32xf32>
    %cst_64 = arith.constant -0.284496725 : f32
    %155 = vector.broadcast %cst_64 : f32 to vector<64x32xf32>
    %156 = arith.addf %154, %155 : vector<64x32xf32>
    %157 = arith.mulf %156, %146 : vector<64x32xf32>
    %cst_65 = arith.constant 0.254829586 : f32
    %158 = vector.broadcast %cst_65 : f32 to vector<64x32xf32>
    %159 = arith.addf %157, %158 : vector<64x32xf32>
    %160 = arith.mulf %159, %146 : vector<64x32xf32>
    %cst_66 = arith.constant 0.000000e+00 : f32
    %161 = vector.broadcast %cst_66 : f32 to vector<64x32xf32>
    %162 = arith.subf %161, %141 : vector<64x32xf32>
    %163 = arith.mulf %162, %141 : vector<64x32xf32>
    %164 = math.exp %163 : vector<64x32xf32>
    %165 = arith.mulf %160, %164 : vector<64x32xf32>
    %cst_67 = arith.constant 1.000000e+00 : f32
    %166 = vector.broadcast %cst_67 : f32 to vector<64x32xf32>
    %167 = arith.subf %166, %165 : vector<64x32xf32>
    %cst_68 = arith.constant 0.000000e+00 : f32
    %168 = vector.broadcast %cst_68 : f32 to vector<64x32xf32>
    %169 = arith.cmpf oge, %140, %168 : vector<64x32xf32>
    %cst_69 = arith.constant 0.000000e+00 : f32
    %170 = vector.broadcast %cst_69 : f32 to vector<64x32xf32>
    %171 = arith.subf %170, %167 : vector<64x32xf32>
    %172 = arith.select %169, %167, %171 : vector<64x32xi1>, vector<64x32xf32>
    %cst_70 = arith.constant 1.000000e+00 : f32
    %173 = vector.broadcast %cst_70 : f32 to vector<64x32xf32>
    %174 = arith.addf %173, %172 : vector<64x32xf32>
    %175 = arith.mulf %138, %174 : vector<64x32xf32>
    %c376 = arith.constant 376 : index
    %c0_71 = arith.constant 0 : index
    %176 = vector.load %arg2[%c376, %c0_71] : memref<3560x128xf32, #tpu.memory_space<vmem>>, vector<32x16xf32>
    %cst_72 = arith.constant dense<0.000000e+00> : vector<64x16xf32>
    %177 = tpu.matmul %175, %176, %cst_72 {dimension_numbers = #tpu.dot_dimension_numbers<[1], [0], [0], [1], [0, 0, 1, 1], [], []>} : vector<64x32xf32>, vector<32x16xf32>, vector<64x16xf32> -> vector<64x16xf32>
    %c472 = arith.constant 472 : index
    %c0_73 = arith.constant 0 : index
    %178 = vector.load %arg2[%c472, %c0_73] : memref<3560x128xf32, #tpu.memory_space<vmem>>, vector<1x16xf32>
    %179 = vector.broadcast %178 : vector<1x16xf32> to vector<64x16xf32>
    %180 = arith.addf %177, %179 : vector<64x16xf32>
    %c408 = arith.constant 408 : index
    %c0_74 = arith.constant 0 : index
    %181 = vector.load %arg2[%c408, %c0_74] : memref<3560x128xf32, #tpu.memory_space<vmem>>, vector<32x16xf32>
    %cst_75 = arith.constant dense<0.000000e+00> : vector<64x16xf32>
    %182 = tpu.matmul %175, %181, %cst_75 {dimension_numbers = #tpu.dot_dimension_numbers<[1], [0], [0], [1], [0, 0, 1, 1], [], []>} : vector<64x32xf32>, vector<32x16xf32>, vector<64x16xf32> -> vector<64x16xf32>
    %c480 = arith.constant 480 : index
    %c0_76 = arith.constant 0 : index
    %183 = vector.load %arg2[%c480, %c0_76] : memref<3560x128xf32, #tpu.memory_space<vmem>>, vector<1x16xf32>
    %184 = vector.broadcast %183 : vector<1x16xf32> to vector<64x16xf32>
    %185 = arith.addf %182, %184 : vector<64x16xf32>
    %c440 = arith.constant 440 : index
    %c0_77 = arith.constant 0 : index
    %186 = vector.load %arg2[%c440, %c0_77] : memref<3560x128xf32, #tpu.memory_space<vmem>>, vector<32x16xf32>
    %cst_78 = arith.constant dense<0.000000e+00> : vector<64x16xf32>
    %187 = tpu.matmul %175, %186, %cst_78 {dimension_numbers = #tpu.dot_dimension_numbers<[1], [0], [0], [1], [0, 0, 1, 1], [], []>} : vector<64x32xf32>, vector<32x16xf32>, vector<64x16xf32> -> vector<64x16xf32>
    %c488 = arith.constant 488 : index
    %c0_79 = arith.constant 0 : index
    %188 = vector.load %arg2[%c488, %c0_79] : memref<3560x128xf32, #tpu.memory_space<vmem>>, vector<1x16xf32>
    %189 = vector.broadcast %188 : vector<1x16xf32> to vector<64x16xf32>
    %190 = arith.addf %187, %189 : vector<64x16xf32>
    %cst_80 = arith.constant 2.500000e-01 : f32
    %191 = vector.broadcast %cst_80 : f32 to vector<64x16xf32>
    %192 = arith.mulf %180, %191 : vector<64x16xf32>
    %cst_81 = arith.constant dense<0.000000e+00> : vector<64x64xf32>
    %193 = tpu.matmul %192, %185, %cst_81 {dimension_numbers = #tpu.dot_dimension_numbers<[1], [1], [0], [0], [0, 0, 1, 0], [], []>} : vector<64x16xf32>, vector<64x16xf32>, vector<64x64xf32> -> vector<64x64xf32>
    %194 = arith.addf %193, %61 : vector<64x64xf32>
    %cst_82 = arith.constant dense<0xFF800000> : vector<64xf32>
    %195 = vector.multi_reduction <maximumf>, %194, %cst_82 [1] : vector<64x64xf32> to vector<64xf32>
    %196 = vector.shape_cast %195 : vector<64xf32> to vector<64x1xf32>
    %197 = vector.broadcast %196 : vector<64x1xf32> to vector<64x64xf32>
    %198 = arith.subf %194, %197 : vector<64x64xf32>
    %199 = math.exp %198 : vector<64x64xf32>
    %cst_83 = arith.constant dense<0.000000e+00> : vector<64xf32>
    %200 = vector.multi_reduction <add>, %199, %cst_83 [1] : vector<64x64xf32> to vector<64xf32>
    %201 = vector.shape_cast %200 : vector<64xf32> to vector<64x1xf32>
    %202 = tpu.reciprocal %201 {approx = true} : vector<64x1xf32> -> vector<64x1xf32>
    %203 = vector.broadcast %202 : vector<64x1xf32> to vector<64x64xf32>
    %204 = arith.mulf %199, %203 : vector<64x64xf32>
    %cst_84 = arith.constant dense<0.000000e+00> : vector<64x16xf32>
    %205 = tpu.matmul %204, %190, %cst_84 {dimension_numbers = #tpu.dot_dimension_numbers<[1], [0], [0], [1], [0, 0, 1, 1], [], []>} : vector<64x64xf32>, vector<64x16xf32>, vector<64x16xf32> -> vector<64x16xf32>
    %c496 = arith.constant 496 : index
    %c0_85 = arith.constant 0 : index
    %206 = vector.load %arg2[%c496, %c0_85] : memref<3560x128xf32, #tpu.memory_space<vmem>>, vector<16x32xf32>
    %cst_86 = arith.constant dense<0.000000e+00> : vector<64x32xf32>
    %207 = tpu.matmul %205, %206, %cst_86 {dimension_numbers = #tpu.dot_dimension_numbers<[1], [0], [0], [1], [0, 0, 1, 1], [], []>} : vector<64x16xf32>, vector<16x32xf32>, vector<64x32xf32> -> vector<64x32xf32>
    %c512 = arith.constant 512 : index
    %c0_87 = arith.constant 0 : index
    %208 = vector.load %arg2[%c512, %c0_87] : memref<3560x128xf32, #tpu.memory_space<vmem>>, vector<32x16xf32>
    %cst_88 = arith.constant dense<0.000000e+00> : vector<64x16xf32>
    %209 = tpu.matmul %175, %208, %cst_88 {dimension_numbers = #tpu.dot_dimension_numbers<[1], [0], [0], [1], [0, 0, 1, 1], [], []>} : vector<64x32xf32>, vector<32x16xf32>, vector<64x16xf32> -> vector<64x16xf32>
    %c608 = arith.constant 608 : index
    %c0_89 = arith.constant 0 : index
    %210 = vector.load %arg2[%c608, %c0_89] : memref<3560x128xf32, #tpu.memory_space<vmem>>, vector<1x16xf32>
    %211 = vector.broadcast %210 : vector<1x16xf32> to vector<64x16xf32>
    %212 = arith.addf %209, %211 : vector<64x16xf32>
    %c544 = arith.constant 544 : index
    %c0_90 = arith.constant 0 : index
    %213 = vector.load %arg2[%c544, %c0_90] : memref<3560x128xf32, #tpu.memory_space<vmem>>, vector<32x16xf32>
    %cst_91 = arith.constant dense<0.000000e+00> : vector<64x16xf32>
    %214 = tpu.matmul %175, %213, %cst_91 {dimension_numbers = #tpu.dot_dimension_numbers<[1], [0], [0], [1], [0, 0, 1, 1], [], []>} : vector<64x32xf32>, vector<32x16xf32>, vector<64x16xf32> -> vector<64x16xf32>
    %c616 = arith.constant 616 : index
    %c0_92 = arith.constant 0 : index
    %215 = vector.load %arg2[%c616, %c0_92] : memref<3560x128xf32, #tpu.memory_space<vmem>>, vector<1x16xf32>
    %216 = vector.broadcast %215 : vector<1x16xf32> to vector<64x16xf32>
    %217 = arith.addf %214, %216 : vector<64x16xf32>
    %c576 = arith.constant 576 : index
    %c0_93 = arith.constant 0 : index
    %218 = vector.load %arg2[%c576, %c0_93] : memref<3560x128xf32, #tpu.memory_space<vmem>>, vector<32x16xf32>
    %cst_94 = arith.constant dense<0.000000e+00> : vector<64x16xf32>
    %219 = tpu.matmul %175, %218, %cst_94 {dimension_numbers = #tpu.dot_dimension_numbers<[1], [0], [0], [1], [0, 0, 1, 1], [], []>} : vector<64x32xf32>, vector<32x16xf32>, vector<64x16xf32> -> vector<64x16xf32>
    %c624 = arith.constant 624 : index
    %c0_95 = arith.constant 0 : index
    %220 = vector.load %arg2[%c624, %c0_95] : memref<3560x128xf32, #tpu.memory_space<vmem>>, vector<1x16xf32>
    %221 = vector.broadcast %220 : vector<1x16xf32> to vector<64x16xf32>
    %222 = arith.addf %219, %221 : vector<64x16xf32>
    %cst_96 = arith.constant 2.500000e-01 : f32
    %223 = vector.broadcast %cst_96 : f32 to vector<64x16xf32>
    %224 = arith.mulf %212, %223 : vector<64x16xf32>
    %cst_97 = arith.constant dense<0.000000e+00> : vector<64x64xf32>
    %225 = tpu.matmul %224, %217, %cst_97 {dimension_numbers = #tpu.dot_dimension_numbers<[1], [1], [0], [0], [0, 0, 1, 0], [], []>} : vector<64x16xf32>, vector<64x16xf32>, vector<64x64xf32> -> vector<64x64xf32>
    %226 = arith.addf %225, %61 : vector<64x64xf32>
    %cst_98 = arith.constant dense<0xFF800000> : vector<64xf32>
    %227 = vector.multi_reduction <maximumf>, %226, %cst_98 [1] : vector<64x64xf32> to vector<64xf32>
    %228 = vector.shape_cast %227 : vector<64xf32> to vector<64x1xf32>
    %229 = vector.broadcast %228 : vector<64x1xf32> to vector<64x64xf32>
    %230 = arith.subf %226, %229 : vector<64x64xf32>
    %231 = math.exp %230 : vector<64x64xf32>
    %cst_99 = arith.constant dense<0.000000e+00> : vector<64xf32>
    %232 = vector.multi_reduction <add>, %231, %cst_99 [1] : vector<64x64xf32> to vector<64xf32>
    %233 = vector.shape_cast %232 : vector<64xf32> to vector<64x1xf32>
    %234 = tpu.reciprocal %233 {approx = true} : vector<64x1xf32> -> vector<64x1xf32>
    %235 = vector.broadcast %234 : vector<64x1xf32> to vector<64x64xf32>
    %236 = arith.mulf %231, %235 : vector<64x64xf32>
    %cst_100 = arith.constant dense<0.000000e+00> : vector<64x16xf32>
    %237 = tpu.matmul %236, %222, %cst_100 {dimension_numbers = #tpu.dot_dimension_numbers<[1], [0], [0], [1], [0, 0, 1, 1], [], []>} : vector<64x64xf32>, vector<64x16xf32>, vector<64x16xf32> -> vector<64x16xf32>
    %c632 = arith.constant 632 : index
    %c0_101 = arith.constant 0 : index
    %238 = vector.load %arg2[%c632, %c0_101] : memref<3560x128xf32, #tpu.memory_space<vmem>>, vector<16x32xf32>
    %cst_102 = arith.constant dense<0.000000e+00> : vector<64x32xf32>
    %239 = tpu.matmul %237, %238, %cst_102 {dimension_numbers = #tpu.dot_dimension_numbers<[1], [0], [0], [1], [0, 0, 1, 1], [], []>} : vector<64x16xf32>, vector<16x32xf32>, vector<64x32xf32> -> vector<64x32xf32>
    %240 = arith.addf %207, %239 : vector<64x32xf32>
    %241 = arith.addf %175, %240 : vector<64x32xf32>
    %c648 = arith.constant 648 : index
    %c0_103 = arith.constant 0 : index
    %242 = vector.load %arg2[%c648, %c0_103] : memref<3560x128xf32, #tpu.memory_space<vmem>>, vector<1x32xf32>
    %243 = vector.broadcast %242 : vector<1x32xf32> to vector<64x32xf32>
    %244 = arith.addf %241, %243 : vector<64x32xf32>
    %c656 = arith.constant 656 : index
    %c0_104 = arith.constant 0 : index
    %245 = vector.load %arg2[%c656, %c0_104] : memref<3560x128xf32, #tpu.memory_space<vmem>>, vector<32x32xf32>
    %cst_105 = arith.constant dense<0.000000e+00> : vector<64x32xf32>
    %246 = tpu.matmul %244, %245, %cst_105 {dimension_numbers = #tpu.dot_dimension_numbers<[1], [0], [0], [1], [0, 0, 1, 1], [], []>} : vector<64x32xf32>, vector<32x32xf32>, vector<64x32xf32> -> vector<64x32xf32>
    %247 = arith.addf %244, %246 : vector<64x32xf32>
    %c688 = arith.constant 688 : index
    %c0_106 = arith.constant 0 : index
    %248 = vector.load %arg2[%c688, %c0_106] : memref<3560x128xf32, #tpu.memory_space<vmem>>, vector<1x32xf32>
    %249 = vector.broadcast %248 : vector<1x32xf32> to vector<64x32xf32>
    %250 = arith.addf %247, %249 : vector<64x32xf32>
    %cst_107 = arith.constant 5.000000e-01 : f32
    %251 = vector.broadcast %cst_107 : f32 to vector<64x32xf32>
    %252 = arith.mulf %251, %250 : vector<64x32xf32>
    %cst_108 = arith.constant 0.707106769 : f32
    %253 = vector.broadcast %cst_108 : f32 to vector<64x32xf32>
    %254 = arith.mulf %250, %253 : vector<64x32xf32>
    %255 = math.absf %254 : vector<64x32xf32>
    %cst_109 = arith.constant 0.327591091 : f32
    %256 = vector.broadcast %cst_109 : f32 to vector<64x32xf32>
    %257 = arith.mulf %256, %255 : vector<64x32xf32>
    %cst_110 = arith.constant 1.000000e+00 : f32
    %258 = vector.broadcast %cst_110 : f32 to vector<64x32xf32>
    %259 = arith.addf %258, %257 : vector<64x32xf32>
    %260 = tpu.reciprocal %259 {approx = true} : vector<64x32xf32> -> vector<64x32xf32>
    %cst_111 = arith.constant 1.06140542 : f32
    %261 = vector.broadcast %cst_111 : f32 to vector<64x32xf32>
    %262 = arith.mulf %261, %260 : vector<64x32xf32>
    %cst_112 = arith.constant -1.45315206 : f32
    %263 = vector.broadcast %cst_112 : f32 to vector<64x32xf32>
    %264 = arith.addf %262, %263 : vector<64x32xf32>
    %265 = arith.mulf %264, %260 : vector<64x32xf32>
    %cst_113 = arith.constant 1.42141378 : f32
    %266 = vector.broadcast %cst_113 : f32 to vector<64x32xf32>
    %267 = arith.addf %265, %266 : vector<64x32xf32>
    %268 = arith.mulf %267, %260 : vector<64x32xf32>
    %cst_114 = arith.constant -0.284496725 : f32
    %269 = vector.broadcast %cst_114 : f32 to vector<64x32xf32>
    %270 = arith.addf %268, %269 : vector<64x32xf32>
    %271 = arith.mulf %270, %260 : vector<64x32xf32>
    %cst_115 = arith.constant 0.254829586 : f32
    %272 = vector.broadcast %cst_115 : f32 to vector<64x32xf32>
    %273 = arith.addf %271, %272 : vector<64x32xf32>
    %274 = arith.mulf %273, %260 : vector<64x32xf32>
    %cst_116 = arith.constant 0.000000e+00 : f32
    %275 = vector.broadcast %cst_116 : f32 to vector<64x32xf32>
    %276 = arith.subf %275, %255 : vector<64x32xf32>
    %277 = arith.mulf %276, %255 : vector<64x32xf32>
    %278 = math.exp %277 : vector<64x32xf32>
    %279 = arith.mulf %274, %278 : vector<64x32xf32>
    %cst_117 = arith.constant 1.000000e+00 : f32
    %280 = vector.broadcast %cst_117 : f32 to vector<64x32xf32>
    %281 = arith.subf %280, %279 : vector<64x32xf32>
    %cst_118 = arith.constant 0.000000e+00 : f32
    %282 = vector.broadcast %cst_118 : f32 to vector<64x32xf32>
    %283 = arith.cmpf oge, %254, %282 : vector<64x32xf32>
    %cst_119 = arith.constant 0.000000e+00 : f32
    %284 = vector.broadcast %cst_119 : f32 to vector<64x32xf32>
    %285 = arith.subf %284, %281 : vector<64x32xf32>
    %286 = arith.select %283, %281, %285 : vector<64x32xi1>, vector<64x32xf32>
    %cst_120 = arith.constant 1.000000e+00 : f32
    %287 = vector.broadcast %cst_120 : f32 to vector<64x32xf32>
    %288 = arith.addf %287, %286 : vector<64x32xf32>
    %289 = arith.mulf %252, %288 : vector<64x32xf32>
    %c696 = arith.constant 696 : index
    %c0_121 = arith.constant 0 : index
    %290 = vector.load %arg2[%c696, %c0_121] : memref<3560x128xf32, #tpu.memory_space<vmem>>, vector<32x16xf32>
    %cst_122 = arith.constant dense<0.000000e+00> : vector<64x16xf32>
    %291 = tpu.matmul %289, %290, %cst_122 {dimension_numbers = #tpu.dot_dimension_numbers<[1], [0], [0], [1], [0, 0, 1, 1], [], []>} : vector<64x32xf32>, vector<32x16xf32>, vector<64x16xf32> -> vector<64x16xf32>
    %c792 = arith.constant 792 : index
    %c0_123 = arith.constant 0 : index
    %292 = vector.load %arg2[%c792, %c0_123] : memref<3560x128xf32, #tpu.memory_space<vmem>>, vector<1x16xf32>
    %293 = vector.broadcast %292 : vector<1x16xf32> to vector<64x16xf32>
    %294 = arith.addf %291, %293 : vector<64x16xf32>
    %c728 = arith.constant 728 : index
    %c0_124 = arith.constant 0 : index
    %295 = vector.load %arg2[%c728, %c0_124] : memref<3560x128xf32, #tpu.memory_space<vmem>>, vector<32x16xf32>
    %cst_125 = arith.constant dense<0.000000e+00> : vector<64x16xf32>
    %296 = tpu.matmul %289, %295, %cst_125 {dimension_numbers = #tpu.dot_dimension_numbers<[1], [0], [0], [1], [0, 0, 1, 1], [], []>} : vector<64x32xf32>, vector<32x16xf32>, vector<64x16xf32> -> vector<64x16xf32>
    %c800 = arith.constant 800 : index
    %c0_126 = arith.constant 0 : index
    %297 = vector.load %arg2[%c800, %c0_126] : memref<3560x128xf32, #tpu.memory_space<vmem>>, vector<1x16xf32>
    %298 = vector.broadcast %297 : vector<1x16xf32> to vector<64x16xf32>
    %299 = arith.addf %296, %298 : vector<64x16xf32>
    %c760 = arith.constant 760 : index
    %c0_127 = arith.constant 0 : index
    %300 = vector.load %arg2[%c760, %c0_127] : memref<3560x128xf32, #tpu.memory_space<vmem>>, vector<32x16xf32>
    %cst_128 = arith.constant dense<0.000000e+00> : vector<64x16xf32>
    %301 = tpu.matmul %289, %300, %cst_128 {dimension_numbers = #tpu.dot_dimension_numbers<[1], [0], [0], [1], [0, 0, 1, 1], [], []>} : vector<64x32xf32>, vector<32x16xf32>, vector<64x16xf32> -> vector<64x16xf32>
    %c808 = arith.constant 808 : index
    %c0_129 = arith.constant 0 : index
    %302 = vector.load %arg2[%c808, %c0_129] : memref<3560x128xf32, #tpu.memory_space<vmem>>, vector<1x16xf32>
    %303 = vector.broadcast %302 : vector<1x16xf32> to vector<64x16xf32>
    %304 = arith.addf %301, %303 : vector<64x16xf32>
    %cst_130 = arith.constant 2.500000e-01 : f32
    %305 = vector.broadcast %cst_130 : f32 to vector<64x16xf32>
    %306 = arith.mulf %294, %305 : vector<64x16xf32>
    %cst_131 = arith.constant dense<0.000000e+00> : vector<64x64xf32>
    %307 = tpu.matmul %306, %299, %cst_131 {dimension_numbers = #tpu.dot_dimension_numbers<[1], [1], [0], [0], [0, 0, 1, 0], [], []>} : vector<64x16xf32>, vector<64x16xf32>, vector<64x64xf32> -> vector<64x64xf32>
    %308 = arith.addf %307, %61 : vector<64x64xf32>
    %cst_132 = arith.constant dense<0xFF800000> : vector<64xf32>
    %309 = vector.multi_reduction <maximumf>, %308, %cst_132 [1] : vector<64x64xf32> to vector<64xf32>
    %310 = vector.shape_cast %309 : vector<64xf32> to vector<64x1xf32>
    %311 = vector.broadcast %310 : vector<64x1xf32> to vector<64x64xf32>
    %312 = arith.subf %308, %311 : vector<64x64xf32>
    %313 = math.exp %312 : vector<64x64xf32>
    %cst_133 = arith.constant dense<0.000000e+00> : vector<64xf32>
    %314 = vector.multi_reduction <add>, %313, %cst_133 [1] : vector<64x64xf32> to vector<64xf32>
    %315 = vector.shape_cast %314 : vector<64xf32> to vector<64x1xf32>
    %316 = tpu.reciprocal %315 {approx = true} : vector<64x1xf32> -> vector<64x1xf32>
    %317 = vector.broadcast %316 : vector<64x1xf32> to vector<64x64xf32>
    %318 = arith.mulf %313, %317 : vector<64x64xf32>
    %cst_134 = arith.constant dense<0.000000e+00> : vector<64x16xf32>
    %319 = tpu.matmul %318, %304, %cst_134 {dimension_numbers = #tpu.dot_dimension_numbers<[1], [0], [0], [1], [0, 0, 1, 1], [], []>} : vector<64x64xf32>, vector<64x16xf32>, vector<64x16xf32> -> vector<64x16xf32>
    %c816 = arith.constant 816 : index
    %c0_135 = arith.constant 0 : index
    %320 = vector.load %arg2[%c816, %c0_135] : memref<3560x128xf32, #tpu.memory_space<vmem>>, vector<16x32xf32>
    %cst_136 = arith.constant dense<0.000000e+00> : vector<64x32xf32>
    %321 = tpu.matmul %319, %320, %cst_136 {dimension_numbers = #tpu.dot_dimension_numbers<[1], [0], [0], [1], [0, 0, 1, 1], [], []>} : vector<64x16xf32>, vector<16x32xf32>, vector<64x32xf32> -> vector<64x32xf32>
    %c832 = arith.constant 832 : index
    %c0_137 = arith.constant 0 : index
    %322 = vector.load %arg2[%c832, %c0_137] : memref<3560x128xf32, #tpu.memory_space<vmem>>, vector<32x16xf32>
    %cst_138 = arith.constant dense<0.000000e+00> : vector<64x16xf32>
    %323 = tpu.matmul %289, %322, %cst_138 {dimension_numbers = #tpu.dot_dimension_numbers<[1], [0], [0], [1], [0, 0, 1, 1], [], []>} : vector<64x32xf32>, vector<32x16xf32>, vector<64x16xf32> -> vector<64x16xf32>
    %c928 = arith.constant 928 : index
    %c0_139 = arith.constant 0 : index
    %324 = vector.load %arg2[%c928, %c0_139] : memref<3560x128xf32, #tpu.memory_space<vmem>>, vector<1x16xf32>
    %325 = vector.broadcast %324 : vector<1x16xf32> to vector<64x16xf32>
    %326 = arith.addf %323, %325 : vector<64x16xf32>
    %c864 = arith.constant 864 : index
    %c0_140 = arith.constant 0 : index
    %327 = vector.load %arg2[%c864, %c0_140] : memref<3560x128xf32, #tpu.memory_space<vmem>>, vector<32x16xf32>
    %cst_141 = arith.constant dense<0.000000e+00> : vector<64x16xf32>
    %328 = tpu.matmul %289, %327, %cst_141 {dimension_numbers = #tpu.dot_dimension_numbers<[1], [0], [0], [1], [0, 0, 1, 1], [], []>} : vector<64x32xf32>, vector<32x16xf32>, vector<64x16xf32> -> vector<64x16xf32>
    %c936 = arith.constant 936 : index
    %c0_142 = arith.constant 0 : index
    %329 = vector.load %arg2[%c936, %c0_142] : memref<3560x128xf32, #tpu.memory_space<vmem>>, vector<1x16xf32>
    %330 = vector.broadcast %329 : vector<1x16xf32> to vector<64x16xf32>
    %331 = arith.addf %328, %330 : vector<64x16xf32>
    %c896 = arith.constant 896 : index
    %c0_143 = arith.constant 0 : index
    %332 = vector.load %arg2[%c896, %c0_143] : memref<3560x128xf32, #tpu.memory_space<vmem>>, vector<32x16xf32>
    %cst_144 = arith.constant dense<0.000000e+00> : vector<64x16xf32>
    %333 = tpu.matmul %289, %332, %cst_144 {dimension_numbers = #tpu.dot_dimension_numbers<[1], [0], [0], [1], [0, 0, 1, 1], [], []>} : vector<64x32xf32>, vector<32x16xf32>, vector<64x16xf32> -> vector<64x16xf32>
    %c944 = arith.constant 944 : index
    %c0_145 = arith.constant 0 : index
    %334 = vector.load %arg2[%c944, %c0_145] : memref<3560x128xf32, #tpu.memory_space<vmem>>, vector<1x16xf32>
    %335 = vector.broadcast %334 : vector<1x16xf32> to vector<64x16xf32>
    %336 = arith.addf %333, %335 : vector<64x16xf32>
    %cst_146 = arith.constant 2.500000e-01 : f32
    %337 = vector.broadcast %cst_146 : f32 to vector<64x16xf32>
    %338 = arith.mulf %326, %337 : vector<64x16xf32>
    %cst_147 = arith.constant dense<0.000000e+00> : vector<64x64xf32>
    %339 = tpu.matmul %338, %331, %cst_147 {dimension_numbers = #tpu.dot_dimension_numbers<[1], [1], [0], [0], [0, 0, 1, 0], [], []>} : vector<64x16xf32>, vector<64x16xf32>, vector<64x64xf32> -> vector<64x64xf32>
    %340 = arith.addf %339, %61 : vector<64x64xf32>
    %cst_148 = arith.constant dense<0xFF800000> : vector<64xf32>
    %341 = vector.multi_reduction <maximumf>, %340, %cst_148 [1] : vector<64x64xf32> to vector<64xf32>
    %342 = vector.shape_cast %341 : vector<64xf32> to vector<64x1xf32>
    %343 = vector.broadcast %342 : vector<64x1xf32> to vector<64x64xf32>
    %344 = arith.subf %340, %343 : vector<64x64xf32>
    %345 = math.exp %344 : vector<64x64xf32>
    %cst_149 = arith.constant dense<0.000000e+00> : vector<64xf32>
    %346 = vector.multi_reduction <add>, %345, %cst_149 [1] : vector<64x64xf32> to vector<64xf32>
    %347 = vector.shape_cast %346 : vector<64xf32> to vector<64x1xf32>
    %348 = tpu.reciprocal %347 {approx = true} : vector<64x1xf32> -> vector<64x1xf32>
    %349 = vector.broadcast %348 : vector<64x1xf32> to vector<64x64xf32>
    %350 = arith.mulf %345, %349 : vector<64x64xf32>
    %cst_150 = arith.constant dense<0.000000e+00> : vector<64x16xf32>
    %351 = tpu.matmul %350, %336, %cst_150 {dimension_numbers = #tpu.dot_dimension_numbers<[1], [0], [0], [1], [0, 0, 1, 1], [], []>} : vector<64x64xf32>, vector<64x16xf32>, vector<64x16xf32> -> vector<64x16xf32>
    %c952 = arith.constant 952 : index
    %c0_151 = arith.constant 0 : index
    %352 = vector.load %arg2[%c952, %c0_151] : memref<3560x128xf32, #tpu.memory_space<vmem>>, vector<16x32xf32>
    %cst_152 = arith.constant dense<0.000000e+00> : vector<64x32xf32>
    %353 = tpu.matmul %351, %352, %cst_152 {dimension_numbers = #tpu.dot_dimension_numbers<[1], [0], [0], [1], [0, 0, 1, 1], [], []>} : vector<64x16xf32>, vector<16x32xf32>, vector<64x32xf32> -> vector<64x32xf32>
    %354 = arith.addf %321, %353 : vector<64x32xf32>
    %355 = arith.addf %289, %354 : vector<64x32xf32>
    %c968 = arith.constant 968 : index
    %c0_153 = arith.constant 0 : index
    %356 = vector.load %arg2[%c968, %c0_153] : memref<3560x128xf32, #tpu.memory_space<vmem>>, vector<1x32xf32>
    %357 = vector.broadcast %356 : vector<1x32xf32> to vector<64x32xf32>
    %358 = arith.addf %355, %357 : vector<64x32xf32>
    %c976 = arith.constant 976 : index
    %c0_154 = arith.constant 0 : index
    %359 = vector.load %arg2[%c976, %c0_154] : memref<3560x128xf32, #tpu.memory_space<vmem>>, vector<32x32xf32>
    %cst_155 = arith.constant dense<0.000000e+00> : vector<64x32xf32>
    %360 = tpu.matmul %358, %359, %cst_155 {dimension_numbers = #tpu.dot_dimension_numbers<[1], [0], [0], [1], [0, 0, 1, 1], [], []>} : vector<64x32xf32>, vector<32x32xf32>, vector<64x32xf32> -> vector<64x32xf32>
    %361 = arith.addf %358, %360 : vector<64x32xf32>
    %c1008 = arith.constant 1008 : index
    %c0_156 = arith.constant 0 : index
    %362 = vector.load %arg2[%c1008, %c0_156] : memref<3560x128xf32, #tpu.memory_space<vmem>>, vector<1x32xf32>
    %363 = vector.broadcast %362 : vector<1x32xf32> to vector<64x32xf32>
    %364 = arith.addf %361, %363 : vector<64x32xf32>
    %cst_157 = arith.constant 5.000000e-01 : f32
    %365 = vector.broadcast %cst_157 : f32 to vector<64x32xf32>
    %366 = arith.mulf %365, %364 : vector<64x32xf32>
    %cst_158 = arith.constant 0.707106769 : f32
    %367 = vector.broadcast %cst_158 : f32 to vector<64x32xf32>
    %368 = arith.mulf %364, %367 : vector<64x32xf32>
    %369 = math.absf %368 : vector<64x32xf32>
    %cst_159 = arith.constant 0.327591091 : f32
    %370 = vector.broadcast %cst_159 : f32 to vector<64x32xf32>
    %371 = arith.mulf %370, %369 : vector<64x32xf32>
    %cst_160 = arith.constant 1.000000e+00 : f32
    %372 = vector.broadcast %cst_160 : f32 to vector<64x32xf32>
    %373 = arith.addf %372, %371 : vector<64x32xf32>
    %374 = tpu.reciprocal %373 {approx = true} : vector<64x32xf32> -> vector<64x32xf32>
    %cst_161 = arith.constant 1.06140542 : f32
    %375 = vector.broadcast %cst_161 : f32 to vector<64x32xf32>
    %376 = arith.mulf %375, %374 : vector<64x32xf32>
    %cst_162 = arith.constant -1.45315206 : f32
    %377 = vector.broadcast %cst_162 : f32 to vector<64x32xf32>
    %378 = arith.addf %376, %377 : vector<64x32xf32>
    %379 = arith.mulf %378, %374 : vector<64x32xf32>
    %cst_163 = arith.constant 1.42141378 : f32
    %380 = vector.broadcast %cst_163 : f32 to vector<64x32xf32>
    %381 = arith.addf %379, %380 : vector<64x32xf32>
    %382 = arith.mulf %381, %374 : vector<64x32xf32>
    %cst_164 = arith.constant -0.284496725 : f32
    %383 = vector.broadcast %cst_164 : f32 to vector<64x32xf32>
    %384 = arith.addf %382, %383 : vector<64x32xf32>
    %385 = arith.mulf %384, %374 : vector<64x32xf32>
    %cst_165 = arith.constant 0.254829586 : f32
    %386 = vector.broadcast %cst_165 : f32 to vector<64x32xf32>
    %387 = arith.addf %385, %386 : vector<64x32xf32>
    %388 = arith.mulf %387, %374 : vector<64x32xf32>
    %cst_166 = arith.constant 0.000000e+00 : f32
    %389 = vector.broadcast %cst_166 : f32 to vector<64x32xf32>
    %390 = arith.subf %389, %369 : vector<64x32xf32>
    %391 = arith.mulf %390, %369 : vector<64x32xf32>
    %392 = math.exp %391 : vector<64x32xf32>
    %393 = arith.mulf %388, %392 : vector<64x32xf32>
    %cst_167 = arith.constant 1.000000e+00 : f32
    %394 = vector.broadcast %cst_167 : f32 to vector<64x32xf32>
    %395 = arith.subf %394, %393 : vector<64x32xf32>
    %cst_168 = arith.constant 0.000000e+00 : f32
    %396 = vector.broadcast %cst_168 : f32 to vector<64x32xf32>
    %397 = arith.cmpf oge, %368, %396 : vector<64x32xf32>
    %cst_169 = arith.constant 0.000000e+00 : f32
    %398 = vector.broadcast %cst_169 : f32 to vector<64x32xf32>
    %399 = arith.subf %398, %395 : vector<64x32xf32>
    %400 = arith.select %397, %395, %399 : vector<64x32xi1>, vector<64x32xf32>
    %cst_170 = arith.constant 1.000000e+00 : f32
    %401 = vector.broadcast %cst_170 : f32 to vector<64x32xf32>
    %402 = arith.addf %401, %400 : vector<64x32xf32>
    %403 = arith.mulf %366, %402 : vector<64x32xf32>
    %c1016 = arith.constant 1016 : index
    %c0_171 = arith.constant 0 : index
    %404 = vector.load %arg2[%c1016, %c0_171] : memref<3560x128xf32, #tpu.memory_space<vmem>>, vector<32x32xf32>
    %cst_172 = arith.constant dense<0.000000e+00> : vector<64x32xf32>
    %405 = tpu.matmul %403, %404, %cst_172 {dimension_numbers = #tpu.dot_dimension_numbers<[1], [0], [0], [1], [0, 0, 1, 1], [], []>} : vector<64x32xf32>, vector<32x32xf32>, vector<64x32xf32> -> vector<64x32xf32>
    %c1048 = arith.constant 1048 : index
    %c0_173 = arith.constant 0 : index
    %406 = vector.load %arg2[%c1048, %c0_173] : memref<3560x128xf32, #tpu.memory_space<vmem>>, vector<1x32xf32>
    %407 = vector.broadcast %406 : vector<1x32xf32> to vector<64x32xf32>
    %408 = arith.addf %405, %407 : vector<64x32xf32>
    %cst_174 = arith.constant 5.000000e-01 : f32
    %409 = vector.broadcast %cst_174 : f32 to vector<64x32xf32>
    %410 = arith.mulf %409, %408 : vector<64x32xf32>
    %cst_175 = arith.constant 0.707106769 : f32
    %411 = vector.broadcast %cst_175 : f32 to vector<64x32xf32>
    %412 = arith.mulf %408, %411 : vector<64x32xf32>
    %413 = math.absf %412 : vector<64x32xf32>
    %cst_176 = arith.constant 0.327591091 : f32
    %414 = vector.broadcast %cst_176 : f32 to vector<64x32xf32>
    %415 = arith.mulf %414, %413 : vector<64x32xf32>
    %cst_177 = arith.constant 1.000000e+00 : f32
    %416 = vector.broadcast %cst_177 : f32 to vector<64x32xf32>
    %417 = arith.addf %416, %415 : vector<64x32xf32>
    %418 = tpu.reciprocal %417 {approx = true} : vector<64x32xf32> -> vector<64x32xf32>
    %cst_178 = arith.constant 1.06140542 : f32
    %419 = vector.broadcast %cst_178 : f32 to vector<64x32xf32>
    %420 = arith.mulf %419, %418 : vector<64x32xf32>
    %cst_179 = arith.constant -1.45315206 : f32
    %421 = vector.broadcast %cst_179 : f32 to vector<64x32xf32>
    %422 = arith.addf %420, %421 : vector<64x32xf32>
    %423 = arith.mulf %422, %418 : vector<64x32xf32>
    %cst_180 = arith.constant 1.42141378 : f32
    %424 = vector.broadcast %cst_180 : f32 to vector<64x32xf32>
    %425 = arith.addf %423, %424 : vector<64x32xf32>
    %426 = arith.mulf %425, %418 : vector<64x32xf32>
    %cst_181 = arith.constant -0.284496725 : f32
    %427 = vector.broadcast %cst_181 : f32 to vector<64x32xf32>
    %428 = arith.addf %426, %427 : vector<64x32xf32>
    %429 = arith.mulf %428, %418 : vector<64x32xf32>
    %cst_182 = arith.constant 0.254829586 : f32
    %430 = vector.broadcast %cst_182 : f32 to vector<64x32xf32>
    %431 = arith.addf %429, %430 : vector<64x32xf32>
    %432 = arith.mulf %431, %418 : vector<64x32xf32>
    %cst_183 = arith.constant 0.000000e+00 : f32
    %433 = vector.broadcast %cst_183 : f32 to vector<64x32xf32>
    %434 = arith.subf %433, %413 : vector<64x32xf32>
    %435 = arith.mulf %434, %413 : vector<64x32xf32>
    %436 = math.exp %435 : vector<64x32xf32>
    %437 = arith.mulf %432, %436 : vector<64x32xf32>
    %cst_184 = arith.constant 1.000000e+00 : f32
    %438 = vector.broadcast %cst_184 : f32 to vector<64x32xf32>
    %439 = arith.subf %438, %437 : vector<64x32xf32>
    %cst_185 = arith.constant 0.000000e+00 : f32
    %440 = vector.broadcast %cst_185 : f32 to vector<64x32xf32>
    %441 = arith.cmpf oge, %412, %440 : vector<64x32xf32>
    %cst_186 = arith.constant 0.000000e+00 : f32
    %442 = vector.broadcast %cst_186 : f32 to vector<64x32xf32>
    %443 = arith.subf %442, %439 : vector<64x32xf32>
    %444 = arith.select %441, %439, %443 : vector<64x32xi1>, vector<64x32xf32>
    %cst_187 = arith.constant 1.000000e+00 : f32
    %445 = vector.broadcast %cst_187 : f32 to vector<64x32xf32>
    %446 = arith.addf %445, %444 : vector<64x32xf32>
    %447 = arith.mulf %410, %446 : vector<64x32xf32>
    %c1120 = arith.constant 1120 : index
    %c0_188 = arith.constant 0 : index
    %448 = vector.load %arg2[%c1120, %c0_188] : memref<3560x128xf32, #tpu.memory_space<vmem>>, vector<8x64xf32>
    %cst_189 = arith.constant dense<0.000000e+00> : vector<8x32xf32>
    %449 = tpu.matmul %448, %447, %cst_189 {dimension_numbers = #tpu.dot_dimension_numbers<[1], [0], [0], [1], [0, 0, 1, 1], [], []>} : vector<8x64xf32>, vector<64x32xf32>, vector<8x32xf32> -> vector<8x32xf32>
    %c1128 = arith.constant 1128 : index
    %c0_190 = arith.constant 0 : index
    %450 = vector.load %arg2[%c1128, %c0_190] : memref<3560x128xf32, #tpu.memory_space<vmem>>, vector<32x32xf32>
    %cst_191 = arith.constant dense<0.000000e+00> : vector<8x32xf32>
    %451 = tpu.matmul %449, %450, %cst_191 {dimension_numbers = #tpu.dot_dimension_numbers<[1], [0], [0], [1], [0, 0, 1, 1], [], []>} : vector<8x32xf32>, vector<32x32xf32>, vector<8x32xf32> -> vector<8x32xf32>
    %c1160 = arith.constant 1160 : index
    %c0_192 = arith.constant 0 : index
    %452 = vector.load %arg2[%c1160, %c0_192] : memref<3560x128xf32, #tpu.memory_space<vmem>>, vector<1x32xf32>
    %453 = vector.broadcast %452 : vector<1x32xf32> to vector<8x32xf32>
    %454 = arith.addf %451, %453 : vector<8x32xf32>
    %455 = math.tanh %454 : vector<8x32xf32>
    %c1168 = arith.constant 1168 : index
    %c0_193 = arith.constant 0 : index
    %456 = vector.load %arg2[%c1168, %c0_193] : memref<3560x128xf32, #tpu.memory_space<vmem>>, vector<32x32xf32>
    %cst_194 = arith.constant dense<0.000000e+00> : vector<8x32xf32>
    %457 = tpu.matmul %455, %456, %cst_194 {dimension_numbers = #tpu.dot_dimension_numbers<[1], [0], [0], [1], [0, 0, 1, 1], [], []>} : vector<8x32xf32>, vector<32x32xf32>, vector<8x32xf32> -> vector<8x32xf32>
    %c1200 = arith.constant 1200 : index
    %c0_195 = arith.constant 0 : index
    %458 = vector.load %arg2[%c1200, %c0_195] : memref<3560x128xf32, #tpu.memory_space<vmem>>, vector<1x32xf32>
    %459 = vector.broadcast %458 : vector<1x32xf32> to vector<8x32xf32>
    %460 = arith.addf %457, %459 : vector<8x32xf32>
    %cst_196 = arith.constant 5.000000e-01 : f32
    %461 = vector.broadcast %cst_196 : f32 to vector<8x32xf32>
    %462 = arith.mulf %461, %460 : vector<8x32xf32>
    %cst_197 = arith.constant 0.707106769 : f32
    %463 = vector.broadcast %cst_197 : f32 to vector<8x32xf32>
    %464 = arith.mulf %460, %463 : vector<8x32xf32>
    %465 = math.absf %464 : vector<8x32xf32>
    %cst_198 = arith.constant 0.327591091 : f32
    %466 = vector.broadcast %cst_198 : f32 to vector<8x32xf32>
    %467 = arith.mulf %466, %465 : vector<8x32xf32>
    %cst_199 = arith.constant 1.000000e+00 : f32
    %468 = vector.broadcast %cst_199 : f32 to vector<8x32xf32>
    %469 = arith.addf %468, %467 : vector<8x32xf32>
    %470 = tpu.reciprocal %469 {approx = true} : vector<8x32xf32> -> vector<8x32xf32>
    %cst_200 = arith.constant 1.06140542 : f32
    %471 = vector.broadcast %cst_200 : f32 to vector<8x32xf32>
    %472 = arith.mulf %471, %470 : vector<8x32xf32>
    %cst_201 = arith.constant -1.45315206 : f32
    %473 = vector.broadcast %cst_201 : f32 to vector<8x32xf32>
    %474 = arith.addf %472, %473 : vector<8x32xf32>
    %475 = arith.mulf %474, %470 : vector<8x32xf32>
    %cst_202 = arith.constant 1.42141378 : f32
    %476 = vector.broadcast %cst_202 : f32 to vector<8x32xf32>
    %477 = arith.addf %475, %476 : vector<8x32xf32>
    %478 = arith.mulf %477, %470 : vector<8x32xf32>
    %cst_203 = arith.constant -0.284496725 : f32
    %479 = vector.broadcast %cst_203 : f32 to vector<8x32xf32>
    %480 = arith.addf %478, %479 : vector<8x32xf32>
    %481 = arith.mulf %480, %470 : vector<8x32xf32>
    %cst_204 = arith.constant 0.254829586 : f32
    %482 = vector.broadcast %cst_204 : f32 to vector<8x32xf32>
    %483 = arith.addf %481, %482 : vector<8x32xf32>
    %484 = arith.mulf %483, %470 : vector<8x32xf32>
    %cst_205 = arith.constant 0.000000e+00 : f32
    %485 = vector.broadcast %cst_205 : f32 to vector<8x32xf32>
    %486 = arith.subf %485, %465 : vector<8x32xf32>
    %487 = arith.mulf %486, %465 : vector<8x32xf32>
    %488 = math.exp %487 : vector<8x32xf32>
    %489 = arith.mulf %484, %488 : vector<8x32xf32>
    %cst_206 = arith.constant 1.000000e+00 : f32
    %490 = vector.broadcast %cst_206 : f32 to vector<8x32xf32>
    %491 = arith.subf %490, %489 : vector<8x32xf32>
    %cst_207 = arith.constant 0.000000e+00 : f32
    %492 = vector.broadcast %cst_207 : f32 to vector<8x32xf32>
    %493 = arith.cmpf oge, %464, %492 : vector<8x32xf32>
    %cst_208 = arith.constant 0.000000e+00 : f32
    %494 = vector.broadcast %cst_208 : f32 to vector<8x32xf32>
    %495 = arith.subf %494, %491 : vector<8x32xf32>
    %496 = arith.select %493, %491, %495 : vector<8x32xi1>, vector<8x32xf32>
    %cst_209 = arith.constant 1.000000e+00 : f32
    %497 = vector.broadcast %cst_209 : f32 to vector<8x32xf32>
    %498 = arith.addf %497, %496 : vector<8x32xf32>
    %499 = arith.mulf %462, %498 : vector<8x32xf32>
    %c1208 = arith.constant 1208 : index
    %c0_210 = arith.constant 0 : index
    %500 = vector.load %arg2[%c1208, %c0_210] : memref<3560x128xf32, #tpu.memory_space<vmem>>, vector<32x8xf32>
    %cst_211 = arith.constant dense<0.000000e+00> : vector<8x8xf32>
    %501 = tpu.matmul %499, %500, %cst_211 {dimension_numbers = #tpu.dot_dimension_numbers<[1], [0], [0], [1], [0, 0, 1, 1], [], []>} : vector<8x32xf32>, vector<32x8xf32>, vector<8x8xf32> -> vector<8x8xf32>
    %c1304 = arith.constant 1304 : index
    %c0_212 = arith.constant 0 : index
    %502 = vector.load %arg2[%c1304, %c0_212] : memref<3560x128xf32, #tpu.memory_space<vmem>>, vector<1x8xf32>
    %503 = vector.broadcast %502 : vector<1x8xf32> to vector<8x8xf32>
    %504 = arith.addf %501, %503 : vector<8x8xf32>
    %c1240 = arith.constant 1240 : index
    %c0_213 = arith.constant 0 : index
    %505 = vector.load %arg2[%c1240, %c0_213] : memref<3560x128xf32, #tpu.memory_space<vmem>>, vector<32x8xf32>
    %cst_214 = arith.constant dense<0.000000e+00> : vector<8x8xf32>
    %506 = tpu.matmul %499, %505, %cst_214 {dimension_numbers = #tpu.dot_dimension_numbers<[1], [0], [0], [1], [0, 0, 1, 1], [], []>} : vector<8x32xf32>, vector<32x8xf32>, vector<8x8xf32> -> vector<8x8xf32>
    %c1312 = arith.constant 1312 : index
    %c0_215 = arith.constant 0 : index
    %507 = vector.load %arg2[%c1312, %c0_215] : memref<3560x128xf32, #tpu.memory_space<vmem>>, vector<1x8xf32>
    %508 = vector.broadcast %507 : vector<1x8xf32> to vector<8x8xf32>
    %509 = arith.addf %506, %508 : vector<8x8xf32>
    %c1272 = arith.constant 1272 : index
    %c0_216 = arith.constant 0 : index
    %510 = vector.load %arg2[%c1272, %c0_216] : memref<3560x128xf32, #tpu.memory_space<vmem>>, vector<32x8xf32>
    %cst_217 = arith.constant dense<0.000000e+00> : vector<8x8xf32>
    %511 = tpu.matmul %499, %510, %cst_217 {dimension_numbers = #tpu.dot_dimension_numbers<[1], [0], [0], [1], [0, 0, 1, 1], [], []>} : vector<8x32xf32>, vector<32x8xf32>, vector<8x8xf32> -> vector<8x8xf32>
    %c1320 = arith.constant 1320 : index
    %c0_218 = arith.constant 0 : index
    %512 = vector.load %arg2[%c1320, %c0_218] : memref<3560x128xf32, #tpu.memory_space<vmem>>, vector<1x8xf32>
    %513 = vector.broadcast %512 : vector<1x8xf32> to vector<8x8xf32>
    %514 = arith.addf %511, %513 : vector<8x8xf32>
    %cst_219 = arith.constant 0.353553385 : f32
    %515 = vector.broadcast %cst_219 : f32 to vector<8x8xf32>
    %516 = arith.mulf %504, %515 : vector<8x8xf32>
    %cst_220 = arith.constant dense<0.000000e+00> : vector<8x8xf32>
    %517 = tpu.matmul %516, %509, %cst_220 {dimension_numbers = #tpu.dot_dimension_numbers<[1], [1], [0], [0], [0, 0, 1, 0], [], []>} : vector<8x8xf32>, vector<8x8xf32>, vector<8x8xf32> -> vector<8x8xf32>
    %cst_221 = arith.constant dense<0xFF800000> : vector<8xf32>
    %518 = vector.multi_reduction <maximumf>, %517, %cst_221 [1] : vector<8x8xf32> to vector<8xf32>
    %519 = vector.shape_cast %518 : vector<8xf32> to vector<8x1xf32>
    %520 = vector.broadcast %519 : vector<8x1xf32> to vector<8x8xf32>
    %521 = arith.subf %517, %520 : vector<8x8xf32>
    %522 = math.exp %521 : vector<8x8xf32>
    %cst_222 = arith.constant dense<0.000000e+00> : vector<8xf32>
    %523 = vector.multi_reduction <add>, %522, %cst_222 [1] : vector<8x8xf32> to vector<8xf32>
    %524 = vector.shape_cast %523 : vector<8xf32> to vector<8x1xf32>
    %525 = tpu.reciprocal %524 {approx = true} : vector<8x1xf32> -> vector<8x1xf32>
    %526 = vector.broadcast %525 : vector<8x1xf32> to vector<8x8xf32>
    %527 = arith.mulf %522, %526 : vector<8x8xf32>
    %cst_223 = arith.constant dense<0.000000e+00> : vector<8x8xf32>
    %528 = tpu.matmul %527, %514, %cst_223 {dimension_numbers = #tpu.dot_dimension_numbers<[1], [0], [0], [1], [0, 0, 1, 1], [], []>} : vector<8x8xf32>, vector<8x8xf32>, vector<8x8xf32> -> vector<8x8xf32>
    %c1328 = arith.constant 1328 : index
    %c0_224 = arith.constant 0 : index
    %529 = vector.load %arg2[%c1328, %c0_224] : memref<3560x128xf32, #tpu.memory_space<vmem>>, vector<8x32xf32>
    %cst_225 = arith.constant dense<0.000000e+00> : vector<8x32xf32>
    %530 = tpu.matmul %528, %529, %cst_225 {dimension_numbers = #tpu.dot_dimension_numbers<[1], [0], [0], [1], [0, 0, 1, 1], [], []>} : vector<8x8xf32>, vector<8x32xf32>, vector<8x32xf32> -> vector<8x32xf32>
    %c1336 = arith.constant 1336 : index
    %c0_226 = arith.constant 0 : index
    %531 = vector.load %arg2[%c1336, %c0_226] : memref<3560x128xf32, #tpu.memory_space<vmem>>, vector<32x8xf32>
    %cst_227 = arith.constant dense<0.000000e+00> : vector<8x8xf32>
    %532 = tpu.matmul %499, %531, %cst_227 {dimension_numbers = #tpu.dot_dimension_numbers<[1], [0], [0], [1], [0, 0, 1, 1], [], []>} : vector<8x32xf32>, vector<32x8xf32>, vector<8x8xf32> -> vector<8x8xf32>
    %c1432 = arith.constant 1432 : index
    %c0_228 = arith.constant 0 : index
    %533 = vector.load %arg2[%c1432, %c0_228] : memref<3560x128xf32, #tpu.memory_space<vmem>>, vector<1x8xf32>
    %534 = vector.broadcast %533 : vector<1x8xf32> to vector<8x8xf32>
    %535 = arith.addf %532, %534 : vector<8x8xf32>
    %c1368 = arith.constant 1368 : index
    %c0_229 = arith.constant 0 : index
    %536 = vector.load %arg2[%c1368, %c0_229] : memref<3560x128xf32, #tpu.memory_space<vmem>>, vector<32x8xf32>
    %cst_230 = arith.constant dense<0.000000e+00> : vector<8x8xf32>
    %537 = tpu.matmul %499, %536, %cst_230 {dimension_numbers = #tpu.dot_dimension_numbers<[1], [0], [0], [1], [0, 0, 1, 1], [], []>} : vector<8x32xf32>, vector<32x8xf32>, vector<8x8xf32> -> vector<8x8xf32>
    %c1440 = arith.constant 1440 : index
    %c0_231 = arith.constant 0 : index
    %538 = vector.load %arg2[%c1440, %c0_231] : memref<3560x128xf32, #tpu.memory_space<vmem>>, vector<1x8xf32>
    %539 = vector.broadcast %538 : vector<1x8xf32> to vector<8x8xf32>
    %540 = arith.addf %537, %539 : vector<8x8xf32>
    %c1400 = arith.constant 1400 : index
    %c0_232 = arith.constant 0 : index
    %541 = vector.load %arg2[%c1400, %c0_232] : memref<3560x128xf32, #tpu.memory_space<vmem>>, vector<32x8xf32>
    %cst_233 = arith.constant dense<0.000000e+00> : vector<8x8xf32>
    %542 = tpu.matmul %499, %541, %cst_233 {dimension_numbers = #tpu.dot_dimension_numbers<[1], [0], [0], [1], [0, 0, 1, 1], [], []>} : vector<8x32xf32>, vector<32x8xf32>, vector<8x8xf32> -> vector<8x8xf32>
    %c1448 = arith.constant 1448 : index
    %c0_234 = arith.constant 0 : index
    %543 = vector.load %arg2[%c1448, %c0_234] : memref<3560x128xf32, #tpu.memory_space<vmem>>, vector<1x8xf32>
    %544 = vector.broadcast %543 : vector<1x8xf32> to vector<8x8xf32>
    %545 = arith.addf %542, %544 : vector<8x8xf32>
    %cst_235 = arith.constant 0.353553385 : f32
    %546 = vector.broadcast %cst_235 : f32 to vector<8x8xf32>
    %547 = arith.mulf %535, %546 : vector<8x8xf32>
    %cst_236 = arith.constant dense<0.000000e+00> : vector<8x8xf32>
    %548 = tpu.matmul %547, %540, %cst_236 {dimension_numbers = #tpu.dot_dimension_numbers<[1], [1], [0], [0], [0, 0, 1, 0], [], []>} : vector<8x8xf32>, vector<8x8xf32>, vector<8x8xf32> -> vector<8x8xf32>
    %cst_237 = arith.constant dense<0xFF800000> : vector<8xf32>
    %549 = vector.multi_reduction <maximumf>, %548, %cst_237 [1] : vector<8x8xf32> to vector<8xf32>
    %550 = vector.shape_cast %549 : vector<8xf32> to vector<8x1xf32>
    %551 = vector.broadcast %550 : vector<8x1xf32> to vector<8x8xf32>
    %552 = arith.subf %548, %551 : vector<8x8xf32>
    %553 = math.exp %552 : vector<8x8xf32>
    %cst_238 = arith.constant dense<0.000000e+00> : vector<8xf32>
    %554 = vector.multi_reduction <add>, %553, %cst_238 [1] : vector<8x8xf32> to vector<8xf32>
    %555 = vector.shape_cast %554 : vector<8xf32> to vector<8x1xf32>
    %556 = tpu.reciprocal %555 {approx = true} : vector<8x1xf32> -> vector<8x1xf32>
    %557 = vector.broadcast %556 : vector<8x1xf32> to vector<8x8xf32>
    %558 = arith.mulf %553, %557 : vector<8x8xf32>
    %cst_239 = arith.constant dense<0.000000e+00> : vector<8x8xf32>
    %559 = tpu.matmul %558, %545, %cst_239 {dimension_numbers = #tpu.dot_dimension_numbers<[1], [0], [0], [1], [0, 0, 1, 1], [], []>} : vector<8x8xf32>, vector<8x8xf32>, vector<8x8xf32> -> vector<8x8xf32>
    %c1456 = arith.constant 1456 : index
    %c0_240 = arith.constant 0 : index
    %560 = vector.load %arg2[%c1456, %c0_240] : memref<3560x128xf32, #tpu.memory_space<vmem>>, vector<8x32xf32>
    %cst_241 = arith.constant dense<0.000000e+00> : vector<8x32xf32>
    %561 = tpu.matmul %559, %560, %cst_241 {dimension_numbers = #tpu.dot_dimension_numbers<[1], [0], [0], [1], [0, 0, 1, 1], [], []>} : vector<8x8xf32>, vector<8x32xf32>, vector<8x32xf32> -> vector<8x32xf32>
    %562 = arith.addf %530, %561 : vector<8x32xf32>
    %c1464 = arith.constant 1464 : index
    %c0_242 = arith.constant 0 : index
    %563 = vector.load %arg2[%c1464, %c0_242] : memref<3560x128xf32, #tpu.memory_space<vmem>>, vector<32x8xf32>
    %cst_243 = arith.constant dense<0.000000e+00> : vector<8x8xf32>
    %564 = tpu.matmul %499, %563, %cst_243 {dimension_numbers = #tpu.dot_dimension_numbers<[1], [0], [0], [1], [0, 0, 1, 1], [], []>} : vector<8x32xf32>, vector<32x8xf32>, vector<8x8xf32> -> vector<8x8xf32>
    %c1560 = arith.constant 1560 : index
    %c0_244 = arith.constant 0 : index
    %565 = vector.load %arg2[%c1560, %c0_244] : memref<3560x128xf32, #tpu.memory_space<vmem>>, vector<1x8xf32>
    %566 = vector.broadcast %565 : vector<1x8xf32> to vector<8x8xf32>
    %567 = arith.addf %564, %566 : vector<8x8xf32>
    %c1496 = arith.constant 1496 : index
    %c0_245 = arith.constant 0 : index
    %568 = vector.load %arg2[%c1496, %c0_245] : memref<3560x128xf32, #tpu.memory_space<vmem>>, vector<32x8xf32>
    %cst_246 = arith.constant dense<0.000000e+00> : vector<8x8xf32>
    %569 = tpu.matmul %499, %568, %cst_246 {dimension_numbers = #tpu.dot_dimension_numbers<[1], [0], [0], [1], [0, 0, 1, 1], [], []>} : vector<8x32xf32>, vector<32x8xf32>, vector<8x8xf32> -> vector<8x8xf32>
    %c1568 = arith.constant 1568 : index
    %c0_247 = arith.constant 0 : index
    %570 = vector.load %arg2[%c1568, %c0_247] : memref<3560x128xf32, #tpu.memory_space<vmem>>, vector<1x8xf32>
    %571 = vector.broadcast %570 : vector<1x8xf32> to vector<8x8xf32>
    %572 = arith.addf %569, %571 : vector<8x8xf32>
    %c1528 = arith.constant 1528 : index
    %c0_248 = arith.constant 0 : index
    %573 = vector.load %arg2[%c1528, %c0_248] : memref<3560x128xf32, #tpu.memory_space<vmem>>, vector<32x8xf32>
    %cst_249 = arith.constant dense<0.000000e+00> : vector<8x8xf32>
    %574 = tpu.matmul %499, %573, %cst_249 {dimension_numbers = #tpu.dot_dimension_numbers<[1], [0], [0], [1], [0, 0, 1, 1], [], []>} : vector<8x32xf32>, vector<32x8xf32>, vector<8x8xf32> -> vector<8x8xf32>
    %c1576 = arith.constant 1576 : index
    %c0_250 = arith.constant 0 : index
    %575 = vector.load %arg2[%c1576, %c0_250] : memref<3560x128xf32, #tpu.memory_space<vmem>>, vector<1x8xf32>
    %576 = vector.broadcast %575 : vector<1x8xf32> to vector<8x8xf32>
    %577 = arith.addf %574, %576 : vector<8x8xf32>
    %cst_251 = arith.constant 0.353553385 : f32
    %578 = vector.broadcast %cst_251 : f32 to vector<8x8xf32>
    %579 = arith.mulf %567, %578 : vector<8x8xf32>
    %cst_252 = arith.constant dense<0.000000e+00> : vector<8x8xf32>
    %580 = tpu.matmul %579, %572, %cst_252 {dimension_numbers = #tpu.dot_dimension_numbers<[1], [1], [0], [0], [0, 0, 1, 0], [], []>} : vector<8x8xf32>, vector<8x8xf32>, vector<8x8xf32> -> vector<8x8xf32>
    %cst_253 = arith.constant dense<0xFF800000> : vector<8xf32>
    %581 = vector.multi_reduction <maximumf>, %580, %cst_253 [1] : vector<8x8xf32> to vector<8xf32>
    %582 = vector.shape_cast %581 : vector<8xf32> to vector<8x1xf32>
    %583 = vector.broadcast %582 : vector<8x1xf32> to vector<8x8xf32>
    %584 = arith.subf %580, %583 : vector<8x8xf32>
    %585 = math.exp %584 : vector<8x8xf32>
    %cst_254 = arith.constant dense<0.000000e+00> : vector<8xf32>
    %586 = vector.multi_reduction <add>, %585, %cst_254 [1] : vector<8x8xf32> to vector<8xf32>
    %587 = vector.shape_cast %586 : vector<8xf32> to vector<8x1xf32>
    %588 = tpu.reciprocal %587 {approx = true} : vector<8x1xf32> -> vector<8x1xf32>
    %589 = vector.broadcast %588 : vector<8x1xf32> to vector<8x8xf32>
    %590 = arith.mulf %585, %589 : vector<8x8xf32>
    %cst_255 = arith.constant dense<0.000000e+00> : vector<8x8xf32>
    %591 = tpu.matmul %590, %577, %cst_255 {dimension_numbers = #tpu.dot_dimension_numbers<[1], [0], [0], [1], [0, 0, 1, 1], [], []>} : vector<8x8xf32>, vector<8x8xf32>, vector<8x8xf32> -> vector<8x8xf32>
    %c1584 = arith.constant 1584 : index
    %c0_256 = arith.constant 0 : index
    %592 = vector.load %arg2[%c1584, %c0_256] : memref<3560x128xf32, #tpu.memory_space<vmem>>, vector<8x32xf32>
    %cst_257 = arith.constant dense<0.000000e+00> : vector<8x32xf32>
    %593 = tpu.matmul %591, %592, %cst_257 {dimension_numbers = #tpu.dot_dimension_numbers<[1], [0], [0], [1], [0, 0, 1, 1], [], []>} : vector<8x8xf32>, vector<8x32xf32>, vector<8x32xf32> -> vector<8x32xf32>
    %594 = arith.addf %562, %593 : vector<8x32xf32>
    %c1592 = arith.constant 1592 : index
    %c0_258 = arith.constant 0 : index
    %595 = vector.load %arg2[%c1592, %c0_258] : memref<3560x128xf32, #tpu.memory_space<vmem>>, vector<32x8xf32>
    %cst_259 = arith.constant dense<0.000000e+00> : vector<8x8xf32>
    %596 = tpu.matmul %499, %595, %cst_259 {dimension_numbers = #tpu.dot_dimension_numbers<[1], [0], [0], [1], [0, 0, 1, 1], [], []>} : vector<8x32xf32>, vector<32x8xf32>, vector<8x8xf32> -> vector<8x8xf32>
    %c1688 = arith.constant 1688 : index
    %c0_260 = arith.constant 0 : index
    %597 = vector.load %arg2[%c1688, %c0_260] : memref<3560x128xf32, #tpu.memory_space<vmem>>, vector<1x8xf32>
    %598 = vector.broadcast %597 : vector<1x8xf32> to vector<8x8xf32>
    %599 = arith.addf %596, %598 : vector<8x8xf32>
    %c1624 = arith.constant 1624 : index
    %c0_261 = arith.constant 0 : index
    %600 = vector.load %arg2[%c1624, %c0_261] : memref<3560x128xf32, #tpu.memory_space<vmem>>, vector<32x8xf32>
    %cst_262 = arith.constant dense<0.000000e+00> : vector<8x8xf32>
    %601 = tpu.matmul %499, %600, %cst_262 {dimension_numbers = #tpu.dot_dimension_numbers<[1], [0], [0], [1], [0, 0, 1, 1], [], []>} : vector<8x32xf32>, vector<32x8xf32>, vector<8x8xf32> -> vector<8x8xf32>
    %c1696 = arith.constant 1696 : index
    %c0_263 = arith.constant 0 : index
    %602 = vector.load %arg2[%c1696, %c0_263] : memref<3560x128xf32, #tpu.memory_space<vmem>>, vector<1x8xf32>
    %603 = vector.broadcast %602 : vector<1x8xf32> to vector<8x8xf32>
    %604 = arith.addf %601, %603 : vector<8x8xf32>
    %c1656 = arith.constant 1656 : index
    %c0_264 = arith.constant 0 : index
    %605 = vector.load %arg2[%c1656, %c0_264] : memref<3560x128xf32, #tpu.memory_space<vmem>>, vector<32x8xf32>
    %cst_265 = arith.constant dense<0.000000e+00> : vector<8x8xf32>
    %606 = tpu.matmul %499, %605, %cst_265 {dimension_numbers = #tpu.dot_dimension_numbers<[1], [0], [0], [1], [0, 0, 1, 1], [], []>} : vector<8x32xf32>, vector<32x8xf32>, vector<8x8xf32> -> vector<8x8xf32>
    %c1704 = arith.constant 1704 : index
    %c0_266 = arith.constant 0 : index
    %607 = vector.load %arg2[%c1704, %c0_266] : memref<3560x128xf32, #tpu.memory_space<vmem>>, vector<1x8xf32>
    %608 = vector.broadcast %607 : vector<1x8xf32> to vector<8x8xf32>
    %609 = arith.addf %606, %608 : vector<8x8xf32>
    %cst_267 = arith.constant 0.353553385 : f32
    %610 = vector.broadcast %cst_267 : f32 to vector<8x8xf32>
    %611 = arith.mulf %599, %610 : vector<8x8xf32>
    %cst_268 = arith.constant dense<0.000000e+00> : vector<8x8xf32>
    %612 = tpu.matmul %611, %604, %cst_268 {dimension_numbers = #tpu.dot_dimension_numbers<[1], [1], [0], [0], [0, 0, 1, 0], [], []>} : vector<8x8xf32>, vector<8x8xf32>, vector<8x8xf32> -> vector<8x8xf32>
    %cst_269 = arith.constant dense<0xFF800000> : vector<8xf32>
    %613 = vector.multi_reduction <maximumf>, %612, %cst_269 [1] : vector<8x8xf32> to vector<8xf32>
    %614 = vector.shape_cast %613 : vector<8xf32> to vector<8x1xf32>
    %615 = vector.broadcast %614 : vector<8x1xf32> to vector<8x8xf32>
    %616 = arith.subf %612, %615 : vector<8x8xf32>
    %617 = math.exp %616 : vector<8x8xf32>
    %cst_270 = arith.constant dense<0.000000e+00> : vector<8xf32>
    %618 = vector.multi_reduction <add>, %617, %cst_270 [1] : vector<8x8xf32> to vector<8xf32>
    %619 = vector.shape_cast %618 : vector<8xf32> to vector<8x1xf32>
    %620 = tpu.reciprocal %619 {approx = true} : vector<8x1xf32> -> vector<8x1xf32>
    %621 = vector.broadcast %620 : vector<8x1xf32> to vector<8x8xf32>
    %622 = arith.mulf %617, %621 : vector<8x8xf32>
    %cst_271 = arith.constant dense<0.000000e+00> : vector<8x8xf32>
    %623 = tpu.matmul %622, %609, %cst_271 {dimension_numbers = #tpu.dot_dimension_numbers<[1], [0], [0], [1], [0, 0, 1, 1], [], []>} : vector<8x8xf32>, vector<8x8xf32>, vector<8x8xf32> -> vector<8x8xf32>
    %c1712 = arith.constant 1712 : index
    %c0_272 = arith.constant 0 : index
    %624 = vector.load %arg2[%c1712, %c0_272] : memref<3560x128xf32, #tpu.memory_space<vmem>>, vector<8x32xf32>
    %cst_273 = arith.constant dense<0.000000e+00> : vector<8x32xf32>
    %625 = tpu.matmul %623, %624, %cst_273 {dimension_numbers = #tpu.dot_dimension_numbers<[1], [0], [0], [1], [0, 0, 1, 1], [], []>} : vector<8x8xf32>, vector<8x32xf32>, vector<8x32xf32> -> vector<8x32xf32>
    %626 = arith.addf %594, %625 : vector<8x32xf32>
    %627 = arith.addf %499, %626 : vector<8x32xf32>
    %c1720 = arith.constant 1720 : index
    %c0_274 = arith.constant 0 : index
    %628 = vector.load %arg2[%c1720, %c0_274] : memref<3560x128xf32, #tpu.memory_space<vmem>>, vector<1x32xf32>
    %629 = vector.broadcast %628 : vector<1x32xf32> to vector<8x32xf32>
    %630 = arith.addf %627, %629 : vector<8x32xf32>
    %c1728 = arith.constant 1728 : index
    %c0_275 = arith.constant 0 : index
    %631 = vector.load %arg2[%c1728, %c0_275] : memref<3560x128xf32, #tpu.memory_space<vmem>>, vector<32x32xf32>
    %cst_276 = arith.constant dense<0.000000e+00> : vector<8x32xf32>
    %632 = tpu.matmul %630, %631, %cst_276 {dimension_numbers = #tpu.dot_dimension_numbers<[1], [0], [0], [1], [0, 0, 1, 1], [], []>} : vector<8x32xf32>, vector<32x32xf32>, vector<8x32xf32> -> vector<8x32xf32>
    %633 = arith.addf %630, %632 : vector<8x32xf32>
    %c1760 = arith.constant 1760 : index
    %c0_277 = arith.constant 0 : index
    %634 = vector.load %arg2[%c1760, %c0_277] : memref<3560x128xf32, #tpu.memory_space<vmem>>, vector<1x32xf32>
    %635 = vector.broadcast %634 : vector<1x32xf32> to vector<8x32xf32>
    %636 = arith.addf %633, %635 : vector<8x32xf32>
    %cst_278 = arith.constant 5.000000e-01 : f32
    %637 = vector.broadcast %cst_278 : f32 to vector<8x32xf32>
    %638 = arith.mulf %637, %636 : vector<8x32xf32>
    %cst_279 = arith.constant 0.707106769 : f32
    %639 = vector.broadcast %cst_279 : f32 to vector<8x32xf32>
    %640 = arith.mulf %636, %639 : vector<8x32xf32>
    %641 = math.absf %640 : vector<8x32xf32>
    %cst_280 = arith.constant 0.327591091 : f32
    %642 = vector.broadcast %cst_280 : f32 to vector<8x32xf32>
    %643 = arith.mulf %642, %641 : vector<8x32xf32>
    %cst_281 = arith.constant 1.000000e+00 : f32
    %644 = vector.broadcast %cst_281 : f32 to vector<8x32xf32>
    %645 = arith.addf %644, %643 : vector<8x32xf32>
    %646 = tpu.reciprocal %645 {approx = true} : vector<8x32xf32> -> vector<8x32xf32>
    %cst_282 = arith.constant 1.06140542 : f32
    %647 = vector.broadcast %cst_282 : f32 to vector<8x32xf32>
    %648 = arith.mulf %647, %646 : vector<8x32xf32>
    %cst_283 = arith.constant -1.45315206 : f32
    %649 = vector.broadcast %cst_283 : f32 to vector<8x32xf32>
    %650 = arith.addf %648, %649 : vector<8x32xf32>
    %651 = arith.mulf %650, %646 : vector<8x32xf32>
    %cst_284 = arith.constant 1.42141378 : f32
    %652 = vector.broadcast %cst_284 : f32 to vector<8x32xf32>
    %653 = arith.addf %651, %652 : vector<8x32xf32>
    %654 = arith.mulf %653, %646 : vector<8x32xf32>
    %cst_285 = arith.constant -0.284496725 : f32
    %655 = vector.broadcast %cst_285 : f32 to vector<8x32xf32>
    %656 = arith.addf %654, %655 : vector<8x32xf32>
    %657 = arith.mulf %656, %646 : vector<8x32xf32>
    %cst_286 = arith.constant 0.254829586 : f32
    %658 = vector.broadcast %cst_286 : f32 to vector<8x32xf32>
    %659 = arith.addf %657, %658 : vector<8x32xf32>
    %660 = arith.mulf %659, %646 : vector<8x32xf32>
    %cst_287 = arith.constant 0.000000e+00 : f32
    %661 = vector.broadcast %cst_287 : f32 to vector<8x32xf32>
    %662 = arith.subf %661, %641 : vector<8x32xf32>
    %663 = arith.mulf %662, %641 : vector<8x32xf32>
    %664 = math.exp %663 : vector<8x32xf32>
    %665 = arith.mulf %660, %664 : vector<8x32xf32>
    %cst_288 = arith.constant 1.000000e+00 : f32
    %666 = vector.broadcast %cst_288 : f32 to vector<8x32xf32>
    %667 = arith.subf %666, %665 : vector<8x32xf32>
    %cst_289 = arith.constant 0.000000e+00 : f32
    %668 = vector.broadcast %cst_289 : f32 to vector<8x32xf32>
    %669 = arith.cmpf oge, %640, %668 : vector<8x32xf32>
    %cst_290 = arith.constant 0.000000e+00 : f32
    %670 = vector.broadcast %cst_290 : f32 to vector<8x32xf32>
    %671 = arith.subf %670, %667 : vector<8x32xf32>
    %672 = arith.select %669, %667, %671 : vector<8x32xi1>, vector<8x32xf32>
    %cst_291 = arith.constant 1.000000e+00 : f32
    %673 = vector.broadcast %cst_291 : f32 to vector<8x32xf32>
    %674 = arith.addf %673, %672 : vector<8x32xf32>
    %675 = arith.mulf %638, %674 : vector<8x32xf32>
    %c1768 = arith.constant 1768 : index
    %c0_292 = arith.constant 0 : index
    %676 = vector.load %arg2[%c1768, %c0_292] : memref<3560x128xf32, #tpu.memory_space<vmem>>, vector<32x8xf32>
    %cst_293 = arith.constant dense<0.000000e+00> : vector<8x8xf32>
    %677 = tpu.matmul %675, %676, %cst_293 {dimension_numbers = #tpu.dot_dimension_numbers<[1], [0], [0], [1], [0, 0, 1, 1], [], []>} : vector<8x32xf32>, vector<32x8xf32>, vector<8x8xf32> -> vector<8x8xf32>
    %c1864 = arith.constant 1864 : index
    %c0_294 = arith.constant 0 : index
    %678 = vector.load %arg2[%c1864, %c0_294] : memref<3560x128xf32, #tpu.memory_space<vmem>>, vector<1x8xf32>
    %679 = vector.broadcast %678 : vector<1x8xf32> to vector<8x8xf32>
    %680 = arith.addf %677, %679 : vector<8x8xf32>
    %c1800 = arith.constant 1800 : index
    %c0_295 = arith.constant 0 : index
    %681 = vector.load %arg2[%c1800, %c0_295] : memref<3560x128xf32, #tpu.memory_space<vmem>>, vector<32x8xf32>
    %cst_296 = arith.constant dense<0.000000e+00> : vector<8x8xf32>
    %682 = tpu.matmul %675, %681, %cst_296 {dimension_numbers = #tpu.dot_dimension_numbers<[1], [0], [0], [1], [0, 0, 1, 1], [], []>} : vector<8x32xf32>, vector<32x8xf32>, vector<8x8xf32> -> vector<8x8xf32>
    %c1872 = arith.constant 1872 : index
    %c0_297 = arith.constant 0 : index
    %683 = vector.load %arg2[%c1872, %c0_297] : memref<3560x128xf32, #tpu.memory_space<vmem>>, vector<1x8xf32>
    %684 = vector.broadcast %683 : vector<1x8xf32> to vector<8x8xf32>
    %685 = arith.addf %682, %684 : vector<8x8xf32>
    %c1832 = arith.constant 1832 : index
    %c0_298 = arith.constant 0 : index
    %686 = vector.load %arg2[%c1832, %c0_298] : memref<3560x128xf32, #tpu.memory_space<vmem>>, vector<32x8xf32>
    %cst_299 = arith.constant dense<0.000000e+00> : vector<8x8xf32>
    %687 = tpu.matmul %675, %686, %cst_299 {dimension_numbers = #tpu.dot_dimension_numbers<[1], [0], [0], [1], [0, 0, 1, 1], [], []>} : vector<8x32xf32>, vector<32x8xf32>, vector<8x8xf32> -> vector<8x8xf32>
    %c1880 = arith.constant 1880 : index
    %c0_300 = arith.constant 0 : index
    %688 = vector.load %arg2[%c1880, %c0_300] : memref<3560x128xf32, #tpu.memory_space<vmem>>, vector<1x8xf32>
    %689 = vector.broadcast %688 : vector<1x8xf32> to vector<8x8xf32>
    %690 = arith.addf %687, %689 : vector<8x8xf32>
    %cst_301 = arith.constant 0.353553385 : f32
    %691 = vector.broadcast %cst_301 : f32 to vector<8x8xf32>
    %692 = arith.mulf %680, %691 : vector<8x8xf32>
    %cst_302 = arith.constant dense<0.000000e+00> : vector<8x8xf32>
    %693 = tpu.matmul %692, %685, %cst_302 {dimension_numbers = #tpu.dot_dimension_numbers<[1], [1], [0], [0], [0, 0, 1, 0], [], []>} : vector<8x8xf32>, vector<8x8xf32>, vector<8x8xf32> -> vector<8x8xf32>
    %cst_303 = arith.constant dense<0xFF800000> : vector<8xf32>
    %694 = vector.multi_reduction <maximumf>, %693, %cst_303 [1] : vector<8x8xf32> to vector<8xf32>
    %695 = vector.shape_cast %694 : vector<8xf32> to vector<8x1xf32>
    %696 = vector.broadcast %695 : vector<8x1xf32> to vector<8x8xf32>
    %697 = arith.subf %693, %696 : vector<8x8xf32>
    %698 = math.exp %697 : vector<8x8xf32>
    %cst_304 = arith.constant dense<0.000000e+00> : vector<8xf32>
    %699 = vector.multi_reduction <add>, %698, %cst_304 [1] : vector<8x8xf32> to vector<8xf32>
    %700 = vector.shape_cast %699 : vector<8xf32> to vector<8x1xf32>
    %701 = tpu.reciprocal %700 {approx = true} : vector<8x1xf32> -> vector<8x1xf32>
    %702 = vector.broadcast %701 : vector<8x1xf32> to vector<8x8xf32>
    %703 = arith.mulf %698, %702 : vector<8x8xf32>
    %cst_305 = arith.constant dense<0.000000e+00> : vector<8x8xf32>
    %704 = tpu.matmul %703, %690, %cst_305 {dimension_numbers = #tpu.dot_dimension_numbers<[1], [0], [0], [1], [0, 0, 1, 1], [], []>} : vector<8x8xf32>, vector<8x8xf32>, vector<8x8xf32> -> vector<8x8xf32>
    %c1888 = arith.constant 1888 : index
    %c0_306 = arith.constant 0 : index
    %705 = vector.load %arg2[%c1888, %c0_306] : memref<3560x128xf32, #tpu.memory_space<vmem>>, vector<8x32xf32>
    %cst_307 = arith.constant dense<0.000000e+00> : vector<8x32xf32>
    %706 = tpu.matmul %704, %705, %cst_307 {dimension_numbers = #tpu.dot_dimension_numbers<[1], [0], [0], [1], [0, 0, 1, 1], [], []>} : vector<8x8xf32>, vector<8x32xf32>, vector<8x32xf32> -> vector<8x32xf32>
    %c1896 = arith.constant 1896 : index
    %c0_308 = arith.constant 0 : index
    %707 = vector.load %arg2[%c1896, %c0_308] : memref<3560x128xf32, #tpu.memory_space<vmem>>, vector<32x8xf32>
    %cst_309 = arith.constant dense<0.000000e+00> : vector<8x8xf32>
    %708 = tpu.matmul %675, %707, %cst_309 {dimension_numbers = #tpu.dot_dimension_numbers<[1], [0], [0], [1], [0, 0, 1, 1], [], []>} : vector<8x32xf32>, vector<32x8xf32>, vector<8x8xf32> -> vector<8x8xf32>
    %c1992 = arith.constant 1992 : index
    %c0_310 = arith.constant 0 : index
    %709 = vector.load %arg2[%c1992, %c0_310] : memref<3560x128xf32, #tpu.memory_space<vmem>>, vector<1x8xf32>
    %710 = vector.broadcast %709 : vector<1x8xf32> to vector<8x8xf32>
    %711 = arith.addf %708, %710 : vector<8x8xf32>
    %c1928 = arith.constant 1928 : index
    %c0_311 = arith.constant 0 : index
    %712 = vector.load %arg2[%c1928, %c0_311] : memref<3560x128xf32, #tpu.memory_space<vmem>>, vector<32x8xf32>
    %cst_312 = arith.constant dense<0.000000e+00> : vector<8x8xf32>
    %713 = tpu.matmul %675, %712, %cst_312 {dimension_numbers = #tpu.dot_dimension_numbers<[1], [0], [0], [1], [0, 0, 1, 1], [], []>} : vector<8x32xf32>, vector<32x8xf32>, vector<8x8xf32> -> vector<8x8xf32>
    %c2000 = arith.constant 2000 : index
    %c0_313 = arith.constant 0 : index
    %714 = vector.load %arg2[%c2000, %c0_313] : memref<3560x128xf32, #tpu.memory_space<vmem>>, vector<1x8xf32>
    %715 = vector.broadcast %714 : vector<1x8xf32> to vector<8x8xf32>
    %716 = arith.addf %713, %715 : vector<8x8xf32>
    %c1960 = arith.constant 1960 : index
    %c0_314 = arith.constant 0 : index
    %717 = vector.load %arg2[%c1960, %c0_314] : memref<3560x128xf32, #tpu.memory_space<vmem>>, vector<32x8xf32>
    %cst_315 = arith.constant dense<0.000000e+00> : vector<8x8xf32>
    %718 = tpu.matmul %675, %717, %cst_315 {dimension_numbers = #tpu.dot_dimension_numbers<[1], [0], [0], [1], [0, 0, 1, 1], [], []>} : vector<8x32xf32>, vector<32x8xf32>, vector<8x8xf32> -> vector<8x8xf32>
    %c2008 = arith.constant 2008 : index
    %c0_316 = arith.constant 0 : index
    %719 = vector.load %arg2[%c2008, %c0_316] : memref<3560x128xf32, #tpu.memory_space<vmem>>, vector<1x8xf32>
    %720 = vector.broadcast %719 : vector<1x8xf32> to vector<8x8xf32>
    %721 = arith.addf %718, %720 : vector<8x8xf32>
    %cst_317 = arith.constant 0.353553385 : f32
    %722 = vector.broadcast %cst_317 : f32 to vector<8x8xf32>
    %723 = arith.mulf %711, %722 : vector<8x8xf32>
    %cst_318 = arith.constant dense<0.000000e+00> : vector<8x8xf32>
    %724 = tpu.matmul %723, %716, %cst_318 {dimension_numbers = #tpu.dot_dimension_numbers<[1], [1], [0], [0], [0, 0, 1, 0], [], []>} : vector<8x8xf32>, vector<8x8xf32>, vector<8x8xf32> -> vector<8x8xf32>
    %cst_319 = arith.constant dense<0xFF800000> : vector<8xf32>
    %725 = vector.multi_reduction <maximumf>, %724, %cst_319 [1] : vector<8x8xf32> to vector<8xf32>
    %726 = vector.shape_cast %725 : vector<8xf32> to vector<8x1xf32>
    %727 = vector.broadcast %726 : vector<8x1xf32> to vector<8x8xf32>
    %728 = arith.subf %724, %727 : vector<8x8xf32>
    %729 = math.exp %728 : vector<8x8xf32>
    %cst_320 = arith.constant dense<0.000000e+00> : vector<8xf32>
    %730 = vector.multi_reduction <add>, %729, %cst_320 [1] : vector<8x8xf32> to vector<8xf32>
    %731 = vector.shape_cast %730 : vector<8xf32> to vector<8x1xf32>
    %732 = tpu.reciprocal %731 {approx = true} : vector<8x1xf32> -> vector<8x1xf32>
    %733 = vector.broadcast %732 : vector<8x1xf32> to vector<8x8xf32>
    %734 = arith.mulf %729, %733 : vector<8x8xf32>
    %cst_321 = arith.constant dense<0.000000e+00> : vector<8x8xf32>
    %735 = tpu.matmul %734, %721, %cst_321 {dimension_numbers = #tpu.dot_dimension_numbers<[1], [0], [0], [1], [0, 0, 1, 1], [], []>} : vector<8x8xf32>, vector<8x8xf32>, vector<8x8xf32> -> vector<8x8xf32>
    %c2016 = arith.constant 2016 : index
    %c0_322 = arith.constant 0 : index
    %736 = vector.load %arg2[%c2016, %c0_322] : memref<3560x128xf32, #tpu.memory_space<vmem>>, vector<8x32xf32>
    %cst_323 = arith.constant dense<0.000000e+00> : vector<8x32xf32>
    %737 = tpu.matmul %735, %736, %cst_323 {dimension_numbers = #tpu.dot_dimension_numbers<[1], [0], [0], [1], [0, 0, 1, 1], [], []>} : vector<8x8xf32>, vector<8x32xf32>, vector<8x32xf32> -> vector<8x32xf32>
    %738 = arith.addf %706, %737 : vector<8x32xf32>
    %c2024 = arith.constant 2024 : index
    %c0_324 = arith.constant 0 : index
    %739 = vector.load %arg2[%c2024, %c0_324] : memref<3560x128xf32, #tpu.memory_space<vmem>>, vector<32x8xf32>
    %cst_325 = arith.constant dense<0.000000e+00> : vector<8x8xf32>
    %740 = tpu.matmul %675, %739, %cst_325 {dimension_numbers = #tpu.dot_dimension_numbers<[1], [0], [0], [1], [0, 0, 1, 1], [], []>} : vector<8x32xf32>, vector<32x8xf32>, vector<8x8xf32> -> vector<8x8xf32>
    %c2120 = arith.constant 2120 : index
    %c0_326 = arith.constant 0 : index
    %741 = vector.load %arg2[%c2120, %c0_326] : memref<3560x128xf32, #tpu.memory_space<vmem>>, vector<1x8xf32>
    %742 = vector.broadcast %741 : vector<1x8xf32> to vector<8x8xf32>
    %743 = arith.addf %740, %742 : vector<8x8xf32>
    %c2056 = arith.constant 2056 : index
    %c0_327 = arith.constant 0 : index
    %744 = vector.load %arg2[%c2056, %c0_327] : memref<3560x128xf32, #tpu.memory_space<vmem>>, vector<32x8xf32>
    %cst_328 = arith.constant dense<0.000000e+00> : vector<8x8xf32>
    %745 = tpu.matmul %675, %744, %cst_328 {dimension_numbers = #tpu.dot_dimension_numbers<[1], [0], [0], [1], [0, 0, 1, 1], [], []>} : vector<8x32xf32>, vector<32x8xf32>, vector<8x8xf32> -> vector<8x8xf32>
    %c2128 = arith.constant 2128 : index
    %c0_329 = arith.constant 0 : index
    %746 = vector.load %arg2[%c2128, %c0_329] : memref<3560x128xf32, #tpu.memory_space<vmem>>, vector<1x8xf32>
    %747 = vector.broadcast %746 : vector<1x8xf32> to vector<8x8xf32>
    %748 = arith.addf %745, %747 : vector<8x8xf32>
    %c2088 = arith.constant 2088 : index
    %c0_330 = arith.constant 0 : index
    %749 = vector.load %arg2[%c2088, %c0_330] : memref<3560x128xf32, #tpu.memory_space<vmem>>, vector<32x8xf32>
    %cst_331 = arith.constant dense<0.000000e+00> : vector<8x8xf32>
    %750 = tpu.matmul %675, %749, %cst_331 {dimension_numbers = #tpu.dot_dimension_numbers<[1], [0], [0], [1], [0, 0, 1, 1], [], []>} : vector<8x32xf32>, vector<32x8xf32>, vector<8x8xf32> -> vector<8x8xf32>
    %c2136 = arith.constant 2136 : index
    %c0_332 = arith.constant 0 : index
    %751 = vector.load %arg2[%c2136, %c0_332] : memref<3560x128xf32, #tpu.memory_space<vmem>>, vector<1x8xf32>
    %752 = vector.broadcast %751 : vector<1x8xf32> to vector<8x8xf32>
    %753 = arith.addf %750, %752 : vector<8x8xf32>
    %cst_333 = arith.constant 0.353553385 : f32
    %754 = vector.broadcast %cst_333 : f32 to vector<8x8xf32>
    %755 = arith.mulf %743, %754 : vector<8x8xf32>
    %cst_334 = arith.constant dense<0.000000e+00> : vector<8x8xf32>
    %756 = tpu.matmul %755, %748, %cst_334 {dimension_numbers = #tpu.dot_dimension_numbers<[1], [1], [0], [0], [0, 0, 1, 0], [], []>} : vector<8x8xf32>, vector<8x8xf32>, vector<8x8xf32> -> vector<8x8xf32>
    %cst_335 = arith.constant dense<0xFF800000> : vector<8xf32>
    %757 = vector.multi_reduction <maximumf>, %756, %cst_335 [1] : vector<8x8xf32> to vector<8xf32>
    %758 = vector.shape_cast %757 : vector<8xf32> to vector<8x1xf32>
    %759 = vector.broadcast %758 : vector<8x1xf32> to vector<8x8xf32>
    %760 = arith.subf %756, %759 : vector<8x8xf32>
    %761 = math.exp %760 : vector<8x8xf32>
    %cst_336 = arith.constant dense<0.000000e+00> : vector<8xf32>
    %762 = vector.multi_reduction <add>, %761, %cst_336 [1] : vector<8x8xf32> to vector<8xf32>
    %763 = vector.shape_cast %762 : vector<8xf32> to vector<8x1xf32>
    %764 = tpu.reciprocal %763 {approx = true} : vector<8x1xf32> -> vector<8x1xf32>
    %765 = vector.broadcast %764 : vector<8x1xf32> to vector<8x8xf32>
    %766 = arith.mulf %761, %765 : vector<8x8xf32>
    %cst_337 = arith.constant dense<0.000000e+00> : vector<8x8xf32>
    %767 = tpu.matmul %766, %753, %cst_337 {dimension_numbers = #tpu.dot_dimension_numbers<[1], [0], [0], [1], [0, 0, 1, 1], [], []>} : vector<8x8xf32>, vector<8x8xf32>, vector<8x8xf32> -> vector<8x8xf32>
    %c2144 = arith.constant 2144 : index
    %c0_338 = arith.constant 0 : index
    %768 = vector.load %arg2[%c2144, %c0_338] : memref<3560x128xf32, #tpu.memory_space<vmem>>, vector<8x32xf32>
    %cst_339 = arith.constant dense<0.000000e+00> : vector<8x32xf32>
    %769 = tpu.matmul %767, %768, %cst_339 {dimension_numbers = #tpu.dot_dimension_numbers<[1], [0], [0], [1], [0, 0, 1, 1], [], []>} : vector<8x8xf32>, vector<8x32xf32>, vector<8x32xf32> -> vector<8x32xf32>
    %770 = arith.addf %738, %769 : vector<8x32xf32>
    %c2152 = arith.constant 2152 : index
    %c0_340 = arith.constant 0 : index
    %771 = vector.load %arg2[%c2152, %c0_340] : memref<3560x128xf32, #tpu.memory_space<vmem>>, vector<32x8xf32>
    %cst_341 = arith.constant dense<0.000000e+00> : vector<8x8xf32>
    %772 = tpu.matmul %675, %771, %cst_341 {dimension_numbers = #tpu.dot_dimension_numbers<[1], [0], [0], [1], [0, 0, 1, 1], [], []>} : vector<8x32xf32>, vector<32x8xf32>, vector<8x8xf32> -> vector<8x8xf32>
    %c2248 = arith.constant 2248 : index
    %c0_342 = arith.constant 0 : index
    %773 = vector.load %arg2[%c2248, %c0_342] : memref<3560x128xf32, #tpu.memory_space<vmem>>, vector<1x8xf32>
    %774 = vector.broadcast %773 : vector<1x8xf32> to vector<8x8xf32>
    %775 = arith.addf %772, %774 : vector<8x8xf32>
    %c2184 = arith.constant 2184 : index
    %c0_343 = arith.constant 0 : index
    %776 = vector.load %arg2[%c2184, %c0_343] : memref<3560x128xf32, #tpu.memory_space<vmem>>, vector<32x8xf32>
    %cst_344 = arith.constant dense<0.000000e+00> : vector<8x8xf32>
    %777 = tpu.matmul %675, %776, %cst_344 {dimension_numbers = #tpu.dot_dimension_numbers<[1], [0], [0], [1], [0, 0, 1, 1], [], []>} : vector<8x32xf32>, vector<32x8xf32>, vector<8x8xf32> -> vector<8x8xf32>
    %c2256 = arith.constant 2256 : index
    %c0_345 = arith.constant 0 : index
    %778 = vector.load %arg2[%c2256, %c0_345] : memref<3560x128xf32, #tpu.memory_space<vmem>>, vector<1x8xf32>
    %779 = vector.broadcast %778 : vector<1x8xf32> to vector<8x8xf32>
    %780 = arith.addf %777, %779 : vector<8x8xf32>
    %c2216 = arith.constant 2216 : index
    %c0_346 = arith.constant 0 : index
    %781 = vector.load %arg2[%c2216, %c0_346] : memref<3560x128xf32, #tpu.memory_space<vmem>>, vector<32x8xf32>
    %cst_347 = arith.constant dense<0.000000e+00> : vector<8x8xf32>
    %782 = tpu.matmul %675, %781, %cst_347 {dimension_numbers = #tpu.dot_dimension_numbers<[1], [0], [0], [1], [0, 0, 1, 1], [], []>} : vector<8x32xf32>, vector<32x8xf32>, vector<8x8xf32> -> vector<8x8xf32>
    %c2264 = arith.constant 2264 : index
    %c0_348 = arith.constant 0 : index
    %783 = vector.load %arg2[%c2264, %c0_348] : memref<3560x128xf32, #tpu.memory_space<vmem>>, vector<1x8xf32>
    %784 = vector.broadcast %783 : vector<1x8xf32> to vector<8x8xf32>
    %785 = arith.addf %782, %784 : vector<8x8xf32>
    %cst_349 = arith.constant 0.353553385 : f32
    %786 = vector.broadcast %cst_349 : f32 to vector<8x8xf32>
    %787 = arith.mulf %775, %786 : vector<8x8xf32>
    %cst_350 = arith.constant dense<0.000000e+00> : vector<8x8xf32>
    %788 = tpu.matmul %787, %780, %cst_350 {dimension_numbers = #tpu.dot_dimension_numbers<[1], [1], [0], [0], [0, 0, 1, 0], [], []>} : vector<8x8xf32>, vector<8x8xf32>, vector<8x8xf32> -> vector<8x8xf32>
    %cst_351 = arith.constant dense<0xFF800000> : vector<8xf32>
    %789 = vector.multi_reduction <maximumf>, %788, %cst_351 [1] : vector<8x8xf32> to vector<8xf32>
    %790 = vector.shape_cast %789 : vector<8xf32> to vector<8x1xf32>
    %791 = vector.broadcast %790 : vector<8x1xf32> to vector<8x8xf32>
    %792 = arith.subf %788, %791 : vector<8x8xf32>
    %793 = math.exp %792 : vector<8x8xf32>
    %cst_352 = arith.constant dense<0.000000e+00> : vector<8xf32>
    %794 = vector.multi_reduction <add>, %793, %cst_352 [1] : vector<8x8xf32> to vector<8xf32>
    %795 = vector.shape_cast %794 : vector<8xf32> to vector<8x1xf32>
    %796 = tpu.reciprocal %795 {approx = true} : vector<8x1xf32> -> vector<8x1xf32>
    %797 = vector.broadcast %796 : vector<8x1xf32> to vector<8x8xf32>
    %798 = arith.mulf %793, %797 : vector<8x8xf32>
    %cst_353 = arith.constant dense<0.000000e+00> : vector<8x8xf32>
    %799 = tpu.matmul %798, %785, %cst_353 {dimension_numbers = #tpu.dot_dimension_numbers<[1], [0], [0], [1], [0, 0, 1, 1], [], []>} : vector<8x8xf32>, vector<8x8xf32>, vector<8x8xf32> -> vector<8x8xf32>
    %c2272 = arith.constant 2272 : index
    %c0_354 = arith.constant 0 : index
    %800 = vector.load %arg2[%c2272, %c0_354] : memref<3560x128xf32, #tpu.memory_space<vmem>>, vector<8x32xf32>
    %cst_355 = arith.constant dense<0.000000e+00> : vector<8x32xf32>
    %801 = tpu.matmul %799, %800, %cst_355 {dimension_numbers = #tpu.dot_dimension_numbers<[1], [0], [0], [1], [0, 0, 1, 1], [], []>} : vector<8x8xf32>, vector<8x32xf32>, vector<8x32xf32> -> vector<8x32xf32>
    %802 = arith.addf %770, %801 : vector<8x32xf32>
    %803 = arith.addf %675, %802 : vector<8x32xf32>
    %c2280 = arith.constant 2280 : index
    %c0_356 = arith.constant 0 : index
    %804 = vector.load %arg2[%c2280, %c0_356] : memref<3560x128xf32, #tpu.memory_space<vmem>>, vector<1x32xf32>
    %805 = vector.broadcast %804 : vector<1x32xf32> to vector<8x32xf32>
    %806 = arith.addf %803, %805 : vector<8x32xf32>
    %c2288 = arith.constant 2288 : index
    %c0_357 = arith.constant 0 : index
    %807 = vector.load %arg2[%c2288, %c0_357] : memref<3560x128xf32, #tpu.memory_space<vmem>>, vector<32x32xf32>
    %cst_358 = arith.constant dense<0.000000e+00> : vector<8x32xf32>
    %808 = tpu.matmul %806, %807, %cst_358 {dimension_numbers = #tpu.dot_dimension_numbers<[1], [0], [0], [1], [0, 0, 1, 1], [], []>} : vector<8x32xf32>, vector<32x32xf32>, vector<8x32xf32> -> vector<8x32xf32>
    %809 = arith.addf %806, %808 : vector<8x32xf32>
    %c2320 = arith.constant 2320 : index
    %c0_359 = arith.constant 0 : index
    %810 = vector.load %arg2[%c2320, %c0_359] : memref<3560x128xf32, #tpu.memory_space<vmem>>, vector<1x32xf32>
    %811 = vector.broadcast %810 : vector<1x32xf32> to vector<8x32xf32>
    %812 = arith.addf %809, %811 : vector<8x32xf32>
    %cst_360 = arith.constant 5.000000e-01 : f32
    %813 = vector.broadcast %cst_360 : f32 to vector<8x32xf32>
    %814 = arith.mulf %813, %812 : vector<8x32xf32>
    %cst_361 = arith.constant 0.707106769 : f32
    %815 = vector.broadcast %cst_361 : f32 to vector<8x32xf32>
    %816 = arith.mulf %812, %815 : vector<8x32xf32>
    %817 = math.absf %816 : vector<8x32xf32>
    %cst_362 = arith.constant 0.327591091 : f32
    %818 = vector.broadcast %cst_362 : f32 to vector<8x32xf32>
    %819 = arith.mulf %818, %817 : vector<8x32xf32>
    %cst_363 = arith.constant 1.000000e+00 : f32
    %820 = vector.broadcast %cst_363 : f32 to vector<8x32xf32>
    %821 = arith.addf %820, %819 : vector<8x32xf32>
    %822 = tpu.reciprocal %821 {approx = true} : vector<8x32xf32> -> vector<8x32xf32>
    %cst_364 = arith.constant 1.06140542 : f32
    %823 = vector.broadcast %cst_364 : f32 to vector<8x32xf32>
    %824 = arith.mulf %823, %822 : vector<8x32xf32>
    %cst_365 = arith.constant -1.45315206 : f32
    %825 = vector.broadcast %cst_365 : f32 to vector<8x32xf32>
    %826 = arith.addf %824, %825 : vector<8x32xf32>
    %827 = arith.mulf %826, %822 : vector<8x32xf32>
    %cst_366 = arith.constant 1.42141378 : f32
    %828 = vector.broadcast %cst_366 : f32 to vector<8x32xf32>
    %829 = arith.addf %827, %828 : vector<8x32xf32>
    %830 = arith.mulf %829, %822 : vector<8x32xf32>
    %cst_367 = arith.constant -0.284496725 : f32
    %831 = vector.broadcast %cst_367 : f32 to vector<8x32xf32>
    %832 = arith.addf %830, %831 : vector<8x32xf32>
    %833 = arith.mulf %832, %822 : vector<8x32xf32>
    %cst_368 = arith.constant 0.254829586 : f32
    %834 = vector.broadcast %cst_368 : f32 to vector<8x32xf32>
    %835 = arith.addf %833, %834 : vector<8x32xf32>
    %836 = arith.mulf %835, %822 : vector<8x32xf32>
    %cst_369 = arith.constant 0.000000e+00 : f32
    %837 = vector.broadcast %cst_369 : f32 to vector<8x32xf32>
    %838 = arith.subf %837, %817 : vector<8x32xf32>
    %839 = arith.mulf %838, %817 : vector<8x32xf32>
    %840 = math.exp %839 : vector<8x32xf32>
    %841 = arith.mulf %836, %840 : vector<8x32xf32>
    %cst_370 = arith.constant 1.000000e+00 : f32
    %842 = vector.broadcast %cst_370 : f32 to vector<8x32xf32>
    %843 = arith.subf %842, %841 : vector<8x32xf32>
    %cst_371 = arith.constant 0.000000e+00 : f32
    %844 = vector.broadcast %cst_371 : f32 to vector<8x32xf32>
    %845 = arith.cmpf oge, %816, %844 : vector<8x32xf32>
    %cst_372 = arith.constant 0.000000e+00 : f32
    %846 = vector.broadcast %cst_372 : f32 to vector<8x32xf32>
    %847 = arith.subf %846, %843 : vector<8x32xf32>
    %848 = arith.select %845, %843, %847 : vector<8x32xi1>, vector<8x32xf32>
    %cst_373 = arith.constant 1.000000e+00 : f32
    %849 = vector.broadcast %cst_373 : f32 to vector<8x32xf32>
    %850 = arith.addf %849, %848 : vector<8x32xf32>
    %851 = arith.mulf %814, %850 : vector<8x32xf32>
    %c2328 = arith.constant 2328 : index
    %c0_374 = arith.constant 0 : index
    %852 = vector.load %arg2[%c2328, %c0_374] : memref<3560x128xf32, #tpu.memory_space<vmem>>, vector<32x8xf32>
    %cst_375 = arith.constant dense<0.000000e+00> : vector<8x8xf32>
    %853 = tpu.matmul %851, %852, %cst_375 {dimension_numbers = #tpu.dot_dimension_numbers<[1], [0], [0], [1], [0, 0, 1, 1], [], []>} : vector<8x32xf32>, vector<32x8xf32>, vector<8x8xf32> -> vector<8x8xf32>
    %c2424 = arith.constant 2424 : index
    %c0_376 = arith.constant 0 : index
    %854 = vector.load %arg2[%c2424, %c0_376] : memref<3560x128xf32, #tpu.memory_space<vmem>>, vector<1x8xf32>
    %855 = vector.broadcast %854 : vector<1x8xf32> to vector<8x8xf32>
    %856 = arith.addf %853, %855 : vector<8x8xf32>
    %c2360 = arith.constant 2360 : index
    %c0_377 = arith.constant 0 : index
    %857 = vector.load %arg2[%c2360, %c0_377] : memref<3560x128xf32, #tpu.memory_space<vmem>>, vector<32x8xf32>
    %cst_378 = arith.constant dense<0.000000e+00> : vector<8x8xf32>
    %858 = tpu.matmul %851, %857, %cst_378 {dimension_numbers = #tpu.dot_dimension_numbers<[1], [0], [0], [1], [0, 0, 1, 1], [], []>} : vector<8x32xf32>, vector<32x8xf32>, vector<8x8xf32> -> vector<8x8xf32>
    %c2432 = arith.constant 2432 : index
    %c0_379 = arith.constant 0 : index
    %859 = vector.load %arg2[%c2432, %c0_379] : memref<3560x128xf32, #tpu.memory_space<vmem>>, vector<1x8xf32>
    %860 = vector.broadcast %859 : vector<1x8xf32> to vector<8x8xf32>
    %861 = arith.addf %858, %860 : vector<8x8xf32>
    %c2392 = arith.constant 2392 : index
    %c0_380 = arith.constant 0 : index
    %862 = vector.load %arg2[%c2392, %c0_380] : memref<3560x128xf32, #tpu.memory_space<vmem>>, vector<32x8xf32>
    %cst_381 = arith.constant dense<0.000000e+00> : vector<8x8xf32>
    %863 = tpu.matmul %851, %862, %cst_381 {dimension_numbers = #tpu.dot_dimension_numbers<[1], [0], [0], [1], [0, 0, 1, 1], [], []>} : vector<8x32xf32>, vector<32x8xf32>, vector<8x8xf32> -> vector<8x8xf32>
    %c2440 = arith.constant 2440 : index
    %c0_382 = arith.constant 0 : index
    %864 = vector.load %arg2[%c2440, %c0_382] : memref<3560x128xf32, #tpu.memory_space<vmem>>, vector<1x8xf32>
    %865 = vector.broadcast %864 : vector<1x8xf32> to vector<8x8xf32>
    %866 = arith.addf %863, %865 : vector<8x8xf32>
    %cst_383 = arith.constant 0.353553385 : f32
    %867 = vector.broadcast %cst_383 : f32 to vector<8x8xf32>
    %868 = arith.mulf %856, %867 : vector<8x8xf32>
    %cst_384 = arith.constant dense<0.000000e+00> : vector<8x8xf32>
    %869 = tpu.matmul %868, %861, %cst_384 {dimension_numbers = #tpu.dot_dimension_numbers<[1], [1], [0], [0], [0, 0, 1, 0], [], []>} : vector<8x8xf32>, vector<8x8xf32>, vector<8x8xf32> -> vector<8x8xf32>
    %cst_385 = arith.constant dense<0xFF800000> : vector<8xf32>
    %870 = vector.multi_reduction <maximumf>, %869, %cst_385 [1] : vector<8x8xf32> to vector<8xf32>
    %871 = vector.shape_cast %870 : vector<8xf32> to vector<8x1xf32>
    %872 = vector.broadcast %871 : vector<8x1xf32> to vector<8x8xf32>
    %873 = arith.subf %869, %872 : vector<8x8xf32>
    %874 = math.exp %873 : vector<8x8xf32>
    %cst_386 = arith.constant dense<0.000000e+00> : vector<8xf32>
    %875 = vector.multi_reduction <add>, %874, %cst_386 [1] : vector<8x8xf32> to vector<8xf32>
    %876 = vector.shape_cast %875 : vector<8xf32> to vector<8x1xf32>
    %877 = tpu.reciprocal %876 {approx = true} : vector<8x1xf32> -> vector<8x1xf32>
    %878 = vector.broadcast %877 : vector<8x1xf32> to vector<8x8xf32>
    %879 = arith.mulf %874, %878 : vector<8x8xf32>
    %cst_387 = arith.constant dense<0.000000e+00> : vector<8x8xf32>
    %880 = tpu.matmul %879, %866, %cst_387 {dimension_numbers = #tpu.dot_dimension_numbers<[1], [0], [0], [1], [0, 0, 1, 1], [], []>} : vector<8x8xf32>, vector<8x8xf32>, vector<8x8xf32> -> vector<8x8xf32>
    %c2448 = arith.constant 2448 : index
    %c0_388 = arith.constant 0 : index
    %881 = vector.load %arg2[%c2448, %c0_388] : memref<3560x128xf32, #tpu.memory_space<vmem>>, vector<8x32xf32>
    %cst_389 = arith.constant dense<0.000000e+00> : vector<8x32xf32>
    %882 = tpu.matmul %880, %881, %cst_389 {dimension_numbers = #tpu.dot_dimension_numbers<[1], [0], [0], [1], [0, 0, 1, 1], [], []>} : vector<8x8xf32>, vector<8x32xf32>, vector<8x32xf32> -> vector<8x32xf32>
    %c2456 = arith.constant 2456 : index
    %c0_390 = arith.constant 0 : index
    %883 = vector.load %arg2[%c2456, %c0_390] : memref<3560x128xf32, #tpu.memory_space<vmem>>, vector<32x8xf32>
    %cst_391 = arith.constant dense<0.000000e+00> : vector<8x8xf32>
    %884 = tpu.matmul %851, %883, %cst_391 {dimension_numbers = #tpu.dot_dimension_numbers<[1], [0], [0], [1], [0, 0, 1, 1], [], []>} : vector<8x32xf32>, vector<32x8xf32>, vector<8x8xf32> -> vector<8x8xf32>
    %c2552 = arith.constant 2552 : index
    %c0_392 = arith.constant 0 : index
    %885 = vector.load %arg2[%c2552, %c0_392] : memref<3560x128xf32, #tpu.memory_space<vmem>>, vector<1x8xf32>
    %886 = vector.broadcast %885 : vector<1x8xf32> to vector<8x8xf32>
    %887 = arith.addf %884, %886 : vector<8x8xf32>
    %c2488 = arith.constant 2488 : index
    %c0_393 = arith.constant 0 : index
    %888 = vector.load %arg2[%c2488, %c0_393] : memref<3560x128xf32, #tpu.memory_space<vmem>>, vector<32x8xf32>
    %cst_394 = arith.constant dense<0.000000e+00> : vector<8x8xf32>
    %889 = tpu.matmul %851, %888, %cst_394 {dimension_numbers = #tpu.dot_dimension_numbers<[1], [0], [0], [1], [0, 0, 1, 1], [], []>} : vector<8x32xf32>, vector<32x8xf32>, vector<8x8xf32> -> vector<8x8xf32>
    %c2560 = arith.constant 2560 : index
    %c0_395 = arith.constant 0 : index
    %890 = vector.load %arg2[%c2560, %c0_395] : memref<3560x128xf32, #tpu.memory_space<vmem>>, vector<1x8xf32>
    %891 = vector.broadcast %890 : vector<1x8xf32> to vector<8x8xf32>
    %892 = arith.addf %889, %891 : vector<8x8xf32>
    %c2520 = arith.constant 2520 : index
    %c0_396 = arith.constant 0 : index
    %893 = vector.load %arg2[%c2520, %c0_396] : memref<3560x128xf32, #tpu.memory_space<vmem>>, vector<32x8xf32>
    %cst_397 = arith.constant dense<0.000000e+00> : vector<8x8xf32>
    %894 = tpu.matmul %851, %893, %cst_397 {dimension_numbers = #tpu.dot_dimension_numbers<[1], [0], [0], [1], [0, 0, 1, 1], [], []>} : vector<8x32xf32>, vector<32x8xf32>, vector<8x8xf32> -> vector<8x8xf32>
    %c2568 = arith.constant 2568 : index
    %c0_398 = arith.constant 0 : index
    %895 = vector.load %arg2[%c2568, %c0_398] : memref<3560x128xf32, #tpu.memory_space<vmem>>, vector<1x8xf32>
    %896 = vector.broadcast %895 : vector<1x8xf32> to vector<8x8xf32>
    %897 = arith.addf %894, %896 : vector<8x8xf32>
    %cst_399 = arith.constant 0.353553385 : f32
    %898 = vector.broadcast %cst_399 : f32 to vector<8x8xf32>
    %899 = arith.mulf %887, %898 : vector<8x8xf32>
    %cst_400 = arith.constant dense<0.000000e+00> : vector<8x8xf32>
    %900 = tpu.matmul %899, %892, %cst_400 {dimension_numbers = #tpu.dot_dimension_numbers<[1], [1], [0], [0], [0, 0, 1, 0], [], []>} : vector<8x8xf32>, vector<8x8xf32>, vector<8x8xf32> -> vector<8x8xf32>
    %cst_401 = arith.constant dense<0xFF800000> : vector<8xf32>
    %901 = vector.multi_reduction <maximumf>, %900, %cst_401 [1] : vector<8x8xf32> to vector<8xf32>
    %902 = vector.shape_cast %901 : vector<8xf32> to vector<8x1xf32>
    %903 = vector.broadcast %902 : vector<8x1xf32> to vector<8x8xf32>
    %904 = arith.subf %900, %903 : vector<8x8xf32>
    %905 = math.exp %904 : vector<8x8xf32>
    %cst_402 = arith.constant dense<0.000000e+00> : vector<8xf32>
    %906 = vector.multi_reduction <add>, %905, %cst_402 [1] : vector<8x8xf32> to vector<8xf32>
    %907 = vector.shape_cast %906 : vector<8xf32> to vector<8x1xf32>
    %908 = tpu.reciprocal %907 {approx = true} : vector<8x1xf32> -> vector<8x1xf32>
    %909 = vector.broadcast %908 : vector<8x1xf32> to vector<8x8xf32>
    %910 = arith.mulf %905, %909 : vector<8x8xf32>
    %cst_403 = arith.constant dense<0.000000e+00> : vector<8x8xf32>
    %911 = tpu.matmul %910, %897, %cst_403 {dimension_numbers = #tpu.dot_dimension_numbers<[1], [0], [0], [1], [0, 0, 1, 1], [], []>} : vector<8x8xf32>, vector<8x8xf32>, vector<8x8xf32> -> vector<8x8xf32>
    %c2576 = arith.constant 2576 : index
    %c0_404 = arith.constant 0 : index
    %912 = vector.load %arg2[%c2576, %c0_404] : memref<3560x128xf32, #tpu.memory_space<vmem>>, vector<8x32xf32>
    %cst_405 = arith.constant dense<0.000000e+00> : vector<8x32xf32>
    %913 = tpu.matmul %911, %912, %cst_405 {dimension_numbers = #tpu.dot_dimension_numbers<[1], [0], [0], [1], [0, 0, 1, 1], [], []>} : vector<8x8xf32>, vector<8x32xf32>, vector<8x32xf32> -> vector<8x32xf32>
    %914 = arith.addf %882, %913 : vector<8x32xf32>
    %c2584 = arith.constant 2584 : index
    %c0_406 = arith.constant 0 : index
    %915 = vector.load %arg2[%c2584, %c0_406] : memref<3560x128xf32, #tpu.memory_space<vmem>>, vector<32x8xf32>
    %cst_407 = arith.constant dense<0.000000e+00> : vector<8x8xf32>
    %916 = tpu.matmul %851, %915, %cst_407 {dimension_numbers = #tpu.dot_dimension_numbers<[1], [0], [0], [1], [0, 0, 1, 1], [], []>} : vector<8x32xf32>, vector<32x8xf32>, vector<8x8xf32> -> vector<8x8xf32>
    %c2680 = arith.constant 2680 : index
    %c0_408 = arith.constant 0 : index
    %917 = vector.load %arg2[%c2680, %c0_408] : memref<3560x128xf32, #tpu.memory_space<vmem>>, vector<1x8xf32>
    %918 = vector.broadcast %917 : vector<1x8xf32> to vector<8x8xf32>
    %919 = arith.addf %916, %918 : vector<8x8xf32>
    %c2616 = arith.constant 2616 : index
    %c0_409 = arith.constant 0 : index
    %920 = vector.load %arg2[%c2616, %c0_409] : memref<3560x128xf32, #tpu.memory_space<vmem>>, vector<32x8xf32>
    %cst_410 = arith.constant dense<0.000000e+00> : vector<8x8xf32>
    %921 = tpu.matmul %851, %920, %cst_410 {dimension_numbers = #tpu.dot_dimension_numbers<[1], [0], [0], [1], [0, 0, 1, 1], [], []>} : vector<8x32xf32>, vector<32x8xf32>, vector<8x8xf32> -> vector<8x8xf32>
    %c2688 = arith.constant 2688 : index
    %c0_411 = arith.constant 0 : index
    %922 = vector.load %arg2[%c2688, %c0_411] : memref<3560x128xf32, #tpu.memory_space<vmem>>, vector<1x8xf32>
    %923 = vector.broadcast %922 : vector<1x8xf32> to vector<8x8xf32>
    %924 = arith.addf %921, %923 : vector<8x8xf32>
    %c2648 = arith.constant 2648 : index
    %c0_412 = arith.constant 0 : index
    %925 = vector.load %arg2[%c2648, %c0_412] : memref<3560x128xf32, #tpu.memory_space<vmem>>, vector<32x8xf32>
    %cst_413 = arith.constant dense<0.000000e+00> : vector<8x8xf32>
    %926 = tpu.matmul %851, %925, %cst_413 {dimension_numbers = #tpu.dot_dimension_numbers<[1], [0], [0], [1], [0, 0, 1, 1], [], []>} : vector<8x32xf32>, vector<32x8xf32>, vector<8x8xf32> -> vector<8x8xf32>
    %c2696 = arith.constant 2696 : index
    %c0_414 = arith.constant 0 : index
    %927 = vector.load %arg2[%c2696, %c0_414] : memref<3560x128xf32, #tpu.memory_space<vmem>>, vector<1x8xf32>
    %928 = vector.broadcast %927 : vector<1x8xf32> to vector<8x8xf32>
    %929 = arith.addf %926, %928 : vector<8x8xf32>
    %cst_415 = arith.constant 0.353553385 : f32
    %930 = vector.broadcast %cst_415 : f32 to vector<8x8xf32>
    %931 = arith.mulf %919, %930 : vector<8x8xf32>
    %cst_416 = arith.constant dense<0.000000e+00> : vector<8x8xf32>
    %932 = tpu.matmul %931, %924, %cst_416 {dimension_numbers = #tpu.dot_dimension_numbers<[1], [1], [0], [0], [0, 0, 1, 0], [], []>} : vector<8x8xf32>, vector<8x8xf32>, vector<8x8xf32> -> vector<8x8xf32>
    %cst_417 = arith.constant dense<0xFF800000> : vector<8xf32>
    %933 = vector.multi_reduction <maximumf>, %932, %cst_417 [1] : vector<8x8xf32> to vector<8xf32>
    %934 = vector.shape_cast %933 : vector<8xf32> to vector<8x1xf32>
    %935 = vector.broadcast %934 : vector<8x1xf32> to vector<8x8xf32>
    %936 = arith.subf %932, %935 : vector<8x8xf32>
    %937 = math.exp %936 : vector<8x8xf32>
    %cst_418 = arith.constant dense<0.000000e+00> : vector<8xf32>
    %938 = vector.multi_reduction <add>, %937, %cst_418 [1] : vector<8x8xf32> to vector<8xf32>
    %939 = vector.shape_cast %938 : vector<8xf32> to vector<8x1xf32>
    %940 = tpu.reciprocal %939 {approx = true} : vector<8x1xf32> -> vector<8x1xf32>
    %941 = vector.broadcast %940 : vector<8x1xf32> to vector<8x8xf32>
    %942 = arith.mulf %937, %941 : vector<8x8xf32>
    %cst_419 = arith.constant dense<0.000000e+00> : vector<8x8xf32>
    %943 = tpu.matmul %942, %929, %cst_419 {dimension_numbers = #tpu.dot_dimension_numbers<[1], [0], [0], [1], [0, 0, 1, 1], [], []>} : vector<8x8xf32>, vector<8x8xf32>, vector<8x8xf32> -> vector<8x8xf32>
    %c2704 = arith.constant 2704 : index
    %c0_420 = arith.constant 0 : index
    %944 = vector.load %arg2[%c2704, %c0_420] : memref<3560x128xf32, #tpu.memory_space<vmem>>, vector<8x32xf32>
    %cst_421 = arith.constant dense<0.000000e+00> : vector<8x32xf32>
    %945 = tpu.matmul %943, %944, %cst_421 {dimension_numbers = #tpu.dot_dimension_numbers<[1], [0], [0], [1], [0, 0, 1, 1], [], []>} : vector<8x8xf32>, vector<8x32xf32>, vector<8x32xf32> -> vector<8x32xf32>
    %946 = arith.addf %914, %945 : vector<8x32xf32>
    %c2712 = arith.constant 2712 : index
    %c0_422 = arith.constant 0 : index
    %947 = vector.load %arg2[%c2712, %c0_422] : memref<3560x128xf32, #tpu.memory_space<vmem>>, vector<32x8xf32>
    %cst_423 = arith.constant dense<0.000000e+00> : vector<8x8xf32>
    %948 = tpu.matmul %851, %947, %cst_423 {dimension_numbers = #tpu.dot_dimension_numbers<[1], [0], [0], [1], [0, 0, 1, 1], [], []>} : vector<8x32xf32>, vector<32x8xf32>, vector<8x8xf32> -> vector<8x8xf32>
    %c2808 = arith.constant 2808 : index
    %c0_424 = arith.constant 0 : index
    %949 = vector.load %arg2[%c2808, %c0_424] : memref<3560x128xf32, #tpu.memory_space<vmem>>, vector<1x8xf32>
    %950 = vector.broadcast %949 : vector<1x8xf32> to vector<8x8xf32>
    %951 = arith.addf %948, %950 : vector<8x8xf32>
    %c2744 = arith.constant 2744 : index
    %c0_425 = arith.constant 0 : index
    %952 = vector.load %arg2[%c2744, %c0_425] : memref<3560x128xf32, #tpu.memory_space<vmem>>, vector<32x8xf32>
    %cst_426 = arith.constant dense<0.000000e+00> : vector<8x8xf32>
    %953 = tpu.matmul %851, %952, %cst_426 {dimension_numbers = #tpu.dot_dimension_numbers<[1], [0], [0], [1], [0, 0, 1, 1], [], []>} : vector<8x32xf32>, vector<32x8xf32>, vector<8x8xf32> -> vector<8x8xf32>
    %c2816 = arith.constant 2816 : index
    %c0_427 = arith.constant 0 : index
    %954 = vector.load %arg2[%c2816, %c0_427] : memref<3560x128xf32, #tpu.memory_space<vmem>>, vector<1x8xf32>
    %955 = vector.broadcast %954 : vector<1x8xf32> to vector<8x8xf32>
    %956 = arith.addf %953, %955 : vector<8x8xf32>
    %c2776 = arith.constant 2776 : index
    %c0_428 = arith.constant 0 : index
    %957 = vector.load %arg2[%c2776, %c0_428] : memref<3560x128xf32, #tpu.memory_space<vmem>>, vector<32x8xf32>
    %cst_429 = arith.constant dense<0.000000e+00> : vector<8x8xf32>
    %958 = tpu.matmul %851, %957, %cst_429 {dimension_numbers = #tpu.dot_dimension_numbers<[1], [0], [0], [1], [0, 0, 1, 1], [], []>} : vector<8x32xf32>, vector<32x8xf32>, vector<8x8xf32> -> vector<8x8xf32>
    %c2824 = arith.constant 2824 : index
    %c0_430 = arith.constant 0 : index
    %959 = vector.load %arg2[%c2824, %c0_430] : memref<3560x128xf32, #tpu.memory_space<vmem>>, vector<1x8xf32>
    %960 = vector.broadcast %959 : vector<1x8xf32> to vector<8x8xf32>
    %961 = arith.addf %958, %960 : vector<8x8xf32>
    %cst_431 = arith.constant 0.353553385 : f32
    %962 = vector.broadcast %cst_431 : f32 to vector<8x8xf32>
    %963 = arith.mulf %951, %962 : vector<8x8xf32>
    %cst_432 = arith.constant dense<0.000000e+00> : vector<8x8xf32>
    %964 = tpu.matmul %963, %956, %cst_432 {dimension_numbers = #tpu.dot_dimension_numbers<[1], [1], [0], [0], [0, 0, 1, 0], [], []>} : vector<8x8xf32>, vector<8x8xf32>, vector<8x8xf32> -> vector<8x8xf32>
    %cst_433 = arith.constant dense<0xFF800000> : vector<8xf32>
    %965 = vector.multi_reduction <maximumf>, %964, %cst_433 [1] : vector<8x8xf32> to vector<8xf32>
    %966 = vector.shape_cast %965 : vector<8xf32> to vector<8x1xf32>
    %967 = vector.broadcast %966 : vector<8x1xf32> to vector<8x8xf32>
    %968 = arith.subf %964, %967 : vector<8x8xf32>
    %969 = math.exp %968 : vector<8x8xf32>
    %cst_434 = arith.constant dense<0.000000e+00> : vector<8xf32>
    %970 = vector.multi_reduction <add>, %969, %cst_434 [1] : vector<8x8xf32> to vector<8xf32>
    %971 = vector.shape_cast %970 : vector<8xf32> to vector<8x1xf32>
    %972 = tpu.reciprocal %971 {approx = true} : vector<8x1xf32> -> vector<8x1xf32>
    %973 = vector.broadcast %972 : vector<8x1xf32> to vector<8x8xf32>
    %974 = arith.mulf %969, %973 : vector<8x8xf32>
    %cst_435 = arith.constant dense<0.000000e+00> : vector<8x8xf32>
    %975 = tpu.matmul %974, %961, %cst_435 {dimension_numbers = #tpu.dot_dimension_numbers<[1], [0], [0], [1], [0, 0, 1, 1], [], []>} : vector<8x8xf32>, vector<8x8xf32>, vector<8x8xf32> -> vector<8x8xf32>
    %c2832 = arith.constant 2832 : index
    %c0_436 = arith.constant 0 : index
    %976 = vector.load %arg2[%c2832, %c0_436] : memref<3560x128xf32, #tpu.memory_space<vmem>>, vector<8x32xf32>
    %cst_437 = arith.constant dense<0.000000e+00> : vector<8x32xf32>
    %977 = tpu.matmul %975, %976, %cst_437 {dimension_numbers = #tpu.dot_dimension_numbers<[1], [0], [0], [1], [0, 0, 1, 1], [], []>} : vector<8x8xf32>, vector<8x32xf32>, vector<8x32xf32> -> vector<8x32xf32>
    %978 = arith.addf %946, %977 : vector<8x32xf32>
    %979 = arith.addf %851, %978 : vector<8x32xf32>
    %c2840 = arith.constant 2840 : index
    %c0_438 = arith.constant 0 : index
    %980 = vector.load %arg2[%c2840, %c0_438] : memref<3560x128xf32, #tpu.memory_space<vmem>>, vector<1x32xf32>
    %981 = vector.broadcast %980 : vector<1x32xf32> to vector<8x32xf32>
    %982 = arith.addf %979, %981 : vector<8x32xf32>
    %c2848 = arith.constant 2848 : index
    %c0_439 = arith.constant 0 : index
    %983 = vector.load %arg2[%c2848, %c0_439] : memref<3560x128xf32, #tpu.memory_space<vmem>>, vector<32x32xf32>
    %cst_440 = arith.constant dense<0.000000e+00> : vector<8x32xf32>
    %984 = tpu.matmul %982, %983, %cst_440 {dimension_numbers = #tpu.dot_dimension_numbers<[1], [0], [0], [1], [0, 0, 1, 1], [], []>} : vector<8x32xf32>, vector<32x32xf32>, vector<8x32xf32> -> vector<8x32xf32>
    %985 = arith.addf %982, %984 : vector<8x32xf32>
    %c2880 = arith.constant 2880 : index
    %c0_441 = arith.constant 0 : index
    %986 = vector.load %arg2[%c2880, %c0_441] : memref<3560x128xf32, #tpu.memory_space<vmem>>, vector<1x32xf32>
    %987 = vector.broadcast %986 : vector<1x32xf32> to vector<8x32xf32>
    %988 = arith.addf %985, %987 : vector<8x32xf32>
    %cst_442 = arith.constant 5.000000e-01 : f32
    %989 = vector.broadcast %cst_442 : f32 to vector<8x32xf32>
    %990 = arith.mulf %989, %988 : vector<8x32xf32>
    %cst_443 = arith.constant 0.707106769 : f32
    %991 = vector.broadcast %cst_443 : f32 to vector<8x32xf32>
    %992 = arith.mulf %988, %991 : vector<8x32xf32>
    %993 = math.absf %992 : vector<8x32xf32>
    %cst_444 = arith.constant 0.327591091 : f32
    %994 = vector.broadcast %cst_444 : f32 to vector<8x32xf32>
    %995 = arith.mulf %994, %993 : vector<8x32xf32>
    %cst_445 = arith.constant 1.000000e+00 : f32
    %996 = vector.broadcast %cst_445 : f32 to vector<8x32xf32>
    %997 = arith.addf %996, %995 : vector<8x32xf32>
    %998 = tpu.reciprocal %997 {approx = true} : vector<8x32xf32> -> vector<8x32xf32>
    %cst_446 = arith.constant 1.06140542 : f32
    %999 = vector.broadcast %cst_446 : f32 to vector<8x32xf32>
    %1000 = arith.mulf %999, %998 : vector<8x32xf32>
    %cst_447 = arith.constant -1.45315206 : f32
    %1001 = vector.broadcast %cst_447 : f32 to vector<8x32xf32>
    %1002 = arith.addf %1000, %1001 : vector<8x32xf32>
    %1003 = arith.mulf %1002, %998 : vector<8x32xf32>
    %cst_448 = arith.constant 1.42141378 : f32
    %1004 = vector.broadcast %cst_448 : f32 to vector<8x32xf32>
    %1005 = arith.addf %1003, %1004 : vector<8x32xf32>
    %1006 = arith.mulf %1005, %998 : vector<8x32xf32>
    %cst_449 = arith.constant -0.284496725 : f32
    %1007 = vector.broadcast %cst_449 : f32 to vector<8x32xf32>
    %1008 = arith.addf %1006, %1007 : vector<8x32xf32>
    %1009 = arith.mulf %1008, %998 : vector<8x32xf32>
    %cst_450 = arith.constant 0.254829586 : f32
    %1010 = vector.broadcast %cst_450 : f32 to vector<8x32xf32>
    %1011 = arith.addf %1009, %1010 : vector<8x32xf32>
    %1012 = arith.mulf %1011, %998 : vector<8x32xf32>
    %cst_451 = arith.constant 0.000000e+00 : f32
    %1013 = vector.broadcast %cst_451 : f32 to vector<8x32xf32>
    %1014 = arith.subf %1013, %993 : vector<8x32xf32>
    %1015 = arith.mulf %1014, %993 : vector<8x32xf32>
    %1016 = math.exp %1015 : vector<8x32xf32>
    %1017 = arith.mulf %1012, %1016 : vector<8x32xf32>
    %cst_452 = arith.constant 1.000000e+00 : f32
    %1018 = vector.broadcast %cst_452 : f32 to vector<8x32xf32>
    %1019 = arith.subf %1018, %1017 : vector<8x32xf32>
    %cst_453 = arith.constant 0.000000e+00 : f32
    %1020 = vector.broadcast %cst_453 : f32 to vector<8x32xf32>
    %1021 = arith.cmpf oge, %992, %1020 : vector<8x32xf32>
    %cst_454 = arith.constant 0.000000e+00 : f32
    %1022 = vector.broadcast %cst_454 : f32 to vector<8x32xf32>
    %1023 = arith.subf %1022, %1019 : vector<8x32xf32>
    %1024 = arith.select %1021, %1019, %1023 : vector<8x32xi1>, vector<8x32xf32>
    %cst_455 = arith.constant 1.000000e+00 : f32
    %1025 = vector.broadcast %cst_455 : f32 to vector<8x32xf32>
    %1026 = arith.addf %1025, %1024 : vector<8x32xf32>
    %1027 = arith.mulf %990, %1026 : vector<8x32xf32>
    %c2888 = arith.constant 2888 : index
    %c0_456 = arith.constant 0 : index
    %1028 = vector.load %arg2[%c2888, %c0_456] : memref<3560x128xf32, #tpu.memory_space<vmem>>, vector<32x8xf32>
    %cst_457 = arith.constant dense<0.000000e+00> : vector<8x8xf32>
    %1029 = tpu.matmul %1027, %1028, %cst_457 {dimension_numbers = #tpu.dot_dimension_numbers<[1], [0], [0], [1], [0, 0, 1, 1], [], []>} : vector<8x32xf32>, vector<32x8xf32>, vector<8x8xf32> -> vector<8x8xf32>
    %c2984 = arith.constant 2984 : index
    %c0_458 = arith.constant 0 : index
    %1030 = vector.load %arg2[%c2984, %c0_458] : memref<3560x128xf32, #tpu.memory_space<vmem>>, vector<1x8xf32>
    %1031 = vector.broadcast %1030 : vector<1x8xf32> to vector<8x8xf32>
    %1032 = arith.addf %1029, %1031 : vector<8x8xf32>
    %c2920 = arith.constant 2920 : index
    %c0_459 = arith.constant 0 : index
    %1033 = vector.load %arg2[%c2920, %c0_459] : memref<3560x128xf32, #tpu.memory_space<vmem>>, vector<32x8xf32>
    %cst_460 = arith.constant dense<0.000000e+00> : vector<8x8xf32>
    %1034 = tpu.matmul %1027, %1033, %cst_460 {dimension_numbers = #tpu.dot_dimension_numbers<[1], [0], [0], [1], [0, 0, 1, 1], [], []>} : vector<8x32xf32>, vector<32x8xf32>, vector<8x8xf32> -> vector<8x8xf32>
    %c2992 = arith.constant 2992 : index
    %c0_461 = arith.constant 0 : index
    %1035 = vector.load %arg2[%c2992, %c0_461] : memref<3560x128xf32, #tpu.memory_space<vmem>>, vector<1x8xf32>
    %1036 = vector.broadcast %1035 : vector<1x8xf32> to vector<8x8xf32>
    %1037 = arith.addf %1034, %1036 : vector<8x8xf32>
    %c2952 = arith.constant 2952 : index
    %c0_462 = arith.constant 0 : index
    %1038 = vector.load %arg2[%c2952, %c0_462] : memref<3560x128xf32, #tpu.memory_space<vmem>>, vector<32x8xf32>
    %cst_463 = arith.constant dense<0.000000e+00> : vector<8x8xf32>
    %1039 = tpu.matmul %1027, %1038, %cst_463 {dimension_numbers = #tpu.dot_dimension_numbers<[1], [0], [0], [1], [0, 0, 1, 1], [], []>} : vector<8x32xf32>, vector<32x8xf32>, vector<8x8xf32> -> vector<8x8xf32>
    %c3000 = arith.constant 3000 : index
    %c0_464 = arith.constant 0 : index
    %1040 = vector.load %arg2[%c3000, %c0_464] : memref<3560x128xf32, #tpu.memory_space<vmem>>, vector<1x8xf32>
    %1041 = vector.broadcast %1040 : vector<1x8xf32> to vector<8x8xf32>
    %1042 = arith.addf %1039, %1041 : vector<8x8xf32>
    %cst_465 = arith.constant 0.353553385 : f32
    %1043 = vector.broadcast %cst_465 : f32 to vector<8x8xf32>
    %1044 = arith.mulf %1032, %1043 : vector<8x8xf32>
    %cst_466 = arith.constant dense<0.000000e+00> : vector<8x8xf32>
    %1045 = tpu.matmul %1044, %1037, %cst_466 {dimension_numbers = #tpu.dot_dimension_numbers<[1], [1], [0], [0], [0, 0, 1, 0], [], []>} : vector<8x8xf32>, vector<8x8xf32>, vector<8x8xf32> -> vector<8x8xf32>
    %cst_467 = arith.constant dense<0xFF800000> : vector<8xf32>
    %1046 = vector.multi_reduction <maximumf>, %1045, %cst_467 [1] : vector<8x8xf32> to vector<8xf32>
    %1047 = vector.shape_cast %1046 : vector<8xf32> to vector<8x1xf32>
    %1048 = vector.broadcast %1047 : vector<8x1xf32> to vector<8x8xf32>
    %1049 = arith.subf %1045, %1048 : vector<8x8xf32>
    %1050 = math.exp %1049 : vector<8x8xf32>
    %cst_468 = arith.constant dense<0.000000e+00> : vector<8xf32>
    %1051 = vector.multi_reduction <add>, %1050, %cst_468 [1] : vector<8x8xf32> to vector<8xf32>
    %1052 = vector.shape_cast %1051 : vector<8xf32> to vector<8x1xf32>
    %1053 = tpu.reciprocal %1052 {approx = true} : vector<8x1xf32> -> vector<8x1xf32>
    %1054 = vector.broadcast %1053 : vector<8x1xf32> to vector<8x8xf32>
    %1055 = arith.mulf %1050, %1054 : vector<8x8xf32>
    %cst_469 = arith.constant dense<0.000000e+00> : vector<8x8xf32>
    %1056 = tpu.matmul %1055, %1042, %cst_469 {dimension_numbers = #tpu.dot_dimension_numbers<[1], [0], [0], [1], [0, 0, 1, 1], [], []>} : vector<8x8xf32>, vector<8x8xf32>, vector<8x8xf32> -> vector<8x8xf32>
    %c3008 = arith.constant 3008 : index
    %c0_470 = arith.constant 0 : index
    %1057 = vector.load %arg2[%c3008, %c0_470] : memref<3560x128xf32, #tpu.memory_space<vmem>>, vector<8x32xf32>
    %cst_471 = arith.constant dense<0.000000e+00> : vector<8x32xf32>
    %1058 = tpu.matmul %1056, %1057, %cst_471 {dimension_numbers = #tpu.dot_dimension_numbers<[1], [0], [0], [1], [0, 0, 1, 1], [], []>} : vector<8x8xf32>, vector<8x32xf32>, vector<8x32xf32> -> vector<8x32xf32>
    %c3016 = arith.constant 3016 : index
    %c0_472 = arith.constant 0 : index
    %1059 = vector.load %arg2[%c3016, %c0_472] : memref<3560x128xf32, #tpu.memory_space<vmem>>, vector<32x8xf32>
    %cst_473 = arith.constant dense<0.000000e+00> : vector<8x8xf32>
    %1060 = tpu.matmul %1027, %1059, %cst_473 {dimension_numbers = #tpu.dot_dimension_numbers<[1], [0], [0], [1], [0, 0, 1, 1], [], []>} : vector<8x32xf32>, vector<32x8xf32>, vector<8x8xf32> -> vector<8x8xf32>
    %c3112 = arith.constant 3112 : index
    %c0_474 = arith.constant 0 : index
    %1061 = vector.load %arg2[%c3112, %c0_474] : memref<3560x128xf32, #tpu.memory_space<vmem>>, vector<1x8xf32>
    %1062 = vector.broadcast %1061 : vector<1x8xf32> to vector<8x8xf32>
    %1063 = arith.addf %1060, %1062 : vector<8x8xf32>
    %c3048 = arith.constant 3048 : index
    %c0_475 = arith.constant 0 : index
    %1064 = vector.load %arg2[%c3048, %c0_475] : memref<3560x128xf32, #tpu.memory_space<vmem>>, vector<32x8xf32>
    %cst_476 = arith.constant dense<0.000000e+00> : vector<8x8xf32>
    %1065 = tpu.matmul %1027, %1064, %cst_476 {dimension_numbers = #tpu.dot_dimension_numbers<[1], [0], [0], [1], [0, 0, 1, 1], [], []>} : vector<8x32xf32>, vector<32x8xf32>, vector<8x8xf32> -> vector<8x8xf32>
    %c3120 = arith.constant 3120 : index
    %c0_477 = arith.constant 0 : index
    %1066 = vector.load %arg2[%c3120, %c0_477] : memref<3560x128xf32, #tpu.memory_space<vmem>>, vector<1x8xf32>
    %1067 = vector.broadcast %1066 : vector<1x8xf32> to vector<8x8xf32>
    %1068 = arith.addf %1065, %1067 : vector<8x8xf32>
    %c3080 = arith.constant 3080 : index
    %c0_478 = arith.constant 0 : index
    %1069 = vector.load %arg2[%c3080, %c0_478] : memref<3560x128xf32, #tpu.memory_space<vmem>>, vector<32x8xf32>
    %cst_479 = arith.constant dense<0.000000e+00> : vector<8x8xf32>
    %1070 = tpu.matmul %1027, %1069, %cst_479 {dimension_numbers = #tpu.dot_dimension_numbers<[1], [0], [0], [1], [0, 0, 1, 1], [], []>} : vector<8x32xf32>, vector<32x8xf32>, vector<8x8xf32> -> vector<8x8xf32>
    %c3128 = arith.constant 3128 : index
    %c0_480 = arith.constant 0 : index
    %1071 = vector.load %arg2[%c3128, %c0_480] : memref<3560x128xf32, #tpu.memory_space<vmem>>, vector<1x8xf32>
    %1072 = vector.broadcast %1071 : vector<1x8xf32> to vector<8x8xf32>
    %1073 = arith.addf %1070, %1072 : vector<8x8xf32>
    %cst_481 = arith.constant 0.353553385 : f32
    %1074 = vector.broadcast %cst_481 : f32 to vector<8x8xf32>
    %1075 = arith.mulf %1063, %1074 : vector<8x8xf32>
    %cst_482 = arith.constant dense<0.000000e+00> : vector<8x8xf32>
    %1076 = tpu.matmul %1075, %1068, %cst_482 {dimension_numbers = #tpu.dot_dimension_numbers<[1], [1], [0], [0], [0, 0, 1, 0], [], []>} : vector<8x8xf32>, vector<8x8xf32>, vector<8x8xf32> -> vector<8x8xf32>
    %cst_483 = arith.constant dense<0xFF800000> : vector<8xf32>
    %1077 = vector.multi_reduction <maximumf>, %1076, %cst_483 [1] : vector<8x8xf32> to vector<8xf32>
    %1078 = vector.shape_cast %1077 : vector<8xf32> to vector<8x1xf32>
    %1079 = vector.broadcast %1078 : vector<8x1xf32> to vector<8x8xf32>
    %1080 = arith.subf %1076, %1079 : vector<8x8xf32>
    %1081 = math.exp %1080 : vector<8x8xf32>
    %cst_484 = arith.constant dense<0.000000e+00> : vector<8xf32>
    %1082 = vector.multi_reduction <add>, %1081, %cst_484 [1] : vector<8x8xf32> to vector<8xf32>
    %1083 = vector.shape_cast %1082 : vector<8xf32> to vector<8x1xf32>
    %1084 = tpu.reciprocal %1083 {approx = true} : vector<8x1xf32> -> vector<8x1xf32>
    %1085 = vector.broadcast %1084 : vector<8x1xf32> to vector<8x8xf32>
    %1086 = arith.mulf %1081, %1085 : vector<8x8xf32>
    %cst_485 = arith.constant dense<0.000000e+00> : vector<8x8xf32>
    %1087 = tpu.matmul %1086, %1073, %cst_485 {dimension_numbers = #tpu.dot_dimension_numbers<[1], [0], [0], [1], [0, 0, 1, 1], [], []>} : vector<8x8xf32>, vector<8x8xf32>, vector<8x8xf32> -> vector<8x8xf32>
    %c3136 = arith.constant 3136 : index
    %c0_486 = arith.constant 0 : index
    %1088 = vector.load %arg2[%c3136, %c0_486] : memref<3560x128xf32, #tpu.memory_space<vmem>>, vector<8x32xf32>
    %cst_487 = arith.constant dense<0.000000e+00> : vector<8x32xf32>
    %1089 = tpu.matmul %1087, %1088, %cst_487 {dimension_numbers = #tpu.dot_dimension_numbers<[1], [0], [0], [1], [0, 0, 1, 1], [], []>} : vector<8x8xf32>, vector<8x32xf32>, vector<8x32xf32> -> vector<8x32xf32>
    %1090 = arith.addf %1058, %1089 : vector<8x32xf32>
    %c3144 = arith.constant 3144 : index
    %c0_488 = arith.constant 0 : index
    %1091 = vector.load %arg2[%c3144, %c0_488] : memref<3560x128xf32, #tpu.memory_space<vmem>>, vector<32x8xf32>
    %cst_489 = arith.constant dense<0.000000e+00> : vector<8x8xf32>
    %1092 = tpu.matmul %1027, %1091, %cst_489 {dimension_numbers = #tpu.dot_dimension_numbers<[1], [0], [0], [1], [0, 0, 1, 1], [], []>} : vector<8x32xf32>, vector<32x8xf32>, vector<8x8xf32> -> vector<8x8xf32>
    %c3240 = arith.constant 3240 : index
    %c0_490 = arith.constant 0 : index
    %1093 = vector.load %arg2[%c3240, %c0_490] : memref<3560x128xf32, #tpu.memory_space<vmem>>, vector<1x8xf32>
    %1094 = vector.broadcast %1093 : vector<1x8xf32> to vector<8x8xf32>
    %1095 = arith.addf %1092, %1094 : vector<8x8xf32>
    %c3176 = arith.constant 3176 : index
    %c0_491 = arith.constant 0 : index
    %1096 = vector.load %arg2[%c3176, %c0_491] : memref<3560x128xf32, #tpu.memory_space<vmem>>, vector<32x8xf32>
    %cst_492 = arith.constant dense<0.000000e+00> : vector<8x8xf32>
    %1097 = tpu.matmul %1027, %1096, %cst_492 {dimension_numbers = #tpu.dot_dimension_numbers<[1], [0], [0], [1], [0, 0, 1, 1], [], []>} : vector<8x32xf32>, vector<32x8xf32>, vector<8x8xf32> -> vector<8x8xf32>
    %c3248 = arith.constant 3248 : index
    %c0_493 = arith.constant 0 : index
    %1098 = vector.load %arg2[%c3248, %c0_493] : memref<3560x128xf32, #tpu.memory_space<vmem>>, vector<1x8xf32>
    %1099 = vector.broadcast %1098 : vector<1x8xf32> to vector<8x8xf32>
    %1100 = arith.addf %1097, %1099 : vector<8x8xf32>
    %c3208 = arith.constant 3208 : index
    %c0_494 = arith.constant 0 : index
    %1101 = vector.load %arg2[%c3208, %c0_494] : memref<3560x128xf32, #tpu.memory_space<vmem>>, vector<32x8xf32>
    %cst_495 = arith.constant dense<0.000000e+00> : vector<8x8xf32>
    %1102 = tpu.matmul %1027, %1101, %cst_495 {dimension_numbers = #tpu.dot_dimension_numbers<[1], [0], [0], [1], [0, 0, 1, 1], [], []>} : vector<8x32xf32>, vector<32x8xf32>, vector<8x8xf32> -> vector<8x8xf32>
    %c3256 = arith.constant 3256 : index
    %c0_496 = arith.constant 0 : index
    %1103 = vector.load %arg2[%c3256, %c0_496] : memref<3560x128xf32, #tpu.memory_space<vmem>>, vector<1x8xf32>
    %1104 = vector.broadcast %1103 : vector<1x8xf32> to vector<8x8xf32>
    %1105 = arith.addf %1102, %1104 : vector<8x8xf32>
    %cst_497 = arith.constant 0.353553385 : f32
    %1106 = vector.broadcast %cst_497 : f32 to vector<8x8xf32>
    %1107 = arith.mulf %1095, %1106 : vector<8x8xf32>
    %cst_498 = arith.constant dense<0.000000e+00> : vector<8x8xf32>
    %1108 = tpu.matmul %1107, %1100, %cst_498 {dimension_numbers = #tpu.dot_dimension_numbers<[1], [1], [0], [0], [0, 0, 1, 0], [], []>} : vector<8x8xf32>, vector<8x8xf32>, vector<8x8xf32> -> vector<8x8xf32>
    %cst_499 = arith.constant dense<0xFF800000> : vector<8xf32>
    %1109 = vector.multi_reduction <maximumf>, %1108, %cst_499 [1] : vector<8x8xf32> to vector<8xf32>
    %1110 = vector.shape_cast %1109 : vector<8xf32> to vector<8x1xf32>
    %1111 = vector.broadcast %1110 : vector<8x1xf32> to vector<8x8xf32>
    %1112 = arith.subf %1108, %1111 : vector<8x8xf32>
    %1113 = math.exp %1112 : vector<8x8xf32>
    %cst_500 = arith.constant dense<0.000000e+00> : vector<8xf32>
    %1114 = vector.multi_reduction <add>, %1113, %cst_500 [1] : vector<8x8xf32> to vector<8xf32>
    %1115 = vector.shape_cast %1114 : vector<8xf32> to vector<8x1xf32>
    %1116 = tpu.reciprocal %1115 {approx = true} : vector<8x1xf32> -> vector<8x1xf32>
    %1117 = vector.broadcast %1116 : vector<8x1xf32> to vector<8x8xf32>
    %1118 = arith.mulf %1113, %1117 : vector<8x8xf32>
    %cst_501 = arith.constant dense<0.000000e+00> : vector<8x8xf32>
    %1119 = tpu.matmul %1118, %1105, %cst_501 {dimension_numbers = #tpu.dot_dimension_numbers<[1], [0], [0], [1], [0, 0, 1, 1], [], []>} : vector<8x8xf32>, vector<8x8xf32>, vector<8x8xf32> -> vector<8x8xf32>
    %c3264 = arith.constant 3264 : index
    %c0_502 = arith.constant 0 : index
    %1120 = vector.load %arg2[%c3264, %c0_502] : memref<3560x128xf32, #tpu.memory_space<vmem>>, vector<8x32xf32>
    %cst_503 = arith.constant dense<0.000000e+00> : vector<8x32xf32>
    %1121 = tpu.matmul %1119, %1120, %cst_503 {dimension_numbers = #tpu.dot_dimension_numbers<[1], [0], [0], [1], [0, 0, 1, 1], [], []>} : vector<8x8xf32>, vector<8x32xf32>, vector<8x32xf32> -> vector<8x32xf32>
    %1122 = arith.addf %1090, %1121 : vector<8x32xf32>
    %c3272 = arith.constant 3272 : index
    %c0_504 = arith.constant 0 : index
    %1123 = vector.load %arg2[%c3272, %c0_504] : memref<3560x128xf32, #tpu.memory_space<vmem>>, vector<32x8xf32>
    %cst_505 = arith.constant dense<0.000000e+00> : vector<8x8xf32>
    %1124 = tpu.matmul %1027, %1123, %cst_505 {dimension_numbers = #tpu.dot_dimension_numbers<[1], [0], [0], [1], [0, 0, 1, 1], [], []>} : vector<8x32xf32>, vector<32x8xf32>, vector<8x8xf32> -> vector<8x8xf32>
    %c3368 = arith.constant 3368 : index
    %c0_506 = arith.constant 0 : index
    %1125 = vector.load %arg2[%c3368, %c0_506] : memref<3560x128xf32, #tpu.memory_space<vmem>>, vector<1x8xf32>
    %1126 = vector.broadcast %1125 : vector<1x8xf32> to vector<8x8xf32>
    %1127 = arith.addf %1124, %1126 : vector<8x8xf32>
    %c3304 = arith.constant 3304 : index
    %c0_507 = arith.constant 0 : index
    %1128 = vector.load %arg2[%c3304, %c0_507] : memref<3560x128xf32, #tpu.memory_space<vmem>>, vector<32x8xf32>
    %cst_508 = arith.constant dense<0.000000e+00> : vector<8x8xf32>
    %1129 = tpu.matmul %1027, %1128, %cst_508 {dimension_numbers = #tpu.dot_dimension_numbers<[1], [0], [0], [1], [0, 0, 1, 1], [], []>} : vector<8x32xf32>, vector<32x8xf32>, vector<8x8xf32> -> vector<8x8xf32>
    %c3376 = arith.constant 3376 : index
    %c0_509 = arith.constant 0 : index
    %1130 = vector.load %arg2[%c3376, %c0_509] : memref<3560x128xf32, #tpu.memory_space<vmem>>, vector<1x8xf32>
    %1131 = vector.broadcast %1130 : vector<1x8xf32> to vector<8x8xf32>
    %1132 = arith.addf %1129, %1131 : vector<8x8xf32>
    %c3336 = arith.constant 3336 : index
    %c0_510 = arith.constant 0 : index
    %1133 = vector.load %arg2[%c3336, %c0_510] : memref<3560x128xf32, #tpu.memory_space<vmem>>, vector<32x8xf32>
    %cst_511 = arith.constant dense<0.000000e+00> : vector<8x8xf32>
    %1134 = tpu.matmul %1027, %1133, %cst_511 {dimension_numbers = #tpu.dot_dimension_numbers<[1], [0], [0], [1], [0, 0, 1, 1], [], []>} : vector<8x32xf32>, vector<32x8xf32>, vector<8x8xf32> -> vector<8x8xf32>
    %c3384 = arith.constant 3384 : index
    %c0_512 = arith.constant 0 : index
    %1135 = vector.load %arg2[%c3384, %c0_512] : memref<3560x128xf32, #tpu.memory_space<vmem>>, vector<1x8xf32>
    %1136 = vector.broadcast %1135 : vector<1x8xf32> to vector<8x8xf32>
    %1137 = arith.addf %1134, %1136 : vector<8x8xf32>
    %cst_513 = arith.constant 0.353553385 : f32
    %1138 = vector.broadcast %cst_513 : f32 to vector<8x8xf32>
    %1139 = arith.mulf %1127, %1138 : vector<8x8xf32>
    %cst_514 = arith.constant dense<0.000000e+00> : vector<8x8xf32>
    %1140 = tpu.matmul %1139, %1132, %cst_514 {dimension_numbers = #tpu.dot_dimension_numbers<[1], [1], [0], [0], [0, 0, 1, 0], [], []>} : vector<8x8xf32>, vector<8x8xf32>, vector<8x8xf32> -> vector<8x8xf32>
    %cst_515 = arith.constant dense<0xFF800000> : vector<8xf32>
    %1141 = vector.multi_reduction <maximumf>, %1140, %cst_515 [1] : vector<8x8xf32> to vector<8xf32>
    %1142 = vector.shape_cast %1141 : vector<8xf32> to vector<8x1xf32>
    %1143 = vector.broadcast %1142 : vector<8x1xf32> to vector<8x8xf32>
    %1144 = arith.subf %1140, %1143 : vector<8x8xf32>
    %1145 = math.exp %1144 : vector<8x8xf32>
    %cst_516 = arith.constant dense<0.000000e+00> : vector<8xf32>
    %1146 = vector.multi_reduction <add>, %1145, %cst_516 [1] : vector<8x8xf32> to vector<8xf32>
    %1147 = vector.shape_cast %1146 : vector<8xf32> to vector<8x1xf32>
    %1148 = tpu.reciprocal %1147 {approx = true} : vector<8x1xf32> -> vector<8x1xf32>
    %1149 = vector.broadcast %1148 : vector<8x1xf32> to vector<8x8xf32>
    %1150 = arith.mulf %1145, %1149 : vector<8x8xf32>
    %cst_517 = arith.constant dense<0.000000e+00> : vector<8x8xf32>
    %1151 = tpu.matmul %1150, %1137, %cst_517 {dimension_numbers = #tpu.dot_dimension_numbers<[1], [0], [0], [1], [0, 0, 1, 1], [], []>} : vector<8x8xf32>, vector<8x8xf32>, vector<8x8xf32> -> vector<8x8xf32>
    %c3392 = arith.constant 3392 : index
    %c0_518 = arith.constant 0 : index
    %1152 = vector.load %arg2[%c3392, %c0_518] : memref<3560x128xf32, #tpu.memory_space<vmem>>, vector<8x32xf32>
    %cst_519 = arith.constant dense<0.000000e+00> : vector<8x32xf32>
    %1153 = tpu.matmul %1151, %1152, %cst_519 {dimension_numbers = #tpu.dot_dimension_numbers<[1], [0], [0], [1], [0, 0, 1, 1], [], []>} : vector<8x8xf32>, vector<8x32xf32>, vector<8x32xf32> -> vector<8x32xf32>
    %1154 = arith.addf %1122, %1153 : vector<8x32xf32>
    %1155 = arith.addf %1027, %1154 : vector<8x32xf32>
    %c3400 = arith.constant 3400 : index
    %c0_520 = arith.constant 0 : index
    %1156 = vector.load %arg2[%c3400, %c0_520] : memref<3560x128xf32, #tpu.memory_space<vmem>>, vector<1x32xf32>
    %1157 = vector.broadcast %1156 : vector<1x32xf32> to vector<8x32xf32>
    %1158 = arith.addf %1155, %1157 : vector<8x32xf32>
    %c3408 = arith.constant 3408 : index
    %c0_521 = arith.constant 0 : index
    %1159 = vector.load %arg2[%c3408, %c0_521] : memref<3560x128xf32, #tpu.memory_space<vmem>>, vector<32x32xf32>
    %cst_522 = arith.constant dense<0.000000e+00> : vector<8x32xf32>
    %1160 = tpu.matmul %1158, %1159, %cst_522 {dimension_numbers = #tpu.dot_dimension_numbers<[1], [0], [0], [1], [0, 0, 1, 1], [], []>} : vector<8x32xf32>, vector<32x32xf32>, vector<8x32xf32> -> vector<8x32xf32>
    %1161 = arith.addf %1158, %1160 : vector<8x32xf32>
    %c3440 = arith.constant 3440 : index
    %c0_523 = arith.constant 0 : index
    %1162 = vector.load %arg2[%c3440, %c0_523] : memref<3560x128xf32, #tpu.memory_space<vmem>>, vector<1x32xf32>
    %1163 = vector.broadcast %1162 : vector<1x32xf32> to vector<8x32xf32>
    %1164 = arith.addf %1161, %1163 : vector<8x32xf32>
    %cst_524 = arith.constant 5.000000e-01 : f32
    %1165 = vector.broadcast %cst_524 : f32 to vector<8x32xf32>
    %1166 = arith.mulf %1165, %1164 : vector<8x32xf32>
    %cst_525 = arith.constant 0.707106769 : f32
    %1167 = vector.broadcast %cst_525 : f32 to vector<8x32xf32>
    %1168 = arith.mulf %1164, %1167 : vector<8x32xf32>
    %1169 = math.absf %1168 : vector<8x32xf32>
    %cst_526 = arith.constant 0.327591091 : f32
    %1170 = vector.broadcast %cst_526 : f32 to vector<8x32xf32>
    %1171 = arith.mulf %1170, %1169 : vector<8x32xf32>
    %cst_527 = arith.constant 1.000000e+00 : f32
    %1172 = vector.broadcast %cst_527 : f32 to vector<8x32xf32>
    %1173 = arith.addf %1172, %1171 : vector<8x32xf32>
    %1174 = tpu.reciprocal %1173 {approx = true} : vector<8x32xf32> -> vector<8x32xf32>
    %cst_528 = arith.constant 1.06140542 : f32
    %1175 = vector.broadcast %cst_528 : f32 to vector<8x32xf32>
    %1176 = arith.mulf %1175, %1174 : vector<8x32xf32>
    %cst_529 = arith.constant -1.45315206 : f32
    %1177 = vector.broadcast %cst_529 : f32 to vector<8x32xf32>
    %1178 = arith.addf %1176, %1177 : vector<8x32xf32>
    %1179 = arith.mulf %1178, %1174 : vector<8x32xf32>
    %cst_530 = arith.constant 1.42141378 : f32
    %1180 = vector.broadcast %cst_530 : f32 to vector<8x32xf32>
    %1181 = arith.addf %1179, %1180 : vector<8x32xf32>
    %1182 = arith.mulf %1181, %1174 : vector<8x32xf32>
    %cst_531 = arith.constant -0.284496725 : f32
    %1183 = vector.broadcast %cst_531 : f32 to vector<8x32xf32>
    %1184 = arith.addf %1182, %1183 : vector<8x32xf32>
    %1185 = arith.mulf %1184, %1174 : vector<8x32xf32>
    %cst_532 = arith.constant 0.254829586 : f32
    %1186 = vector.broadcast %cst_532 : f32 to vector<8x32xf32>
    %1187 = arith.addf %1185, %1186 : vector<8x32xf32>
    %1188 = arith.mulf %1187, %1174 : vector<8x32xf32>
    %cst_533 = arith.constant 0.000000e+00 : f32
    %1189 = vector.broadcast %cst_533 : f32 to vector<8x32xf32>
    %1190 = arith.subf %1189, %1169 : vector<8x32xf32>
    %1191 = arith.mulf %1190, %1169 : vector<8x32xf32>
    %1192 = math.exp %1191 : vector<8x32xf32>
    %1193 = arith.mulf %1188, %1192 : vector<8x32xf32>
    %cst_534 = arith.constant 1.000000e+00 : f32
    %1194 = vector.broadcast %cst_534 : f32 to vector<8x32xf32>
    %1195 = arith.subf %1194, %1193 : vector<8x32xf32>
    %cst_535 = arith.constant 0.000000e+00 : f32
    %1196 = vector.broadcast %cst_535 : f32 to vector<8x32xf32>
    %1197 = arith.cmpf oge, %1168, %1196 : vector<8x32xf32>
    %cst_536 = arith.constant 0.000000e+00 : f32
    %1198 = vector.broadcast %cst_536 : f32 to vector<8x32xf32>
    %1199 = arith.subf %1198, %1195 : vector<8x32xf32>
    %1200 = arith.select %1197, %1195, %1199 : vector<8x32xi1>, vector<8x32xf32>
    %cst_537 = arith.constant 1.000000e+00 : f32
    %1201 = vector.broadcast %cst_537 : f32 to vector<8x32xf32>
    %1202 = arith.addf %1201, %1200 : vector<8x32xf32>
    %1203 = arith.mulf %1166, %1202 : vector<8x32xf32>
    %c3448 = arith.constant 3448 : index
    %c0_538 = arith.constant 0 : index
    %1204 = vector.load %arg2[%c3448, %c0_538] : memref<3560x128xf32, #tpu.memory_space<vmem>>, vector<32x14xf32>
    %cst_539 = arith.constant dense<0.000000e+00> : vector<8x14xf32>
    %1205 = tpu.matmul %1203, %1204, %cst_539 {dimension_numbers = #tpu.dot_dimension_numbers<[1], [0], [0], [1], [0, 0, 1, 1], [], []>} : vector<8x32xf32>, vector<32x14xf32>, vector<8x14xf32> -> vector<8x14xf32>
    %c3480 = arith.constant 3480 : index
    %c0_540 = arith.constant 0 : index
    %1206 = vector.load %arg2[%c3480, %c0_540] : memref<3560x128xf32, #tpu.memory_space<vmem>>, vector<1x14xf32>
    %1207 = vector.broadcast %1206 : vector<1x14xf32> to vector<8x14xf32>
    %1208 = arith.addf %1205, %1207 : vector<8x14xf32>
    %cst_541 = arith.constant 0.000000e+00 : f32
    %1209 = vector.broadcast %cst_541 : f32 to vector<8x14xf32>
    %1210 = arith.maximumf %1208, %1209 : vector<8x14xf32>
    %c3488 = arith.constant 3488 : index
    %c0_542 = arith.constant 0 : index
    %1211 = vector.load %arg2[%c3488, %c0_542] : memref<3560x128xf32, #tpu.memory_space<vmem>>, vector<14x14xf32>
    %cst_543 = arith.constant dense<0.000000e+00> : vector<8x14xf32>
    %1212 = tpu.matmul %1210, %1211, %cst_543 {dimension_numbers = #tpu.dot_dimension_numbers<[1], [0], [0], [1], [0, 0, 1, 1], [], []>} : vector<8x14xf32>, vector<14x14xf32>, vector<8x14xf32> -> vector<8x14xf32>
    %c3504 = arith.constant 3504 : index
    %c0_544 = arith.constant 0 : index
    %1213 = vector.load %arg2[%c3504, %c0_544] : memref<3560x128xf32, #tpu.memory_space<vmem>>, vector<1x14xf32>
    %1214 = vector.broadcast %1213 : vector<1x14xf32> to vector<8x14xf32>
    %1215 = arith.addf %1212, %1214 : vector<8x14xf32>
    %cst_545 = arith.constant 0.000000e+00 : f32
    %1216 = vector.broadcast %cst_545 : f32 to vector<8x14xf32>
    %1217 = arith.maximumf %1215, %1216 : vector<8x14xf32>
    %c3512 = arith.constant 3512 : index
    %c0_546 = arith.constant 0 : index
    %1218 = vector.load %arg2[%c3512, %c0_546] : memref<3560x128xf32, #tpu.memory_space<vmem>>, vector<14x7xf32>
    %cst_547 = arith.constant dense<0.000000e+00> : vector<8x7xf32>
    %1219 = tpu.matmul %1217, %1218, %cst_547 {dimension_numbers = #tpu.dot_dimension_numbers<[1], [0], [0], [1], [0, 0, 1, 1], [], []>} : vector<8x14xf32>, vector<14x7xf32>, vector<8x7xf32> -> vector<8x7xf32>
    %c3528 = arith.constant 3528 : index
    %c0_548 = arith.constant 0 : index
    %1220 = vector.load %arg2[%c3528, %c0_548] : memref<3560x128xf32, #tpu.memory_space<vmem>>, vector<1x7xf32>
    %1221 = vector.broadcast %1220 : vector<1x7xf32> to vector<8x7xf32>
    %1222 = arith.addf %1219, %1221 : vector<8x7xf32>
    %cst_549 = arith.constant 0.000000e+00 : f32
    %1223 = vector.broadcast %cst_549 : f32 to vector<8x7xf32>
    %1224 = arith.subf %1223, %1222 : vector<8x7xf32>
    %1225 = math.exp %1224 : vector<8x7xf32>
    %cst_550 = arith.constant 1.000000e+00 : f32
    %1226 = vector.broadcast %cst_550 : f32 to vector<8x7xf32>
    %1227 = arith.addf %1226, %1225 : vector<8x7xf32>
    %1228 = tpu.reciprocal %1227 {approx = true} : vector<8x7xf32> -> vector<8x7xf32>
    %c3536 = arith.constant 3536 : index
    %c0_551 = arith.constant 0 : index
    %1229 = vector.load %arg2[%c3536, %c0_551] : memref<3560x128xf32, #tpu.memory_space<vmem>>, vector<14x7xf32>
    %cst_552 = arith.constant dense<0.000000e+00> : vector<8x7xf32>
    %1230 = tpu.matmul %1217, %1229, %cst_552 {dimension_numbers = #tpu.dot_dimension_numbers<[1], [0], [0], [1], [0, 0, 1, 1], [], []>} : vector<8x14xf32>, vector<14x7xf32>, vector<8x7xf32> -> vector<8x7xf32>
    %c3552 = arith.constant 3552 : index
    %c0_553 = arith.constant 0 : index
    %1231 = vector.load %arg2[%c3552, %c0_553] : memref<3560x128xf32, #tpu.memory_space<vmem>>, vector<1x7xf32>
    %1232 = vector.broadcast %1231 : vector<1x7xf32> to vector<8x7xf32>
    %1233 = arith.addf %1230, %1232 : vector<8x7xf32>
    %cst_554 = arith.constant 0.000000e+00 : f32
    %1234 = vector.broadcast %cst_554 : f32 to vector<8x7xf32>
    %1235 = arith.subf %1234, %1233 : vector<8x7xf32>
    %1236 = math.exp %1235 : vector<8x7xf32>
    %cst_555 = arith.constant 1.000000e+00 : f32
    %1237 = vector.broadcast %cst_555 : f32 to vector<8x7xf32>
    %1238 = arith.addf %1237, %1236 : vector<8x7xf32>
    %1239 = tpu.reciprocal %1238 {approx = true} : vector<8x7xf32> -> vector<8x7xf32>
    %c0_556 = arith.constant 0 : index
    %c0_557 = arith.constant 0 : index
    %1240 = vector.load %arg1[%c0_556, %c0_557] : memref<8x7xf32, #tpu.memory_space<vmem>>, vector<8x7xf32>
    %cst_558 = arith.constant 5.000000e-01 : f32
    %1241 = vector.broadcast %cst_558 : f32 to vector<8x7xf32>
    %1242 = arith.mulf %1241, %1239 : vector<8x7xf32>
    %1243 = math.exp %1242 : vector<8x7xf32>
    %1244 = arith.mulf %1243, %1240 : vector<8x7xf32>
    %1245 = arith.addf %1228, %1244 : vector<8x7xf32>
    %cst_559 = arith.constant -5.000000e-01 : f32
    %1246 = vector.broadcast %cst_559 : f32 to vector<8x7xf32>
    %1247 = arith.mulf %1246, %1240 : vector<8x7xf32>
    %1248 = arith.mulf %1247, %1240 : vector<8x7xf32>
    %cst_560 = arith.constant 5.000000e-01 : f32
    %1249 = vector.broadcast %cst_560 : f32 to vector<8x7xf32>
    %1250 = arith.mulf %1249, %1239 : vector<8x7xf32>
    %1251 = arith.subf %1248, %1250 : vector<8x7xf32>
    %cst_561 = arith.constant 0.918938517 : f32
    %1252 = vector.broadcast %cst_561 : f32 to vector<8x7xf32>
    %1253 = arith.subf %1251, %1252 : vector<8x7xf32>
    %1254 = tpu.concatenate %1245, %1253, %1243 in 1 : vector<8x7xf32>, vector<8x7xf32>, vector<8x7xf32> -> vector<8x21xf32>
    %c0_562 = arith.constant 0 : index
    %c0_563 = arith.constant 0 : index
    %1255 = vector.load %arg3[%c0_562, %c0_563] : memref<8x21xf32, #tpu.memory_space<vmem>>, vector<8x21xf32>
    tpu.vector_store %arg3[%c0_562, %c0_563], %1254 {strides = array<i32>} : memref<8x21xf32, #tpu.memory_space<vmem>>, vector<8x21xf32>,
    return
  }
}

</mosaic_0001>

<bundles_post_ra>
// kernel: forward.1
= control target key start
LH: loop header
LB: loop body
LE: loop exit
PB: predicated region body
PF: predicated region fallthrough
CT: control target
= control target key end

     0   :  { %8 = vsyncpa [#allocation3], 0  ;;  %s20500_s12 = smov [#allocation2]   ;;  %s22952_s0 = inlined_call_operand.vmem [shape: f32[64,2], index: 0, kind: input, shape index: {}]   ;;  %s22953_s1 = inlined_call_operand.vmem [shape: f32[8,7], index: 1, kind: input, shape index: {}]   ;;  %s22954_s2 = inlined_call_operand.hbm [shape: f32[3560,128], index: 2, kind: input, shape index: {}]   ;;  %s22955_s3 = inlined_call_operand.vmem [shape: f32[8,21], index: 3, kind: output, shape index: {}]  }
   0x1   :  { %s18_s13 = sshll.u32 %s20500_s12, 4  ;;  %s20476_s16 = scalar_lea.hbm %s22954_s2, 56960  ;;  %s19_s13 = int_to_ptr.vmem [resolvable:$true] %s18_s13 }
   0x2   :  { %p20477_p0 = scmp.ne.s32.totalorder %s22954_s2, %s20476_s16  ;;  %p20480_p1 = scmp.lt.u32.totalorder %s20476_s16, %s22954_s2 }
   0x4   :  { %p20482_p2 = pnand %p20480_p1, %p20477_p0 }
   0x6   :  { %20485 = shalt.err (!%p20482_p2)
}
   0x7   :  { %s20486_s21 = scalar_lea.vmem %s19_s13, 56960  ;;  %p20491_p4 = scmp.lt.s32.totalorder %s19_s13, %s19_s13 }
   0x8   :  { %p20487_p3 = scmp.ne.s32.totalorder %s19_s13, %s20486_s21  ;;  %p20492_p5 = scmp.lt.s32.totalorder %s20486_s21, %s20486_s21 }
   0xa   :  { %p20493_p6 = por %p20492_p5, %p20491_p4 }
   0xc   :  { %p20494_p7 = pnand %p20493_p6, %p20487_p3 }
   0xe   :  { %20497 = shalt.err (!%p20494_p7)
}
   0xf   :  { %s20501_s22 = smov 128   ;;  %s20502_s23 = smov 8  }
  0x10   :  { %24 = dma.hbm_to_vmem [thread:$0]  %s22954_s2, 56960, %s19_s13, [#allocation3], %s20501_s22, %s20501_s22, %s20502_s23  }
  0x11   :  { %20498 = dma.done.wait [#allocation3], 56960  }
  0x12   :  { %20499 = vsyncadd [#allocation3], 4294910336  ;;  %v20503_v0 = vmov 0   ;;  %v29_v1 = vld [vmem:[%s22952_s0 + $0x8] sm:$0xff]  ;;  %v28_v2 = vld [vmem:[%s22952_s0] sm:$0xff]  ;;  %v20504_v3 = vmov 1   ;;  %v77_v16 = vlaneseq }
  0x13   :  { %19993 = vset.pattern.permute.xlu1 %v20503_v0  ;;  %19991 = vset.pattern.permute.xlu0 %v20503_v0  ;;  %v30_v4 = vld [vmem:[%s22952_s0 + $0x10] sm:$0xff]  ;;  %v31_v5 = vld [vmem:[%s22952_s0 + $0x18] sm:$0xff]  ;;  %v32_v8 = vld [vmem:[%s22952_s0 + $0x20] sm:$0xff]  ;;  %vm171_vm0 = vcmask 261120   ;;  %vm891_vm9 = vcmask 130048   ;;  %vm1045_vm11 = vcmask 523264  }
  0x14   :  { %44 = vperm.xlu1 %19993, %v29_v1   ;;  %39 = vperm.xlu0 %19991, %v28_v2   ;;  %v162_v6 = vld [vmem:[#allocation2 + $0x10] sm:$0xff]  ;;  %v163_v7 = vld [vmem:[#allocation2 + $0x18] sm:$0xff]  ;;  %v164_v10 = vld [vmem:[#allocation2 + $0x20] sm:$0xff]  ;;  %v78_v17 = vshrl.u32 %v77_v16, 7  ;;  %s20509_s15 = smov 7   ;;  %s20510_s16 = smov 14  }
  0x15   :  { %v19154_v9 = vpack.c.bf16 %v163_v7, %v162_v6  ;;  %v165_v11 = vld [vmem:[#allocation2 + $0x28] sm:$0xff]  ;;  %v34_v14 = vld [vmem:[%s22952_s0 + $0x30] sm:$0xff]  ;;  %v35_v15 = vld [vmem:[%s22952_s0 + $0x38] sm:$0xff] }
  0x16   :  { %v33_v12 = vld [vmem:[%s22952_s0 + $0x28] sm:$0xff]  ;;  %v19158_v13 = vpack.c.bf16 %v165_v11, %v164_v10  ;;  %v79_v18 = vsub.s32 0, %v78_v17  ;;  %v123_v19 = vsub.s32 1, %v78_v17  ;;  %v36_v20 = vld [vmem:[#allocation2] sm:$0x3]  ;;  %v655_v16 = vld [vmem:[#allocation2 + $0x58] sm:$0xff] }
  0x17   :  { %19155 = vmatprep.subr.bf16.mxu0 %v19154_v9  ;;  %v15868_v31 = vld [vmem:[#allocation2 + $0x8] ss:$0 sm:$0xff]  ;;  %v656_v17 = vld [vmem:[#allocation2 + $0x60] sm:$0xff]  ;;  %vm20791_vm10 = vmpackc.low %vm891_vm9, %vm891_vm9 }
  0x18   :  { %19994 = vset.pattern.permute.xlu1 %v20504_v3  ;;  %19992 = vset.pattern.permute.xlu0 %v20504_v3  ;;  %v80_v23 = vrot.slane %v36_v20, %v79_v18  ;;  %v124_v24 = vrot.slane %v36_v20, %v123_v19  ;;  %v517_v18 = vld [vmem:[#allocation2 + $0x38] sm:$0xff]  ;;  %v19170_v19 = vpack.c.bf16 %v656_v17, %v655_v16  ;;  %v518_v20 = vld [vmem:[#allocation2 + $0x40] sm:$0xff] }
  0x19   :  { %94 = vperm.xlu1 %19994, %v29_v1   ;;  %90 = vperm.xlu0 %19992, %v28_v2  }
  0x1a   :  { %19157 = vmatpush3.bf16.msra.mxu0 %v19154_v9 }
  0x1b   :  { %19159 = vmatprep.subr.bf16.mxu0 %v19158_v13 }
  0x1d   :  { %19995 = vset.pattern.permute.xlu1 %v20503_v0  ;;  %98 = vperm.xlu0 %19992, %v30_v4  }
  0x1e   :  { %49 = vperm.xlu1 %19995, %v30_v4   ;;  %19161 = vmatpush3.bf16.msra.mxu0 %v19158_v13 }
  0x1f   :  { %19171 = vmatprep.subr.bf16.mxu0 %v19170_v19 }
  0x21   :  { %102 = vperm.xlu0 %19992, %v31_v5  }
  0x22   :  { %54 = vperm.xlu1 %19995, %v31_v5  }
  0x25   :  { %106 = vperm.xlu0 %19992, %v32_v8  }
  0x26   :  { %59 = vperm.xlu1 %19995, %v32_v8  }
  0x29   :  { %110 = vperm.xlu0 %19992, %v33_v12  }
  0x2a   :  { %64 = vperm.xlu1 %19995, %v33_v12  }
  0x2d   :  { %114 = vperm.xlu0 %19992, %v34_v14  }
  0x2e   :  { %69 = vperm.xlu1 %19995, %v34_v14  }
  0x31   :  { %118 = vperm.xlu0 %19992, %v35_v15  }
  0x32   :  { %74 = vperm.xlu1 %19995, %v35_v15  }
  0x93   :  { %v45_v21 = vpop.permute.xlu1 %44  ;;  %v40_v22 = vpop.permute.xlu0 %39 }
  0x94   :  { %v82_v27 = vmul.f32 %v80_v23, %v45_v21  ;;  %v81_v28 = vmul.f32 %v80_v23, %v40_v22  ;;  %v19162_v21 = vpack.c.bf16 %v518_v20, %v517_v18  ;;  %v657_v22 = vld [vmem:[#allocation2 + $0x68] sm:$0xff] }
  0x96   :  { %19163 = vmatprep.subr.bf16.mxu1 %v19162_v21 }
  0x97   :  { %19165 = vmatpush3.bf16.msra.mxu1 %v19162_v21 }
  0x98   :  { %v95_v25 = vpop.permute.xlu1 %94  ;;  %v91_v26 = vpop.permute.xlu0 %90 }
  0x99   :  { %v126_v29 = vmul.f32 %v124_v24, %v95_v25  ;;  %v125_v30 = vmul.f32 %v124_v24, %v91_v26  ;;  %v520_v26 = vld [vmem:[#allocation2 + $0x50] sm:$0xff] }
  0x9b   :  { %v134_v32 = vadd.f32 %v126_v29, %v82_v27  ;;  %v133_v33 = vadd.f32 %v125_v30, %v81_v28  ;;  %v769_v28 = vld [vmem:[#allocation2 + $0x78] sm:$0xff]  ;;  %v770_v29 = vld [vmem:[#allocation2 + $0x80] sm:$0xff] }
  0x9c   :  { %v99_v34 = vpop.permute.xlu0 %98  ;;  %v20575_v30 = vpack.c.bf16 %v770_v29, %v769_v28 }
  0x9d   :  { %v147_v35 = vadd.f32 %v15868_v31, %v134_v32  ;;  %v146_v36 = vadd.f32 %v15868_v31, %v133_v33  ;;  %v127_v37 = vmul.f32 %v124_v24, %v99_v34  ;;  %v50_v38 = vpop.permute.xlu1 %49 }
  0x9e   :  { %v83_v39 = vmul.f32 %v80_v23, %v50_v38 }
  0x9f   :  { %19996 = vtanh.f32 %v147_v35 }
  0xa0   :  { %19998 = vtanh.f32 %v146_v36  ;;  %v135_v40 = vadd.f32 %v127_v37, %v83_v39  ;;  %v103_v41 = vpop.permute.xlu0 %102 }
  0xa1   :  { %v128_v42 = vmul.f32 %v124_v24, %v103_v41  ;;  %v55_v43 = vpop.permute.xlu1 %54 }
  0xa2   :  { %v148_v44 = vadd.f32 %v15868_v31, %v135_v40  ;;  %v84_v45 = vmul.f32 %v80_v23, %v55_v43 }
  0xa4   :  { %20000 = vtanh.f32 %v148_v44  ;;  %v136_v46 = vadd.f32 %v128_v42, %v84_v45  ;;  %v107_v47 = vpop.permute.xlu0 %106 }
  0xa5   :  { %v129_v48 = vmul.f32 %v124_v24, %v107_v47  ;;  %v60_v49 = vpop.permute.xlu1 %59 }
  0xa6   :  { %v149_v50 = vadd.f32 %v15868_v31, %v136_v46  ;;  %v85_v51 = vmul.f32 %v80_v23, %v60_v49 }
  0xa8   :  { %20002 = vtanh.f32 %v149_v50  ;;  %v137_v52 = vadd.f32 %v129_v48, %v85_v51  ;;  %v111_v53 = vpop.permute.xlu0 %110 }
  0xa9   :  { %v19997_v54 = vpop.eup %19996  ;;  %v130_v55 = vmul.f32 %v124_v24, %v111_v53  ;;  %v65_v56 = vpop.permute.xlu1 %64 }
  0xaa   :  { %v19999_v57 = vpop.eup %19998  ;;  %v150_v58 = vadd.f32 %v15868_v31, %v137_v52  ;;  %v86_v59 = vmul.f32 %v80_v23, %v65_v56 }
  0xab   :  { %17385 = vmatprep.mubr.msk.f32.mxu0 %vm171_vm0, %v19999_v57 }
  0xac   :  { %20004 = vtanh.f32 %v150_v58  ;;  %v138_v60 = vadd.f32 %v130_v55, %v86_v59  ;;  %17386 = vmatmul.mubr.msk.f32.vlgmr.msra.gmra.mrb[0].mxu0 %vm171_vm0, %v19997_v54  ;;  %v115_v61 = vpop.permute.xlu0 %114 }
  0xad   :  { %v131_v62 = vmul.f32 %v124_v24, %v115_v61  ;;  %v70_v63 = vpop.permute.xlu1 %69  ;;  %19173 = vmatpush3.bf16.msra.mxu0 %v19170_v19 }
  0xae   :  { %v20001_v0 = vpop.eup %20000  ;;  %v151_v1 = vadd.f32 %v15868_v31, %v138_v60  ;;  %v87_v2 = vmul.f32 %v80_v23, %v70_v63 }
  0xaf   :  { %17388 = vmatprep.mubr.msk.f32.mxu0 %vm171_vm0, %v20001_v0 }
  0xb0   :  { %20006 = vtanh.f32 %v151_v1  ;;  %v139_v3 = vadd.f32 %v131_v62, %v87_v2  ;;  %v119_v4 = vpop.permute.xlu0 %118 }
  0xb1   :  { %v132_v5 = vmul.f32 %v124_v24, %v119_v4  ;;  %v75_v6 = vpop.permute.xlu1 %74  ;;  %v519_v24 = vld [vmem:[#allocation2 + $0x48] sm:$0xff] }
  0xb2   :  { %v20003_v7 = vpop.eup %20002  ;;  %v152_v8 = vadd.f32 %v15868_v31, %v139_v3  ;;  %v88_v9 = vmul.f32 %v80_v23, %v75_v6  ;;  %v658_v23 = vld [vmem:[#allocation2 + $0x70] sm:$0xff]  ;;  %v19166_v27 = vpack.c.bf16 %v520_v26, %v519_v24 }
  0xb3   :  { %17389 = vmatmul.mubr.msk.f32.gmra.mrb[2].mxu0 %vm171_vm0, %v20003_v7  ;;  %v19174_v25 = vpack.c.bf16 %v658_v23, %v657_v22 }
  0xb4   :  { %20008 = vtanh.f32 %v152_v8  ;;  %v140_v10 = vadd.f32 %v132_v5, %v88_v9  ;;  %19167 = vmatprep.subr.bf16.mxu1 %v19166_v27 }
  0xb5   :  { %19175 = vmatprep.subr.bf16.mxu0 %v19174_v25  ;;  %19169 = vmatpush3.bf16.msra.mxu1 %v19166_v27 }
  0xb6   :  { %v20005_v11 = vpop.eup %20004  ;;  %v153_v12 = vadd.f32 %v15868_v31, %v140_v10  ;;  %19177 = vmatpush3.bf16.msra.mxu0 %v19174_v25  ;;  %19179 = vmatprep.subr.bf16.mxu1 %v20575_v30  ;;  %v15869_v31 = vld [vmem:[#allocation2 + $0x30] ss:$0 sm:$0xff] }
  0xb7   :  { %17391 = vmatprep.mubr.msk.f32.mxu0 %vm171_vm0, %v20005_v11 }
  0xb8   :  { %20010 = vtanh.f32 %v153_v12 }
  0xba   :  { %v20007_v13 = vpop.eup %20006 }
  0xbb   :  { %17392 = vmatmul.mubr.msk.f32.gmra.mrb[4].mxu0 %vm171_vm0, %v20007_v13 }
  0xbe   :  { %v20009_v14 = vpop.eup %20008 }
  0xbf   :  { %17394 = vmatprep.mubr.msk.f32.mxu0 %vm171_vm0, %v20009_v14 }
  0xc2   :  { %v20011_v15 = vpop.eup %20010 }
  0xc3   :  { %17395 = vmatmul.mubr.msk.f32.gmra.mrb[6].mxu0 %vm171_vm0, %v20011_v15 }
 0x17f   :  { %v17387_v32 = vpop.f32.mrb[0].mxu0 }
 0x180   :  { %v268_v33 = vadd.f32 %v17387_v32, %v15869_v31  ;;  %v262_v34 = vpop.f32.mrb[1].mxu0  ;;  %v771_v32 = vld [vmem:[#allocation2 + $0x88] sm:$0xff] }
 0x181   :  { %v263_v35 = vadd.f32 %v15869_v31, %v262_v34  ;;  %v772_v34 = vld [vmem:[#allocation2 + $0x90] sm:$0xff] }
 0x182   :  { %v20578_v36 = vmul.f32 0.70710677, %v268_v33  ;;  %v20624_v24 = vmul.f32 0.5, %v268_v33 }
 0x183   :  { %v20580_v37 = vmul.f32 0.70710677, %v263_v35  ;;  %v20627_v26 = vmul.f32 0.5, %v263_v35 }
 0x184   :  { %v318_v38 = vand.u32 2147483647, %v20578_v36  ;;  %vm470_vm1 = vcmp.ge.f32.partialorder %v20578_v36, 0.0 }
 0x185   :  { %v317_v39 = vand.u32 2147483647, %v20580_v37  ;;  %vm469_vm2 = vcmp.ge.f32.partialorder %v20580_v37, 0.0 }
 0x186   :  { %v326_v40 = vmul.f32 0.3275911, %v318_v38  ;;  %v17390_v41 = vpop.f32.mrb[2].mxu0  ;;  %v422_v52 = vsub.f32 0.0, %v318_v38 }
 0x187   :  { %v325_v42 = vmul.f32 0.3275911, %v317_v39  ;;  %v20584_v43 = vadd.f32 %v17390_v41, %v15869_v31  ;;  %v272_v44 = vpop.f32.mrb[3].mxu0  ;;  %v421_v59 = vsub.f32 0.0, %v317_v39 }
 0x188   :  { %v334_v45 = vadd.f32 1.0, %v326_v40  ;;  %v20586_v46 = vadd.f32 %v15869_v31, %v272_v44  ;;  %v430_v62 = vmul.f32 %v422_v52, %v318_v38 }
 0x189   :  { %v333_v47 = vadd.f32 1.0, %v325_v42  ;;  %v20589_v48 = vmul.f32 0.70710677, %v20584_v43  ;;  %v429_v5 = vmul.f32 %v421_v59, %v317_v39  ;;  %v20651_v59 = vpack.c.bf16 %v772_v34, %v771_v32 }
 0x18a   :  { %20012 = vrcp.f32 %v334_v45  ;;  %v20592_v49 = vmul.f32 0.70710677, %v20586_v46  ;;  %v439_v9 = vmul.f32 1.442695, %v430_v62 }
 0x18b   :  { %20014 = vrcp.f32 %v333_v47  ;;  %v320_v50 = vand.u32 2147483647, %v20589_v48  ;;  %v437_v21 = vmul.f32 1.442695, %v429_v5  ;;  %vm472_vm3 = vcmp.ge.f32.partialorder %v20589_v48, 0.0 }
 0x18c   :  { %v319_v51 = vand.u32 2147483647, %v20592_v49  ;;  %vm471_vm4 = vcmp.ge.f32.partialorder %v20592_v49, 0.0  ;;  %v303_v48 = vmul.f32 0.5, %v20586_v46 }
 0x18d   :  { %v328_v53 = vmul.f32 0.3275911, %v320_v50  ;;  %v424_v0 = vsub.f32 0.0, %v320_v50 }
 0x18e   :  { %v327_v54 = vmul.f32 0.3275911, %v319_v51  ;;  %v17393_v55 = vpop.f32.mrb[4].mxu0  ;;  %v423_v2 = vsub.f32 0.0, %v319_v51 }
 0x18f   :  { %v336_v56 = vadd.f32 1.0, %v328_v53  ;;  %v20596_v57 = vadd.f32 %v17393_v55, %v15869_v31  ;;  %v282_v58 = vpop.f32.mrb[5].mxu0  ;;  %v432_v12 = vmul.f32 %v424_v0, %v320_v50 }
 0x190   :  { %v335_v60 = vadd.f32 1.0, %v327_v54  ;;  %v20598_v61 = vadd.f32 %v15869_v31, %v282_v58  ;;  %v431_v16 = vmul.f32 %v423_v2, %v319_v51 }
 0x191   :  { %20016 = vrcp.f32 %v336_v56  ;;  %v20601_v63 = vmul.f32 0.70710677, %v20596_v57  ;;  %v443_v28 = vmul.f32 1.442695, %v432_v12 }
 0x192   :  { %20018 = vrcp.f32 %v335_v60  ;;  %v20604_v1 = vmul.f32 0.70710677, %v20598_v61  ;;  %v441_v33 = vmul.f32 1.442695, %v431_v16 }
 0x193   :  { %v20607_v3 = vand.u32 2147483647, %v20601_v63  ;;  %vm474_vm5 = vcmp.ge.f32.partialorder %v20601_v63, 0.0  ;;  %v305_v63 = vmul.f32 0.5, %v20598_v61 }
 0x194   :  { %v20609_v4 = vpop.eup %20012  ;;  %v20612_v6 = vand.u32 2147483647, %v20604_v1  ;;  %vm473_vm6 = vcmp.ge.f32.partialorder %v20604_v1, 0.0 }
 0x195   :  { %v20614_v7 = vpop.eup %20014  ;;  %v350_v8 = vmul.f32 1.0614054, %v20609_v4  ;;  %v330_v10 = vmul.f32 0.3275911, %v20607_v3  ;;  %v426_v47 = vsub.f32 0.0, %v20607_v3 }
 0x196   :  { %v349_v11 = vmul.f32 1.0614054, %v20614_v7  ;;  %v329_v13 = vmul.f32 0.3275911, %v20612_v6  ;;  %v17396_v14 = vpop.f32.mrb[6].mxu0  ;;  %v425_v53 = vsub.f32 0.0, %v20612_v6 }
 0x197   :  { %v358_v15 = vadd.f32 -1.4531521, %v350_v8  ;;  %v338_v17 = vadd.f32 1.0, %v330_v10  ;;  %v20620_v18 = vadd.f32 %v17396_v14, %v15869_v31  ;;  %v292_v19 = vpop.f32.mrb[7].mxu0  ;;  %v434_v12 = vmul.f32 %v426_v47, %v20607_v3 }
 0x198   :  { %v357_v20 = vadd.f32 -1.4531521, %v349_v11  ;;  %v337_v22 = vadd.f32 1.0, %v329_v13  ;;  %v20622_v23 = vadd.f32 %v15869_v31, %v292_v19  ;;  %v433_v16 = vmul.f32 %v425_v53, %v20612_v6 }
 0x199   :  { %v366_v25 = vmul.f32 %v20609_v4, %v358_v15  ;;  %20020 = vrcp.f32 %v338_v17  ;;  %v20631_v29 = vmul.f32 0.70710677, %v20620_v18 }
 0x19a   :  { %v365_v27 = vmul.f32 %v20614_v7, %v357_v20  ;;  %20022 = vrcp.f32 %v337_v22  ;;  %v20636_v39 = vmul.f32 0.70710677, %v20622_v23 }
 0x19b   :  { %v20633_v38 = vpop.eup %20016  ;;  %v374_v31 = vadd.f32 1.4214138, %v366_v25  ;;  %20024 = vpow2.f32 %v439_v9  ;;  %v324_v42 = vand.u32 2147483647, %v20631_v29  ;;  %vm476_vm7 = vcmp.ge.f32.partialorder %v20631_v29, 0.0 }
 0x19c   :  { %v20638_v35 = vpop.eup %20018  ;;  %v373_v40 = vadd.f32 1.4214138, %v365_v27  ;;  %20026 = vpow2.f32 %v437_v21  ;;  %v352_v41 = vmul.f32 1.0614054, %v20633_v38  ;;  %v20646_v50 = vand.u32 2147483647, %v20636_v39 }
 0x19d   :  { %v382_v44 = vmul.f32 %v20609_v4, %v374_v31  ;;  %v351_v45 = vmul.f32 1.0614054, %v20638_v35  ;;  %v332_v54 = vmul.f32 0.3275911, %v324_v42  ;;  %20028 = vpow2.f32 %v443_v28 }
 0x19e   :  { %v381_v51 = vmul.f32 %v20614_v7, %v373_v40  ;;  %v360_v52 = vadd.f32 -1.4531521, %v352_v41  ;;  %v331_v58 = vmul.f32 0.3275911, %v20646_v50  ;;  %v428_v8 = vsub.f32 0.0, %v324_v42 }
 0x19f   :  { %v390_v55 = vadd.f32 -0.28449672, %v382_v44  ;;  %v359_v56 = vadd.f32 -1.4531521, %v351_v45  ;;  %v340_v0 = vadd.f32 1.0, %v332_v54  ;;  %vm475_vm8 = vcmp.ge.f32.partialorder %v20636_v39, 0.0 }
 0x1a0   :  { %v389_v60 = vadd.f32 -0.28449672, %v381_v51  ;;  %v368_v62 = vmul.f32 %v20633_v38, %v360_v52  ;;  %v339_v9 = vadd.f32 1.0, %v331_v58  ;;  %v436_v27 = vmul.f32 %v428_v8, %v324_v42 }
 0x1a1   :  { %v398_v2 = vmul.f32 %v20609_v4, %v390_v55  ;;  %v367_v5 = vmul.f32 %v20638_v35, %v359_v56  ;;  %20030 = vrcp.f32 %v340_v0  ;;  %v447_v40 = vmul.f32 1.442695, %v434_v12 }
 0x1a2   :  { %v397_v10 = vmul.f32 %v20614_v7, %v389_v60  ;;  %v376_v11 = vadd.f32 1.4214138, %v368_v62  ;;  %20032 = vrcp.f32 %v339_v9  ;;  %v445_v45 = vmul.f32 1.442695, %v433_v16 }
 0x1a3   :  { %v20658_v13 = vpop.eup %20020  ;;  %v406_v14 = vadd.f32 0.2548296, %v398_v2  ;;  %v375_v15 = vadd.f32 1.4214138, %v367_v5  ;;  %20034 = vpow2.f32 %v441_v33  ;;  %v427_v52 = vsub.f32 0.0, %v20646_v50 }
 0x1a4   :  { %v20661_v17 = vpop.eup %20022  ;;  %v405_v19 = vadd.f32 0.2548296, %v397_v10  ;;  %v384_v20 = vmul.f32 %v20633_v38, %v376_v11  ;;  %v354_v21 = vmul.f32 1.0614054, %v20658_v13  ;;  %20036 = vpow2.f32 %v447_v40 }
 0x1a5   :  { %v20025_v22 = vpop.eup %20024  ;;  %v414_v3 = vmul.f32 %v20609_v4, %v406_v14  ;;  %v383_v25 = vmul.f32 %v20638_v35, %v375_v15  ;;  %v353_v6 = vmul.f32 1.0614054, %v20661_v17  ;;  %20038 = vpow2.f32 %v445_v45 }
 0x1a6   :  { %v20027_v28 = vpop.eup %20026  ;;  %v413_v32 = vmul.f32 %v20614_v7, %v405_v19  ;;  %v392_v34 = vadd.f32 -0.28449672, %v384_v20  ;;  %v362_v31 = vadd.f32 -1.4531521, %v354_v21  ;;  %v451_v7 = vmul.f32 1.442695, %v436_v27 }
 0x1a7   :  { %v454_v41 = vmul.f32 %v20025_v22, %v414_v3  ;;  %v391_v33 = vadd.f32 -0.28449672, %v383_v25  ;;  %v361_v44 = vadd.f32 -1.4531521, %v353_v6  ;;  %v20029_v55 = vpop.eup %20028  ;;  %v435_v11 = vmul.f32 %v427_v52, %v20646_v50 }
 0x1a8   :  { %v453_v47 = vmul.f32 %v20027_v28, %v413_v32  ;;  %v400_v4 = vmul.f32 %v20633_v38, %v392_v34  ;;  %v370_v51 = vmul.f32 %v20658_v13, %v362_v31  ;;  %20040 = vpow2.f32 %v451_v7 }
 0x1a9   :  { %v462_v53 = vsub.f32 1.0, %v454_v41  ;;  %v399_v42 = vmul.f32 %v20638_v35, %v391_v33  ;;  %v369_v54 = vmul.f32 %v20661_v17, %v361_v44  ;;  %v449_v32 = vmul.f32 1.442695, %v435_v11 }
 0x1aa   :  { %v461_v56 = vsub.f32 1.0, %v453_v47  ;;  %v408_v58 = vadd.f32 0.2548296, %v400_v4  ;;  %v378_v60 = vadd.f32 1.4214138, %v370_v51 }
 0x1ab   :  { %v478_v62 = vsub.f32 0.0, %v462_v53  ;;  %v407_v0 = vadd.f32 0.2548296, %v399_v42  ;;  %v377_v2 = vadd.f32 1.4214138, %v369_v54  ;;  %v20677_v5 = vpop.eup %20030  ;;  %20042 = vpow2.f32 %v449_v32 }
 0x1ac   :  { %v477_v8 = vsub.f32 0.0, %v461_v56  ;;  %v416_v9 = vmul.f32 %v20633_v38, %v408_v58  ;;  %v386_v10 = vmul.f32 %v20658_v13, %v378_v60  ;;  %v20682_v12 = vpop.eup %20032  ;;  %v356_v19 = vmul.f32 1.0614054, %v20677_v5 }
 0x1ad   :  { %v486_v14 = vsel %vm470_vm1, %v462_v53, %v478_v62  ;;  %v415_v15 = vmul.f32 %v20638_v35, %v407_v0  ;;  %v385_v16 = vmul.f32 %v20661_v17, %v377_v2  ;;  %v20035_v20 = vpop.eup %20034  ;;  %v355_v35 = vmul.f32 1.0614054, %v20682_v12 }
 0x1ae   :  { %v494_v21 = vadd.f32 1.0, %v486_v14  ;;  %v485_v38 = vsel %vm469_vm2, %v461_v56, %v477_v8  ;;  %v456_v22 = vmul.f32 %v20029_v55, %v416_v9  ;;  %v394_v3 = vadd.f32 -0.28449672, %v386_v10 }
 0x1af   :  { %v493_v25 = vadd.f32 1.0, %v485_v38  ;;  %v455_v50 = vmul.f32 %v20035_v20, %v415_v15  ;;  %v393_v6 = vadd.f32 -0.28449672, %v385_v16  ;;  %v364_v27 = vadd.f32 -1.4531521, %v356_v19 }
 0x1b0   :  { %v464_v28 = vsub.f32 1.0, %v456_v22  ;;  %v402_v36 = vmul.f32 %v20658_v13, %v394_v3  ;;  %v20699_v41 = vmul.f32 %v494_v21, %v20624_v24  ;;  %v363_v45 = vadd.f32 -1.4531521, %v355_v35 }
 0x1b1   :  { %v20694_v34 = vmul.f32 %v493_v25, %v20627_v26  ;;  %v463_v31 = vsub.f32 1.0, %v455_v50  ;;  %v401_v40 = vmul.f32 %v20661_v17, %v393_v6  ;;  %v372_v37 = vmul.f32 %v20677_v5, %v364_v27  ;;  %v20037_v26 = vpop.eup %20036 }
 0x1b2   :  { %v480_v33 = vsub.f32 0.0, %v464_v28  ;;  %v410_v44 = vadd.f32 0.2548296, %v402_v36  ;;  %v371_v53 = vmul.f32 %v20682_v12, %v363_v45  ;;  %v20039_v49 = vpop.eup %20038  ;;  %v304_v60 = vmul.f32 0.5, %v20584_v43 }
 0x1b3   :  { %v479_v47 = vsub.f32 0.0, %v463_v31  ;;  %v409_v4 = vadd.f32 0.2548296, %v401_v40  ;;  %v380_v51 = vadd.f32 1.4214138, %v372_v37  ;;  %17405 = vmatprep.mubr.msk.f32.mxu1 %vm171_vm0, %v20694_v34  ;;  %17425 = vmatprep.mubr.msk.f32.mxu0 %vm171_vm0, %v20694_v34  ;;  %v20041_v21 = vpop.eup %20040  ;;  %v306_v3 = vmul.f32 0.5, %v20596_v57 }
 0x1b4   :  { %v488_v52 = vsel %vm472_vm3, %v464_v28, %v480_v33  ;;  %v418_v24 = vmul.f32 %v20658_v13, %v410_v44  ;;  %17406 = vmatmul.mubr.msk.f32.vlgmr.msra.gmra.mrb[0].mxu1 %vm171_vm0, %v20699_v41  ;;  %17426 = vmatmul.mubr.msk.f32.vlgmr.msra.gmra.mrb[8].mxu0 %vm171_vm0, %v20699_v41  ;;  %v379_v58 = vadd.f32 1.4214138, %v371_v53  ;;  %v308_v37 = vmul.f32 0.5, %v20620_v18  ;;  %v15887_v18 = vld [vmem:[#allocation2 + $0xa0] ss:$0 sm:$0xff] }
 0x1b5   :  { %v496_v42 = vadd.f32 1.0, %v488_v52  ;;  %v487_v54 = vsel %vm471_vm4, %v463_v31, %v479_v47  ;;  %v417_v55 = vmul.f32 %v20661_v17, %v409_v4  ;;  %v388_v56 = vmul.f32 %v20677_v5, %v380_v51  ;;  %19181 = vmatpush3.bf16.msra.mxu1 %v20575_v30  ;;  %v20043_v27 = vpop.eup %20042 }
 0x1b6   :  { %v495_v13 = vadd.f32 1.0, %v487_v54  ;;  %v458_v7 = vmul.f32 %v20037_v26, %v418_v24  ;;  %19183 = vmatprep.subr.bf16.mxu1 %v20651_v59  ;;  %v387_v17 = vmul.f32 %v20682_v12, %v379_v58  ;;  %v307_v31 = vmul.f32 0.5, %v20622_v23  ;;  %v20786_v23 = vld [vmem:[#allocation2 + $0x98] ss:$0 sm:$0xff] }
 0x1b7   :  { %v457_v62 = vmul.f32 %v20039_v49, %v417_v55  ;;  %v396_v0 = vadd.f32 -0.28449672, %v388_v56  ;;  %v20723_v9 = vmul.f32 %v496_v42, %v304_v60 }
 0x1b8   :  { %v20720_v2 = vmul.f32 %v495_v13, %v303_v48  ;;  %v466_v8 = vsub.f32 1.0, %v458_v7  ;;  %v395_v11 = vadd.f32 -0.28449672, %v387_v17 }
 0x1b9   :  { %v465_v30 = vsub.f32 1.0, %v457_v62  ;;  %v404_v46 = vmul.f32 %v20677_v5, %v396_v0  ;;  %19185 = vmatpush3.bf16.msra.mxu1 %v20651_v59 }
 0x1ba   :  { %v482_v10 = vsub.f32 0.0, %v466_v8  ;;  %17408 = vmatprep.mubr.msk.f32.mxu1 %vm171_vm0, %v20720_v2  ;;  %17428 = vmatprep.mubr.msk.f32.mxu0 %vm171_vm0, %v20720_v2  ;;  %v403_v59 = vmul.f32 %v20682_v12, %v395_v11 }
 0x1bb   :  { %v481_v43 = vsub.f32 0.0, %v465_v30  ;;  %v412_v14 = vadd.f32 0.2548296, %v404_v46  ;;  %17409 = vmatmul.mubr.msk.f32.gmra.mrb[2].mxu1 %vm171_vm0, %v20723_v9  ;;  %17429 = vmatmul.mubr.msk.f32.gmra.mrb[10].mxu0 %vm171_vm0, %v20723_v9 }
 0x1bc   :  { %v490_v15 = vsel %vm474_vm5, %v466_v8, %v482_v10  ;;  %v411_v22 = vadd.f32 0.2548296, %v403_v59 }
 0x1bd   :  { %v498_v16 = vadd.f32 1.0, %v490_v15  ;;  %v489_v19 = vsel %vm473_vm6, %v465_v30, %v481_v43  ;;  %v420_v20 = vmul.f32 %v20677_v5, %v412_v14  ;;  %v1379_v14 = vld [vmem:[#allocation2 + $0xe0] sm:$0xff]  ;;  %v1380_v15 = vld [vmem:[#allocation2 + $0xe8] sm:$0xff] }
 0x1be   :  { %v497_v38 = vadd.f32 1.0, %v489_v19  ;;  %v419_v6 = vmul.f32 %v20682_v12, %v411_v22 }
 0x1bf   :  { %v460_v25 = vmul.f32 %v20041_v21, %v420_v20  ;;  %v20744_v1 = vmul.f32 %v498_v16, %v306_v3  ;;  %v15896_v16 = vld [vmem:[#allocation2 + $0xa8] ss:$0 sm:$0xff]  ;;  %v19234_v21 = vpack.c.bf16 %v1380_v15, %v1379_v14 }
 0x1c0   :  { %v20741_v50 = vmul.f32 %v497_v38, %v305_v63  ;;  %v459_v36 = vmul.f32 %v20043_v27, %v419_v6 }
 0x1c1   :  { %v468_v28 = vsub.f32 1.0, %v460_v25 }
 0x1c2   :  { %17411 = vmatprep.mubr.msk.f32.mxu1 %vm171_vm0, %v20741_v50  ;;  %17431 = vmatprep.mubr.msk.f32.mxu0 %vm171_vm0, %v20741_v50  ;;  %v467_v57 = vsub.f32 1.0, %v459_v36 }
 0x1c3   :  { %v484_v61 = vsub.f32 0.0, %v468_v28  ;;  %17412 = vmatmul.mubr.msk.f32.gmra.mrb[4].mxu1 %vm171_vm0, %v20744_v1  ;;  %17432 = vmatmul.mubr.msk.f32.gmra.mrb[12].mxu0 %vm171_vm0, %v20744_v1 }
 0x1c4   :  { %v483_v12 = vsub.f32 0.0, %v467_v57 }
 0x1c5   :  { %v492_v5 = vsel %vm476_vm7, %v468_v28, %v484_v61 }
 0x1c6   :  { %v500_v35 = vadd.f32 1.0, %v492_v5  ;;  %v491_v32 = vsel %vm475_vm8, %v467_v57, %v483_v12  ;;  %v1381_v57 = vld [vmem:[#allocation2 + $0xf0] sm:$0xff]  ;;  %v1382_v5 = vld [vmem:[#allocation2 + $0xf8] sm:$0xff] }
 0x1c7   :  { %v499_v40 = vadd.f32 1.0, %v491_v32 }
 0x1c8   :  { %v20760_v44 = vmul.f32 %v500_v35, %v308_v37 }
 0x1c9   :  { %v20758_v33 = vmul.f32 %v499_v40, %v307_v31 }
 0x1cb   :  { %17414 = vmatprep.mubr.msk.f32.mxu1 %vm171_vm0, %v20758_v33  ;;  %17434 = vmatprep.mubr.msk.f32.mxu0 %vm171_vm0, %v20758_v33 }
 0x1cc   :  { %17415 = vmatmul.mubr.msk.f32.gmra.mrb[6].mxu1 %vm171_vm0, %v20760_v44  ;;  %17435 = vmatmul.mubr.msk.f32.gmra.mrb[14].mxu0 %vm171_vm0, %v20760_v44 }
 0x1cd   :  { %17445 = vmatprep.mubr.msk.f32.mxu1 %vm171_vm0, %v20694_v34 }
 0x1d0   :  { %17446 = vmatmul.mubr.msk.f32.vlgmr.msra.gmra.mrb[8].mxu1 %vm171_vm0, %v20699_v41 }
 0x1d1   :  { %17448 = vmatprep.mubr.msk.f32.mxu1 %vm171_vm0, %v20720_v2 }
 0x1d4   :  { %17449 = vmatmul.mubr.msk.f32.gmra.mrb[10].mxu1 %vm171_vm0, %v20723_v9 }
 0x1d5   :  { %17451 = vmatprep.mubr.msk.f32.mxu1 %vm171_vm0, %v20741_v50 }
 0x1d8   :  { %17452 = vmatmul.mubr.msk.f32.gmra.mrb[12].mxu1 %vm171_vm0, %v20744_v1 }
 0x1d9   :  { %17454 = vmatprep.mubr.msk.f32.mxu1 %vm171_vm0, %v20758_v33 }
 0x1dc   :  { %17455 = vmatmul.mubr.msk.f32.gmra.mrb[14].mxu1 %vm171_vm0, %v20760_v44 }
 0x287   :  { %v17407_v29 = vpop.f32.mrb[0].mxu1  ;;  %v17427_v39 = vpop.f32.mrb[8].mxu0 }
 0x288   :  { %v736_v45 = vadd.f32 %v17427_v39, %v15887_v18  ;;  %v616_v47 = vpop.f32.mrb[1].mxu1  ;;  %v730_v4 = vpop.f32.mrb[9].mxu0  ;;  %v622_v3 = vadd.f32 %v17407_v29, %v20786_v23  ;;  %v19238_v39 = vpack.c.bf16 %v1382_v5, %v1381_v57  ;;  %v15938_v5 = vld [vmem:[#allocation2 + $0x128] ss:$0 sm:$0xff] }
 0x289   :  { %v617_v51 = vadd.f32 %v20786_v23, %v616_v47  ;;  %v731_v26 = vadd.f32 %v15887_v18, %v730_v4 }
 0x28a   :  { %v884_v12 = vmul.f32 0.25, %v622_v3  ;;  %v20880_v3 = vld [vmem:[#allocation2 + $0x458] sm:$0xff] }
 0x28b   :  { %v883_v24 = vmul.f32 0.25, %v617_v51  ;;  %v19186_v53 = vpack.c.bf16 %v736_v45, %v731_v26 }
 0x28d   :  { %19188 = vmatprep.subr.msk.bf16.mxu0 %vm20791_vm10, %v19186_v53  ;;  %17473 = vmatprep.mubr.msk.f32.mxu0 %vm891_vm9, %v883_v24 }
 0x28e   :  { %19191 = vmatpush3.bf16.xpose.msk.msra.mxu0 %vm20791_vm10, %v19186_v53  ;;  %v17410_v49 = vpop.f32.mrb[2].mxu1  ;;  %v17430_v42 = vpop.f32.mrb[10].mxu0 }
 0x28f   :  { %v746_v54 = vadd.f32 %v17430_v42, %v15887_v18  ;;  %v626_v55 = vpop.f32.mrb[3].mxu1  ;;  %v740_v56 = vpop.f32.mrb[11].mxu0  ;;  %v632_v35 = vadd.f32 %v17410_v49, %v20786_v23 }
 0x290   :  { %v741_v48 = vadd.f32 %v15887_v18, %v740_v56  ;;  %v627_v27 = vadd.f32 %v20786_v23, %v626_v55 }
 0x291   :  { %v886_v47 = vmul.f32 0.25, %v632_v35 }
 0x292   :  { %v19192_v13 = vpack.c.bf16 %v746_v54, %v741_v48  ;;  %v885_v40 = vmul.f32 0.25, %v627_v27 }
 0x294   :  { %19194 = vmatprep.subr.msk.bf16.mxu0 %vm20791_vm10, %v19192_v13 }
 0x296   :  { %19197 = vmatpush3.bf16.xpose.msk.msra.mxu0 %vm20791_vm10, %v19192_v13  ;;  %v17413_v7 = vpop.f32.mrb[4].mxu1  ;;  %v17433_v58 = vpop.f32.mrb[12].mxu0 }
 0x297   :  { %v756_v60 = vadd.f32 %v17433_v58, %v15887_v18  ;;  %v636_v62 = vpop.f32.mrb[5].mxu1  ;;  %v750_v0 = vpop.f32.mrb[13].mxu0  ;;  %v642_v4 = vadd.f32 %v17413_v7, %v20786_v23  ;;  %v20844_v58 = vld [vmem:[#allocation2 + $0x420] sm:$0xff] }
 0x298   :  { %v751_v8 = vadd.f32 %v15887_v18, %v750_v0  ;;  %v637_v37 = vadd.f32 %v20786_v23, %v636_v62 }
 0x299   :  { %v888_v55 = vmul.f32 0.25, %v642_v4 }
 0x29a   :  { %v19198_v17 = vpack.c.bf16 %v756_v60, %v751_v8  ;;  %v887_v24 = vmul.f32 0.25, %v637_v37 }
 0x29c   :  { %19200 = vmatprep.subr.msk.bf16.mxu0 %vm20791_vm10, %v19198_v17 }
 0x29e   :  { %19203 = vmatpush3.bf16.xpose.msk.msra.mxu0 %vm20791_vm10, %v19198_v17  ;;  %v20852_v17 = vld [vmem:[#allocation2 + $0x438] sm:$0xff] }
 0x29f   :  { %v17416_v30 = vpop.f32.mrb[6].mxu1  ;;  %v17436_v46 = vpop.f32.mrb[14].mxu0 }
 0x2a0   :  { %v766_v10 = vadd.f32 %v17436_v46, %v15887_v18  ;;  %v646_v11 = vpop.f32.mrb[7].mxu1  ;;  %v760_v43 = vpop.f32.mrb[15].mxu0  ;;  %v652_v56 = vadd.f32 %v17416_v30, %v20786_v23  ;;  %v20856_v46 = vld [vmem:[#allocation2 + $0x430] sm:$0xff] }
 0x2a1   :  { %v761_v59 = vadd.f32 %v15887_v18, %v760_v43  ;;  %v647_v53 = vadd.f32 %v20786_v23, %v646_v11  ;;  %v20842_v23 = vld [vmem:[#allocation2 + $0x428] sm:$0xff] }
 0x2a2   :  { %v890_v7 = vmul.f32 0.25, %v652_v56 }
 0x2a3   :  { %v19204_v19 = vpack.c.bf16 %v766_v10, %v761_v59  ;;  %v17447_v20 = vpop.f32.mrb[8].mxu1  ;;  %v889_v13 = vmul.f32 0.25, %v647_v53  ;;  %v20866_v59 = vld [vmem:[#allocation2 + $0x448] sm:$0xff] }
 0x2a4   :  { %v850_v63 = vadd.f32 %v17447_v20, %v15896_v16  ;;  %v844_v38 = vpop.f32.mrb[9].mxu1 }
 0x2a5   :  { %v845_v22 = vadd.f32 %v15896_v16, %v844_v38  ;;  %19206 = vmatprep.subr.msk.bf16.mxu0 %vm20791_vm10, %v19204_v19 }
 0x2a6   :  { %19209 = vmatpush3.bf16.xpose.msk.msra.mxu0 %vm20791_vm10, %v19204_v19 }
 0x2a7   :  { %v19210_v25 = vpack.c.bf16 %v850_v63, %v845_v22  ;;  %v17450_v6 = vpop.f32.mrb[10].mxu1  ;;  %19235 = vmatprep.subr.bf16.mxu0 %v19234_v21 }
 0x2a8   :  { %v860_v28 = vadd.f32 %v17450_v6, %v15896_v16  ;;  %v854_v36 = vpop.f32.mrb[11].mxu1  ;;  %v20884_v6 = vld [vmem:[#allocation2 + $0x450] sm:$0xff] }
 0x2a9   :  { %v855_v61 = vadd.f32 %v15896_v16, %v854_v36  ;;  %19211 = vmatprep.subr.bf16.mxu1 %v19210_v25 }
 0x2aa   :  { %19213 = vmatpush3.bf16.msra.mxu1 %v19210_v25 }
 0x2ab   :  { %v19214_v32 = vpack.c.bf16 %v860_v28, %v855_v61  ;;  %v17453_v31 = vpop.f32.mrb[12].mxu1 }
 0x2ac   :  { %v870_v18 = vadd.f32 %v17453_v31, %v15896_v16  ;;  %v864_v29 = vpop.f32.mrb[13].mxu1 }
 0x2ad   :  { %v865_v45 = vadd.f32 %v15896_v16, %v864_v29  ;;  %17474 = vmatmul.mubr.msk.f32.vlgmr.msra.gmra.mrb[16].mxu0 %vm891_vm9, %v884_v12  ;;  %19215 = vmatprep.subr.bf16.mxu1 %v19214_v32 }
 0x2ae   :  { %17476 = vmatprep.mubr.msk.f32.mxu0 %vm891_vm9, %v885_v40  ;;  %19217 = vmatpush3.bf16.msra.mxu1 %v19214_v32 }
 0x2af   :  { %v19218_v51 = vpack.c.bf16 %v870_v18, %v865_v45  ;;  %v17456_v26 = vpop.f32.mrb[14].mxu1  ;;  %19237 = vmatpush3.bf16.msra.mxu0 %v19234_v21 }
 0x2b0   :  { %v880_v49 = vadd.f32 %v17456_v26, %v15896_v16  ;;  %v874_v42 = vpop.f32.mrb[15].mxu1  ;;  %19239 = vmatprep.subr.bf16.mxu0 %v19238_v39 }
 0x2b1   :  { %v875_v54 = vadd.f32 %v15896_v16, %v874_v42  ;;  %17477 = vmatmul.mubr.msk.f32.gmra.mrb[18].mxu0 %vm891_vm9, %v886_v47  ;;  %19219 = vmatprep.subr.bf16.mxu1 %v19218_v51  ;;  %v20868_v16 = vld [vmem:[#allocation2 + $0x440] sm:$0xff] }
 0x2b2   :  { %17479 = vmatprep.mubr.msk.f32.mxu0 %vm891_vm9, %v887_v24  ;;  %19221 = vmatpush3.bf16.msra.mxu1 %v19218_v51 }
 0x2b3   :  { %v19222_v48 = vpack.c.bf16 %v880_v49, %v875_v54  ;;  %19241 = vmatpush3.bf16.msra.mxu0 %v19238_v39 }
 0x2b5   :  { %17480 = vmatmul.mubr.msk.f32.gmra.mrb[20].mxu0 %vm891_vm9, %v888_v55  ;;  %19223 = vmatprep.subr.bf16.mxu1 %v19222_v48 }
 0x2b6   :  { %17482 = vmatprep.mubr.msk.f32.mxu0 %vm891_vm9, %v889_v13  ;;  %19225 = vmatpush3.bf16.msra.mxu1 %v19222_v48 }
 0x2b9   :  { %17483 = vmatmul.mubr.msk.f32.gmra.mrb[22].mxu0 %vm891_vm9, %v890_v7 }
 0x2ba   :  { %17541 = vmatprep.mubr.msk.f32.mxu0 %vm171_vm0, %v20694_v34 }
 0x2bd   :  { %17542 = vmatmul.mubr.msk.f32.vlgmr.msra.gmra.mrb[24].mxu0 %vm171_vm0, %v20699_v41 }
 0x2be   :  { %17544 = vmatprep.mubr.msk.f32.mxu0 %vm171_vm0, %v20720_v2 }
 0x2c1   :  { %17545 = vmatmul.mubr.msk.f32.gmra.mrb[26].mxu0 %vm171_vm0, %v20723_v9 }
 0x2c2   :  { %17547 = vmatprep.mubr.msk.f32.mxu0 %vm171_vm0, %v20741_v50 }
 0x2c5   :  { %17548 = vmatmul.mubr.msk.f32.gmra.mrb[28].mxu0 %vm171_vm0, %v20744_v1 }
 0x2c6   :  { %17550 = vmatprep.mubr.msk.f32.mxu0 %vm171_vm0, %v20758_v33 }
 0x2c9   :  { %17551 = vmatmul.mubr.msk.f32.gmra.mrb[30].mxu0 %vm171_vm0, %v20760_v44 }
 0x380   :  { %v17475_v60 = vpop.f32.mrb[16].mxu0 }
 0x381   :  { %v20847_v62 = vadd.f32 %v17475_v60, %v20842_v23  ;;  %v1006_v0 = vpop.f32.mrb[17].mxu0 }
 0x382   :  { %v20850_v8 = vadd.f32 %v1006_v0, %v20844_v58 }
 0x383   :  { %v1049_v30 = vsel %vm1045_vm11, %v20847_v62, -inf }
 0x384   :  { %1050 = vmax.xlane.f32.xlu0 %v1049_v30  ;;  %v17478_v10 = vpop.f32.mrb[18].mxu0  ;;  %v1046_v11 = vsel %vm1045_vm11, %v20850_v8, -inf }
 0x385   :  { %v20861_v43 = vadd.f32 %v17478_v10, %v20852_v17  ;;  %v1016_v14 = vpop.f32.mrb[19].mxu0  ;;  %1047 = vmax.xlane.f32.xlu1 %v1046_v11 }
 0x386   :  { %v20864_v15 = vadd.f32 %v1016_v14, %v20856_v46 }
 0x387   :  { %v1055_v19 = vsel %vm1045_vm11, %v20861_v43, -inf }
 0x388   :  { %v17481_v20 = vpop.f32.mrb[20].mxu0  ;;  %v1052_v21 = vsel %vm1045_vm11, %v20864_v15, -inf }
 0x389   :  { %v20875_v63 = vadd.f32 %v17481_v20, %v20866_v59  ;;  %v1026_v38 = vpop.f32.mrb[21].mxu0  ;;  %1053 = vmax.xlane.f32.xlu0 %v1052_v21  ;;  %1056 = vmax.xlane.f32.xlu1 %v1055_v19 }
 0x38a   :  { %v20878_v22 = vadd.f32 %v1026_v38, %v20868_v16 }
 0x38b   :  { %v1061_v25 = vsel %vm1045_vm11, %v20875_v63, -inf }
 0x38c   :  { %v17484_v27 = vpop.f32.mrb[22].mxu0  ;;  %v1058_v28 = vsel %vm1045_vm11, %v20878_v22, -inf }
 0x38d   :  { %v20889_v36 = vadd.f32 %v17484_v27, %v20880_v3  ;;  %1059 = vmax.xlane.f32.xlu0 %v1058_v28  ;;  %1062 = vmax.xlane.f32.xlu1 %v1061_v25  ;;  %v1036_v61 = vpop.f32.mrb[23].mxu0 }
 0x38e   :  { %v20892_v57 = vadd.f32 %v1036_v61, %v20884_v6 }
 0x38f   :  { %v1067_v12 = vsel %vm1045_vm11, %v20889_v36, -inf }
 0x390   :  { %v17543_v35 = vpop.f32.mrb[24].mxu0  ;;  %v1064_v32 = vsel %vm1045_vm11, %v20892_v57, -inf }
 0x391   :  { %v1460_v31 = vadd.f32 %v17543_v35, %v15938_v5  ;;  %1068 = vmax.xlane.f32.xlu1 %v1067_v12  ;;  %v1454_v40 = vpop.f32.mrb[25].mxu0  ;;  %1065 = vmax.xlane.f32.xlu0 %v1064_v32 }
 0x392   :  { %v1455_v37 = vadd.f32 %v15938_v5, %v1454_v40 }
 0x394   :  { %v19250_v18 = vpack.c.bf16 %v1460_v31, %v1455_v37  ;;  %v17546_v29 = vpop.f32.mrb[26].mxu0 }
 0x395   :  { %v1470_v39 = vadd.f32 %v17546_v29, %v15938_v5  ;;  %v1464_v45 = vpop.f32.mrb[27].mxu0 }
 0x396   :  { %v1465_v47 = vadd.f32 %v15938_v5, %v1464_v45  ;;  %19252 = vmatprep.subr.msk.bf16.mxu0 %vm20791_vm10, %v19250_v18 }
 0x397   :  { %19255 = vmatpush3.bf16.xpose.msk.msra.mxu0 %vm20791_vm10, %v19250_v18 }
 0x398   :  { %v19256_v4 = vpack.c.bf16 %v1470_v39, %v1465_v47  ;;  %v17549_v51 = vpop.f32.mrb[28].mxu0 }
 0x399   :  { %v1480_v26 = vadd.f32 %v17549_v51, %v15938_v5  ;;  %v1474_v24 = vpop.f32.mrb[29].mxu0 }
 0x39a   :  { %v1475_v53 = vadd.f32 %v15938_v5, %v1474_v24  ;;  %19258 = vmatprep.subr.msk.bf16.mxu0 %vm20791_vm10, %v19256_v4 }
 0x39c   :  { %v19262_v49 = vpack.c.bf16 %v1480_v26, %v1475_v53  ;;  %v17552_v42 = vpop.f32.mrb[30].mxu0  ;;  %v1265_v53 = vld [vmem:[#allocation2 + $0xc0] sm:$0xff] }
 0x39d   :  { %v1490_v54 = vadd.f32 %v17552_v42, %v15938_v5  ;;  %v1484_v55 = vpop.f32.mrb[31].mxu0 }
 0x39e   :  { %v1485_v56 = vadd.f32 %v15938_v5, %v1484_v55 }
 0x39f   :  { %19261 = vmatpush3.bf16.xpose.msk.msra.mxu0 %vm20791_vm10, %v19256_v4 }
 0x3a0   :  { %v19268_v48 = vpack.c.bf16 %v1490_v54, %v1485_v56  ;;  %19264 = vmatprep.subr.msk.bf16.mxu0 %vm20791_vm10, %v19262_v49 }
 0x3a7   :  { %19267 = vmatpush3.bf16.xpose.msk.msra.mxu0 %vm20791_vm10, %v19262_v49  ;;  %v1266_v49 = vld [vmem:[#allocation2 + $0xc8] sm:$0xff] }
 0x3a8   :  { %19270 = vmatprep.subr.msk.bf16.mxu0 %vm20791_vm10, %v19268_v48  ;;  %v19226_v42 = vpack.c.bf16 %v1266_v49, %v1265_v53 }
 0x3aa   :  { %19227 = vmatprep.subr.bf16.mxu1 %v19226_v42 }
 0x3af   :  { %19273 = vmatpush3.bf16.xpose.msk.msra.mxu0 %vm20791_vm10, %v19268_v48 }
 0x411   :  { %v1051_v13 = vpop.xlane.xlu0 %1050 }
 0x412   :  { %v1071_v7 = vsub.f32 %v20847_v62, %v1051_v13  ;;  %v1048_v60 = vpop.xlane.xlu1 %1047 }
 0x413   :  { %v1070_v0 = vsub.f32 %v20850_v8, %v1048_v60 }
 0x414   :  { %v1080_v30 = vmul.f32 1.442695, %v1071_v7 }
 0x415   :  { %v1078_v10 = vmul.f32 1.442695, %v1070_v0  ;;  %v1267_v0 = vld [vmem:[#allocation2 + $0xd0] sm:$0xff] }
 0x416   :  { %20044 = vpow2.f32 %v1080_v30  ;;  %v1054_v11 = vpop.xlane.xlu0 %1053  ;;  %v1057_v14 = vpop.xlane.xlu1 %1056  ;;  %v1268_v30 = vld [vmem:[#allocation2 + $0xd8] sm:$0xff] }
 0x417   :  { %20046 = vpow2.f32 %v1078_v10  ;;  %v1072_v19 = vsub.f32 %v20864_v15, %v1054_v11  ;;  %v1073_v20 = vsub.f32 %v20861_v43, %v1057_v14 }
 0x419   :  { %v1082_v21 = vmul.f32 1.442695, %v1072_v19  ;;  %v1084_v38 = vmul.f32 1.442695, %v1073_v20 }
 0x41a   :  { %v1060_v25 = vpop.xlane.xlu0 %1059  ;;  %v1063_v27 = vpop.xlane.xlu1 %1062 }
 0x41b   :  { %20048 = vpow2.f32 %v1082_v21  ;;  %v1074_v62 = vsub.f32 %v20878_v22, %v1060_v25  ;;  %v1075_v28 = vsub.f32 %v20875_v63, %v1063_v27  ;;  %v19230_v21 = vpack.c.bf16 %v1268_v30, %v1267_v0  ;;  %v1494_v25 = vld [vmem:[#allocation2 + $0x108] sm:$0xff] }
 0x41c   :  { %20050 = vpow2.f32 %v1084_v38  ;;  %v1493_v38 = vld [vmem:[#allocation2 + $0x100] sm:$0xff] }
 0x41d   :  { %v1086_v8 = vmul.f32 1.442695, %v1074_v62  ;;  %v1088_v61 = vmul.f32 1.442695, %v1075_v28 }
 0x41e   :  { %v1069_v5 = vpop.xlane.xlu1 %1068  ;;  %v1066_v12 = vpop.xlane.xlu0 %1065 }
 0x41f   :  { %20052 = vpow2.f32 %v1086_v8  ;;  %v1077_v35 = vsub.f32 %v20889_v36, %v1069_v5  ;;  %v1076_v15 = vsub.f32 %v20892_v57, %v1066_v12 }
 0x420   :  { %v20045_v43 = vpop.eup %20044  ;;  %20054 = vpow2.f32 %v1088_v61  ;;  %v19242_v61 = vpack.c.bf16 %v1494_v25, %v1493_v38 }
 0x421   :  { %v20047_v32 = vpop.eup %20046  ;;  %v1092_v31 = vmul.f32 1.442695, %v1077_v35  ;;  %v1090_v40 = vmul.f32 1.442695, %v1076_v15  ;;  %v1097_v37 = vsel %vm1045_vm11, %v20045_v43, 0.0 }
 0x422   :  { %1098 = vadd.xlane.f32.xlu1 %v1097_v37  ;;  %v1094_v63 = vsel %vm1045_vm11, %v20047_v32, 0.0  ;;  %v1495_v37 = vld [vmem:[#allocation2 + $0x110] sm:$0xff] }
 0x423   :  { %20056 = vpow2.f32 %v1092_v31  ;;  %1095 = vadd.xlane.f32.xlu0 %v1094_v63  ;;  %v1496_v63 = vld [vmem:[#allocation2 + $0x118] sm:$0xff] }
 0x424   :  { %20058 = vpow2.f32 %v1090_v40 }
 0x425   :  { %v20049_v22 = vpop.eup %20048 }
 0x426   :  { %v20051_v18 = vpop.eup %20050  ;;  %v1100_v29 = vsel %vm1045_vm11, %v20049_v22, 0.0 }
 0x427   :  { %v1103_v36 = vsel %vm1045_vm11, %v20051_v18, 0.0  ;;  %1101 = vadd.xlane.f32.xlu0 %v1100_v29 }
 0x428   :  { %1104 = vadd.xlane.f32.xlu1 %v1103_v36 }
 0x429   :  { %v20053_v57 = vpop.eup %20052 }
 0x42a   :  { %v20055_v39 = vpop.eup %20054  ;;  %v1106_v45 = vsel %vm1045_vm11, %v20053_v57, 0.0 }
 0x42b   :  { %v1109_v47 = vsel %vm1045_vm11, %v20055_v39, 0.0  ;;  %1107 = vadd.xlane.f32.xlu0 %v1106_v45 }
 0x42c   :  { %1110 = vadd.xlane.f32.xlu1 %v1109_v47 }
 0x42d   :  { %v20057_v4 = vpop.eup %20056 }
 0x42e   :  { %v20059_v51 = vpop.eup %20058  ;;  %v1115_v26 = vsel %vm1045_vm11, %v20057_v4, 0.0 }
 0x42f   :  { %v1112_v24 = vsel %vm1045_vm11, %v20059_v51, 0.0 }
 0x430   :  { %1116 = vadd.xlane.f32.xlu1 %v1115_v26  ;;  %1113 = vadd.xlane.f32.xlu0 %v1112_v24 }
 0x4af   :  { %v1099_v54 = vpop.xlane.xlu1 %1098 }
 0x4b0   :  { %20060 = vrcp.f32 %v1099_v54  ;;  %v1096_v55 = vpop.xlane.xlu0 %1095 }
 0x4b1   :  { %20062 = vrcp.f32 %v1096_v55 }
 0x4b4   :  { %v1102_v56 = vpop.xlane.xlu0 %1101 }
 0x4b5   :  { %v1105_v48 = vpop.xlane.xlu1 %1104  ;;  %20064 = vrcp.f32 %v1102_v56 }
 0x4b6   :  { %20066 = vrcp.f32 %v1105_v48 }
 0x4b8   :  { %v1108_v13 = vpop.xlane.xlu0 %1107 }
 0x4b9   :  { %v1111_v7 = vpop.xlane.xlu1 %1110  ;;  %20068 = vrcp.f32 %v1108_v13 }
 0x4ba   :  { %v20061_v60 = vpop.eup %20060  ;;  %20070 = vrcp.f32 %v1111_v7 }
 0x4bb   :  { %v20063_v10 = vpop.eup %20062  ;;  %v1127_v14 = vmul.f32 %v20061_v60, %v20045_v43 }
 0x4bc   :  { %v1126_v11 = vmul.f32 %v20063_v10, %v20047_v32 }
 0x4bd   :  { %v1117_v19 = vpop.xlane.xlu1 %1116  ;;  %v1114_v20 = vpop.xlane.xlu0 %1113 }
 0x4be   :  { %20072 = vrcp.f32 %v1117_v19  ;;  %17501 = vmatprep.mubr.msk.f32.mxu1 %vm1045_vm11, %v1126_v11 }
 0x4bf   :  { %v20065_v27 = vpop.eup %20064  ;;  %20074 = vrcp.f32 %v1114_v20  ;;  %17502 = vmatmul.mubr.msk.f32.vlgmr.msra.gmra.mrb[16].mxu1 %vm1045_vm11, %v1127_v14 }
 0x4c0   :  { %v20067_v62 = vpop.eup %20066  ;;  %19229 = vmatpush3.bf16.msra.mxu1 %v19226_v42  ;;  %v1128_v28 = vmul.f32 %v20065_v27, %v20049_v22  ;;  %v19246_v22 = vpack.c.bf16 %v1496_v63, %v1495_v37  ;;  %v15947_v27 = vld [vmem:[#allocation2 + $0x130] ss:$0 sm:$0xff] }
 0x4c1   :  { %v1129_v8 = vmul.f32 %v20067_v62, %v20051_v18  ;;  %19231 = vmatprep.subr.bf16.mxu1 %v19230_v21 }
 0x4c2   :  { %17504 = vmatprep.mubr.msk.f32.mxu1 %vm1045_vm11, %v1128_v28 }
 0x4c3   :  { %v20069_v5 = vpop.eup %20068  ;;  %17505 = vmatmul.mubr.msk.f32.gmra.mrb[18].mxu1 %vm1045_vm11, %v1129_v8 }
 0x4c4   :  { %v20071_v12 = vpop.eup %20070  ;;  %v1130_v35 = vmul.f32 %v20069_v5, %v20053_v57  ;;  %19233 = vmatpush3.bf16.msra.mxu1 %v19230_v21 }
 0x4c5   :  { %v1131_v15 = vmul.f32 %v20071_v12, %v20055_v39  ;;  %19243 = vmatprep.subr.bf16.mxu1 %v19242_v61 }
 0x4c6   :  { %17507 = vmatprep.mubr.msk.f32.mxu1 %vm1045_vm11, %v1130_v35 }
 0x4c7   :  { %17508 = vmatmul.mubr.msk.f32.gmra.mrb[20].mxu1 %vm1045_vm11, %v1131_v15 }
 0x4c8   :  { %v20073_v43 = vpop.eup %20072 }
 0x4c9   :  { %v20075_v32 = vpop.eup %20074  ;;  %v1133_v31 = vmul.f32 %v20073_v43, %v20057_v4 }
 0x4ca   :  { %v1132_v40 = vmul.f32 %v20075_v32, %v20059_v51  ;;  %v15929_v51 = vld [vmem:[#allocation2 + $0x120] ss:$0 sm:$0xff] }
 0x4cc   :  { %17510 = vmatprep.mubr.msk.f32.mxu1 %vm1045_vm11, %v1132_v40 }
 0x4cd   :  { %17511 = vmatmul.mubr.msk.f32.gmra.mrb[22].mxu1 %vm1045_vm11, %v1133_v31 }
 0x4ce   :  { %17521 = vmatprep.mubr.msk.f32.mxu1 %vm171_vm0, %v20694_v34 }
 0x4d1   :  { %17522 = vmatmul.mubr.msk.f32.vlgmr.msra.gmra.mrb[24].mxu1 %vm171_vm0, %v20699_v41 }
 0x4d2   :  { %17524 = vmatprep.mubr.msk.f32.mxu1 %vm171_vm0, %v20720_v2  ;;  %19245 = vmatpush3.bf16.msra.mxu1 %v19242_v61 }
 0x4d3   :  { %19247 = vmatprep.subr.bf16.mxu1 %v19246_v22 }
 0x4d5   :  { %17525 = vmatmul.mubr.msk.f32.gmra.mrb[26].mxu1 %vm171_vm0, %v20723_v9 }
 0x4d6   :  { %17527 = vmatprep.mubr.msk.f32.mxu1 %vm171_vm0, %v20741_v50  ;;  %19249 = vmatpush3.bf16.msra.mxu1 %v19246_v22 }
 0x4d9   :  { %17528 = vmatmul.mubr.msk.f32.gmra.mrb[28].mxu1 %vm171_vm0, %v20744_v1 }
 0x4da   :  { %17530 = vmatprep.mubr.msk.f32.mxu1 %vm171_vm0, %v20758_v33 }
 0x4dd   :  { %17531 = vmatmul.mubr.msk.f32.gmra.mrb[30].mxu1 %vm171_vm0, %v20760_v44 }
 0x4de   :  { %17561 = vmatprep.mubr.msk.f32.mxu1 %vm171_vm0, %v20694_v34 }
 0x4e1   :  { %17562 = vmatmul.mubr.msk.f32.vlgmr.msra.gmra.mrb[32].mxu1 %vm171_vm0, %v20699_v41 }
 0x4e2   :  { %17564 = vmatprep.mubr.msk.f32.mxu1 %vm171_vm0, %v20720_v2 }
 0x4e5   :  { %17565 = vmatmul.mubr.msk.f32.gmra.mrb[34].mxu1 %vm171_vm0, %v20723_v9 }
 0x4e6   :  { %17567 = vmatprep.mubr.msk.f32.mxu1 %vm171_vm0, %v20741_v50 }
 0x4e9   :  { %17568 = vmatmul.mubr.msk.f32.gmra.mrb[36].mxu1 %vm171_vm0, %v20744_v1 }
 0x4ea   :  { %17570 = vmatprep.mubr.msk.f32.mxu1 %vm171_vm0, %v20758_v33 }
 0x4ed   :  { %17571 = vmatmul.mubr.msk.f32.gmra.mrb[38].mxu1 %vm171_vm0, %v20760_v44 }
 0x592   :  { %v20970_v18 = vpop.f32.mrb[16].mxu1 }
 0x593   :  { %v20972_v29 = vpop.f32.mrb[17].mxu1 }
 0x596   :  { %v20974_v36 = vpop.f32.mrb[18].mxu1 }
 0x597   :  { %v20976_v57 = vpop.f32.mrb[19].mxu1 }
 0x59a   :  { %v20978_v39 = vpop.f32.mrb[20].mxu1 }
 0x59b   :  { %v20980_v45 = vpop.f32.mrb[21].mxu1 }
 0x5a0   :  { %v20982_v47 = vpop.f32.mrb[22].mxu1 }
 0x5a1   :  { %v20984_v4 = vpop.f32.mrb[23].mxu1 }
 0x5a4   :  { %v17523_v26 = vpop.f32.mrb[24].mxu1 }
 0x5a5   :  { %v1346_v24 = vadd.f32 %v17523_v26, %v15929_v51  ;;  %v1340_v53 = vpop.f32.mrb[25].mxu1 }
 0x5a6   :  { %v1341_v49 = vadd.f32 %v15929_v51, %v1340_v53 }
 0x5a7   :  { %v1608_v55 = vmul.f32 0.25, %v1346_v24 }
 0x5a8   :  { %v1607_v42 = vmul.f32 0.25, %v1341_v49  ;;  %v17526_v54 = vpop.f32.mrb[26].mxu1 }
 0x5a9   :  { %v1356_v56 = vadd.f32 %v17526_v54, %v15929_v51  ;;  %v1350_v48 = vpop.f32.mrb[27].mxu1 }
 0x5aa   :  { %v1351_v13 = vadd.f32 %v15929_v51, %v1350_v48  ;;  %17589 = vmatprep.mubr.msk.f32.mxu0 %vm891_vm9, %v1607_v42 }
 0x5ab   :  { %17590 = vmatmul.mubr.msk.f32.vlgmr.msra.gmra.mrb[32].mxu0 %vm891_vm9, %v1608_v55  ;;  %v1610_v0 = vmul.f32 0.25, %v1356_v56 }
 0x5ac   :  { %v1609_v7 = vmul.f32 0.25, %v1351_v13  ;;  %v17529_v60 = vpop.f32.mrb[28].mxu1 }
 0x5ad   :  { %v1366_v30 = vadd.f32 %v17529_v60, %v15929_v51  ;;  %v1360_v10 = vpop.f32.mrb[29].mxu1 }
 0x5ae   :  { %v1361_v11 = vadd.f32 %v15929_v51, %v1360_v10  ;;  %17592 = vmatprep.mubr.msk.f32.mxu0 %vm891_vm9, %v1609_v7 }
 0x5af   :  { %17593 = vmatmul.mubr.msk.f32.gmra.mrb[34].mxu0 %vm891_vm9, %v1610_v0  ;;  %v1612_v20 = vmul.f32 0.25, %v1366_v30 }
 0x5b0   :  { %v1611_v14 = vmul.f32 0.25, %v1361_v11  ;;  %v17532_v19 = vpop.f32.mrb[30].mxu1 }
 0x5b1   :  { %v1376_v21 = vadd.f32 %v17532_v19, %v15929_v51  ;;  %v1370_v38 = vpop.f32.mrb[31].mxu1 }
 0x5b2   :  { %v1371_v25 = vadd.f32 %v15929_v51, %v1370_v38  ;;  %17595 = vmatprep.mubr.msk.f32.mxu0 %vm891_vm9, %v1611_v14 }
 0x5b3   :  { %17596 = vmatmul.mubr.msk.f32.gmra.mrb[36].mxu0 %vm891_vm9, %v1612_v20  ;;  %v1614_v8 = vmul.f32 0.25, %v1376_v21 }
 0x5b4   :  { %v1613_v62 = vmul.f32 0.25, %v1371_v25  ;;  %v17563_v28 = vpop.f32.mrb[32].mxu1 }
 0x5b5   :  { %v1574_v61 = vadd.f32 %v17563_v28, %v15947_v27  ;;  %v1568_v5 = vpop.f32.mrb[33].mxu1 }
 0x5b6   :  { %v1569_v12 = vadd.f32 %v15947_v27, %v1568_v5  ;;  %17598 = vmatprep.mubr.msk.f32.mxu0 %vm891_vm9, %v1613_v62 }
 0x5b7   :  { %17599 = vmatmul.mubr.msk.f32.gmra.mrb[38].mxu0 %vm891_vm9, %v1614_v8 }
 0x5b8   :  { %v19274_v35 = vpack.c.bf16 %v1574_v61, %v1569_v12  ;;  %v17566_v15 = vpop.f32.mrb[34].mxu1 }
 0x5b9   :  { %v1584_v43 = vadd.f32 %v17566_v15, %v15947_v27  ;;  %v1578_v32 = vpop.f32.mrb[35].mxu1 }
 0x5ba   :  { %v1579_v31 = vadd.f32 %v15947_v27, %v1578_v32  ;;  %19275 = vmatprep.subr.bf16.mxu1 %v19274_v35 }
 0x5bb   :  { %19277 = vmatpush3.bf16.msra.mxu1 %v19274_v35 }
 0x5bc   :  { %v19278_v40 = vpack.c.bf16 %v1584_v43, %v1579_v31  ;;  %v17569_v37 = vpop.f32.mrb[36].mxu1 }
 0x5bd   :  { %v1594_v63 = vadd.f32 %v17569_v37, %v15947_v27  ;;  %v1588_v22 = vpop.f32.mrb[37].mxu1 }
 0x5be   :  { %v1589_v51 = vadd.f32 %v15947_v27, %v1588_v22  ;;  %19279 = vmatprep.subr.bf16.mxu1 %v19278_v40 }
 0x5bf   :  { %19281 = vmatpush3.bf16.msra.mxu1 %v19278_v40 }
 0x5c0   :  { %v19282_v26 = vpack.c.bf16 %v1594_v63, %v1589_v51  ;;  %v17572_v24 = vpop.f32.mrb[38].mxu1 }
 0x5c1   :  { %v1604_v53 = vadd.f32 %v17572_v24, %v15947_v27  ;;  %v1598_v49 = vpop.f32.mrb[39].mxu1 }
 0x5c2   :  { %v1599_v42 = vadd.f32 %v15947_v27, %v1598_v49  ;;  %19283 = vmatprep.subr.bf16.mxu1 %v19282_v26 }
 0x5c3   :  { %19285 = vmatpush3.bf16.msra.mxu1 %v19282_v26 }
 0x5c4   :  { %v19286_v54 = vpack.c.bf16 %v1604_v53, %v1599_v42 }
 0x5c6   :  { %19287 = vmatprep.subr.bf16.mxu1 %v19286_v54 }
 0x5c7   :  { %19289 = vmatpush3.bf16.msra.mxu1 %v19286_v54 }
 0x67e   :  { %v17591_v55 = vpop.f32.mrb[32].mxu0 }
 0x67f   :  { %v1735_v56 = vadd.f32 %v17591_v55, %v20842_v23  ;;  %v1729_v48 = vpop.f32.mrb[33].mxu0 }
 0x680   :  { %v1730_v13 = vadd.f32 %v1729_v48, %v20844_v58 }
 0x681   :  { %v1771_v7 = vsel %vm1045_vm11, %v1735_v56, -inf }
 0x682   :  { %1772 = vmax.xlane.f32.xlu1 %v1771_v7  ;;  %v17594_v60 = vpop.f32.mrb[34].mxu0  ;;  %v1768_v0 = vsel %vm1045_vm11, %v1730_v13, -inf }
 0x683   :  { %v1745_v30 = vadd.f32 %v17594_v60, %v20852_v17  ;;  %v1739_v10 = vpop.f32.mrb[35].mxu0  ;;  %1769 = vmax.xlane.f32.xlu0 %v1768_v0 }
 0x684   :  { %v1740_v11 = vadd.f32 %v1739_v10, %v20856_v46 }
 0x685   :  { %v1777_v14 = vsel %vm1045_vm11, %v1745_v30, -inf }
 0x686   :  { %1778 = vmax.xlane.f32.xlu1 %v1777_v14  ;;  %v17597_v19 = vpop.f32.mrb[36].mxu0  ;;  %v1774_v23 = vsel %vm1045_vm11, %v1740_v11, -inf }
 0x687   :  { %v1755_v58 = vadd.f32 %v17597_v19, %v20866_v59  ;;  %v1749_v20 = vpop.f32.mrb[37].mxu0  ;;  %1775 = vmax.xlane.f32.xlu0 %v1774_v23 }
 0x688   :  { %v1750_v21 = vadd.f32 %v1749_v20, %v20868_v16 }
 0x689   :  { %v1783_v38 = vsel %vm1045_vm11, %v1755_v58, -inf }
 0x68a   :  { %1784 = vmax.xlane.f32.xlu1 %v1783_v38  ;;  %v17600_v17 = vpop.f32.mrb[38].mxu0  ;;  %v1780_v25 = vsel %vm1045_vm11, %v1750_v21, -inf }
 0x68b   :  { %v1765_v46 = vadd.f32 %v17600_v17, %v20880_v3  ;;  %v1759_v27 = vpop.f32.mrb[39].mxu0  ;;  %1781 = vmax.xlane.f32.xlu0 %v1780_v25  ;;  %v1985_v17 = vld [vmem:[#allocation2 + $0x138] sm:$0xff]  ;;  %v1986_v25 = vld [vmem:[#allocation2 + $0x140] sm:$0xff] }
 0x68c   :  { %v1760_v62 = vadd.f32 %v1759_v27, %v20884_v6 }
 0x68d   :  { %v1789_v28 = vsel %vm1045_vm11, %v1765_v46, -inf }
 0x68e   :  { %1790 = vmax.xlane.f32.xlu1 %v1789_v28  ;;  %v1786_v59 = vsel %vm1045_vm11, %v1760_v62, -inf }
 0x68f   :  { %1787 = vmax.xlane.f32.xlu0 %v1786_v59 }
 0x70f   :  { %v1773_v8 = vpop.xlane.xlu1 %1772 }
 0x710   :  { %v1793_v16 = vsub.f32 %v1735_v56, %v1773_v8  ;;  %v1770_v61 = vpop.xlane.xlu0 %1769 }
 0x711   :  { %v1792_v5 = vsub.f32 %v1730_v13, %v1770_v61 }
 0x712   :  { %v1802_v12 = vmul.f32 1.442695, %v1793_v16 }
 0x713   :  { %v1800_v35 = vmul.f32 1.442695, %v1792_v5  ;;  %v1779_v15 = vpop.xlane.xlu1 %1778 }
 0x714   :  { %20076 = vpow2.f32 %v1802_v12  ;;  %v1795_v43 = vsub.f32 %v1745_v30, %v1779_v15  ;;  %v1776_v3 = vpop.xlane.xlu0 %1775 }
 0x715   :  { %20078 = vpow2.f32 %v1800_v35  ;;  %v1794_v32 = vsub.f32 %v1740_v11, %v1776_v3 }
 0x716   :  { %v1806_v31 = vmul.f32 1.442695, %v1795_v43 }
 0x717   :  { %v1804_v6 = vmul.f32 1.442695, %v1794_v32  ;;  %v1785_v40 = vpop.xlane.xlu1 %1784 }
 0x718   :  { %20080 = vpow2.f32 %v1806_v31  ;;  %v1797_v37 = vsub.f32 %v1755_v58, %v1785_v40  ;;  %v1782_v63 = vpop.xlane.xlu0 %1781 }
 0x719   :  { %20082 = vpow2.f32 %v1804_v6  ;;  %v1796_v22 = vsub.f32 %v1750_v21, %v1782_v63 }
 0x71a   :  { %v1810_v51 = vmul.f32 1.442695, %v1797_v37 }
 0x71b   :  { %v1808_v26 = vmul.f32 1.442695, %v1796_v22  ;;  %v1791_v24 = vpop.xlane.xlu1 %1790 }
 0x71c   :  { %20084 = vpow2.f32 %v1810_v51  ;;  %v1799_v53 = vsub.f32 %v1765_v46, %v1791_v24  ;;  %v1788_v49 = vpop.xlane.xlu0 %1787  ;;  %v19290_v46 = vpack.c.bf16 %v1986_v25, %v1985_v17 }
 0x71d   :  { %20086 = vpow2.f32 %v1808_v26  ;;  %v1798_v42 = vsub.f32 %v1760_v62, %v1788_v49  ;;  %v1263_v49 = vld [vmem:[#allocation2 + $0xb0] sm:$0xff] }
 0x71e   :  { %v20077_v54 = vpop.eup %20076  ;;  %v1814_v55 = vmul.f32 1.442695, %v1799_v53  ;;  %19291 = vmatprep.subr.bf16.mxu1 %v19290_v46 }
 0x71f   :  { %v20079_v56 = vpop.eup %20078  ;;  %v1812_v48 = vmul.f32 1.442695, %v1798_v42  ;;  %v1819_v13 = vsel %vm1045_vm11, %v20077_v54, 0.0  ;;  %v1264_v42 = vld [vmem:[#allocation2 + $0xb8] sm:$0xff] }
 0x720   :  { %20088 = vpow2.f32 %v1814_v55  ;;  %1820 = vadd.xlane.f32.xlu1 %v1819_v13  ;;  %v1816_v7 = vsel %vm1045_vm11, %v20079_v56, 0.0  ;;  %v2266_v55 = vld [vmem:[#allocation2 + $0x150] sm:$0xff] }
 0x721   :  { %20090 = vpow2.f32 %v1812_v48  ;;  %1817 = vadd.xlane.f32.xlu0 %v1816_v7  ;;  %v2268_v48 = vld [vmem:[#allocation2 + $0x160] sm:$0xff]  ;;  %v2269_v7 = vld [vmem:[#allocation2 + $0x168] sm:$0xff] }
 0x722   :  { %v20081_v60 = vpop.eup %20080 }
 0x723   :  { %v20083_v0 = vpop.eup %20082  ;;  %v1825_v30 = vsel %vm1045_vm11, %v20081_v60, 0.0 }
 0x724   :  { %1826 = vadd.xlane.f32.xlu1 %v1825_v30  ;;  %v1822_v10 = vsel %vm1045_vm11, %v20083_v0, 0.0 }
 0x725   :  { %1823 = vadd.xlane.f32.xlu0 %v1822_v10 }
 0x726   :  { %v20085_v11 = vpop.eup %20084 }
 0x727   :  { %v20087_v14 = vpop.eup %20086  ;;  %v1831_v19 = vsel %vm1045_vm11, %v20085_v11, 0.0 }
 0x728   :  { %1832 = vadd.xlane.f32.xlu1 %v1831_v19  ;;  %v1828_v23 = vsel %vm1045_vm11, %v20087_v14, 0.0 }
 0x729   :  { %1829 = vadd.xlane.f32.xlu0 %v1828_v23 }
 0x72a   :  { %v20089_v58 = vpop.eup %20088 }
 0x72b   :  { %v20091_v20 = vpop.eup %20090  ;;  %v1837_v21 = vsel %vm1045_vm11, %v20089_v58, 0.0 }
 0x72c   :  { %1838 = vadd.xlane.f32.xlu1 %v1837_v21  ;;  %v1834_v38 = vsel %vm1045_vm11, %v20091_v20, 0.0 }
 0x72d   :  { %1835 = vadd.xlane.f32.xlu0 %v1834_v38 }
 0x7ad   :  { %v1821_v27 = vpop.xlane.xlu1 %1820 }
 0x7ae   :  { %20092 = vrcp.f32 %v1821_v27  ;;  %v1818_v62 = vpop.xlane.xlu0 %1817 }
 0x7af   :  { %20094 = vrcp.f32 %v1818_v62 }
 0x7b1   :  { %v1827_v28 = vpop.xlane.xlu1 %1826 }
 0x7b2   :  { %20096 = vrcp.f32 %v1827_v28  ;;  %v1824_v59 = vpop.xlane.xlu0 %1823 }
 0x7b3   :  { %20098 = vrcp.f32 %v1824_v59 }
 0x7b5   :  { %v1833_v8 = vpop.xlane.xlu1 %1832 }
 0x7b6   :  { %20100 = vrcp.f32 %v1833_v8  ;;  %v1830_v16 = vpop.xlane.xlu0 %1829 }
 0x7b7   :  { %20102 = vrcp.f32 %v1830_v16  ;;  %v2767_v16 = vld [vmem:[#allocation2 + $0x1a0] sm:$0xff] }
 0x7b8   :  { %v20093_v61 = vpop.eup %20092 }
 0x7b9   :  { %v20095_v5 = vpop.eup %20094  ;;  %v1839_v12 = vpop.xlane.xlu1 %1838  ;;  %v1849_v43 = vmul.f32 %v20093_v61, %v20077_v54  ;;  %v19294_v54 = vpack.c.bf16 %v1264_v42, %v1263_v49  ;;  %v2628_v61 = vld [vmem:[#allocation2 + $0x178] sm:$0xff] }
 0x7ba   :  { %20104 = vrcp.f32 %v1839_v12  ;;  %v1836_v35 = vpop.xlane.xlu0 %1835  ;;  %v1848_v15 = vmul.f32 %v20095_v5, %v20079_v56  ;;  %v2267_v56 = vld [vmem:[#allocation2 + $0x158] sm:$0xff]  ;;  %v2629_v5 = vld [vmem:[#allocation2 + $0x180] sm:$0xff] }
 0x7bb   :  { %20106 = vrcp.f32 %v1836_v35  ;;  %v19298_v13 = vpack.c.bf16 %v2267_v56, %v2266_v55  ;;  %v19306_v12 = vpack.c.bf16 %v2629_v5, %v2628_v61  ;;  %v2768_v35 = vld [vmem:[#allocation2 + $0x1a8] sm:$0xff] }
 0x7bc   :  { %v20097_v3 = vpop.eup %20096  ;;  %17617 = vmatprep.mubr.msk.f32.mxu1 %vm1045_vm11, %v1848_v15  ;;  %v2769_v15 = vld [vmem:[#allocation2 + $0x1b0] sm:$0xff] }
 0x7bd   :  { %v20099_v32 = vpop.eup %20098  ;;  %17618 = vmatmul.mubr.msk.f32.vlgmr.msra.gmra.mrb[40].mxu1 %vm1045_vm11, %v1849_v43  ;;  %v1851_v6 = vmul.f32 %v20097_v3, %v20081_v60  ;;  %v19302_v60 = vpack.c.bf16 %v2269_v7, %v2268_v48  ;;  %19299 = vmatprep.subr.bf16.mxu0 %v19298_v13  ;;  %v2630_v43 = vld [vmem:[#allocation2 + $0x188] sm:$0xff]  ;;  %v19318_v3 = vpack.c.bf16 %v2769_v15, %v2768_v35 }
 0x7be   :  { %v1850_v31 = vmul.f32 %v20099_v32, %v20083_v0  ;;  %19293 = vmatpush3.bf16.msra.mxu1 %v19290_v46  ;;  %19301 = vmatpush3.bf16.msra.mxu0 %v19298_v13  ;;  %v2631_v32 = vld [vmem:[#allocation2 + $0x190] sm:$0xff] }
 0x7bf   :  { %19295 = vmatprep.subr.bf16.mxu1 %v19294_v54  ;;  %19303 = vmatprep.subr.bf16.mxu0 %v19302_v60 }
 0x7c0   :  { %v20101_v40 = vpop.eup %20100  ;;  %17620 = vmatprep.mubr.msk.f32.mxu1 %vm1045_vm11, %v1850_v31  ;;  %v19310_v31 = vpack.c.bf16 %v2631_v32, %v2630_v43 }
 0x7c1   :  { %v20103_v37 = vpop.eup %20102  ;;  %17621 = vmatmul.mubr.msk.f32.gmra.mrb[42].mxu1 %vm1045_vm11, %v1851_v6  ;;  %v1853_v22 = vmul.f32 %v20101_v40, %v20085_v11  ;;  %v2880_v6 = vld [vmem:[#allocation2 + $0x1b8] sm:$0xff]  ;;  %v2881_v40 = vld [vmem:[#allocation2 + $0x1c0] sm:$0xff] }
 0x7c2   :  { %v1852_v63 = vmul.f32 %v20103_v37, %v20087_v14  ;;  %19305 = vmatpush3.bf16.msra.mxu0 %v19302_v60  ;;  %v21078_v37 = vpack.c.bf16 %v2881_v40, %v2880_v6 }
 0x7c3   :  { %19307 = vmatprep.subr.bf16.mxu0 %v19306_v12 }
 0x7c4   :  { %v20105_v51 = vpop.eup %20104  ;;  %17623 = vmatprep.mubr.msk.f32.mxu1 %vm1045_vm11, %v1852_v63 }
 0x7c5   :  { %v20107_v26 = vpop.eup %20106  ;;  %17624 = vmatmul.mubr.msk.f32.gmra.mrb[44].mxu1 %vm1045_vm11, %v1853_v22  ;;  %v1855_v53 = vmul.f32 %v20105_v51, %v20089_v58  ;;  %v16005_v22 = vld [vmem:[#allocation2 + $0x170] ss:$0 sm:$0xff] }
 0x7c6   :  { %v1854_v24 = vmul.f32 %v20107_v26, %v20091_v20  ;;  %v15996_v20 = vld [vmem:[#allocation2 + $0x148] ss:$0 sm:$0xff] }
 0x7c8   :  { %17626 = vmatprep.mubr.msk.f32.mxu1 %vm1045_vm11, %v1854_v24 }
 0x7c9   :  { %17627 = vmatmul.mubr.msk.f32.gmra.mrb[46].mxu1 %vm1045_vm11, %v1855_v53 }
 0x890   :  { %v17619_v0 = vpop.f32.mrb[40].mxu1 }
 0x891   :  { %v1946_v30 = vpop.f32.mrb[41].mxu1 }
 0x892   :  { %17633 = vmatprep.mubr.msk.f32.mxu1 %vm891_vm9, %v1946_v30 }
 0x893   :  { %17634 = vmatmul.mubr.msk.f32.vlgmr.msra.gmra.mrb[48].mxu1 %vm891_vm9, %v17619_v0 }
 0x894   :  { %v17622_v10 = vpop.f32.mrb[42].mxu1  ;;  %19297 = vmatpush3.bf16.msra.mxu1 %v19294_v54 }
 0x895   :  { %v1956_v11 = vpop.f32.mrb[43].mxu1 }
 0x896   :  { %17636 = vmatprep.mubr.msk.f32.mxu1 %vm891_vm9, %v1956_v11 }
 0x897   :  { %17637 = vmatmul.mubr.msk.f32.gmra.mrb[50].mxu1 %vm891_vm9, %v17622_v10 }
 0x898   :  { %v17625_v14 = vpop.f32.mrb[44].mxu1 }
 0x899   :  { %v1966_v19 = vpop.f32.mrb[45].mxu1 }
 0x89a   :  { %17639 = vmatprep.mubr.msk.f32.mxu1 %vm891_vm9, %v1966_v19 }
 0x89b   :  { %17640 = vmatmul.mubr.msk.f32.gmra.mrb[52].mxu1 %vm891_vm9, %v17625_v14 }
 0x89c   :  { %v17628_v23 = vpop.f32.mrb[46].mxu1 }
 0x89d   :  { %v1976_v58 = vpop.f32.mrb[47].mxu1 }
 0x89e   :  { %17642 = vmatprep.mubr.msk.f32.mxu1 %vm891_vm9, %v1976_v58 }
 0x89f   :  { %17643 = vmatmul.mubr.msk.f32.gmra.mrb[54].mxu1 %vm891_vm9, %v17628_v23 }
 0x8a0   :  { %17649 = vmatprep.mubr.msk.f32.mxu1 %vm891_vm9, %v20972_v29 }
 0x8a3   :  { %17650 = vmatmul.mubr.msk.f32.vlgmr.msra.gmra.mrb[48].mxu1 %vm891_vm9, %v20970_v18 }
 0x8a4   :  { %17652 = vmatprep.mubr.msk.f32.mxu1 %vm891_vm9, %v20976_v57 }
 0x8a7   :  { %17653 = vmatmul.mubr.msk.f32.gmra.mrb[50].mxu1 %vm891_vm9, %v20974_v36 }
 0x8a8   :  { %17655 = vmatprep.mubr.msk.f32.mxu1 %vm891_vm9, %v20980_v45 }
 0x8ab   :  { %17656 = vmatmul.mubr.msk.f32.gmra.mrb[52].mxu1 %vm891_vm9, %v20978_v39 }
 0x8ac   :  { %17658 = vmatprep.mubr.msk.f32.mxu1 %vm891_vm9, %v20984_v4 }
 0x8af   :  { %17659 = vmatmul.mubr.msk.f32.gmra.mrb[54].mxu1 %vm891_vm9, %v20982_v47 }
 0x976   :  { %v17651_v29 = vpop.f32.mrb[48].mxu1 }
 0x977   :  { %v2246_v18 = vadd.f32 %v17651_v29, %v20699_v41  ;;  %v2206_v57 = vpop.f32.mrb[49].mxu1 }
 0x978   :  { %v2245_v21 = vadd.f32 %v2206_v57, %v20694_v34 }
 0x979   :  { %v2259_v17 = vadd.f32 %v15996_v20, %v2246_v18 }
 0x97a   :  { %v2258_v36 = vadd.f32 %v15996_v20, %v2245_v21  ;;  %v17654_v38 = vpop.f32.mrb[50].mxu1 }
 0x97b   :  { %v2248_v45 = vadd.f32 %v17654_v38, %v20723_v9  ;;  %v2216_v25 = vpop.f32.mrb[51].mxu1 }
 0x97c   :  { %v2247_v39 = vadd.f32 %v2216_v25, %v20720_v2  ;;  %17669 = vmatprep.mubr.msk.f32.mxu0 %vm171_vm0, %v2258_v36 }
 0x97d   :  { %17670 = vmatmul.mubr.msk.f32.vlgmr.msra.gmra.mrb[40].mxu0 %vm171_vm0, %v2259_v17  ;;  %v2261_v46 = vadd.f32 %v15996_v20, %v2248_v45 }
 0x97e   :  { %v2260_v47 = vadd.f32 %v15996_v20, %v2247_v39  ;;  %v17657_v4 = vpop.f32.mrb[52].mxu1  ;;  %19309 = vmatpush3.bf16.msra.mxu0 %v19306_v12 }
 0x97f   :  { %v2250_v41 = vadd.f32 %v17657_v4, %v20744_v1  ;;  %v2226_v27 = vpop.f32.mrb[53].mxu1  ;;  %19311 = vmatprep.subr.bf16.mxu0 %v19310_v31 }
 0x980   :  { %v2249_v34 = vadd.f32 %v2226_v27, %v20741_v50  ;;  %17672 = vmatprep.mubr.msk.f32.mxu0 %vm171_vm0, %v2260_v47 }
 0x981   :  { %17673 = vmatmul.mubr.msk.f32.gmra.mrb[42].mxu0 %vm171_vm0, %v2261_v46  ;;  %v21062_v2 = vadd.f32 %v15996_v20, %v2250_v41 }
 0x982   :  { %v21060_v9 = vadd.f32 %v15996_v20, %v2249_v34  ;;  %v17660_v62 = vpop.f32.mrb[54].mxu1  ;;  %19313 = vmatpush3.bf16.msra.mxu0 %v19310_v31 }
 0x983   :  { %v2252_v28 = vadd.f32 %v17660_v62, %v20760_v44  ;;  %v2236_v59 = vpop.f32.mrb[55].mxu1  ;;  %v2766_v44 = vld [vmem:[#allocation2 + $0x198] sm:$0xff]  ;;  %19323 = vmatprep.subr.bf16.mxu0 %v21078_v37 }
 0x984   :  { %v2251_v8 = vadd.f32 %v2236_v59, %v20758_v33  ;;  %17675 = vmatprep.mubr.msk.f32.mxu0 %vm171_vm0, %v21060_v9  ;;  %v19314_v33 = vpack.c.bf16 %v2767_v16, %v2766_v44 }
 0x985   :  { %17676 = vmatmul.mubr.msk.f32.gmra.mrb[44].mxu0 %vm171_vm0, %v21062_v2  ;;  %v21072_v1 = vadd.f32 %v15996_v20, %v2252_v28 }
 0x986   :  { %v21070_v50 = vadd.f32 %v15996_v20, %v2251_v8  ;;  %19315 = vmatprep.subr.bf16.mxu1 %v19314_v33 }
 0x987   :  { %19317 = vmatpush3.bf16.msra.mxu1 %v19314_v33 }
 0x988   :  { %17678 = vmatprep.mubr.msk.f32.mxu0 %vm171_vm0, %v21070_v50  ;;  %19319 = vmatprep.subr.bf16.mxu1 %v19318_v3 }
 0x989   :  { %17679 = vmatmul.mubr.msk.f32.gmra.mrb[46].mxu0 %vm171_vm0, %v21072_v1 }
 0x98b   :  { %19321 = vmatpush3.bf16.msra.mxu1 %v19318_v3 }
 0xa50   :  { %v17671_v63 = vpop.f32.mrb[40].mxu0 }
 0xa51   :  { %v2400_v51 = vadd.f32 %v17671_v63, %v2259_v17  ;;  %v2360_v26 = vpop.f32.mrb[41].mxu0 }
 0xa52   :  { %v2399_v24 = vadd.f32 %v2360_v26, %v2258_v36 }
 0xa53   :  { %v2413_v53 = vadd.f32 %v16005_v22, %v2400_v51 }
 0xa54   :  { %v21081_v49 = vadd.f32 %v16005_v22, %v2399_v24  ;;  %v17674_v42 = vpop.f32.mrb[42].mxu0 }
 0xa55   :  { %v21083_v54 = vmul.f32 0.70710677, %v2413_v53  ;;  %v2402_v55 = vadd.f32 %v17674_v42, %v2261_v46  ;;  %v2370_v56 = vpop.f32.mrb[43].mxu0  ;;  %v21122_v5 = vmul.f32 0.5, %v2413_v53 }
 0xa56   :  { %v21086_v48 = vmul.f32 0.70710677, %v21081_v49  ;;  %v2401_v13 = vadd.f32 %v2370_v56, %v2260_v47 }
 0xa57   :  { %v2437_v7 = vand.u32 2147483647, %v21083_v54  ;;  %v21089_v60 = vadd.f32 %v16005_v22, %v2402_v55  ;;  %vm2589_vm12 = vcmp.ge.f32.partialorder %v21083_v54, 0.0 }
 0xa58   :  { %v2436_v0 = vand.u32 2147483647, %v21086_v48  ;;  %v21092_v30 = vadd.f32 %v16005_v22, %v2401_v13  ;;  %v17677_v10 = vpop.f32.mrb[44].mxu0  ;;  %vm2588_vm13 = vcmp.ge.f32.partialorder %v21086_v48, 0.0 }
 0xa59   :  { %v2445_v11 = vmul.f32 0.3275911, %v2437_v7  ;;  %v21095_v14 = vmul.f32 0.70710677, %v21089_v60  ;;  %v2380_v18 = vpop.f32.mrb[45].mxu0  ;;  %v2541_v17 = vsub.f32 0.0, %v2437_v7  ;;  %v2404_v47 = vadd.f32 %v17677_v10, %v21062_v2 }
 0xa5a   :  { %v2444_v19 = vmul.f32 0.3275911, %v2436_v0  ;;  %v21098_v23 = vmul.f32 0.70710677, %v21092_v30  ;;  %v2540_v25 = vsub.f32 0.0, %v2436_v0  ;;  %v2403_v41 = vadd.f32 %v2380_v18, %v21060_v9 }
 0xa5b   :  { %v2453_v58 = vadd.f32 1.0, %v2445_v11  ;;  %v2439_v29 = vand.u32 2147483647, %v21095_v14  ;;  %v21104_v27 = vadd.f32 %v16005_v22, %v2404_v47  ;;  %v2549_v62 = vmul.f32 %v2541_v17, %v2437_v7 }
 0xa5c   :  { %v2452_v20 = vadd.f32 1.0, %v2444_v19  ;;  %v2438_v57 = vand.u32 2147483647, %v21098_v23  ;;  %v17680_v21 = vpop.f32.mrb[46].mxu0  ;;  %v21107_v28 = vadd.f32 %v16005_v22, %v2403_v41  ;;  %v2548_v8 = vmul.f32 %v2540_v25, %v2436_v0 }
 0xa5d   :  { %20108 = vrcp.f32 %v2453_v58  ;;  %v2447_v36 = vmul.f32 0.3275911, %v2439_v29  ;;  %v2390_v38 = vpop.f32.mrb[47].mxu0  ;;  %v2543_v4 = vsub.f32 0.0, %v2439_v29  ;;  %v2406_v34 = vadd.f32 %v17680_v21, %v21072_v1 }
 0xa5e   :  { %20110 = vrcp.f32 %v2452_v20  ;;  %v2446_v45 = vmul.f32 0.3275911, %v2438_v57  ;;  %v2405_v59 = vadd.f32 %v2390_v38, %v21070_v50  ;;  %v21111_v44 = vmul.f32 0.70710677, %v21104_v27 }
 0xa5f   :  { %v2455_v39 = vadd.f32 1.0, %v2447_v36  ;;  %v21113_v2 = vadd.f32 %v16005_v22, %v2406_v34  ;;  %v2551_v16 = vmul.f32 %v2543_v4, %v2439_v29  ;;  %v21116_v9 = vmul.f32 0.70710677, %v21107_v28 }
 0xa60   :  { %v2454_v46 = vadd.f32 1.0, %v2446_v45  ;;  %v2542_v61 = vsub.f32 0.0, %v2438_v57  ;;  %v2441_v33 = vand.u32 2147483647, %v21111_v44  ;;  %v2558_v12 = vmul.f32 1.442695, %v2549_v62 }
 0xa61   :  { %20112 = vrcp.f32 %v2455_v39  ;;  %v21120_v1 = vmul.f32 0.70710677, %v21113_v2  ;;  %v2440_v50 = vand.u32 2147483647, %v21116_v9  ;;  %v21125_v35 = vadd.f32 %v16005_v22, %v2405_v59 }
 0xa62   :  { %20114 = vrcp.f32 %v2454_v46  ;;  %v2556_v43 = vmul.f32 1.442695, %v2548_v8  ;;  %v2449_v3 = vmul.f32 0.3275911, %v2441_v33  ;;  %v2562_v40 = vmul.f32 1.442695, %v2551_v16 }
 0xa63   :  { %v2443_v32 = vand.u32 2147483647, %v21120_v1  ;;  %v2448_v63 = vmul.f32 0.3275911, %v2440_v50  ;;  %v2550_v26 = vmul.f32 %v2542_v61, %v2438_v57  ;;  %20116 = vpow2.f32 %v2558_v12  ;;  %v2882_v8 = vld [vmem:[#allocation2 + $0x1c8] sm:$0xff]  ;;  %v2883_v12 = vld [vmem:[#allocation2 + $0x1d0] sm:$0xff] }
 0xa64   :  { %v2457_v24 = vadd.f32 1.0, %v2449_v3  ;;  %v21135_v55 = vmul.f32 0.70710677, %v21125_v35  ;;  %v2545_v7 = vsub.f32 0.0, %v2441_v33  ;;  %v2544_v58 = vsub.f32 0.0, %v2440_v50 }
 0xa65   :  { %v2451_v53 = vmul.f32 0.3275911, %v2443_v32  ;;  %v2456_v22 = vadd.f32 1.0, %v2448_v63  ;;  %v2560_v20 = vmul.f32 1.442695, %v2550_v26  ;;  %v2547_v57 = vsub.f32 0.0, %v2443_v32 }
 0xa66   :  { %20118 = vrcp.f32 %v2457_v24  ;;  %v2442_v38 = vand.u32 2147483647, %v21135_v55  ;;  %v2553_v25 = vmul.f32 %v2545_v7, %v2441_v33  ;;  %v2552_v4 = vmul.f32 %v2544_v58, %v2440_v50 }
 0xa67   :  { %v21127_v15 = vpop.eup %20108  ;;  %v2459_v0 = vadd.f32 1.0, %v2451_v53  ;;  %20120 = vrcp.f32 %v2456_v22  ;;  %v21149_v41 = vmul.f32 0.5, %v21081_v49  ;;  %v2555_v59 = vmul.f32 %v2547_v57, %v2443_v32 }
 0xa68   :  { %v21130_v31 = vpop.eup %20110  ;;  %v2469_v6 = vmul.f32 1.0614054, %v21127_v15  ;;  %20122 = vpow2.f32 %v2556_v43  ;;  %v2450_v46 = vmul.f32 0.3275911, %v2442_v38  ;;  %v2546_v53 = vsub.f32 0.0, %v2442_v38 }
 0xa69   :  { %v2468_v51 = vmul.f32 1.0614054, %v21130_v31  ;;  %20124 = vrcp.f32 %v2459_v0  ;;  %v21162_v0 = vpack.c.bf16 %v2883_v12, %v2882_v8  ;;  %vm2591_vm14 = vcmp.ge.f32.partialorder %v21095_v14, 0.0 }
 0xa6a   :  { %v2477_v42 = vadd.f32 -1.4531521, %v2469_v6  ;;  %20126 = vpow2.f32 %v2562_v40  ;;  %v2458_v33 = vadd.f32 1.0, %v2450_v46  ;;  %v2566_v6 = vmul.f32 1.442695, %v2553_v25 }
 0xa6b   :  { %v21137_v56 = vpop.eup %20112  ;;  %v2476_v13 = vadd.f32 -1.4531521, %v2468_v51  ;;  %20128 = vpow2.f32 %v2560_v20  ;;  %v2564_v51 = vmul.f32 1.442695, %v2552_v4  ;;  %v2570_v40 = vmul.f32 1.442695, %v2555_v59 }
 0xa6c   :  { %v21139_v10 = vpop.eup %20114  ;;  %v2485_v11 = vmul.f32 %v21127_v15, %v2477_v42  ;;  %v2471_v19 = vmul.f32 1.0614054, %v21137_v56  ;;  %20130 = vrcp.f32 %v2458_v33  ;;  %v2554_v25 = vmul.f32 %v2546_v53, %v2442_v38 }
 0xa6d   :  { %v2484_v29 = vmul.f32 %v21130_v31, %v2476_v13  ;;  %v2470_v18 = vmul.f32 1.0614054, %v21139_v10  ;;  %v20117_v50 = vpop.eup %20116  ;;  %20132 = vpow2.f32 %v2566_v6  ;;  %vm2590_vm15 = vcmp.ge.f32.partialorder %v21098_v23, 0.0 }
 0xa6e   :  { %v2493_v21 = vadd.f32 1.4214138, %v2485_v11  ;;  %v2479_v36 = vadd.f32 -1.4531521, %v2471_v19  ;;  %20134 = vpow2.f32 %v2564_v51  ;;  %v2423_v14 = vmul.f32 0.5, %v21089_v60 }
 0xa6f   :  { %v2492_v17 = vadd.f32 1.4214138, %v2484_v29  ;;  %v2478_v45 = vadd.f32 -1.4531521, %v2470_v18  ;;  %20136 = vpow2.f32 %v2570_v40  ;;  %vm2593_vm1 = vcmp.ge.f32.partialorder %v21111_v44, 0.0 }
 0xa70   :  { %v2501_v39 = vmul.f32 %v21127_v15, %v2493_v21  ;;  %v2487_v47 = vmul.f32 %v21137_v56, %v2479_v36  ;;  %v21155_v26 = vpop.eup %20118  ;;  %vm2592_vm2 = vcmp.ge.f32.partialorder %v21116_v9, 0.0  ;;  %vm2595_vm3 = vcmp.ge.f32.partialorder %v21120_v1, 0.0 }
 0xa71   :  { %v2500_v34 = vmul.f32 %v21130_v31, %v2492_v17  ;;  %v2486_v62 = vmul.f32 %v21139_v10, %v2478_v45  ;;  %v21159_v42 = vpop.eup %20120  ;;  %v2473_v7 = vmul.f32 1.0614054, %v21155_v26  ;;  %vm2594_vm4 = vcmp.ge.f32.partialorder %v21135_v55, 0.0 }
 0xa72   :  { %v2509_v16 = vadd.f32 -0.28449672, %v2501_v39  ;;  %v2495_v61 = vadd.f32 1.4214138, %v2487_v47  ;;  %v2472_v58 = vmul.f32 1.0614054, %v21159_v42  ;;  %v20123_v29 = vpop.eup %20122 }
 0xa73   :  { %v2508_v43 = vadd.f32 -0.28449672, %v2500_v34  ;;  %v2494_v3 = vadd.f32 1.4214138, %v2486_v62  ;;  %v2481_v57 = vadd.f32 -1.4531521, %v2473_v7  ;;  %v21169_v21 = vpop.eup %20124 }
 0xa74   :  { %v2517_v63 = vmul.f32 %v21127_v15, %v2509_v16  ;;  %v2503_v49 = vmul.f32 %v21137_v56, %v2495_v61  ;;  %v2480_v45 = vadd.f32 -1.4531521, %v2472_v58  ;;  %v20127_v59 = vpop.eup %20126 }
 0xa75   :  { %v2516_v32 = vmul.f32 %v21130_v31, %v2508_v43  ;;  %v2502_v24 = vmul.f32 %v21139_v10, %v2494_v3  ;;  %v2489_v4 = vmul.f32 %v21155_v26, %v2481_v57  ;;  %v20129_v61 = vpop.eup %20128  ;;  %v2568_v3 = vmul.f32 1.442695, %v2554_v25 }
 0xa76   :  { %v2525_v22 = vadd.f32 0.2548296, %v2517_v63  ;;  %v2511_v13 = vadd.f32 -0.28449672, %v2503_v49  ;;  %v2488_v62 = vmul.f32 %v21159_v42, %v2480_v45  ;;  %v21180_v6 = vpop.eup %20130 }
 0xa77   :  { %v2524_v11 = vadd.f32 0.2548296, %v2516_v32  ;;  %v2510_v19 = vadd.f32 -0.28449672, %v2502_v24  ;;  %v2497_v38 = vadd.f32 1.4214138, %v2489_v4  ;;  %v20133_v7 = vpop.eup %20132  ;;  %20138 = vpow2.f32 %v2568_v3 }
 0xa78   :  { %v2533_v18 = vmul.f32 %v21127_v15, %v2525_v22  ;;  %v2519_v20 = vmul.f32 %v21137_v56, %v2511_v13  ;;  %v2475_v15 = vmul.f32 1.0614054, %v21169_v21  ;;  %v2496_v43 = vadd.f32 1.4214138, %v2488_v62 }
 0xa79   :  { %v2532_v36 = vmul.f32 %v21130_v31, %v2524_v11  ;;  %v2518_v17 = vmul.f32 %v21139_v10, %v2510_v19  ;;  %v2505_v49 = vmul.f32 %v21155_v26, %v2497_v38  ;;  %v2474_v40 = vmul.f32 1.0614054, %v21180_v6 }
 0xa7a   :  { %v2573_v39 = vmul.f32 %v20117_v50, %v2533_v18  ;;  %v2527_v47 = vadd.f32 0.2548296, %v2519_v20  ;;  %v2483_v16 = vadd.f32 -1.4531521, %v2475_v15  ;;  %v2504_v24 = vmul.f32 %v21159_v42, %v2496_v43  ;;  %v20135_v18 = vpop.eup %20134 }
 0xa7b   :  { %v2572_v46 = vmul.f32 %v20123_v29, %v2532_v36  ;;  %v2526_v34 = vadd.f32 0.2548296, %v2518_v17  ;;  %v2513_v22 = vadd.f32 -0.28449672, %v2505_v49 }
 0xa7c   :  { %v2581_v8 = vsub.f32 1.0, %v2573_v39  ;;  %v2535_v31 = vmul.f32 %v21137_v56, %v2527_v47  ;;  %v2491_v51 = vmul.f32 %v21169_v21, %v2483_v16  ;;  %v2512_v29 = vadd.f32 -0.28449672, %v2504_v24 }
 0xa7d   :  { %v2580_v33 = vsub.f32 1.0, %v2572_v46  ;;  %v2534_v12 = vmul.f32 %v21139_v10, %v2526_v34  ;;  %v2521_v36 = vmul.f32 %v21155_v26, %v2513_v22  ;;  %v2482_v39 = vadd.f32 -1.4531521, %v2474_v40  ;;  %v20137_v46 = vpop.eup %20136 }
 0xa7e   :  { %v2597_v50 = vsub.f32 0.0, %v2581_v8  ;;  %v2575_v63 = vmul.f32 %v20127_v59, %v2535_v31  ;;  %v2499_v13 = vadd.f32 1.4214138, %v2491_v51  ;;  %v2520_v25 = vmul.f32 %v21159_v42, %v2512_v29 }
 0xa7f   :  { %v2596_v32 = vsub.f32 0.0, %v2580_v33  ;;  %v2574_v56 = vmul.f32 %v20129_v61, %v2534_v12  ;;  %v2529_v4 = vadd.f32 0.2548296, %v2521_v36  ;;  %v2425_v22 = vmul.f32 0.5, %v21104_v27 }
 0xa80   :  { %v2605_v53 = vsel %vm2589_vm12, %v2581_v8, %v2597_v50  ;;  %v2583_v10 = vsub.f32 1.0, %v2575_v63  ;;  %v2507_v17 = vmul.f32 %v21169_v21, %v2499_v13  ;;  %v2528_v59 = vadd.f32 0.2548296, %v2520_v25 }
 0xa81   :  { %v2613_v11 = vadd.f32 1.0, %v2605_v53  ;;  %v2604_v19 = vsel %vm2588_vm13, %v2580_v33, %v2596_v32  ;;  %v2582_v58 = vsub.f32 1.0, %v2574_v56  ;;  %v2422_v8 = vmul.f32 0.5, %v21092_v30 }
 0xa82   :  { %v2612_v20 = vadd.f32 1.0, %v2604_v19  ;;  %v2599_v57 = vsub.f32 0.0, %v2583_v10  ;;  %v2515_v15 = vadd.f32 -0.28449672, %v2507_v17  ;;  %v2537_v38 = vmul.f32 %v21155_v26, %v2529_v4 }
 0xa83   :  { %v21193_v54 = vmul.f32 %v2613_v11, %v21122_v5  ;;  %v2598_v45 = vsub.f32 0.0, %v2582_v58  ;;  %v2490_v5 = vmul.f32 %v21180_v6, %v2482_v39  ;;  %v2536_v23 = vmul.f32 %v21159_v42, %v2528_v59 }
 0xa84   :  { %v21197_v47 = vmul.f32 %v2612_v20, %v21149_v41  ;;  %v2607_v48 = vsel %vm2591_vm14, %v2583_v10, %v2599_v57  ;;  %v2523_v41 = vmul.f32 %v21169_v21, %v2515_v15  ;;  %v2577_v26 = vmul.f32 %v20133_v7, %v2537_v38 }
 0xa85   :  { %v2615_v34 = vadd.f32 1.0, %v2607_v48  ;;  %v2606_v62 = vsel %vm2590_vm15, %v2582_v58, %v2598_v45  ;;  %v2498_v16 = vadd.f32 1.4214138, %v2490_v5  ;;  %v2576_v12 = vmul.f32 %v20135_v18, %v2536_v23 }
 0xa86   :  { %v2614_v31 = vadd.f32 1.0, %v2606_v62  ;;  %17689 = vmatprep.mubr.msk.f32.mxu0 %vm171_vm0, %v21197_v47  ;;  %17709 = vmatprep.mubr.msk.f32.mxu1 %vm171_vm0, %v21197_v47  ;;  %v2531_v61 = vadd.f32 0.2548296, %v2523_v41  ;;  %v2585_v42 = vsub.f32 1.0, %v2577_v26  ;;  %v2424_v53 = vmul.f32 0.5, %v21107_v28 }
 0xa87   :  { %17690 = vmatmul.mubr.msk.f32.vlgmr.msra.gmra.mrb[48].mxu0 %vm171_vm0, %v21193_v54  ;;  %17710 = vmatmul.mubr.msk.f32.vlgmr.msra.gmra.mrb[56].mxu1 %vm171_vm0, %v21193_v54  ;;  %v21220_v33 = vmul.f32 %v2615_v34, %v2423_v14  ;;  %v2506_v60 = vmul.f32 %v21180_v6, %v2498_v16  ;;  %v2584_v50 = vsub.f32 1.0, %v2576_v12  ;;  %v2426_v29 = vmul.f32 0.5, %v21125_v35  ;;  %v21284_v35 = vld [vmem:[#allocation2 + $0x1d8] ss:$0 sm:$0xff] }
 0xa88   :  { %v21217_v30 = vmul.f32 %v2614_v31, %v2422_v8  ;;  %19325 = vmatpush3.bf16.msra.mxu0 %v21078_v37  ;;  %v2539_v43 = vmul.f32 %v21169_v21, %v2531_v61  ;;  %v2601_v37 = vsub.f32 0.0, %v2585_v42  ;;  %v2427_v20 = vmul.f32 0.5, %v21113_v2  ;;  %v16015_v2 = vld [vmem:[#allocation2 + $0x1e0] ss:$0 sm:$0xff] }
 0xa89   :  { %19327 = vmatprep.subr.bf16.mxu0 %v21162_v0  ;;  %v2514_v3 = vadd.f32 -0.28449672, %v2506_v60  ;;  %v2600_v21 = vsub.f32 0.0, %v2584_v50 }
 0xa8a   :  { %17692 = vmatprep.mubr.msk.f32.mxu0 %vm171_vm0, %v21217_v30  ;;  %17712 = vmatprep.mubr.msk.f32.mxu1 %vm171_vm0, %v21217_v30  ;;  %v2579_v63 = vmul.f32 %v20137_v46, %v2539_v43  ;;  %v2609_v51 = vsel %vm2593_vm1, %v2585_v42, %v2601_v37  ;;  %v3489_v37 = vld [vmem:[#allocation2 + $0x228] sm:$0xff] }
 0xa8b   :  { %17693 = vmatmul.mubr.msk.f32.gmra.mrb[50].mxu0 %vm171_vm0, %v21220_v33  ;;  %17713 = vmatmul.mubr.msk.f32.gmra.mrb[58].mxu1 %vm171_vm0, %v21220_v33  ;;  %v2522_v49 = vmul.f32 %v21180_v6, %v2514_v3  ;;  %v2617_v56 = vadd.f32 1.0, %v2609_v51  ;;  %v2608_v24 = vsel %vm2592_vm2, %v2584_v50, %v2600_v21  ;;  %v3488_v3 = vld [vmem:[#allocation2 + $0x220] sm:$0xff]  ;;  %v16024_v21 = vld [vmem:[#allocation2 + $0x1e8] ss:$0 sm:$0xff] }
 0xa8c   :  { %19329 = vmatpush3.bf16.msra.mxu0 %v21162_v0  ;;  %v2587_v32 = vsub.f32 1.0, %v2579_v63  ;;  %v2616_v10 = vadd.f32 1.0, %v2608_v24  ;;  %v20139_v0 = vpop.eup %20138 }
 0xa8d   :  { %v2530_v40 = vadd.f32 0.2548296, %v2522_v49  ;;  %v21242_v11 = vmul.f32 %v2617_v56, %v2425_v22 }
 0xa8e   :  { %v21240_v7 = vmul.f32 %v2616_v10, %v2424_v53  ;;  %v2603_v44 = vsub.f32 0.0, %v2587_v32 }
 0xa8f   :  { %v2538_v13 = vmul.f32 %v21180_v6, %v2530_v40 }
 0xa90   :  { %17695 = vmatprep.mubr.msk.f32.mxu0 %vm171_vm0, %v21240_v7  ;;  %17715 = vmatprep.mubr.msk.f32.mxu1 %vm171_vm0, %v21240_v7  ;;  %v2611_v27 = vsel %vm2595_vm3, %v2587_v32, %v2603_v44  ;;  %v19378_v32 = vpack.c.bf16 %v3489_v37, %v3488_v3  ;;  %v21353_v3 = vld [vmem:[#allocation2 + $0x430] sm:$0xff] }
 0xa91   :  { %v2578_v19 = vmul.f32 %v20139_v0, %v2538_v13  ;;  %17696 = vmatmul.mubr.msk.f32.gmra.mrb[52].mxu0 %vm171_vm0, %v21242_v11  ;;  %17716 = vmatmul.mubr.msk.f32.gmra.mrb[60].mxu1 %vm171_vm0, %v21242_v11  ;;  %v2619_v6 = vadd.f32 1.0, %v2611_v27  ;;  %v3491_v27 = vld [vmem:[#allocation2 + $0x238] sm:$0xff] }
 0xa93   :  { %v2586_v28 = vsub.f32 1.0, %v2578_v19  ;;  %v21258_v1 = vmul.f32 %v2619_v6, %v2427_v20 }
 0xa95   :  { %v2602_v9 = vsub.f32 0.0, %v2586_v28 }
 0xa97   :  { %v2610_v58 = vsel %vm2594_vm4, %v2586_v28, %v2602_v9  ;;  %v3490_v28 = vld [vmem:[#allocation2 + $0x230] sm:$0xff] }
 0xa98   :  { %v2618_v18 = vadd.f32 1.0, %v2610_v58 }
 0xa9a   :  { %v21256_v57 = vmul.f32 %v2618_v18, %v2426_v29 }
 0xa9c   :  { %17698 = vmatprep.mubr.msk.f32.mxu0 %vm171_vm0, %v21256_v57  ;;  %17718 = vmatprep.mubr.msk.f32.mxu1 %vm171_vm0, %v21256_v57 }
 0xa9d   :  { %17699 = vmatmul.mubr.msk.f32.gmra.mrb[54].mxu0 %vm171_vm0, %v21258_v1  ;;  %17719 = vmatmul.mubr.msk.f32.gmra.mrb[62].mxu1 %vm171_vm0, %v21258_v1 }
 0xa9e   :  { %17729 = vmatprep.mubr.msk.f32.mxu0 %vm171_vm0, %v21197_v47 }
 0xaa1   :  { %17730 = vmatmul.mubr.msk.f32.vlgmr.msra.gmra.mrb[56].mxu0 %vm171_vm0, %v21193_v54 }
 0xaa2   :  { %17732 = vmatprep.mubr.msk.f32.mxu0 %vm171_vm0, %v21217_v30 }
 0xaa5   :  { %17733 = vmatmul.mubr.msk.f32.gmra.mrb[58].mxu0 %vm171_vm0, %v21220_v33 }
 0xaa6   :  { %17735 = vmatprep.mubr.msk.f32.mxu0 %vm171_vm0, %v21240_v7 }
 0xaa9   :  { %17736 = vmatmul.mubr.msk.f32.gmra.mrb[60].mxu0 %vm171_vm0, %v21242_v11 }
 0xaaa   :  { %17738 = vmatprep.mubr.msk.f32.mxu0 %vm171_vm0, %v21256_v57 }
 0xaad   :  { %17739 = vmatmul.mubr.msk.f32.gmra.mrb[62].mxu0 %vm171_vm0, %v21258_v1 }
 0xb5a   :  { %v17691_v55 = vpop.f32.mrb[48].mxu0  ;;  %v17711_v36 = vpop.f32.mrb[56].mxu1 }
 0xb5b   :  { %v2847_v17 = vadd.f32 %v17711_v36, %v16015_v2  ;;  %v2727_v45 = vpop.f32.mrb[49].mxu0  ;;  %v2841_v25 = vpop.f32.mrb[57].mxu1  ;;  %v2733_v53 = vadd.f32 %v17691_v55, %v21284_v35  ;;  %v19382_v36 = vpack.c.bf16 %v3491_v27, %v3490_v28  ;;  %v16066_v27 = vld [vmem:[#allocation2 + $0x268] ss:$0 sm:$0xff] }
 0xb5c   :  { %v2728_v39 = vadd.f32 %v21284_v35, %v2727_v45  ;;  %v2842_v48 = vadd.f32 %v16015_v2, %v2841_v25 }
 0xb5d   :  { %v2995_v9 = vmul.f32 0.25, %v2733_v53 }
 0xb5e   :  { %v2994_v4 = vmul.f32 0.25, %v2728_v39  ;;  %v19330_v15 = vpack.c.bf16 %v2847_v17, %v2842_v48  ;;  %v17694_v46 = vpop.f32.mrb[50].mxu0  ;;  %v17714_v34 = vpop.f32.mrb[58].mxu1 }
 0xb5f   :  { %v2857_v62 = vadd.f32 %v17714_v34, %v16015_v2  ;;  %v2737_v59 = vpop.f32.mrb[51].mxu0  ;;  %v2851_v5 = vpop.f32.mrb[59].mxu1  ;;  %v2743_v6 = vadd.f32 %v17694_v46, %v21284_v35 }
 0xb60   :  { %v2852_v8 = vadd.f32 %v16015_v2, %v2851_v5  ;;  %19332 = vmatprep.subr.msk.bf16.mxu1 %vm20791_vm10, %v19330_v15  ;;  %17757 = vmatprep.mubr.msk.f32.mxu1 %vm891_vm9, %v2994_v4  ;;  %v2738_v13 = vadd.f32 %v21284_v35, %v2737_v59 }
 0xb61   :  { %19335 = vmatpush3.bf16.xpose.msk.msra.mxu1 %vm20791_vm10, %v19330_v15  ;;  %v2997_v45 = vmul.f32 0.25, %v2743_v6 }
 0xb62   :  { %v19336_v31 = vpack.c.bf16 %v2857_v62, %v2852_v8  ;;  %v2996_v18 = vmul.f32 0.25, %v2738_v13  ;;  %v21376_v13 = vld [vmem:[#allocation2 + $0x458] sm:$0xff] }
 0xb64   :  { %19338 = vmatprep.subr.msk.bf16.mxu1 %vm20791_vm10, %v19336_v31  ;;  %v17697_v38 = vpop.f32.mrb[52].mxu0  ;;  %v17717_v41 = vpop.f32.mrb[60].mxu1 }
 0xb65   :  { %v2867_v14 = vadd.f32 %v17717_v41, %v16015_v2  ;;  %v2747_v23 = vpop.f32.mrb[53].mxu0  ;;  %v2861_v16 = vpop.f32.mrb[61].mxu1  ;;  %v2753_v25 = vadd.f32 %v17697_v38, %v21284_v35  ;;  %v21334_v41 = vld [vmem:[#allocation2 + $0x428] sm:$0xff] }
 0xb66   :  { %v2862_v26 = vadd.f32 %v16015_v2, %v2861_v16  ;;  %v2748_v20 = vadd.f32 %v21284_v35, %v2747_v23  ;;  %v21339_v16 = vld [vmem:[#allocation2 + $0x420] sm:$0xff] }
 0xb67   :  { %v2999_v59 = vmul.f32 0.25, %v2753_v25 }
 0xb68   :  { %v19342_v61 = vpack.c.bf16 %v2867_v14, %v2862_v26  ;;  %v2998_v4 = vmul.f32 0.25, %v2748_v20 }
 0xb69   :  { %19341 = vmatpush3.bf16.xpose.msk.msra.mxu1 %vm20791_vm10, %v19336_v31 }
 0xb6a   :  { %19344 = vmatprep.subr.msk.bf16.mxu1 %vm20791_vm10, %v19342_v61 }
 0xb70   :  { %v17700_v12 = vpop.f32.mrb[54].mxu0  ;;  %v17720_v60 = vpop.f32.mrb[62].mxu1 }
 0xb71   :  { %19347 = vmatpush3.bf16.xpose.msk.msra.mxu1 %vm20791_vm10, %v19342_v61  ;;  %v2877_v42 = vadd.f32 %v17720_v60, %v16015_v2  ;;  %v2757_v43 = vpop.f32.mrb[55].mxu0  ;;  %v2871_v50 = vpop.f32.mrb[63].mxu1  ;;  %v2763_v5 = vadd.f32 %v17700_v12, %v21284_v35 }
 0xb72   :  { %v2872_v63 = vadd.f32 %v16015_v2, %v2871_v50  ;;  %v2758_v15 = vadd.f32 %v21284_v35, %v2757_v43 }
 0xb73   :  { %v3001_v38 = vmul.f32 0.25, %v2763_v5 }
 0xb74   :  { %v19348_v49 = vpack.c.bf16 %v2877_v42, %v2872_v63  ;;  %v17731_v51 = vpop.f32.mrb[56].mxu0  ;;  %v3000_v31 = vmul.f32 0.25, %v2758_v15  ;;  %v21348_v42 = vld [vmem:[#allocation2 + $0x438] sm:$0xff] }
 0xb75   :  { %v2961_v56 = vadd.f32 %v17731_v51, %v16024_v21  ;;  %v2955_v24 = vpop.f32.mrb[57].mxu0  ;;  %v21362_v51 = vld [vmem:[#allocation2 + $0x448] sm:$0xff] }
 0xb76   :  { %v2956_v40 = vadd.f32 %v16024_v21, %v2955_v24  ;;  %19350 = vmatprep.subr.msk.bf16.mxu1 %vm20791_vm10, %v19348_v49  ;;  %v21367_v24 = vld [vmem:[#allocation2 + $0x440] sm:$0xff] }
 0xb78   :  { %v19354_v10 = vpack.c.bf16 %v2961_v56, %v2956_v40  ;;  %v17734_v22 = vpop.f32.mrb[58].mxu0 }
 0xb79   :  { %19353 = vmatpush3.bf16.xpose.msk.msra.mxu1 %vm20791_vm10, %v19348_v49  ;;  %v2971_v0 = vadd.f32 %v17734_v22, %v16024_v21  ;;  %v2965_v44 = vpop.f32.mrb[59].mxu0 }
 0xb7a   :  { %19379 = vmatprep.subr.bf16.mxu1 %v19378_v32  ;;  %v2966_v19 = vadd.f32 %v16024_v21, %v2965_v44  ;;  %19355 = vmatprep.subr.bf16.mxu0 %v19354_v10 }
 0xb7b   :  { %19357 = vmatpush3.bf16.msra.mxu0 %v19354_v10 }
 0xb7c   :  { %v19358_v58 = vpack.c.bf16 %v2971_v0, %v2966_v19  ;;  %v17737_v29 = vpop.f32.mrb[60].mxu0  ;;  %v21381_v19 = vld [vmem:[#allocation2 + $0x450] sm:$0xff] }
 0xb7d   :  { %v2981_v2 = vadd.f32 %v17737_v29, %v16024_v21  ;;  %v2975_v55 = vpop.f32.mrb[61].mxu0 }
 0xb7e   :  { %v2976_v17 = vadd.f32 %v16024_v21, %v2975_v55  ;;  %19359 = vmatprep.subr.bf16.mxu0 %v19358_v58 }
 0xb7f   :  { %19361 = vmatpush3.bf16.msra.mxu0 %v19358_v58 }
 0xb80   :  { %17758 = vmatmul.mubr.msk.f32.vlgmr.msra.gmra.mrb[64].mxu1 %vm891_vm9, %v2995_v9  ;;  %v19362_v39 = vpack.c.bf16 %v2981_v2, %v2976_v17  ;;  %v17740_v48 = vpop.f32.mrb[62].mxu0 }
 0xb81   :  { %17760 = vmatprep.mubr.msk.f32.mxu1 %vm891_vm9, %v2996_v18  ;;  %19381 = vmatpush3.bf16.msra.mxu1 %v19378_v32  ;;  %v2991_v46 = vadd.f32 %v17740_v48, %v16024_v21  ;;  %v2985_v34 = vpop.f32.mrb[63].mxu0 }
 0xb82   :  { %19383 = vmatprep.subr.bf16.mxu1 %v19382_v36  ;;  %v2986_v62 = vadd.f32 %v16024_v21, %v2985_v34  ;;  %19363 = vmatprep.subr.bf16.mxu0 %v19362_v39 }
 0xb83   :  { %19365 = vmatpush3.bf16.msra.mxu0 %v19362_v39 }
 0xb84   :  { %17761 = vmatmul.mubr.msk.f32.gmra.mrb[66].mxu1 %vm891_vm9, %v2997_v45  ;;  %v19366_v8 = vpack.c.bf16 %v2991_v46, %v2986_v62 }
 0xb85   :  { %17763 = vmatprep.mubr.msk.f32.mxu1 %vm891_vm9, %v2998_v4  ;;  %19385 = vmatpush3.bf16.msra.mxu1 %v19382_v36 }
 0xb86   :  { %19367 = vmatprep.subr.bf16.mxu0 %v19366_v8 }
 0xb87   :  { %19369 = vmatpush3.bf16.msra.mxu0 %v19366_v8 }
 0xb88   :  { %17764 = vmatmul.mubr.msk.f32.gmra.mrb[68].mxu1 %vm891_vm9, %v2999_v59 }
 0xb89   :  { %17766 = vmatprep.mubr.msk.f32.mxu1 %vm891_vm9, %v3000_v31 }
 0xb8c   :  { %17767 = vmatmul.mubr.msk.f32.gmra.mrb[70].mxu1 %vm891_vm9, %v3001_v38 }
 0xb8d   :  { %17825 = vmatprep.mubr.msk.f32.mxu1 %vm171_vm0, %v21197_v47 }
 0xb90   :  { %17826 = vmatmul.mubr.msk.f32.vlgmr.msra.gmra.mrb[72].mxu1 %vm171_vm0, %v21193_v54 }
 0xb91   :  { %17828 = vmatprep.mubr.msk.f32.mxu1 %vm171_vm0, %v21217_v30 }
 0xb94   :  { %17829 = vmatmul.mubr.msk.f32.gmra.mrb[74].mxu1 %vm171_vm0, %v21220_v33 }
 0xb95   :  { %17831 = vmatprep.mubr.msk.f32.mxu1 %vm171_vm0, %v21240_v7 }
 0xb98   :  { %17832 = vmatmul.mubr.msk.f32.gmra.mrb[76].mxu1 %vm171_vm0, %v21242_v11 }
 0xb99   :  { %17834 = vmatprep.mubr.msk.f32.mxu1 %vm171_vm0, %v21256_v57 }
 0xb9c   :  { %17835 = vmatmul.mubr.msk.f32.gmra.mrb[78].mxu1 %vm171_vm0, %v21258_v1 }
 0xc53   :  { %v17759_v35 = vpop.f32.mrb[64].mxu1 }
 0xc54   :  { %v21337_v14 = vadd.f32 %v21334_v41, %v17759_v35  ;;  %v3116_v23 = vpop.f32.mrb[65].mxu1 }
 0xc55   :  { %v21342_v26 = vadd.f32 %v21339_v16, %v3116_v23 }
 0xc56   :  { %v3158_v61 = vsel %vm1045_vm11, %v21337_v14, -inf }
 0xc57   :  { %3159 = vmax.xlane.f32.xlu1 %v3158_v61  ;;  %v17762_v12 = vpop.f32.mrb[66].mxu1  ;;  %v3155_v60 = vsel %vm1045_vm11, %v21342_v26, -inf }
 0xc58   :  { %v21351_v43 = vadd.f32 %v21348_v42, %v17762_v12  ;;  %v3126_v50 = vpop.f32.mrb[67].mxu1  ;;  %3156 = vmax.xlane.f32.xlu0 %v3155_v60 }
 0xc59   :  { %v21356_v37 = vadd.f32 %v21353_v3, %v3126_v50 }
 0xc5a   :  { %v3164_v63 = vsel %vm1045_vm11, %v21351_v43, -inf }
 0xc5b   :  { %3165 = vmax.xlane.f32.xlu1 %v3164_v63  ;;  %v17765_v21 = vpop.f32.mrb[68].mxu1  ;;  %v3161_v49 = vsel %vm1045_vm11, %v21356_v37, -inf }
 0xc5c   :  { %v21365_v32 = vadd.f32 %v21362_v51, %v17765_v21  ;;  %v3136_v56 = vpop.f32.mrb[69].mxu1  ;;  %3162 = vmax.xlane.f32.xlu0 %v3161_v49 }
 0xc5d   :  { %v21370_v40 = vadd.f32 %v21367_v24, %v3136_v56 }
 0xc5e   :  { %v3170_v53 = vsel %vm1045_vm11, %v21365_v32, -inf }
 0xc5f   :  { %3171 = vmax.xlane.f32.xlu1 %v3170_v53  ;;  %v17768_v10 = vpop.f32.mrb[70].mxu1  ;;  %v3167_v22 = vsel %vm1045_vm11, %v21370_v40, -inf }
 0xc60   :  { %v21379_v0 = vadd.f32 %v21376_v13, %v17768_v10  ;;  %3168 = vmax.xlane.f32.xlu0 %v3167_v22  ;;  %v3146_v44 = vpop.f32.mrb[71].mxu1 }
 0xc61   :  { %v21384_v28 = vadd.f32 %v21381_v19, %v3146_v44 }
 0xc62   :  { %v3176_v9 = vsel %vm1045_vm11, %v21379_v0, -inf }
 0xc63   :  { %3177 = vmax.xlane.f32.xlu1 %v3176_v9  ;;  %v17827_v6 = vpop.f32.mrb[72].mxu1  ;;  %v3173_v58 = vsel %vm1045_vm11, %v21384_v28, -inf }
 0xc64   :  { %v3569_v29 = vadd.f32 %v17827_v6, %v16066_v27  ;;  %v3563_v18 = vpop.f32.mrb[73].mxu1  ;;  %3174 = vmax.xlane.f32.xlu0 %v3173_v58 }
 0xc65   :  { %v3564_v20 = vadd.f32 %v16066_v27, %v3563_v18 }
 0xc67   :  { %v19394_v2 = vpack.c.bf16 %v3569_v29, %v3564_v20  ;;  %v17830_v55 = vpop.f32.mrb[74].mxu1 }
 0xc68   :  { %v3579_v36 = vadd.f32 %v17830_v55, %v16066_v27  ;;  %v3573_v17 = vpop.f32.mrb[75].mxu1 }
 0xc69   :  { %v3574_v45 = vadd.f32 %v16066_v27, %v3573_v17  ;;  %19396 = vmatprep.subr.msk.bf16.mxu1 %vm20791_vm10, %v19394_v2 }
 0xc6a   :  { %19399 = vmatpush3.bf16.xpose.msk.msra.mxu1 %vm20791_vm10, %v19394_v2 }
 0xc6b   :  { %v19400_v25 = vpack.c.bf16 %v3579_v36, %v3574_v45  ;;  %v17833_v39 = vpop.f32.mrb[76].mxu1 }
 0xc6c   :  { %v3589_v48 = vadd.f32 %v17833_v39, %v16066_v27  ;;  %v3583_v4 = vpop.f32.mrb[77].mxu1 }
 0xc6d   :  { %v3584_v15 = vadd.f32 %v16066_v27, %v3583_v4  ;;  %19402 = vmatprep.subr.msk.bf16.mxu1 %vm20791_vm10, %v19400_v25 }
 0xc6f   :  { %v19406_v46 = vpack.c.bf16 %v3589_v48, %v3584_v15  ;;  %v17836_v34 = vpop.f32.mrb[78].mxu1  ;;  %v3374_v15 = vld [vmem:[#allocation2 + $0x200] sm:$0xff] }
 0xc70   :  { %v3599_v62 = vadd.f32 %v17836_v34, %v16066_v27  ;;  %v3593_v59 = vpop.f32.mrb[79].mxu1 }
 0xc71   :  { %v3594_v5 = vadd.f32 %v16066_v27, %v3593_v59 }
 0xc72   :  { %19405 = vmatpush3.bf16.xpose.msk.msra.mxu1 %vm20791_vm10, %v19400_v25 }
 0xc73   :  { %v19412_v8 = vpack.c.bf16 %v3599_v62, %v3594_v5  ;;  %19408 = vmatprep.subr.msk.bf16.mxu1 %vm20791_vm10, %v19406_v46 }
 0xc7a   :  { %19411 = vmatpush3.bf16.xpose.msk.msra.mxu1 %vm20791_vm10, %v19406_v46  ;;  %v3375_v46 = vld [vmem:[#allocation2 + $0x208] sm:$0xff] }
 0xc7b   :  { %19414 = vmatprep.subr.msk.bf16.mxu1 %vm20791_vm10, %v19412_v8  ;;  %v19370_v34 = vpack.c.bf16 %v3375_v46, %v3374_v15 }
 0xc7d   :  { %19371 = vmatprep.subr.bf16.mxu0 %v19370_v34 }
 0xc82   :  { %19417 = vmatpush3.bf16.xpose.msk.msra.mxu1 %vm20791_vm10, %v19412_v8 }
 0xce4   :  { %v3160_v31 = vpop.xlane.xlu1 %3159 }
 0xce5   :  { %v3180_v38 = vsub.f32 %v21337_v14, %v3160_v31  ;;  %v3157_v35 = vpop.xlane.xlu0 %3156 }
 0xce6   :  { %v3179_v23 = vsub.f32 %v21342_v26, %v3157_v35 }
 0xce7   :  { %v3189_v61 = vmul.f32 1.442695, %v3180_v38 }
 0xce8   :  { %v3187_v12 = vmul.f32 1.442695, %v3179_v23  ;;  %v3166_v60 = vpop.xlane.xlu1 %3165  ;;  %v3376_v23 = vld [vmem:[#allocation2 + $0x210] sm:$0xff] }
 0xce9   :  { %20140 = vpow2.f32 %v3189_v61  ;;  %v3182_v50 = vsub.f32 %v21351_v43, %v3166_v60  ;;  %v3163_v63 = vpop.xlane.xlu0 %3162  ;;  %v3377_v61 = vld [vmem:[#allocation2 + $0x218] sm:$0xff] }
 0xcea   :  { %20142 = vpow2.f32 %v3187_v12  ;;  %v3181_v21 = vsub.f32 %v21356_v37, %v3163_v63 }
 0xceb   :  { %v3193_v49 = vmul.f32 1.442695, %v3182_v50 }
 0xcec   :  { %v3191_v56 = vmul.f32 1.442695, %v3181_v21  ;;  %v3172_v53 = vpop.xlane.xlu1 %3171 }
 0xced   :  { %20144 = vpow2.f32 %v3193_v49  ;;  %v3184_v10 = vsub.f32 %v21365_v32, %v3172_v53  ;;  %v3169_v14 = vpop.xlane.xlu0 %3168  ;;  %v19374_v49 = vpack.c.bf16 %v3377_v61, %v3376_v23  ;;  %v3602_v53 = vld [vmem:[#allocation2 + $0x240] sm:$0xff] }
 0xcee   :  { %20146 = vpow2.f32 %v3191_v56  ;;  %v3183_v26 = vsub.f32 %v21370_v40, %v3169_v14 }
 0xcef   :  { %v3197_v22 = vmul.f32 1.442695, %v3184_v10  ;;  %v3603_v10 = vld [vmem:[#allocation2 + $0x248] sm:$0xff] }
 0xcf0   :  { %v3195_v44 = vmul.f32 1.442695, %v3183_v26  ;;  %v3178_v27 = vpop.xlane.xlu1 %3177 }
 0xcf1   :  { %20148 = vpow2.f32 %v3197_v22  ;;  %v3186_v43 = vsub.f32 %v21379_v0, %v3178_v27  ;;  %v3175_v9 = vpop.xlane.xlu0 %3174 }
 0xcf2   :  { %20150 = vpow2.f32 %v3195_v44  ;;  %v3185_v37 = vsub.f32 %v21384_v28, %v3175_v9  ;;  %v19386_v44 = vpack.c.bf16 %v3603_v10, %v3602_v53  ;;  %v16075_v10 = vld [vmem:[#allocation2 + $0x270] ss:$0 sm:$0xff] }
 0xcf3   :  { %v20141_v6 = vpop.eup %20140  ;;  %v3201_v58 = vmul.f32 1.442695, %v3186_v43 }
 0xcf4   :  { %v20143_v29 = vpop.eup %20142  ;;  %v3199_v18 = vmul.f32 1.442695, %v3185_v37  ;;  %v3206_v32 = vsel %vm1045_vm11, %v20141_v6, 0.0 }
 0xcf5   :  { %20152 = vpow2.f32 %v3201_v58  ;;  %3207 = vadd.xlane.f32.xlu1 %v3206_v32  ;;  %v3203_v40 = vsel %vm1045_vm11, %v20143_v29, 0.0  ;;  %v3604_v32 = vld [vmem:[#allocation2 + $0x250] sm:$0xff] }
 0xcf6   :  { %20154 = vpow2.f32 %v3199_v18  ;;  %3204 = vadd.xlane.f32.xlu0 %v3203_v40  ;;  %v3605_v40 = vld [vmem:[#allocation2 + $0x258] sm:$0xff] }
 0xcf7   :  { %v20145_v20 = vpop.eup %20144 }
 0xcf8   :  { %v20147_v2 = vpop.eup %20146  ;;  %v3212_v0 = vsel %vm1045_vm11, %v20145_v20, 0.0 }
 0xcf9   :  { %3213 = vadd.xlane.f32.xlu1 %v3212_v0  ;;  %v3209_v55 = vsel %vm1045_vm11, %v20147_v2, 0.0 }
 0xcfa   :  { %3210 = vadd.xlane.f32.xlu0 %v3209_v55 }
 0xcfb   :  { %v20149_v28 = vpop.eup %20148 }
 0xcfc   :  { %v20151_v36 = vpop.eup %20150  ;;  %v3218_v17 = vsel %vm1045_vm11, %v20149_v28, 0.0 }
 0xcfd   :  { %3219 = vadd.xlane.f32.xlu1 %v3218_v17  ;;  %v3215_v45 = vsel %vm1045_vm11, %v20151_v36, 0.0 }
 0xcfe   :  { %3216 = vadd.xlane.f32.xlu0 %v3215_v45 }
 0xcff   :  { %v20153_v25 = vpop.eup %20152 }
 0xd00   :  { %v20155_v39 = vpop.eup %20154  ;;  %v3224_v48 = vsel %vm1045_vm11, %v20153_v25, 0.0 }
 0xd01   :  { %3225 = vadd.xlane.f32.xlu1 %v3224_v48  ;;  %v3221_v4 = vsel %vm1045_vm11, %v20155_v39, 0.0 }
 0xd02   :  { %3222 = vadd.xlane.f32.xlu0 %v3221_v4 }
 0xd82   :  { %v3208_v62 = vpop.xlane.xlu1 %3207 }
 0xd83   :  { %20156 = vrcp.f32 %v3208_v62  ;;  %v3205_v59 = vpop.xlane.xlu0 %3204 }
 0xd84   :  { %20158 = vrcp.f32 %v3205_v59 }
 0xd86   :  { %v3214_v5 = vpop.xlane.xlu1 %3213 }
 0xd87   :  { %20160 = vrcp.f32 %v3214_v5  ;;  %v3211_v8 = vpop.xlane.xlu0 %3210 }
 0xd88   :  { %20162 = vrcp.f32 %v3211_v8 }
 0xd8a   :  { %v3220_v31 = vpop.xlane.xlu1 %3219 }
 0xd8b   :  { %20164 = vrcp.f32 %v3220_v31  ;;  %v3217_v38 = vpop.xlane.xlu0 %3216 }
 0xd8c   :  { %20166 = vrcp.f32 %v3217_v38 }
 0xd8d   :  { %v20157_v35 = vpop.eup %20156 }
 0xd8e   :  { %v20159_v12 = vpop.eup %20158  ;;  %v3226_v60 = vpop.xlane.xlu1 %3225  ;;  %v3236_v21 = vmul.f32 %v20157_v35, %v20141_v6 }
 0xd8f   :  { %20168 = vrcp.f32 %v3226_v60  ;;  %v3223_v50 = vpop.xlane.xlu0 %3222  ;;  %v3235_v63 = vmul.f32 %v20159_v12, %v20143_v29 }
 0xd90   :  { %20170 = vrcp.f32 %v3223_v50 }
 0xd91   :  { %v20161_v56 = vpop.eup %20160  ;;  %17785 = vmatprep.mubr.msk.f32.mxu0 %vm1045_vm11, %v3235_v63 }
 0xd92   :  { %v20163_v14 = vpop.eup %20162  ;;  %17786 = vmatmul.mubr.msk.f32.vlgmr.msra.gmra.mrb[64].mxu0 %vm1045_vm11, %v3236_v21  ;;  %v3238_v22 = vmul.f32 %v20161_v56, %v20145_v20  ;;  %v19390_v20 = vpack.c.bf16 %v3605_v40, %v3604_v32 }
 0xd93   :  { %19373 = vmatpush3.bf16.msra.mxu0 %v19370_v34  ;;  %v3237_v26 = vmul.f32 %v20163_v14, %v20147_v2 }
 0xd94   :  { %19375 = vmatprep.subr.bf16.mxu0 %v19374_v49 }
 0xd95   :  { %v20165_v27 = vpop.eup %20164  ;;  %17788 = vmatprep.mubr.msk.f32.mxu0 %vm1045_vm11, %v3237_v26 }
 0xd96   :  { %v20167_v43 = vpop.eup %20166  ;;  %17789 = vmatmul.mubr.msk.f32.gmra.mrb[66].mxu0 %vm1045_vm11, %v3238_v22  ;;  %v3240_v37 = vmul.f32 %v20165_v27, %v20149_v28 }
 0xd97   :  { %v3239_v9 = vmul.f32 %v20167_v43, %v20151_v36  ;;  %19377 = vmatpush3.bf16.msra.mxu0 %v19374_v49 }
 0xd98   :  { %19387 = vmatprep.subr.bf16.mxu0 %v19386_v44 }
 0xd99   :  { %v20169_v6 = vpop.eup %20168  ;;  %17791 = vmatprep.mubr.msk.f32.mxu0 %vm1045_vm11, %v3239_v9 }
 0xd9a   :  { %v20171_v58 = vpop.eup %20170  ;;  %17792 = vmatmul.mubr.msk.f32.gmra.mrb[68].mxu0 %vm1045_vm11, %v3240_v37  ;;  %v3242_v18 = vmul.f32 %v20169_v6, %v20153_v25 }
 0xd9b   :  { %v3241_v29 = vmul.f32 %v20171_v58, %v20155_v39  ;;  %v16057_v39 = vld [vmem:[#allocation2 + $0x260] ss:$0 sm:$0xff] }
 0xd9d   :  { %17794 = vmatprep.mubr.msk.f32.mxu0 %vm1045_vm11, %v3241_v29 }
 0xd9e   :  { %17795 = vmatmul.mubr.msk.f32.gmra.mrb[70].mxu0 %vm1045_vm11, %v3242_v18 }
 0xd9f   :  { %17805 = vmatprep.mubr.msk.f32.mxu0 %vm171_vm0, %v21197_v47 }
 0xda2   :  { %17806 = vmatmul.mubr.msk.f32.vlgmr.msra.gmra.mrb[72].mxu0 %vm171_vm0, %v21193_v54 }
 0xda3   :  { %17808 = vmatprep.mubr.msk.f32.mxu0 %vm171_vm0, %v21217_v30  ;;  %19389 = vmatpush3.bf16.msra.mxu0 %v19386_v44 }
 0xda4   :  { %19391 = vmatprep.subr.bf16.mxu0 %v19390_v20 }
 0xda6   :  { %17809 = vmatmul.mubr.msk.f32.gmra.mrb[74].mxu0 %vm171_vm0, %v21220_v33 }
 0xda7   :  { %17811 = vmatprep.mubr.msk.f32.mxu0 %vm171_vm0, %v21240_v7  ;;  %19393 = vmatpush3.bf16.msra.mxu0 %v19390_v20 }
 0xdaa   :  { %17812 = vmatmul.mubr.msk.f32.gmra.mrb[76].mxu0 %vm171_vm0, %v21242_v11 }
 0xdab   :  { %17814 = vmatprep.mubr.msk.f32.mxu0 %vm171_vm0, %v21256_v57 }
 0xdae   :  { %17815 = vmatmul.mubr.msk.f32.gmra.mrb[78].mxu0 %vm171_vm0, %v21258_v1 }
 0xdaf   :  { %17845 = vmatprep.mubr.msk.f32.mxu0 %vm171_vm0, %v21197_v47 }
 0xdb2   :  { %17846 = vmatmul.mubr.msk.f32.vlgmr.msra.gmra.mrb[80].mxu0 %vm171_vm0, %v21193_v54 }
 0xdb3   :  { %17848 = vmatprep.mubr.msk.f32.mxu0 %vm171_vm0, %v21217_v30 }
 0xdb6   :  { %17849 = vmatmul.mubr.msk.f32.gmra.mrb[82].mxu0 %vm171_vm0, %v21220_v33 }
 0xdb7   :  { %17851 = vmatprep.mubr.msk.f32.mxu0 %vm171_vm0, %v21240_v7 }
 0xdba   :  { %17852 = vmatmul.mubr.msk.f32.gmra.mrb[84].mxu0 %vm171_vm0, %v21242_v11 }
 0xdbb   :  { %17854 = vmatprep.mubr.msk.f32.mxu0 %vm171_vm0, %v21256_v57 }
 0xdbe   :  { %17855 = vmatmul.mubr.msk.f32.gmra.mrb[86].mxu0 %vm171_vm0, %v21258_v1 }
 0xe65   :  { %v21462_v2 = vpop.f32.mrb[64].mxu0 }
 0xe66   :  { %v21464_v0 = vpop.f32.mrb[65].mxu0 }
 0xe69   :  { %v21466_v55 = vpop.f32.mrb[66].mxu0 }
 0xe6a   :  { %v21468_v28 = vpop.f32.mrb[67].mxu0 }
 0xe6d   :  { %v21470_v36 = vpop.f32.mrb[68].mxu0 }
 0xe6e   :  { %v21472_v17 = vpop.f32.mrb[69].mxu0 }
 0xe71   :  { %v21474_v45 = vpop.f32.mrb[70].mxu0 }
 0xe72   :  { %v21476_v25 = vpop.f32.mrb[71].mxu0 }
 0xe75   :  { %v17807_v48 = vpop.f32.mrb[72].mxu0 }
 0xe76   :  { %v3455_v4 = vadd.f32 %v17807_v48, %v16057_v39  ;;  %v3449_v15 = vpop.f32.mrb[73].mxu0 }
 0xe77   :  { %v3450_v46 = vadd.f32 %v16057_v39, %v3449_v15 }
 0xe78   :  { %v3717_v59 = vmul.f32 0.25, %v3455_v4 }
 0xe79   :  { %v3716_v34 = vmul.f32 0.25, %v3450_v46  ;;  %v17810_v62 = vpop.f32.mrb[74].mxu0 }
 0xe7a   :  { %v3465_v5 = vadd.f32 %v17810_v62, %v16057_v39  ;;  %v3459_v8 = vpop.f32.mrb[75].mxu0 }
 0xe7b   :  { %v3460_v31 = vadd.f32 %v16057_v39, %v3459_v8  ;;  %17873 = vmatprep.mubr.msk.f32.mxu1 %vm891_vm9, %v3716_v34 }
 0xe7c   :  { %17874 = vmatmul.mubr.msk.f32.vlgmr.msra.gmra.mrb[80].mxu1 %vm891_vm9, %v3717_v59  ;;  %v3719_v23 = vmul.f32 0.25, %v3465_v5 }
 0xe7d   :  { %v3718_v38 = vmul.f32 0.25, %v3460_v31  ;;  %v17813_v35 = vpop.f32.mrb[76].mxu0 }
 0xe7e   :  { %v3475_v61 = vadd.f32 %v17813_v35, %v16057_v39  ;;  %v3469_v12 = vpop.f32.mrb[77].mxu0 }
 0xe7f   :  { %v3470_v60 = vadd.f32 %v16057_v39, %v3469_v12  ;;  %17876 = vmatprep.mubr.msk.f32.mxu1 %vm891_vm9, %v3718_v38 }
 0xe80   :  { %17877 = vmatmul.mubr.msk.f32.gmra.mrb[82].mxu1 %vm891_vm9, %v3719_v23  ;;  %v3721_v21 = vmul.f32 0.25, %v3475_v61 }
 0xe81   :  { %v3720_v50 = vmul.f32 0.25, %v3470_v60  ;;  %v17816_v63 = vpop.f32.mrb[78].mxu0 }
 0xe82   :  { %v3485_v49 = vadd.f32 %v17816_v63, %v16057_v39  ;;  %v3479_v56 = vpop.f32.mrb[79].mxu0 }
 0xe83   :  { %v3480_v53 = vadd.f32 %v16057_v39, %v3479_v56  ;;  %17879 = vmatprep.mubr.msk.f32.mxu1 %vm891_vm9, %v3720_v50 }
 0xe84   :  { %17880 = vmatmul.mubr.msk.f32.gmra.mrb[84].mxu1 %vm891_vm9, %v3721_v21  ;;  %v3723_v22 = vmul.f32 0.25, %v3485_v49 }
 0xe85   :  { %v3722_v14 = vmul.f32 0.25, %v3480_v53  ;;  %v17847_v26 = vpop.f32.mrb[80].mxu0 }
 0xe86   :  { %v3683_v44 = vadd.f32 %v17847_v26, %v16075_v10  ;;  %v3677_v27 = vpop.f32.mrb[81].mxu0 }
 0xe87   :  { %v3678_v43 = vadd.f32 %v16075_v10, %v3677_v27  ;;  %17882 = vmatprep.mubr.msk.f32.mxu1 %vm891_vm9, %v3722_v14 }
 0xe88   :  { %17883 = vmatmul.mubr.msk.f32.gmra.mrb[86].mxu1 %vm891_vm9, %v3723_v22 }
 0xe89   :  { %v19418_v9 = vpack.c.bf16 %v3683_v44, %v3678_v43  ;;  %v17850_v37 = vpop.f32.mrb[82].mxu0 }
 0xe8a   :  { %v3693_v6 = vadd.f32 %v17850_v37, %v16075_v10  ;;  %v3687_v58 = vpop.f32.mrb[83].mxu0 }
 0xe8b   :  { %v3688_v29 = vadd.f32 %v16075_v10, %v3687_v58  ;;  %19419 = vmatprep.subr.bf16.mxu0 %v19418_v9 }
 0xe8c   :  { %19421 = vmatpush3.bf16.msra.mxu0 %v19418_v9 }
 0xe8d   :  { %v19422_v18 = vpack.c.bf16 %v3693_v6, %v3688_v29  ;;  %v17853_v32 = vpop.f32.mrb[84].mxu0 }
 0xe8e   :  { %v3703_v40 = vadd.f32 %v17853_v32, %v16075_v10  ;;  %v3697_v20 = vpop.f32.mrb[85].mxu0 }
 0xe8f   :  { %v3698_v39 = vadd.f32 %v16075_v10, %v3697_v20  ;;  %19423 = vmatprep.subr.bf16.mxu0 %v19422_v18 }
 0xe90   :  { %19425 = vmatpush3.bf16.msra.mxu0 %v19422_v18 }
 0xe91   :  { %v19426_v48 = vpack.c.bf16 %v3703_v40, %v3698_v39  ;;  %v17856_v4 = vpop.f32.mrb[86].mxu0 }
 0xe92   :  { %v3713_v15 = vadd.f32 %v17856_v4, %v16075_v10  ;;  %v3707_v46 = vpop.f32.mrb[87].mxu0 }
 0xe93   :  { %v3708_v34 = vadd.f32 %v16075_v10, %v3707_v46  ;;  %19427 = vmatprep.subr.bf16.mxu0 %v19426_v48 }
 0xe94   :  { %19429 = vmatpush3.bf16.msra.mxu0 %v19426_v48 }
 0xe95   :  { %v19430_v62 = vpack.c.bf16 %v3713_v15, %v3708_v34 }
 0xe97   :  { %19431 = vmatprep.subr.bf16.mxu0 %v19430_v62 }
 0xe98   :  { %19433 = vmatpush3.bf16.msra.mxu0 %v19430_v62 }
 0xf4f   :  { %v17875_v59 = vpop.f32.mrb[80].mxu1 }
 0xf50   :  { %v3844_v5 = vadd.f32 %v21334_v41, %v17875_v59  ;;  %v3838_v8 = vpop.f32.mrb[81].mxu1 }
 0xf51   :  { %v3839_v31 = vadd.f32 %v21339_v16, %v3838_v8 }
 0xf52   :  { %v3880_v38 = vsel %vm1045_vm11, %v3844_v5, -inf }
 0xf53   :  { %3881 = vmax.xlane.f32.xlu1 %v3880_v38  ;;  %v17878_v35 = vpop.f32.mrb[82].mxu1  ;;  %v3877_v23 = vsel %vm1045_vm11, %v3839_v31, -inf }
 0xf54   :  { %v3854_v61 = vadd.f32 %v21348_v42, %v17878_v35  ;;  %v3848_v12 = vpop.f32.mrb[83].mxu1  ;;  %3878 = vmax.xlane.f32.xlu0 %v3877_v23 }
 0xf55   :  { %v3849_v60 = vadd.f32 %v21353_v3, %v3848_v12 }
 0xf56   :  { %v3886_v50 = vsel %vm1045_vm11, %v3854_v61, -inf }
 0xf57   :  { %3887 = vmax.xlane.f32.xlu1 %v3886_v50  ;;  %v17881_v63 = vpop.f32.mrb[84].mxu1  ;;  %v3883_v41 = vsel %vm1045_vm11, %v3849_v60, -inf }
 0xf58   :  { %v3864_v16 = vadd.f32 %v21362_v51, %v17881_v63  ;;  %v3858_v21 = vpop.f32.mrb[85].mxu1  ;;  %3884 = vmax.xlane.f32.xlu0 %v3883_v41 }
 0xf59   :  { %v3859_v49 = vadd.f32 %v21367_v24, %v3858_v21 }
 0xf5a   :  { %v3892_v56 = vsel %vm1045_vm11, %v3864_v16, -inf }
 0xf5b   :  { %3893 = vmax.xlane.f32.xlu1 %v3892_v56  ;;  %v17884_v42 = vpop.f32.mrb[86].mxu1  ;;  %v3889_v53 = vsel %vm1045_vm11, %v3859_v49, -inf }
 0xf5c   :  { %v3874_v3 = vadd.f32 %v21376_v13, %v17884_v42  ;;  %v3868_v10 = vpop.f32.mrb[87].mxu1  ;;  %3890 = vmax.xlane.f32.xlu0 %v3889_v53  ;;  %v4094_v42 = vld [vmem:[#allocation2 + $0x278] sm:$0xff]  ;;  %v4095_v53 = vld [vmem:[#allocation2 + $0x280] sm:$0xff] }
 0xf5d   :  { %v3869_v14 = vadd.f32 %v21381_v19, %v3868_v10 }
 0xf5e   :  { %v3898_v26 = vsel %vm1045_vm11, %v3874_v3, -inf }
 0xf5f   :  { %3899 = vmax.xlane.f32.xlu1 %v3898_v26  ;;  %v3895_v51 = vsel %vm1045_vm11, %v3869_v14, -inf }
 0xf60   :  { %3896 = vmax.xlane.f32.xlu0 %v3895_v51 }
 0xfe0   :  { %v3882_v22 = vpop.xlane.xlu1 %3881 }
 0xfe1   :  { %v3902_v24 = vsub.f32 %v3844_v5, %v3882_v22  ;;  %v3879_v44 = vpop.xlane.xlu0 %3878 }
 0xfe2   :  { %v3901_v27 = vsub.f32 %v3839_v31, %v3879_v44 }
 0xfe3   :  { %v3911_v43 = vmul.f32 1.442695, %v3902_v24 }
 0xfe4   :  { %v3909_v9 = vmul.f32 1.442695, %v3901_v27  ;;  %v3888_v37 = vpop.xlane.xlu1 %3887 }
 0xfe5   :  { %20172 = vpow2.f32 %v3911_v43  ;;  %v3904_v6 = vsub.f32 %v3854_v61, %v3888_v37  ;;  %v3885_v13 = vpop.xlane.xlu0 %3884 }
 0xfe6   :  { %20174 = vpow2.f32 %v3909_v9  ;;  %v3903_v58 = vsub.f32 %v3849_v60, %v3885_v13 }
 0xfe7   :  { %v3915_v29 = vmul.f32 1.442695, %v3904_v6 }
 0xfe8   :  { %v3913_v19 = vmul.f32 1.442695, %v3903_v58  ;;  %v3894_v18 = vpop.xlane.xlu1 %3893 }
 0xfe9   :  { %20176 = vpow2.f32 %v3915_v29  ;;  %v3906_v32 = vsub.f32 %v3864_v16, %v3894_v18  ;;  %v3891_v40 = vpop.xlane.xlu0 %3890 }
 0xfea   :  { %20178 = vpow2.f32 %v3913_v19  ;;  %v3905_v20 = vsub.f32 %v3859_v49, %v3891_v40 }
 0xfeb   :  { %v3919_v39 = vmul.f32 1.442695, %v3906_v32 }
 0xfec   :  { %v3917_v48 = vmul.f32 1.442695, %v3905_v20  ;;  %v3900_v4 = vpop.xlane.xlu1 %3899 }
 0xfed   :  { %20180 = vpow2.f32 %v3919_v39  ;;  %v3908_v15 = vsub.f32 %v3874_v3, %v3900_v4  ;;  %v3897_v46 = vpop.xlane.xlu0 %3896  ;;  %v19434_v3 = vpack.c.bf16 %v4095_v53, %v4094_v42 }
 0xfee   :  { %20182 = vpow2.f32 %v3917_v48  ;;  %v3907_v34 = vsub.f32 %v3869_v14, %v3897_v46  ;;  %v3372_v46 = vld [vmem:[#allocation2 + $0x1f0] sm:$0xff] }
 0xfef   :  { %v20173_v62 = vpop.eup %20172  ;;  %v3923_v59 = vmul.f32 1.442695, %v3908_v15  ;;  %19435 = vmatprep.subr.bf16.mxu0 %v19434_v3 }
 0xff0   :  { %v20175_v5 = vpop.eup %20174  ;;  %v3921_v8 = vmul.f32 1.442695, %v3907_v34  ;;  %v3928_v31 = vsel %vm1045_vm11, %v20173_v62, 0.0  ;;  %v3373_v34 = vld [vmem:[#allocation2 + $0x1f8] sm:$0xff] }
 0xff1   :  { %20184 = vpow2.f32 %v3923_v59  ;;  %3929 = vadd.xlane.f32.xlu1 %v3928_v31  ;;  %v3925_v38 = vsel %vm1045_vm11, %v20175_v5, 0.0  ;;  %v4375_v59 = vld [vmem:[#allocation2 + $0x290] sm:$0xff] }
 0xff2   :  { %20186 = vpow2.f32 %v3921_v8  ;;  %3926 = vadd.xlane.f32.xlu0 %v3925_v38  ;;  %v4377_v8 = vld [vmem:[#allocation2 + $0x2a0] sm:$0xff]  ;;  %v4378_v38 = vld [vmem:[#allocation2 + $0x2a8] sm:$0xff] }
 0xff3   :  { %v20177_v35 = vpop.eup %20176 }
 0xff4   :  { %v20179_v23 = vpop.eup %20178  ;;  %v3934_v61 = vsel %vm1045_vm11, %v20177_v35, 0.0 }
 0xff5   :  { %3935 = vadd.xlane.f32.xlu1 %v3934_v61  ;;  %v3931_v12 = vsel %vm1045_vm11, %v20179_v23, 0.0 }
 0xff6   :  { %3932 = vadd.xlane.f32.xlu0 %v3931_v12 }
 0xff7   :  { %v20181_v60 = vpop.eup %20180 }
 0xff8   :  { %v20183_v50 = vpop.eup %20182  ;;  %v3940_v63 = vsel %vm1045_vm11, %v20181_v60, 0.0 }
 0xff9   :  { %3941 = vadd.xlane.f32.xlu1 %v3940_v63  ;;  %v3937_v41 = vsel %vm1045_vm11, %v20183_v50, 0.0 }
 0xffa   :  { %3938 = vadd.xlane.f32.xlu0 %v3937_v41 }
 0xffb   :  { %v20185_v16 = vpop.eup %20184 }
 0xffc   :  { %v20187_v21 = vpop.eup %20186  ;;  %v3946_v49 = vsel %vm1045_vm11, %v20185_v16, 0.0 }
 0xffd   :  { %3947 = vadd.xlane.f32.xlu1 %v3946_v49  ;;  %v3943_v56 = vsel %vm1045_vm11, %v20187_v21, 0.0 }
 0xffe   :  { %3944 = vadd.xlane.f32.xlu0 %v3943_v56 }
0x107e   :  { %v3930_v10 = vpop.xlane.xlu1 %3929 }
0x107f   :  { %20188 = vrcp.f32 %v3930_v10  ;;  %v3927_v14 = vpop.xlane.xlu0 %3926 }
0x1080   :  { %20190 = vrcp.f32 %v3927_v14 }
0x1082   :  { %v3936_v26 = vpop.xlane.xlu1 %3935 }
0x1083   :  { %20192 = vrcp.f32 %v3936_v26  ;;  %v3933_v51 = vpop.xlane.xlu0 %3932 }
0x1084   :  { %20194 = vrcp.f32 %v3933_v51 }
0x1086   :  { %v3942_v22 = vpop.xlane.xlu1 %3941 }
0x1087   :  { %20196 = vrcp.f32 %v3942_v22  ;;  %v3939_v24 = vpop.xlane.xlu0 %3938 }
0x1088   :  { %20198 = vrcp.f32 %v3939_v24  ;;  %v4876_v24 = vld [vmem:[#allocation2 + $0x2e0] sm:$0xff] }
0x1089   :  { %v20189_v44 = vpop.eup %20188 }
0x108a   :  { %v20191_v27 = vpop.eup %20190  ;;  %v3948_v43 = vpop.xlane.xlu1 %3947  ;;  %v3958_v6 = vmul.f32 %v20189_v44, %v20173_v62  ;;  %v19438_v62 = vpack.c.bf16 %v3373_v34, %v3372_v46  ;;  %v4737_v44 = vld [vmem:[#allocation2 + $0x2b8] sm:$0xff] }
0x108b   :  { %20200 = vrcp.f32 %v3948_v43  ;;  %v3945_v9 = vpop.xlane.xlu0 %3944  ;;  %v3957_v37 = vmul.f32 %v20191_v27, %v20175_v5  ;;  %v4376_v5 = vld [vmem:[#allocation2 + $0x298] sm:$0xff]  ;;  %v4738_v27 = vld [vmem:[#allocation2 + $0x2c0] sm:$0xff] }
0x108c   :  { %20202 = vrcp.f32 %v3945_v9  ;;  %v19442_v31 = vpack.c.bf16 %v4376_v5, %v4375_v59  ;;  %v19450_v43 = vpack.c.bf16 %v4738_v27, %v4737_v44  ;;  %v4877_v9 = vld [vmem:[#allocation2 + $0x2e8] sm:$0xff] }
0x108d   :  { %v20193_v13 = vpop.eup %20192  ;;  %17901 = vmatprep.mubr.msk.f32.mxu0 %vm1045_vm11, %v3957_v37  ;;  %v4878_v37 = vld [vmem:[#allocation2 + $0x2f0] sm:$0xff] }
0x108e   :  { %v20195_v58 = vpop.eup %20194  ;;  %17902 = vmatmul.mubr.msk.f32.vlgmr.msra.gmra.mrb[88].mxu0 %vm1045_vm11, %v3958_v6  ;;  %v3960_v19 = vmul.f32 %v20193_v13, %v20177_v35  ;;  %v19446_v35 = vpack.c.bf16 %v4378_v38, %v4377_v8  ;;  %19443 = vmatprep.subr.bf16.mxu1 %v19442_v31  ;;  %v4739_v6 = vld [vmem:[#allocation2 + $0x2c8] sm:$0xff]  ;;  %v19462_v13 = vpack.c.bf16 %v4878_v37, %v4877_v9 }
0x108f   :  { %v3959_v29 = vmul.f32 %v20195_v58, %v20179_v23  ;;  %19437 = vmatpush3.bf16.msra.mxu0 %v19434_v3  ;;  %19445 = vmatpush3.bf16.msra.mxu1 %v19442_v31  ;;  %v4740_v58 = vld [vmem:[#allocation2 + $0x2d0] sm:$0xff] }
0x1090   :  { %19439 = vmatprep.subr.bf16.mxu0 %v19438_v62  ;;  %19447 = vmatprep.subr.bf16.mxu1 %v19446_v35 }
0x1091   :  { %v20197_v18 = vpop.eup %20196  ;;  %17904 = vmatprep.mubr.msk.f32.mxu0 %vm1045_vm11, %v3959_v29  ;;  %v19454_v29 = vpack.c.bf16 %v4740_v58, %v4739_v6 }
0x1092   :  { %v20199_v32 = vpop.eup %20198  ;;  %17905 = vmatmul.mubr.msk.f32.gmra.mrb[90].mxu0 %vm1045_vm11, %v3960_v19  ;;  %v3962_v20 = vmul.f32 %v20197_v18, %v20181_v60  ;;  %v4989_v19 = vld [vmem:[#allocation2 + $0x2f8] sm:$0xff]  ;;  %v4990_v18 = vld [vmem:[#allocation2 + $0x300] sm:$0xff] }
0x1093   :  { %v3961_v40 = vmul.f32 %v20199_v32, %v20183_v50  ;;  %19449 = vmatpush3.bf16.msra.mxu1 %v19446_v35  ;;  %v21570_v32 = vpack.c.bf16 %v4990_v18, %v4989_v19 }
0x1094   :  { %19451 = vmatprep.subr.bf16.mxu1 %v19450_v43 }
0x1095   :  { %v20201_v39 = vpop.eup %20200  ;;  %17907 = vmatprep.mubr.msk.f32.mxu0 %vm1045_vm11, %v3961_v40 }
0x1096   :  { %v20203_v48 = vpop.eup %20202  ;;  %17908 = vmatmul.mubr.msk.f32.gmra.mrb[92].mxu0 %vm1045_vm11, %v3962_v20  ;;  %v3964_v15 = vmul.f32 %v20201_v39, %v20185_v16  ;;  %v16133_v20 = vld [vmem:[#allocation2 + $0x2b0] ss:$0 sm:$0xff] }
0x1097   :  { %v3963_v4 = vmul.f32 %v20203_v48, %v20187_v21  ;;  %v16124_v21 = vld [vmem:[#allocation2 + $0x288] ss:$0 sm:$0xff] }
0x1099   :  { %17910 = vmatprep.mubr.msk.f32.mxu0 %vm1045_vm11, %v3963_v4 }
0x109a   :  { %17911 = vmatmul.mubr.msk.f32.gmra.mrb[94].mxu0 %vm1045_vm11, %v3964_v15 }
0x1161   :  { %v17903_v23 = vpop.f32.mrb[88].mxu0 }
0x1162   :  { %v4055_v61 = vpop.f32.mrb[89].mxu0 }
0x1163   :  { %17917 = vmatprep.mubr.msk.f32.mxu0 %vm891_vm9, %v4055_v61 }
0x1164   :  { %17918 = vmatmul.mubr.msk.f32.vlgmr.msra.gmra.mrb[96].mxu0 %vm891_vm9, %v17903_v23 }
0x1165   :  { %v17906_v12 = vpop.f32.mrb[90].mxu0  ;;  %19441 = vmatpush3.bf16.msra.mxu0 %v19438_v62 }
0x1166   :  { %v4065_v60 = vpop.f32.mrb[91].mxu0 }
0x1167   :  { %17920 = vmatprep.mubr.msk.f32.mxu0 %vm891_vm9, %v4065_v60 }
0x1168   :  { %17921 = vmatmul.mubr.msk.f32.gmra.mrb[98].mxu0 %vm891_vm9, %v17906_v12 }
0x1169   :  { %v17909_v50 = vpop.f32.mrb[92].mxu0 }
0x116a   :  { %v4075_v63 = vpop.f32.mrb[93].mxu0 }
0x116b   :  { %17923 = vmatprep.mubr.msk.f32.mxu0 %vm891_vm9, %v4075_v63 }
0x116c   :  { %17924 = vmatmul.mubr.msk.f32.gmra.mrb[100].mxu0 %vm891_vm9, %v17909_v50 }
0x116d   :  { %v17912_v41 = vpop.f32.mrb[94].mxu0 }
0x116e   :  { %v4085_v16 = vpop.f32.mrb[95].mxu0 }
0x116f   :  { %17926 = vmatprep.mubr.msk.f32.mxu0 %vm891_vm9, %v4085_v16 }
0x1170   :  { %17927 = vmatmul.mubr.msk.f32.gmra.mrb[102].mxu0 %vm891_vm9, %v17912_v41 }
0x1171   :  { %17933 = vmatprep.mubr.msk.f32.mxu0 %vm891_vm9, %v21464_v0 }
0x1174   :  { %17934 = vmatmul.mubr.msk.f32.vlgmr.msra.gmra.mrb[96].mxu0 %vm891_vm9, %v21462_v2 }
0x1175   :  { %17936 = vmatprep.mubr.msk.f32.mxu0 %vm891_vm9, %v21468_v28 }
0x1178   :  { %17937 = vmatmul.mubr.msk.f32.gmra.mrb[98].mxu0 %vm891_vm9, %v21466_v55 }
0x1179   :  { %17939 = vmatprep.mubr.msk.f32.mxu0 %vm891_vm9, %v21472_v17 }
0x117c   :  { %17940 = vmatmul.mubr.msk.f32.gmra.mrb[100].mxu0 %vm891_vm9, %v21470_v36 }
0x117d   :  { %17942 = vmatprep.mubr.msk.f32.mxu0 %vm891_vm9, %v21476_v25 }
0x1180   :  { %17943 = vmatmul.mubr.msk.f32.gmra.mrb[102].mxu0 %vm891_vm9, %v21474_v45 }
0x1247   :  { %v17935_v0 = vpop.f32.mrb[96].mxu0 }
0x1248   :  { %v4355_v2 = vadd.f32 %v17935_v0, %v21193_v54  ;;  %v4315_v28 = vpop.f32.mrb[97].mxu0 }
0x1249   :  { %v4354_v49 = vadd.f32 %v4315_v28, %v21197_v47 }
0x124a   :  { %v4368_v42 = vadd.f32 %v16124_v21, %v4355_v2 }
0x124b   :  { %v4367_v55 = vadd.f32 %v16124_v21, %v4354_v49  ;;  %v17938_v56 = vpop.f32.mrb[98].mxu0 }
0x124c   :  { %v4357_v17 = vadd.f32 %v17938_v56, %v21220_v33  ;;  %v4325_v53 = vpop.f32.mrb[99].mxu0 }
0x124d   :  { %v4356_v36 = vadd.f32 %v4325_v53, %v21217_v30  ;;  %17953 = vmatprep.mubr.msk.f32.mxu1 %vm171_vm0, %v4367_v55 }
0x124e   :  { %17954 = vmatmul.mubr.msk.f32.vlgmr.msra.gmra.mrb[88].mxu1 %vm171_vm0, %v4368_v42  ;;  %v4370_v3 = vadd.f32 %v16124_v21, %v4357_v17 }
0x124f   :  { %v4369_v45 = vadd.f32 %v16124_v21, %v4356_v36  ;;  %v17941_v25 = vpop.f32.mrb[100].mxu0  ;;  %19453 = vmatpush3.bf16.msra.mxu1 %v19450_v43 }
0x1250   :  { %v4359_v54 = vadd.f32 %v17941_v25, %v21242_v11  ;;  %v4335_v10 = vpop.f32.mrb[101].mxu0  ;;  %19455 = vmatprep.subr.bf16.mxu1 %v19454_v29 }
0x1251   :  { %v4358_v47 = vadd.f32 %v4335_v10, %v21240_v7  ;;  %17956 = vmatprep.mubr.msk.f32.mxu1 %vm171_vm0, %v4369_v45 }
0x1252   :  { %17957 = vmatmul.mubr.msk.f32.gmra.mrb[90].mxu1 %vm171_vm0, %v4370_v3  ;;  %v21554_v30 = vadd.f32 %v16124_v21, %v4359_v54 }
0x1253   :  { %v21552_v33 = vadd.f32 %v16124_v21, %v4358_v47  ;;  %v17944_v14 = vpop.f32.mrb[102].mxu0  ;;  %19457 = vmatpush3.bf16.msra.mxu1 %v19454_v29 }
0x1254   :  { %v4361_v26 = vadd.f32 %v17944_v14, %v21258_v1  ;;  %v4345_v51 = vpop.f32.mrb[103].mxu0  ;;  %v4875_v1 = vld [vmem:[#allocation2 + $0x2d8] sm:$0xff]  ;;  %19467 = vmatprep.subr.bf16.mxu1 %v21570_v32 }
0x1255   :  { %v4360_v22 = vadd.f32 %v4345_v51, %v21256_v57  ;;  %17959 = vmatprep.mubr.msk.f32.mxu1 %vm171_vm0, %v21552_v33  ;;  %v19458_v57 = vpack.c.bf16 %v4876_v24, %v4875_v1 }
0x1256   :  { %17960 = vmatmul.mubr.msk.f32.gmra.mrb[92].mxu1 %vm171_vm0, %v21554_v30  ;;  %v21564_v11 = vadd.f32 %v16124_v21, %v4361_v26 }
0x1257   :  { %v21562_v7 = vadd.f32 %v16124_v21, %v4360_v22  ;;  %19459 = vmatprep.subr.bf16.mxu0 %v19458_v57 }
0x1258   :  { %19461 = vmatpush3.bf16.msra.mxu0 %v19458_v57 }
0x1259   :  { %17962 = vmatprep.mubr.msk.f32.mxu1 %vm171_vm0, %v21562_v7  ;;  %19463 = vmatprep.subr.bf16.mxu0 %v19462_v13 }
0x125a   :  { %17963 = vmatmul.mubr.msk.f32.gmra.mrb[94].mxu1 %vm171_vm0, %v21564_v11 }
0x125c   :  { %19465 = vmatpush3.bf16.msra.mxu0 %v19462_v13 }
0x1321   :  { %v17955_v40 = vpop.f32.mrb[88].mxu1 }
0x1322   :  { %v4509_v39 = vadd.f32 %v17955_v40, %v4368_v42  ;;  %v4469_v48 = vpop.f32.mrb[89].mxu1 }
0x1323   :  { %v4508_v4 = vadd.f32 %v4469_v48, %v4367_v55 }
0x1324   :  { %v4522_v15 = vadd.f32 %v16133_v20, %v4509_v39 }
0x1325   :  { %v21573_v46 = vadd.f32 %v16133_v20, %v4508_v4  ;;  %v17958_v34 = vpop.f32.mrb[90].mxu1 }
0x1326   :  { %v21575_v62 = vmul.f32 0.70710677, %v4522_v15  ;;  %v4511_v59 = vadd.f32 %v17958_v34, %v4370_v3  ;;  %v4479_v5 = vpop.f32.mrb[91].mxu1  ;;  %v21614_v27 = vmul.f32 0.5, %v4522_v15 }
0x1327   :  { %v21578_v8 = vmul.f32 0.70710677, %v21573_v46  ;;  %v4510_v31 = vadd.f32 %v4479_v5, %v4369_v45 }
0x1328   :  { %v4546_v38 = vand.u32 2147483647, %v21575_v62  ;;  %v21581_v35 = vadd.f32 %v16133_v20, %v4511_v59  ;;  %vm4698_vm5 = vcmp.ge.f32.partialorder %v21575_v62, 0.0 }
0x1329   :  { %v4545_v23 = vand.u32 2147483647, %v21578_v8  ;;  %v21584_v61 = vadd.f32 %v16133_v20, %v4510_v31  ;;  %v17961_v12 = vpop.f32.mrb[92].mxu1  ;;  %vm4697_vm6 = vcmp.ge.f32.partialorder %v21578_v8, 0.0 }
0x132a   :  { %v4554_v60 = vmul.f32 0.3275911, %v4546_v38  ;;  %v21587_v50 = vmul.f32 0.70710677, %v21581_v35  ;;  %v4489_v2 = vpop.f32.mrb[93].mxu1  ;;  %v4650_v42 = vsub.f32 0.0, %v4546_v38  ;;  %v4513_v45 = vadd.f32 %v17961_v12, %v21554_v30 }
0x132b   :  { %v4553_v63 = vmul.f32 0.3275911, %v4545_v23  ;;  %v21590_v41 = vmul.f32 0.70710677, %v21584_v61  ;;  %v4649_v53 = vsub.f32 0.0, %v4545_v23  ;;  %v4512_v54 = vadd.f32 %v4489_v2, %v21552_v33 }
0x132c   :  { %v4562_v16 = vadd.f32 1.0, %v4554_v60  ;;  %v4548_v0 = vand.u32 2147483647, %v21587_v50  ;;  %v21596_v10 = vadd.f32 %v16133_v20, %v4513_v45  ;;  %v4658_v14 = vmul.f32 %v4650_v42, %v4546_v38 }
0x132d   :  { %v4561_v21 = vadd.f32 1.0, %v4553_v63  ;;  %v4547_v28 = vand.u32 2147483647, %v21590_v41  ;;  %v17964_v49 = vpop.f32.mrb[94].mxu1  ;;  %v21599_v26 = vadd.f32 %v16133_v20, %v4512_v54  ;;  %v4657_v22 = vmul.f32 %v4649_v53, %v4545_v23 }
0x132e   :  { %20204 = vrcp.f32 %v4562_v16  ;;  %v4556_v55 = vmul.f32 0.3275911, %v4548_v0  ;;  %v4499_v56 = vpop.f32.mrb[95].mxu1  ;;  %v4652_v25 = vsub.f32 0.0, %v4548_v0  ;;  %v4515_v47 = vadd.f32 %v17964_v49, %v21564_v11 }
0x132f   :  { %20206 = vrcp.f32 %v4561_v21  ;;  %v4555_v17 = vmul.f32 0.3275911, %v4547_v28  ;;  %v4514_v51 = vadd.f32 %v4499_v56, %v21562_v7  ;;  %v21603_v1 = vmul.f32 0.70710677, %v21596_v10 }
0x1330   :  { %v4564_v36 = vadd.f32 1.0, %v4556_v55  ;;  %v21605_v30 = vadd.f32 %v16133_v20, %v4515_v47  ;;  %v4660_v24 = vmul.f32 %v4652_v25, %v4548_v0  ;;  %v21608_v33 = vmul.f32 0.70710677, %v21599_v26 }
0x1331   :  { %v4563_v3 = vadd.f32 1.0, %v4555_v17  ;;  %v4651_v44 = vsub.f32 0.0, %v4547_v28  ;;  %v4550_v57 = vand.u32 2147483647, %v21603_v1  ;;  %v4667_v43 = vmul.f32 1.442695, %v4658_v14 }
0x1332   :  { %20208 = vrcp.f32 %v4564_v36  ;;  %v21612_v11 = vmul.f32 0.70710677, %v21605_v30  ;;  %v4549_v7 = vand.u32 2147483647, %v21608_v33  ;;  %v21617_v9 = vadd.f32 %v16133_v20, %v4514_v51 }
0x1333   :  { %20210 = vrcp.f32 %v4563_v3  ;;  %v4665_v6 = vmul.f32 1.442695, %v4657_v22  ;;  %v4558_v13 = vmul.f32 0.3275911, %v4550_v57  ;;  %v4671_v18 = vmul.f32 1.442695, %v4660_v24 }
0x1334   :  { %v4552_v58 = vand.u32 2147483647, %v21612_v11  ;;  %v4557_v40 = vmul.f32 0.3275911, %v4549_v7  ;;  %v4659_v48 = vmul.f32 %v4651_v44, %v4547_v28  ;;  %20212 = vpow2.f32 %v4667_v43  ;;  %v4991_v22 = vld [vmem:[#allocation2 + $0x308] sm:$0xff]  ;;  %v4992_v43 = vld [vmem:[#allocation2 + $0x310] sm:$0xff] }
0x1335   :  { %v4566_v4 = vadd.f32 1.0, %v4558_v13  ;;  %v21627_v59 = vmul.f32 0.70710677, %v21617_v9  ;;  %v4654_v38 = vsub.f32 0.0, %v4550_v57  ;;  %v4653_v16 = vsub.f32 0.0, %v4549_v7 }
0x1336   :  { %v4560_v15 = vmul.f32 0.3275911, %v4552_v58  ;;  %v4565_v20 = vadd.f32 1.0, %v4557_v40  ;;  %v4669_v21 = vmul.f32 1.442695, %v4659_v48  ;;  %v4656_v28 = vsub.f32 0.0, %v4552_v58 }
0x1337   :  { %20214 = vrcp.f32 %v4566_v4  ;;  %v4551_v56 = vand.u32 2147483647, %v21627_v59  ;;  %v4662_v53 = vmul.f32 %v4654_v38, %v4550_v57  ;;  %v4661_v25 = vmul.f32 %v4653_v16, %v4549_v7 }
0x1338   :  { %v21619_v37 = vpop.eup %20204  ;;  %v4568_v23 = vadd.f32 1.0, %v4560_v15  ;;  %20216 = vrcp.f32 %v4565_v20  ;;  %v21641_v54 = vmul.f32 0.5, %v21573_v46  ;;  %v4664_v51 = vmul.f32 %v4656_v28, %v4552_v58 }
0x1339   :  { %v21622_v29 = vpop.eup %20206  ;;  %v4578_v19 = vmul.f32 1.0614054, %v21619_v37  ;;  %20218 = vpow2.f32 %v4665_v6  ;;  %v4559_v3 = vmul.f32 0.3275911, %v4551_v56  ;;  %v4655_v15 = vsub.f32 0.0, %v4551_v56 }
0x133a   :  { %v4577_v39 = vmul.f32 1.0614054, %v21622_v29  ;;  %20220 = vrcp.f32 %v4568_v23  ;;  %v21654_v23 = vpack.c.bf16 %v4992_v43, %v4991_v22  ;;  %vm4700_vm7 = vcmp.ge.f32.partialorder %v21587_v50, 0.0 }
0x133b   :  { %v4586_v34 = vadd.f32 -1.4531521, %v4578_v19  ;;  %20222 = vpow2.f32 %v4671_v18  ;;  %v4567_v57 = vadd.f32 1.0, %v4559_v3  ;;  %v4675_v19 = vmul.f32 1.442695, %v4662_v53 }
0x133c   :  { %v21629_v5 = vpop.eup %20208  ;;  %v4585_v31 = vadd.f32 -1.4531521, %v4577_v39  ;;  %20224 = vpow2.f32 %v4669_v21  ;;  %v4673_v39 = vmul.f32 1.442695, %v4661_v25  ;;  %v4679_v18 = vmul.f32 1.442695, %v4664_v51 }
0x133d   :  { %v21631_v12 = vpop.eup %20210  ;;  %v4594_v60 = vmul.f32 %v21619_v37, %v4586_v34  ;;  %v4580_v63 = vmul.f32 1.0614054, %v21629_v5  ;;  %20226 = vrcp.f32 %v4567_v57  ;;  %v4663_v53 = vmul.f32 %v4655_v15, %v4551_v56 }
0x133e   :  { %v4593_v0 = vmul.f32 %v21622_v29, %v4585_v31  ;;  %v4579_v2 = vmul.f32 1.0614054, %v21631_v12  ;;  %v20213_v7 = vpop.eup %20212  ;;  %20228 = vpow2.f32 %v4675_v19  ;;  %vm4699_vm8 = vcmp.ge.f32.partialorder %v21590_v41, 0.0 }
0x133f   :  { %v4602_v49 = vadd.f32 1.4214138, %v4594_v60  ;;  %v4588_v55 = vadd.f32 -1.4531521, %v4580_v63  ;;  %20230 = vpow2.f32 %v4673_v39  ;;  %v4532_v50 = vmul.f32 0.5, %v21581_v35 }
0x1340   :  { %v4601_v42 = vadd.f32 1.4214138, %v4593_v0  ;;  %v4587_v17 = vadd.f32 -1.4531521, %v4579_v2  ;;  %20232 = vpow2.f32 %v4679_v18  ;;  %vm4702_vm12 = vcmp.ge.f32.partialorder %v21603_v1, 0.0 }
0x1341   :  { %v4610_v36 = vmul.f32 %v21619_v37, %v4602_v49  ;;  %v4596_v45 = vmul.f32 %v21629_v5, %v4588_v55  ;;  %v21647_v48 = vpop.eup %20214  ;;  %vm4701_vm13 = vcmp.ge.f32.partialorder %v21608_v33, 0.0  ;;  %vm4704_vm14 = vcmp.ge.f32.partialorder %v21612_v11, 0.0 }
0x1342   :  { %v4609_v47 = vmul.f32 %v21622_v29, %v4601_v42  ;;  %v4595_v14 = vmul.f32 %v21631_v12, %v4587_v17  ;;  %v21651_v34 = vpop.eup %20216  ;;  %v4582_v38 = vmul.f32 1.0614054, %v21647_v48  ;;  %vm4703_vm15 = vcmp.ge.f32.partialorder %v21627_v59, 0.0 }
0x1343   :  { %v4618_v24 = vadd.f32 -0.28449672, %v4610_v36  ;;  %v4604_v44 = vadd.f32 1.4214138, %v4596_v45  ;;  %v4581_v16 = vmul.f32 1.0614054, %v21651_v34  ;;  %v20219_v0 = vpop.eup %20218 }
0x1344   :  { %v4617_v6 = vadd.f32 -0.28449672, %v4609_v47  ;;  %v4603_v13 = vadd.f32 1.4214138, %v4595_v14  ;;  %v4590_v28 = vadd.f32 -1.4531521, %v4582_v38  ;;  %v21661_v49 = vpop.eup %20220 }
0x1345   :  { %v4626_v40 = vmul.f32 %v21619_v37, %v4618_v24  ;;  %v4612_v46 = vmul.f32 %v21629_v5, %v4604_v44  ;;  %v4589_v17 = vadd.f32 -1.4531521, %v4581_v16  ;;  %v20223_v51 = vpop.eup %20222 }
0x1346   :  { %v4625_v58 = vmul.f32 %v21622_v29, %v4617_v6  ;;  %v4611_v4 = vmul.f32 %v21631_v12, %v4603_v13  ;;  %v4598_v25 = vmul.f32 %v21647_v48, %v4590_v28  ;;  %v20225_v44 = vpop.eup %20224  ;;  %v4677_v13 = vmul.f32 1.442695, %v4663_v53 }
0x1347   :  { %v4634_v20 = vadd.f32 0.2548296, %v4626_v40  ;;  %v4620_v31 = vadd.f32 -0.28449672, %v4612_v46  ;;  %v4597_v14 = vmul.f32 %v21651_v34, %v4589_v17  ;;  %v21672_v19 = vpop.eup %20226 }
0x1348   :  { %v4633_v60 = vadd.f32 0.2548296, %v4625_v58  ;;  %v4619_v63 = vadd.f32 -0.28449672, %v4611_v4  ;;  %v4606_v56 = vadd.f32 1.4214138, %v4598_v25  ;;  %v20229_v38 = vpop.eup %20228  ;;  %20234 = vpow2.f32 %v4677_v13 }
0x1349   :  { %v4642_v2 = vmul.f32 %v21619_v37, %v4634_v20  ;;  %v4628_v21 = vmul.f32 %v21629_v5, %v4620_v31  ;;  %v4584_v37 = vmul.f32 1.0614054, %v21661_v49  ;;  %v4605_v6 = vadd.f32 1.4214138, %v4597_v14 }
0x134a   :  { %v4641_v55 = vmul.f32 %v21622_v29, %v4633_v60  ;;  %v4627_v42 = vmul.f32 %v21631_v12, %v4619_v63  ;;  %v4614_v46 = vmul.f32 %v21647_v48, %v4606_v56  ;;  %v4583_v18 = vmul.f32 1.0614054, %v21672_v19 }
0x134b   :  { %v4682_v36 = vmul.f32 %v20213_v7, %v4642_v2  ;;  %v4636_v45 = vadd.f32 0.2548296, %v4628_v21  ;;  %v4592_v24 = vadd.f32 -1.4531521, %v4584_v37  ;;  %v4613_v4 = vmul.f32 %v21651_v34, %v4605_v6  ;;  %v20231_v2 = vpop.eup %20230 }
0x134c   :  { %v4681_v3 = vmul.f32 %v20219_v0, %v4641_v55  ;;  %v4635_v47 = vadd.f32 0.2548296, %v4627_v42  ;;  %v4622_v20 = vadd.f32 -0.28449672, %v4614_v46 }
0x134d   :  { %v4690_v22 = vsub.f32 1.0, %v4682_v36  ;;  %v4644_v29 = vmul.f32 %v21629_v5, %v4636_v45  ;;  %v4600_v39 = vmul.f32 %v21661_v49, %v4592_v24  ;;  %v4621_v0 = vadd.f32 -0.28449672, %v4613_v4 }
0x134e   :  { %v4689_v57 = vsub.f32 1.0, %v4681_v3  ;;  %v4643_v43 = vmul.f32 %v21631_v12, %v4635_v47  ;;  %v4630_v55 = vmul.f32 %v21647_v48, %v4622_v20  ;;  %v4591_v36 = vadd.f32 -1.4531521, %v4583_v18  ;;  %v20233_v3 = vpop.eup %20232 }
0x134f   :  { %v4706_v7 = vsub.f32 0.0, %v4690_v22  ;;  %v4684_v40 = vmul.f32 %v20223_v51, %v4644_v29  ;;  %v4608_v31 = vadd.f32 1.4214138, %v4600_v39  ;;  %v4629_v53 = vmul.f32 %v21651_v34, %v4621_v0 }
0x1350   :  { %v4705_v58 = vsub.f32 0.0, %v4689_v57  ;;  %v4683_v5 = vmul.f32 %v20225_v44, %v4643_v43  ;;  %v4638_v25 = vadd.f32 0.2548296, %v4630_v55  ;;  %v4534_v20 = vmul.f32 0.5, %v21596_v10 }
0x1351   :  { %v4714_v15 = vsel %vm4698_vm5, %v4690_v22, %v4706_v7  ;;  %v4692_v12 = vsub.f32 1.0, %v4684_v40  ;;  %v4616_v42 = vmul.f32 %v21661_v49, %v4608_v31  ;;  %v4637_v51 = vadd.f32 0.2548296, %v4629_v53 }
0x1352   :  { %v4722_v60 = vadd.f32 1.0, %v4714_v15  ;;  %v4713_v63 = vsel %vm4697_vm6, %v4689_v57, %v4705_v58  ;;  %v4691_v16 = vsub.f32 1.0, %v4683_v5  ;;  %v4531_v22 = vmul.f32 0.5, %v21584_v61 }
0x1353   :  { %v4721_v21 = vadd.f32 1.0, %v4713_v63  ;;  %v4708_v28 = vsub.f32 0.0, %v4692_v12  ;;  %v4624_v37 = vadd.f32 -0.28449672, %v4616_v42  ;;  %v4646_v56 = vmul.f32 %v21647_v48, %v4638_v25 }
0x1354   :  { %v21685_v62 = vmul.f32 %v4722_v60, %v21614_v27  ;;  %v4707_v17 = vsub.f32 0.0, %v4691_v16  ;;  %v4599_v27 = vmul.f32 %v21672_v19, %v4591_v36  ;;  %v4645_v41 = vmul.f32 %v21651_v34, %v4637_v51 }
0x1355   :  { %v21689_v45 = vmul.f32 %v4721_v21, %v21641_v54  ;;  %v4716_v8 = vsel %vm4700_vm7, %v4692_v12, %v4708_v28  ;;  %v4632_v54 = vmul.f32 %v21661_v49, %v4624_v37  ;;  %v4686_v48 = vmul.f32 %v20229_v38, %v4646_v56 }
0x1356   :  { %v4724_v47 = vadd.f32 1.0, %v4716_v8  ;;  %v4715_v14 = vsel %vm4699_vm8, %v4691_v16, %v4707_v17  ;;  %v4607_v24 = vadd.f32 1.4214138, %v4599_v27  ;;  %v4685_v43 = vmul.f32 %v20231_v2, %v4645_v41 }
0x1357   :  { %v4723_v29 = vadd.f32 1.0, %v4715_v14  ;;  %17973 = vmatprep.mubr.msk.f32.mxu1 %vm171_vm0, %v21689_v45  ;;  %17993 = vmatprep.mubr.msk.f32.mxu0 %vm171_vm0, %v21689_v45  ;;  %v4640_v44 = vadd.f32 0.2548296, %v4632_v54  ;;  %v4694_v34 = vsub.f32 1.0, %v4686_v48  ;;  %v4533_v15 = vmul.f32 0.5, %v21599_v26 }
0x1358   :  { %17974 = vmatmul.mubr.msk.f32.vlgmr.msra.gmra.mrb[96].mxu1 %vm171_vm0, %v21685_v62  ;;  %17994 = vmatmul.mubr.msk.f32.vlgmr.msra.gmra.mrb[104].mxu0 %vm171_vm0, %v21685_v62  ;;  %v21712_v57 = vmul.f32 %v4724_v47, %v4532_v50  ;;  %v4615_v35 = vmul.f32 %v21672_v19, %v4607_v24  ;;  %v4693_v7 = vsub.f32 1.0, %v4685_v43  ;;  %v4535_v0 = vmul.f32 0.5, %v21617_v9  ;;  %v21776_v9 = vld [vmem:[#allocation2 + $0x318] ss:$0 sm:$0xff] }
0x1359   :  { %v21709_v61 = vmul.f32 %v4723_v29, %v4531_v22  ;;  %19469 = vmatpush3.bf16.msra.mxu1 %v21570_v32  ;;  %v4648_v6 = vmul.f32 %v21661_v49, %v4640_v44  ;;  %v4710_v32 = vsub.f32 0.0, %v4694_v34  ;;  %v4536_v21 = vmul.f32 0.5, %v21605_v30  ;;  %v16143_v30 = vld [vmem:[#allocation2 + $0x320] ss:$0 sm:$0xff] }
0x135a   :  { %19471 = vmatprep.subr.bf16.mxu1 %v21654_v23  ;;  %v4623_v13 = vadd.f32 -0.28449672, %v4615_v35  ;;  %v4709_v49 = vsub.f32 0.0, %v4693_v7  ;;  %vm20506_vm7 = vmmov 0  }
0x135b   :  { %17976 = vmatprep.mubr.msk.f32.mxu1 %vm171_vm0, %v21709_v61  ;;  %17996 = vmatprep.mubr.msk.f32.mxu0 %vm171_vm0, %v21709_v61  ;;  %v4688_v40 = vmul.f32 %v20233_v3, %v4648_v6  ;;  %v4718_v39 = vsel %vm4702_vm12, %v4694_v34, %v4710_v32  ;;  %v5598_v32 = vld [vmem:[#allocation2 + $0x368] sm:$0xff] }
0x135c   :  { %17977 = vmatmul.mubr.msk.f32.gmra.mrb[98].mxu1 %vm171_vm0, %v21712_v57  ;;  %17997 = vmatmul.mubr.msk.f32.gmra.mrb[106].mxu0 %vm171_vm0, %v21712_v57  ;;  %v4631_v46 = vmul.f32 %v21672_v19, %v4623_v13  ;;  %v4726_v5 = vadd.f32 1.0, %v4718_v39  ;;  %v4717_v4 = vsel %vm4701_vm13, %v4693_v7, %v4709_v49  ;;  %v5597_v13 = vld [vmem:[#allocation2 + $0x360] sm:$0xff]  ;;  %v16152_v49 = vld [vmem:[#allocation2 + $0x328] ss:$0 sm:$0xff] }
0x135d   :  { %19473 = vmatpush3.bf16.msra.mxu1 %v21654_v23  ;;  %v4696_v58 = vsub.f32 1.0, %v4688_v40  ;;  %v4725_v12 = vadd.f32 1.0, %v4717_v4  ;;  %v20235_v23 = vpop.eup %20234 }
0x135e   :  { %v4639_v18 = vadd.f32 0.2548296, %v4631_v46  ;;  %v21734_v60 = vmul.f32 %v4726_v5, %v4534_v20 }
0x135f   :  { %v21732_v38 = vmul.f32 %v4725_v12, %v4533_v15  ;;  %v4712_v1 = vsub.f32 0.0, %v4696_v58 }
0x1360   :  { %v4647_v31 = vmul.f32 %v21672_v19, %v4639_v18 }
0x1361   :  { %17979 = vmatprep.mubr.msk.f32.mxu1 %vm171_vm0, %v21732_v38  ;;  %17999 = vmatprep.mubr.msk.f32.mxu0 %vm171_vm0, %v21732_v38  ;;  %v4720_v10 = vsel %vm4704_vm14, %v4696_v58, %v4712_v1  ;;  %v19522_v58 = vpack.c.bf16 %v5598_v32, %v5597_v13  ;;  %v21845_v13 = vld [vmem:[#allocation2 + $0x430] sm:$0xff] }
0x1362   :  { %v4687_v63 = vmul.f32 %v20235_v23, %v4647_v31  ;;  %17980 = vmatmul.mubr.msk.f32.gmra.mrb[100].mxu1 %vm171_vm0, %v21734_v60  ;;  %18000 = vmatmul.mubr.msk.f32.gmra.mrb[108].mxu0 %vm171_vm0, %v21734_v60  ;;  %v4728_v19 = vadd.f32 1.0, %v4720_v10  ;;  %v5600_v10 = vld [vmem:[#allocation2 + $0x378] sm:$0xff] }
0x1364   :  { %v4695_v26 = vsub.f32 1.0, %v4687_v63  ;;  %v21750_v11 = vmul.f32 %v4728_v19, %v4536_v21 }
0x1366   :  { %v4711_v33 = vsub.f32 0.0, %v4695_v26 }
0x1368   :  { %v4719_v16 = vsel %vm4703_vm15, %v4695_v26, %v4711_v33  ;;  %v5599_v26 = vld [vmem:[#allocation2 + $0x370] sm:$0xff] }
0x1369   :  { %v4727_v2 = vadd.f32 1.0, %v4719_v16 }
0x136b   :  { %v21748_v28 = vmul.f32 %v4727_v2, %v4535_v0 }
0x136d   :  { %17982 = vmatprep.mubr.msk.f32.mxu1 %vm171_vm0, %v21748_v28  ;;  %18002 = vmatprep.mubr.msk.f32.mxu0 %vm171_vm0, %v21748_v28 }
0x136e   :  { %17983 = vmatmul.mubr.msk.f32.gmra.mrb[102].mxu1 %vm171_vm0, %v21750_v11  ;;  %18003 = vmatmul.mubr.msk.f32.gmra.mrb[110].mxu0 %vm171_vm0, %v21750_v11 }
0x136f   :  { %18013 = vmatprep.mubr.msk.f32.mxu1 %vm171_vm0, %v21689_v45 }
0x1372   :  { %18014 = vmatmul.mubr.msk.f32.vlgmr.msra.gmra.mrb[104].mxu1 %vm171_vm0, %v21685_v62 }
0x1373   :  { %18016 = vmatprep.mubr.msk.f32.mxu1 %vm171_vm0, %v21709_v61 }
0x1376   :  { %18017 = vmatmul.mubr.msk.f32.gmra.mrb[106].mxu1 %vm171_vm0, %v21712_v57 }
0x1377   :  { %18019 = vmatprep.mubr.msk.f32.mxu1 %vm171_vm0, %v21732_v38 }
0x137a   :  { %18020 = vmatmul.mubr.msk.f32.gmra.mrb[108].mxu1 %vm171_vm0, %v21734_v60 }
0x137b   :  { %18022 = vmatprep.mubr.msk.f32.mxu1 %vm171_vm0, %v21748_v28 }
0x137e   :  { %18023 = vmatmul.mubr.msk.f32.gmra.mrb[110].mxu1 %vm171_vm0, %v21750_v11 }
0x142b   :  { %v17975_v59 = vpop.f32.mrb[96].mxu1  ;;  %v17995_v55 = vpop.f32.mrb[104].mxu0 }
0x142c   :  { %v4956_v42 = vadd.f32 %v17995_v55, %v16143_v30  ;;  %v4836_v17 = vpop.f32.mrb[97].mxu1  ;;  %v4950_v53 = vpop.f32.mrb[105].mxu0  ;;  %v4842_v15 = vadd.f32 %v17975_v59, %v21776_v9  ;;  %v19526_v55 = vpack.c.bf16 %v5600_v10, %v5599_v26  ;;  %v16194_v10 = vld [vmem:[#allocation2 + $0x3a8] ss:$0 sm:$0xff] }
0x142d   :  { %v4837_v36 = vadd.f32 %v21776_v9, %v4836_v17  ;;  %v4951_v8 = vadd.f32 %v16143_v30, %v4950_v53 }
0x142e   :  { %v5104_v33 = vmul.f32 0.25, %v4842_v15 }
0x142f   :  { %v5103_v25 = vmul.f32 0.25, %v4837_v36  ;;  %v19474_v37 = vpack.c.bf16 %v4956_v42, %v4951_v8  ;;  %v17978_v3 = vpop.f32.mrb[98].mxu1  ;;  %v17998_v47 = vpop.f32.mrb[106].mxu0 }
0x1430   :  { %v4966_v14 = vadd.f32 %v17998_v47, %v16143_v30  ;;  %v4846_v51 = vpop.f32.mrb[99].mxu1  ;;  %v4960_v27 = vpop.f32.mrb[107].mxu0  ;;  %v4852_v19 = vadd.f32 %v17978_v3, %v21776_v9 }
0x1431   :  { %v4961_v22 = vadd.f32 %v16143_v30, %v4960_v27  ;;  %19476 = vmatprep.subr.msk.bf16.mxu0 %vm20791_vm10, %v19474_v37  ;;  %18041 = vmatprep.mubr.msk.f32.mxu0 %vm891_vm9, %v5103_v25  ;;  %v4847_v31 = vadd.f32 %v21776_v9, %v4846_v51 }
0x1432   :  { %19479 = vmatpush3.bf16.xpose.msk.msra.mxu0 %vm20791_vm10, %v19474_v37  ;;  %v5106_v17 = vmul.f32 0.25, %v4852_v19 }
0x1433   :  { %v19480_v29 = vpack.c.bf16 %v4966_v14, %v4961_v22  ;;  %v5105_v2 = vmul.f32 0.25, %v4847_v31  ;;  %v21868_v31 = vld [vmem:[#allocation2 + $0x458] sm:$0xff] }
0x1435   :  { %19482 = vmatprep.subr.msk.bf16.mxu0 %vm20791_vm10, %v19480_v29  ;;  %v17981_v56 = vpop.f32.mrb[100].mxu1  ;;  %v18001_v54 = vpop.f32.mrb[108].mxu0 }
0x1436   :  { %v4976_v50 = vadd.f32 %v18001_v54, %v16143_v30  ;;  %v4856_v41 = vpop.f32.mrb[101].mxu1  ;;  %v4970_v24 = vpop.f32.mrb[109].mxu0  ;;  %v4862_v53 = vadd.f32 %v17981_v56, %v21776_v9  ;;  %v21826_v54 = vld [vmem:[#allocation2 + $0x428] sm:$0xff] }
0x1437   :  { %v4971_v48 = vadd.f32 %v16143_v30, %v4970_v24  ;;  %v4857_v21 = vadd.f32 %v21776_v9, %v4856_v41  ;;  %v21831_v24 = vld [vmem:[#allocation2 + $0x420] sm:$0xff] }
0x1438   :  { %v5108_v51 = vmul.f32 0.25, %v4862_v53 }
0x1439   :  { %v19486_v44 = vpack.c.bf16 %v4976_v50, %v4971_v48  ;;  %v5107_v25 = vmul.f32 0.25, %v4857_v21 }
0x143a   :  { %19485 = vmatpush3.bf16.xpose.msk.msra.mxu0 %vm20791_vm10, %v19480_v29 }
0x143b   :  { %19488 = vmatprep.subr.msk.bf16.mxu0 %vm20791_vm10, %v19486_v44 }
0x1441   :  { %v17984_v43 = vpop.f32.mrb[102].mxu1  ;;  %v18004_v35 = vpop.f32.mrb[110].mxu0 }
0x1442   :  { %19491 = vmatpush3.bf16.xpose.msk.msra.mxu0 %vm20791_vm10, %v19486_v44  ;;  %v4986_v34 = vadd.f32 %v18004_v35, %v16143_v30  ;;  %v4866_v6 = vpop.f32.mrb[103].mxu1  ;;  %v4980_v7 = vpop.f32.mrb[111].mxu0  ;;  %v4872_v27 = vadd.f32 %v17984_v43, %v21776_v9 }
0x1443   :  { %v4981_v40 = vadd.f32 %v16143_v30, %v4980_v7  ;;  %v4867_v37 = vadd.f32 %v21776_v9, %v4866_v6 }
0x1444   :  { %v5110_v56 = vmul.f32 0.25, %v4872_v27 }
0x1445   :  { %v19492_v46 = vpack.c.bf16 %v4986_v34, %v4981_v40  ;;  %v18015_v39 = vpop.f32.mrb[104].mxu1  ;;  %v5109_v29 = vmul.f32 0.25, %v4867_v37  ;;  %v21840_v34 = vld [vmem:[#allocation2 + $0x438] sm:$0xff] }
0x1446   :  { %v5070_v5 = vadd.f32 %v18015_v39, %v16152_v49  ;;  %v5064_v4 = vpop.f32.mrb[105].mxu1  ;;  %v21854_v39 = vld [vmem:[#allocation2 + $0x448] sm:$0xff] }
0x1447   :  { %v5065_v18 = vadd.f32 %v16152_v49, %v5064_v4  ;;  %19494 = vmatprep.subr.msk.bf16.mxu0 %vm20791_vm10, %v19492_v46  ;;  %v21859_v4 = vld [vmem:[#allocation2 + $0x440] sm:$0xff] }
0x1449   :  { %v19498_v12 = vpack.c.bf16 %v5070_v5, %v5065_v18  ;;  %v18018_v20 = vpop.f32.mrb[106].mxu1 }
0x144a   :  { %19497 = vmatpush3.bf16.xpose.msk.msra.mxu0 %vm20791_vm10, %v19492_v46  ;;  %v5080_v23 = vadd.f32 %v18018_v20, %v16152_v49  ;;  %v5074_v1 = vpop.f32.mrb[107].mxu1 }
0x144b   :  { %19523 = vmatprep.subr.bf16.mxu0 %v19522_v58  ;;  %v5075_v63 = vadd.f32 %v16152_v49, %v5074_v1  ;;  %19499 = vmatprep.subr.bf16.mxu1 %v19498_v12 }
0x144c   :  { %19501 = vmatpush3.bf16.msra.mxu1 %v19498_v12 }
0x144d   :  { %v19502_v16 = vpack.c.bf16 %v5080_v23, %v5075_v63  ;;  %v18021_v0 = vpop.f32.mrb[108].mxu1  ;;  %v21873_v63 = vld [vmem:[#allocation2 + $0x450] sm:$0xff] }
0x144e   :  { %v5090_v30 = vadd.f32 %v18021_v0, %v16152_v49  ;;  %v5084_v59 = vpop.f32.mrb[109].mxu1 }
0x144f   :  { %v5085_v42 = vadd.f32 %v16152_v49, %v5084_v59  ;;  %19503 = vmatprep.subr.bf16.mxu1 %v19502_v16 }
0x1450   :  { %19505 = vmatpush3.bf16.msra.mxu1 %v19502_v16 }
0x1451   :  { %18042 = vmatmul.mubr.msk.f32.vlgmr.msra.gmra.mrb[112].mxu0 %vm891_vm9, %v5104_v33  ;;  %v19506_v36 = vpack.c.bf16 %v5090_v30, %v5085_v42  ;;  %v18024_v8 = vpop.f32.mrb[110].mxu1 }
0x1452   :  { %18044 = vmatprep.mubr.msk.f32.mxu0 %vm891_vm9, %v5105_v2  ;;  %19525 = vmatpush3.bf16.msra.mxu0 %v19522_v58  ;;  %v5100_v3 = vadd.f32 %v18024_v8, %v16152_v49  ;;  %v5094_v47 = vpop.f32.mrb[111].mxu1 }
0x1453   :  { %19527 = vmatprep.subr.bf16.mxu0 %v19526_v55  ;;  %v5095_v14 = vadd.f32 %v16152_v49, %v5094_v47  ;;  %19507 = vmatprep.subr.bf16.mxu1 %v19506_v36 }
0x1454   :  { %19509 = vmatpush3.bf16.msra.mxu1 %v19506_v36 }
0x1455   :  { %18045 = vmatmul.mubr.msk.f32.gmra.mrb[114].mxu0 %vm891_vm9, %v5106_v17  ;;  %v19510_v22 = vpack.c.bf16 %v5100_v3, %v5095_v14 }
0x1456   :  { %18047 = vmatprep.mubr.msk.f32.mxu0 %vm891_vm9, %v5107_v25  ;;  %19529 = vmatpush3.bf16.msra.mxu0 %v19526_v55 }
0x1457   :  { %19511 = vmatprep.subr.bf16.mxu1 %v19510_v22 }
0x1458   :  { %19513 = vmatpush3.bf16.msra.mxu1 %v19510_v22 }
0x1459   :  { %18048 = vmatmul.mubr.msk.f32.gmra.mrb[116].mxu0 %vm891_vm9, %v5108_v51 }
0x145a   :  { %18050 = vmatprep.mubr.msk.f32.mxu0 %vm891_vm9, %v5109_v29 }
0x145d   :  { %18051 = vmatmul.mubr.msk.f32.gmra.mrb[118].mxu0 %vm891_vm9, %v5110_v56 }
0x145e   :  { %18109 = vmatprep.mubr.msk.f32.mxu0 %vm171_vm0, %v21689_v45 }
0x1461   :  { %18110 = vmatmul.mubr.msk.f32.vlgmr.msra.gmra.mrb[120].mxu0 %vm171_vm0, %v21685_v62 }
0x1462   :  { %18112 = vmatprep.mubr.msk.f32.mxu0 %vm171_vm0, %v21709_v61 }
0x1465   :  { %18113 = vmatmul.mubr.msk.f32.gmra.mrb[122].mxu0 %vm171_vm0, %v21712_v57 }
0x1466   :  { %18115 = vmatprep.mubr.msk.f32.mxu0 %vm171_vm0, %v21732_v38 }
0x1469   :  { %18116 = vmatmul.mubr.msk.f32.gmra.mrb[124].mxu0 %vm171_vm0, %v21734_v60 }
0x146a   :  { %18118 = vmatprep.mubr.msk.f32.mxu0 %vm171_vm0, %v21748_v28 }
0x146d   :  { %18119 = vmatmul.mubr.msk.f32.gmra.mrb[126].mxu0 %vm171_vm0, %v21750_v11 }
0x1524   :  { %v18043_v9 = vpop.f32.mrb[112].mxu0 }
0x1525   :  { %v21829_v50 = vadd.f32 %v21826_v54, %v18043_v9  ;;  %v5225_v41 = vpop.f32.mrb[113].mxu0 }
0x1526   :  { %v21834_v48 = vadd.f32 %v21831_v24, %v5225_v41 }
0x1527   :  { %v5267_v44 = vsel %vm1045_vm11, %v21829_v50, -inf }
0x1528   :  { %5268 = vmax.xlane.f32.xlu1 %v5267_v44  ;;  %v18046_v43 = vpop.f32.mrb[114].mxu0  ;;  %v5264_v35 = vsel %vm1045_vm11, %v21834_v48, -inf }
0x1529   :  { %v21843_v6 = vadd.f32 %v21840_v34, %v18046_v43  ;;  %v5235_v7 = vpop.f32.mrb[115].mxu0  ;;  %5265 = vmax.xlane.f32.xlu0 %v5264_v35 }
0x152a   :  { %v21848_v32 = vadd.f32 %v21845_v13, %v5235_v7 }
0x152b   :  { %v5273_v40 = vsel %vm1045_vm11, %v21843_v6, -inf }
0x152c   :  { %5274 = vmax.xlane.f32.xlu1 %v5273_v40  ;;  %v18049_v49 = vpop.f32.mrb[116].mxu0  ;;  %v5270_v46 = vsel %vm1045_vm11, %v21848_v32, -inf }
0x152d   :  { %v21857_v58 = vadd.f32 %v21854_v39, %v18049_v49  ;;  %v5245_v5 = vpop.f32.mrb[117].mxu0  ;;  %5271 = vmax.xlane.f32.xlu0 %v5270_v46 }
0x152e   :  { %v21862_v18 = vadd.f32 %v21859_v4, %v5245_v5 }
0x152f   :  { %v5279_v15 = vsel %vm1045_vm11, %v21857_v58, -inf }
0x1530   :  { %5280 = vmax.xlane.f32.xlu1 %v5279_v15  ;;  %v18052_v12 = vpop.f32.mrb[118].mxu0  ;;  %v5276_v20 = vsel %vm1045_vm11, %v21862_v18, -inf }
0x1531   :  { %v21871_v23 = vadd.f32 %v21868_v31, %v18052_v12  ;;  %5277 = vmax.xlane.f32.xlu0 %v5276_v20  ;;  %v5255_v1 = vpop.f32.mrb[119].mxu0 }
0x1532   :  { %v21876_v26 = vadd.f32 %v21873_v63, %v5255_v1 }
0x1533   :  { %v5285_v33 = vsel %vm1045_vm11, %v21871_v23, -inf }
0x1534   :  { %5286 = vmax.xlane.f32.xlu1 %v5285_v33  ;;  %v18111_v19 = vpop.f32.mrb[120].mxu0  ;;  %v5282_v16 = vsel %vm1045_vm11, %v21876_v26, -inf }
0x1535   :  { %v5678_v0 = vadd.f32 %v18111_v19, %v16194_v10  ;;  %v5672_v2 = vpop.f32.mrb[121].mxu0  ;;  %5283 = vmax.xlane.f32.xlu0 %v5282_v16 }
0x1536   :  { %v5673_v21 = vadd.f32 %v16194_v10, %v5672_v2 }
0x1538   :  { %v19538_v30 = vpack.c.bf16 %v5678_v0, %v5673_v21  ;;  %v18114_v59 = vpop.f32.mrb[122].mxu0 }
0x1539   :  { %v5688_v55 = vadd.f32 %v18114_v59, %v16194_v10  ;;  %v5682_v42 = vpop.f32.mrb[123].mxu0 }
0x153a   :  { %v5683_v17 = vadd.f32 %v16194_v10, %v5682_v42  ;;  %19540 = vmatprep.subr.msk.bf16.mxu0 %vm20791_vm10, %v19538_v30 }
0x153b   :  { %19543 = vmatpush3.bf16.xpose.msk.msra.mxu0 %vm20791_vm10, %v19538_v30 }
0x153c   :  { %v19544_v53 = vpack.c.bf16 %v5688_v55, %v5683_v17  ;;  %v18117_v36 = vpop.f32.mrb[124].mxu0 }
0x153d   :  { %v5698_v8 = vadd.f32 %v18117_v36, %v16194_v10  ;;  %v5692_v25 = vpop.f32.mrb[125].mxu0 }
0x153e   :  { %v5693_v37 = vadd.f32 %v16194_v10, %v5692_v25  ;;  %19546 = vmatprep.subr.msk.bf16.mxu0 %vm20791_vm10, %v19544_v53  ;;  %v5483_v25 = vld [vmem:[#allocation2 + $0x340] sm:$0xff] }
0x1540   :  { %v19550_v3 = vpack.c.bf16 %v5698_v8, %v5693_v37  ;;  %v18120_v47 = vpop.f32.mrb[126].mxu0  ;;  %v5484_v37 = vld [vmem:[#allocation2 + $0x348] sm:$0xff] }
0x1541   :  { %v5708_v14 = vadd.f32 %v18120_v47, %v16194_v10  ;;  %v5702_v51 = vpop.f32.mrb[127].mxu0 }
0x1542   :  { %v5703_v27 = vadd.f32 %v16194_v10, %v5702_v51 }
0x1543   :  { %19549 = vmatpush3.bf16.xpose.msk.msra.mxu0 %vm20791_vm10, %v19544_v53 }
0x1544   :  { %v19556_v22 = vpack.c.bf16 %v5708_v14, %v5703_v27  ;;  %19552 = vmatprep.subr.msk.bf16.mxu0 %vm20791_vm10, %v19550_v3 }
0x154b   :  { %19555 = vmatpush3.bf16.xpose.msk.msra.mxu0 %vm20791_vm10, %v19550_v3  ;;  %v19514_v3 = vpack.c.bf16 %v5484_v37, %v5483_v25 }
0x154c   :  { %19558 = vmatprep.subr.msk.bf16.mxu0 %vm20791_vm10, %v19556_v22 }
0x154d   :  { %19515 = vmatprep.subr.bf16.mxu1 %v19514_v3 }
0x1553   :  { %19561 = vmatpush3.bf16.xpose.msk.msra.mxu0 %vm20791_vm10, %v19556_v22 }
0x15b5   :  { %v5269_v29 = vpop.xlane.xlu1 %5268 }
0x15b6   :  { %v5289_v56 = vsub.f32 %v21829_v50, %v5269_v29  ;;  %v5266_v9 = vpop.xlane.xlu0 %5265 }
0x15b7   :  { %v5288_v41 = vsub.f32 %v21834_v48, %v5266_v9  ;;  %v5485_v9 = vld [vmem:[#allocation2 + $0x350] sm:$0xff] }
0x15b8   :  { %v5298_v44 = vmul.f32 1.442695, %v5289_v56 }
0x15b9   :  { %v5296_v43 = vmul.f32 1.442695, %v5288_v41  ;;  %v5275_v35 = vpop.xlane.xlu1 %5274  ;;  %v5486_v41 = vld [vmem:[#allocation2 + $0x358] sm:$0xff] }
0x15ba   :  { %20236 = vpow2.f32 %v5298_v44  ;;  %v5291_v7 = vsub.f32 %v21843_v6, %v5275_v35  ;;  %v5272_v40 = vpop.xlane.xlu0 %5271 }
0x15bb   :  { %20238 = vpow2.f32 %v5296_v43  ;;  %v5290_v49 = vsub.f32 %v21848_v32, %v5272_v40 }
0x15bc   :  { %v5302_v46 = vmul.f32 1.442695, %v5291_v7 }
0x15bd   :  { %v5300_v5 = vmul.f32 1.442695, %v5290_v49  ;;  %v5281_v52 = vpop.xlane.xlu1 %5280  ;;  %v19518_v49 = vpack.c.bf16 %v5486_v41, %v5485_v9 }
0x15be   :  { %20240 = vpow2.f32 %v5302_v46  ;;  %v5293_v15 = vsub.f32 %v21857_v58, %v5281_v52  ;;  %v5278_v50 = vpop.xlane.xlu0 %5277  ;;  %v5712_v52 = vld [vmem:[#allocation2 + $0x388] sm:$0xff] }
0x15bf   :  { %20242 = vpow2.f32 %v5300_v5  ;;  %v5292_v48 = vsub.f32 %v21862_v18, %v5278_v50  ;;  %v5711_v5 = vld [vmem:[#allocation2 + $0x380] sm:$0xff] }
0x15c0   :  { %v5306_v12 = vmul.f32 1.442695, %v5293_v15 }
0x15c1   :  { %v5304_v20 = vmul.f32 1.442695, %v5292_v48  ;;  %v5287_v1 = vpop.xlane.xlu1 %5286 }
0x15c2   :  { %20244 = vpow2.f32 %v5306_v12  ;;  %v5295_v6 = vsub.f32 %v21871_v23, %v5287_v1  ;;  %v5284_v10 = vpop.xlane.xlu0 %5283  ;;  %v19530_v12 = vpack.c.bf16 %v5712_v52, %v5711_v5  ;;  %v16203_v5 = vld [vmem:[#allocation2 + $0x3b0] ss:$0 sm:$0xff] }
0x15c3   :  { %20246 = vpow2.f32 %v5304_v20  ;;  %v5294_v32 = vsub.f32 %v21876_v26, %v5284_v10 }
0x15c4   :  { %v20237_v33 = vpop.eup %20236  ;;  %v5310_v19 = vmul.f32 1.442695, %v5295_v6 }
0x15c5   :  { %v20239_v16 = vpop.eup %20238  ;;  %v5308_v0 = vmul.f32 1.442695, %v5294_v32  ;;  %v5315_v58 = vsel %vm1045_vm11, %v20237_v33, 0.0 }
0x15c6   :  { %20248 = vpow2.f32 %v5310_v19  ;;  %5316 = vadd.xlane.f32.xlu1 %v5315_v58  ;;  %v5312_v18 = vsel %vm1045_vm11, %v20239_v16, 0.0  ;;  %v5714_v58 = vld [vmem:[#allocation2 + $0x398] sm:$0xff] }
0x15c7   :  { %20250 = vpow2.f32 %v5308_v0  ;;  %5313 = vadd.xlane.f32.xlu0 %v5312_v18  ;;  %v5713_v0 = vld [vmem:[#allocation2 + $0x390] sm:$0xff] }
0x15c8   :  { %v20241_v2 = vpop.eup %20240  ;;  %v19534_v18 = vpack.c.bf16 %v5714_v58, %v5713_v0 }
0x15c9   :  { %v20243_v21 = vpop.eup %20242  ;;  %v5321_v23 = vsel %vm1045_vm11, %v20241_v2, 0.0 }
0x15ca   :  { %5322 = vadd.xlane.f32.xlu1 %v5321_v23  ;;  %v5318_v30 = vsel %vm1045_vm11, %v20243_v21, 0.0 }
0x15cb   :  { %5319 = vadd.xlane.f32.xlu0 %v5318_v30 }
0x15cc   :  { %v20245_v26 = vpop.eup %20244 }
0x15cd   :  { %v20247_v59 = vpop.eup %20246  ;;  %v5327_v55 = vsel %vm1045_vm11, %v20245_v26, 0.0 }
0x15ce   :  { %5328 = vadd.xlane.f32.xlu1 %v5327_v55  ;;  %v5324_v42 = vsel %vm1045_vm11, %v20247_v59, 0.0 }
0x15cf   :  { %5325 = vadd.xlane.f32.xlu0 %v5324_v42 }
0x15d0   :  { %v20249_v17 = vpop.eup %20248 }
0x15d1   :  { %v20251_v53 = vpop.eup %20250  ;;  %v5333_v36 = vsel %vm1045_vm11, %v20249_v17, 0.0 }
0x15d2   :  { %5334 = vadd.xlane.f32.xlu1 %v5333_v36  ;;  %v5330_v8 = vsel %vm1045_vm11, %v20251_v53, 0.0 }
0x15d3   :  { %5331 = vadd.xlane.f32.xlu0 %v5330_v8 }
0x1653   :  { %v5317_v47 = vpop.xlane.xlu1 %5316 }
0x1654   :  { %20252 = vrcp.f32 %v5317_v47  ;;  %v5314_v14 = vpop.xlane.xlu0 %5313 }
0x1655   :  { %20254 = vrcp.f32 %v5314_v14 }
0x1657   :  { %v5323_v51 = vpop.xlane.xlu1 %5322 }
0x1658   :  { %20256 = vrcp.f32 %v5323_v51  ;;  %v5320_v27 = vpop.xlane.xlu0 %5319 }
0x1659   :  { %20258 = vrcp.f32 %v5320_v27 }
0x165b   :  { %v5329_v22 = vpop.xlane.xlu1 %5328 }
0x165c   :  { %20260 = vrcp.f32 %v5329_v22  ;;  %v5326_v29 = vpop.xlane.xlu0 %5325 }
0x165d   :  { %20262 = vrcp.f32 %v5326_v29 }
0x165e   :  { %v20253_v56 = vpop.eup %20252 }
0x165f   :  { %v20255_v44 = vpop.eup %20254  ;;  %v5335_v43 = vpop.xlane.xlu1 %5334  ;;  %v5345_v40 = vmul.f32 %v20253_v56, %v20237_v33 }
0x1660   :  { %20264 = vrcp.f32 %v5335_v43  ;;  %v5332_v35 = vpop.xlane.xlu0 %5331  ;;  %v5344_v7 = vmul.f32 %v20255_v44, %v20239_v16 }
0x1661   :  { %20266 = vrcp.f32 %v5332_v35 }
0x1662   :  { %v20257_v46 = vpop.eup %20256  ;;  %18069 = vmatprep.mubr.msk.f32.mxu1 %vm1045_vm11, %v5344_v7 }
0x1663   :  { %v20259_v15 = vpop.eup %20258  ;;  %18070 = vmatmul.mubr.msk.f32.vlgmr.msra.gmra.mrb[112].mxu1 %vm1045_vm11, %v5345_v40  ;;  %v5347_v48 = vmul.f32 %v20257_v46, %v20241_v2 }
0x1664   :  { %19517 = vmatpush3.bf16.msra.mxu1 %v19514_v3  ;;  %v5346_v50 = vmul.f32 %v20259_v15, %v20243_v21 }
0x1665   :  { %19519 = vmatprep.subr.bf16.mxu1 %v19518_v49 }
0x1666   :  { %v20261_v20 = vpop.eup %20260  ;;  %18072 = vmatprep.mubr.msk.f32.mxu1 %vm1045_vm11, %v5346_v50 }
0x1667   :  { %v20263_v1 = vpop.eup %20262  ;;  %18073 = vmatmul.mubr.msk.f32.gmra.mrb[114].mxu1 %vm1045_vm11, %v5347_v48  ;;  %v5349_v10 = vmul.f32 %v20261_v20, %v20245_v26 }
0x1668   :  { %v5348_v6 = vmul.f32 %v20263_v1, %v20247_v59  ;;  %19521 = vmatpush3.bf16.msra.mxu1 %v19518_v49 }
0x1669   :  { %19531 = vmatprep.subr.bf16.mxu1 %v19530_v12 }
0x166a   :  { %v20265_v32 = vpop.eup %20264  ;;  %18075 = vmatprep.mubr.msk.f32.mxu1 %vm1045_vm11, %v5348_v6 }
0x166b   :  { %v20267_v33 = vpop.eup %20266  ;;  %18076 = vmatmul.mubr.msk.f32.gmra.mrb[116].mxu1 %vm1045_vm11, %v5349_v10  ;;  %v5351_v16 = vmul.f32 %v20265_v32, %v20249_v17  ;;  %v16185_v17 = vld [vmem:[#allocation2 + $0x3a0] ss:$0 sm:$0xff] }
0x166c   :  { %v5350_v19 = vmul.f32 %v20267_v33, %v20251_v53 }
0x166e   :  { %18078 = vmatprep.mubr.msk.f32.mxu1 %vm1045_vm11, %v5350_v19 }
0x166f   :  { %18079 = vmatmul.mubr.msk.f32.gmra.mrb[118].mxu1 %vm1045_vm11, %v5351_v16 }
0x1670   :  { %18089 = vmatprep.mubr.msk.f32.mxu1 %vm171_vm0, %v21689_v45 }
0x1673   :  { %18090 = vmatmul.mubr.msk.f32.vlgmr.msra.gmra.mrb[120].mxu1 %vm171_vm0, %v21685_v62 }
0x1674   :  { %18092 = vmatprep.mubr.msk.f32.mxu1 %vm171_vm0, %v21709_v61  ;;  %19533 = vmatpush3.bf16.msra.mxu1 %v19530_v12 }
0x1675   :  { %19535 = vmatprep.subr.bf16.mxu1 %v19534_v18 }
0x1677   :  { %18093 = vmatmul.mubr.msk.f32.gmra.mrb[122].mxu1 %vm171_vm0, %v21712_v57 }
0x1678   :  { %18095 = vmatprep.mubr.msk.f32.mxu1 %vm171_vm0, %v21732_v38  ;;  %19537 = vmatpush3.bf16.msra.mxu1 %v19534_v18 }
0x167b   :  { %18096 = vmatmul.mubr.msk.f32.gmra.mrb[124].mxu1 %vm171_vm0, %v21734_v60 }
0x167c   :  { %18098 = vmatprep.mubr.msk.f32.mxu1 %vm171_vm0, %v21748_v28 }
0x167f   :  { %18099 = vmatmul.mubr.msk.f32.gmra.mrb[126].mxu1 %vm171_vm0, %v21750_v11 }
0x1680   :  { %18129 = vmatprep.mubr.msk.f32.mxu1 %vm171_vm0, %v21689_v45 }
0x1683   :  { %18130 = vmatmul.mubr.msk.f32.vlgmr.msra.gmra.mrb[128].mxu1 %vm171_vm0, %v21685_v62 }
0x1684   :  { %18132 = vmatprep.mubr.msk.f32.mxu1 %vm171_vm0, %v21709_v61 }
0x1687   :  { %18133 = vmatmul.mubr.msk.f32.gmra.mrb[130].mxu1 %vm171_vm0, %v21712_v57 }
0x1688   :  { %18135 = vmatprep.mubr.msk.f32.mxu1 %vm171_vm0, %v21732_v38 }
0x168b   :  { %18136 = vmatmul.mubr.msk.f32.gmra.mrb[132].mxu1 %vm171_vm0, %v21734_v60 }
0x168c   :  { %18138 = vmatprep.mubr.msk.f32.mxu1 %vm171_vm0, %v21748_v28 }
0x168f   :  { %18139 = vmatmul.mubr.msk.f32.gmra.mrb[134].mxu1 %vm171_vm0, %v21750_v11 }
0x1736   :  { %v21954_v2 = vpop.f32.mrb[112].mxu1 }
0x1737   :  { %v21956_v21 = vpop.f32.mrb[113].mxu1 }
0x173a   :  { %v21958_v23 = vpop.f32.mrb[114].mxu1 }
0x173b   :  { %v21960_v30 = vpop.f32.mrb[115].mxu1 }
0x173e   :  { %v21962_v26 = vpop.f32.mrb[116].mxu1 }
0x173f   :  { %v21964_v59 = vpop.f32.mrb[117].mxu1 }
0x1742   :  { %v21966_v55 = vpop.f32.mrb[118].mxu1 }
0x1743   :  { %v21968_v42 = vpop.f32.mrb[119].mxu1 }
0x1746   :  { %v18091_v53 = vpop.f32.mrb[120].mxu1 }
0x1747   :  { %v5564_v36 = vadd.f32 %v18091_v53, %v16185_v17  ;;  %v5558_v8 = vpop.f32.mrb[121].mxu1 }
0x1748   :  { %v5559_v25 = vadd.f32 %v16185_v17, %v5558_v8 }
0x1749   :  { %v5826_v47 = vmul.f32 0.25, %v5564_v36 }
0x174a   :  { %v5825_v37 = vmul.f32 0.25, %v5559_v25  ;;  %v18094_v3 = vpop.f32.mrb[122].mxu1 }
0x174b   :  { %v5574_v14 = vadd.f32 %v18094_v3, %v16185_v17  ;;  %v5568_v51 = vpop.f32.mrb[123].mxu1 }
0x174c   :  { %v5569_v27 = vadd.f32 %v16185_v17, %v5568_v51  ;;  %18157 = vmatprep.mubr.msk.f32.mxu0 %vm891_vm9, %v5825_v37 }
0x174d   :  { %18158 = vmatmul.mubr.msk.f32.vlgmr.msra.gmra.mrb[128].mxu0 %vm891_vm9, %v5826_v47  ;;  %v5828_v56 = vmul.f32 0.25, %v5574_v14 }
0x174e   :  { %v5827_v22 = vmul.f32 0.25, %v5569_v27  ;;  %v18097_v29 = vpop.f32.mrb[124].mxu1 }
0x174f   :  { %v5584_v9 = vadd.f32 %v18097_v29, %v16185_v17  ;;  %v5578_v41 = vpop.f32.mrb[125].mxu1 }
0x1750   :  { %v5579_v44 = vadd.f32 %v16185_v17, %v5578_v41  ;;  %18160 = vmatprep.mubr.msk.f32.mxu0 %vm891_vm9, %v5827_v22 }
0x1751   :  { %18161 = vmatmul.mubr.msk.f32.gmra.mrb[130].mxu0 %vm891_vm9, %v5828_v56  ;;  %v5830_v7 = vmul.f32 0.25, %v5584_v9 }
0x1752   :  { %v5829_v43 = vmul.f32 0.25, %v5579_v44  ;;  %v18100_v35 = vpop.f32.mrb[126].mxu1 }
0x1753   :  { %v5594_v40 = vadd.f32 %v18100_v35, %v16185_v17  ;;  %v5588_v49 = vpop.f32.mrb[127].mxu1 }
0x1754   :  { %v5589_v46 = vadd.f32 %v16185_v17, %v5588_v49  ;;  %18163 = vmatprep.mubr.msk.f32.mxu0 %vm891_vm9, %v5829_v43 }
0x1755   :  { %18164 = vmatmul.mubr.msk.f32.gmra.mrb[132].mxu0 %vm891_vm9, %v5830_v7  ;;  %v5832_v50 = vmul.f32 0.25, %v5594_v40 }
0x1756   :  { %v5831_v52 = vmul.f32 0.25, %v5589_v46  ;;  %v18131_v15 = vpop.f32.mrb[128].mxu1 }
0x1757   :  { %v5792_v48 = vadd.f32 %v18131_v15, %v16203_v5  ;;  %v5786_v12 = vpop.f32.mrb[129].mxu1 }
0x1758   :  { %v5787_v20 = vadd.f32 %v16203_v5, %v5786_v12  ;;  %18166 = vmatprep.mubr.msk.f32.mxu0 %vm891_vm9, %v5831_v52 }
0x1759   :  { %18167 = vmatmul.mubr.msk.f32.gmra.mrb[134].mxu0 %vm891_vm9, %v5832_v50 }
0x175a   :  { %v19562_v1 = vpack.c.bf16 %v5792_v48, %v5787_v20  ;;  %v18134_v6 = vpop.f32.mrb[130].mxu1 }
0x175b   :  { %v5802_v10 = vadd.f32 %v18134_v6, %v16203_v5  ;;  %v5796_v32 = vpop.f32.mrb[131].mxu1 }
0x175c   :  { %v5797_v33 = vadd.f32 %v16203_v5, %v5796_v32  ;;  %19563 = vmatprep.subr.bf16.mxu1 %v19562_v1 }
0x175d   :  { %19565 = vmatpush3.bf16.msra.mxu1 %v19562_v1 }
0x175e   :  { %v19566_v19 = vpack.c.bf16 %v5802_v10, %v5797_v33  ;;  %v18137_v16 = vpop.f32.mrb[132].mxu1 }
0x175f   :  { %v5812_v0 = vadd.f32 %v18137_v16, %v16203_v5  ;;  %v5806_v58 = vpop.f32.mrb[133].mxu1 }
0x1760   :  { %v5807_v18 = vadd.f32 %v16203_v5, %v5806_v58  ;;  %19567 = vmatprep.subr.bf16.mxu1 %v19566_v19 }
0x1761   :  { %19569 = vmatpush3.bf16.msra.mxu1 %v19566_v19 }
0x1762   :  { %v19570_v17 = vpack.c.bf16 %v5812_v0, %v5807_v18  ;;  %v18140_v53 = vpop.f32.mrb[134].mxu1 }
0x1763   :  { %v5822_v36 = vadd.f32 %v18140_v53, %v16203_v5  ;;  %v5816_v8 = vpop.f32.mrb[135].mxu1 }
0x1764   :  { %v5817_v25 = vadd.f32 %v16203_v5, %v5816_v8  ;;  %19571 = vmatprep.subr.bf16.mxu1 %v19570_v17 }
0x1765   :  { %19573 = vmatpush3.bf16.msra.mxu1 %v19570_v17 }
0x1766   :  { %v19574_v37 = vpack.c.bf16 %v5822_v36, %v5817_v25 }
0x1768   :  { %19575 = vmatprep.subr.bf16.mxu1 %v19574_v37 }
0x1769   :  { %19577 = vmatpush3.bf16.msra.mxu1 %v19574_v37 }
0x1820   :  { %v18159_v3 = vpop.f32.mrb[128].mxu0 }
0x1821   :  { %v5953_v47 = vadd.f32 %v21826_v54, %v18159_v3  ;;  %v5947_v14 = vpop.f32.mrb[129].mxu0 }
0x1822   :  { %v5948_v51 = vadd.f32 %v21831_v24, %v5947_v14 }
0x1823   :  { %v5989_v27 = vsel %vm1045_vm11, %v5953_v47, -inf }
0x1824   :  { %5990 = vmax.xlane.f32.xlu1 %v5989_v27  ;;  %v18162_v22 = vpop.f32.mrb[130].mxu0  ;;  %v5986_v29 = vsel %vm1045_vm11, %v5948_v51, -inf }
0x1825   :  { %v5963_v56 = vadd.f32 %v21840_v34, %v18162_v22  ;;  %v5957_v9 = vpop.f32.mrb[131].mxu0  ;;  %5987 = vmax.xlane.f32.xlu0 %v5986_v29 }
0x1826   :  { %v5958_v41 = vadd.f32 %v21845_v13, %v5957_v9 }
0x1827   :  { %v5995_v44 = vsel %vm1045_vm11, %v5963_v56, -inf }
0x1828   :  { %5996 = vmax.xlane.f32.xlu1 %v5995_v44  ;;  %v18165_v43 = vpop.f32.mrb[132].mxu0  ;;  %v5992_v54 = vsel %vm1045_vm11, %v5958_v41, -inf }
0x1829   :  { %v5973_v24 = vadd.f32 %v21854_v39, %v18165_v43  ;;  %v5967_v35 = vpop.f32.mrb[133].mxu0  ;;  %5993 = vmax.xlane.f32.xlu0 %v5992_v54 }
0x182a   :  { %v5968_v7 = vadd.f32 %v21859_v4, %v5967_v35 }
0x182b   :  { %v6001_v40 = vsel %vm1045_vm11, %v5973_v24, -inf }
0x182c   :  { %6002 = vmax.xlane.f32.xlu1 %v6001_v40  ;;  %v18168_v34 = vpop.f32.mrb[134].mxu0  ;;  %v5998_v49 = vsel %vm1045_vm11, %v5968_v7, -inf  ;;  %v6203_v40 = vld [vmem:[#allocation2 + $0x3b8] sm:$0xff] }
0x182d   :  { %v5983_v13 = vadd.f32 %v21868_v31, %v18168_v34  ;;  %v5977_v46 = vpop.f32.mrb[135].mxu0  ;;  %5999 = vmax.xlane.f32.xlu0 %v5998_v49  ;;  %v6204_v34 = vld [vmem:[#allocation2 + $0x3c0] sm:$0xff] }
0x182e   :  { %v5978_v5 = vadd.f32 %v21873_v63, %v5977_v46  ;;  %v19578_v49 = vpack.c.bf16 %v6204_v34, %v6203_v40 }
0x182f   :  { %v6007_v52 = vsel %vm1045_vm11, %v5983_v13, -inf }
0x1830   :  { %6008 = vmax.xlane.f32.xlu1 %v6007_v52  ;;  %v6004_v39 = vsel %vm1045_vm11, %v5978_v5, -inf  ;;  %19579 = vmatprep.subr.bf16.mxu1 %v19578_v49 }
0x1831   :  { %6005 = vmax.xlane.f32.xlu0 %v6004_v39 }
0x18b1   :  { %v5991_v15 = vpop.xlane.xlu1 %5990 }
0x18b2   :  { %v6011_v4 = vsub.f32 %v5953_v47, %v5991_v15  ;;  %v5988_v50 = vpop.xlane.xlu0 %5987 }
0x18b3   :  { %v6010_v48 = vsub.f32 %v5948_v51, %v5988_v50 }
0x18b4   :  { %v6020_v12 = vmul.f32 1.442695, %v6011_v4 }
0x18b5   :  { %v6018_v20 = vmul.f32 1.442695, %v6010_v48  ;;  %v5997_v1 = vpop.xlane.xlu1 %5996 }
0x18b6   :  { %20268 = vpow2.f32 %v6020_v12  ;;  %v6013_v6 = vsub.f32 %v5963_v56, %v5997_v1  ;;  %v5994_v31 = vpop.xlane.xlu0 %5993 }
0x18b7   :  { %20270 = vpow2.f32 %v6018_v20  ;;  %v6012_v10 = vsub.f32 %v5958_v41, %v5994_v31 }
0x18b8   :  { %v6024_v32 = vmul.f32 1.442695, %v6013_v6 }
0x18b9   :  { %v6022_v63 = vmul.f32 1.442695, %v6012_v10  ;;  %v6003_v33 = vpop.xlane.xlu1 %6002 }
0x18ba   :  { %20272 = vpow2.f32 %v6024_v32  ;;  %v6015_v19 = vsub.f32 %v5973_v24, %v6003_v33  ;;  %v6000_v16 = vpop.xlane.xlu0 %5999 }
0x18bb   :  { %20274 = vpow2.f32 %v6022_v63  ;;  %v6014_v0 = vsub.f32 %v5968_v7, %v6000_v16 }
0x18bc   :  { %v6028_v58 = vmul.f32 1.442695, %v6015_v19 }
0x18bd   :  { %v6026_v18 = vmul.f32 1.442695, %v6014_v0  ;;  %v6009_v17 = vpop.xlane.xlu1 %6008 }
0x18be   :  { %20276 = vpow2.f32 %v6028_v58  ;;  %v6017_v53 = vsub.f32 %v5983_v13, %v6009_v17  ;;  %v6006_v36 = vpop.xlane.xlu0 %6005 }
0x18bf   :  { %20278 = vpow2.f32 %v6026_v18  ;;  %v6016_v8 = vsub.f32 %v5978_v5, %v6006_v36  ;;  %v5482_v36 = vld [vmem:[#allocation2 + $0x338] sm:$0xff] }
0x18c0   :  { %v20269_v25 = vpop.eup %20268  ;;  %v6032_v37 = vmul.f32 1.442695, %v6017_v53  ;;  %v5481_v53 = vld [vmem:[#allocation2 + $0x330] sm:$0xff] }
0x18c1   :  { %v20271_v3 = vpop.eup %20270  ;;  %v6030_v47 = vmul.f32 1.442695, %v6016_v8  ;;  %v6037_v14 = vsel %vm1045_vm11, %v20269_v25, 0.0  ;;  %v19582_v8 = vpack.c.bf16 %v5482_v36, %v5481_v53 }
0x18c2   :  { %20280 = vpow2.f32 %v6032_v37  ;;  %6038 = vadd.xlane.f32.xlu1 %v6037_v14  ;;  %v6034_v51 = vsel %vm1045_vm11, %v20271_v3, 0.0  ;;  %v6485_v37 = vld [vmem:[#allocation2 + $0x3d8] sm:$0xff]  ;;  %v6487_v14 = vld [vmem:[#allocation2 + $0x3e8] sm:$0xff] }
0x18c3   :  { %20282 = vpow2.f32 %v6030_v47  ;;  %6035 = vadd.xlane.f32.xlu0 %v6034_v51 }
0x18c4   :  { %v20273_v27 = vpop.eup %20272 }
0x18c5   :  { %v20275_v22 = vpop.eup %20274  ;;  %v6043_v29 = vsel %vm1045_vm11, %v20273_v27, 0.0 }
0x18c6   :  { %6044 = vadd.xlane.f32.xlu1 %v6043_v29  ;;  %v6040_v56 = vsel %vm1045_vm11, %v20275_v22, 0.0 }
0x18c7   :  { %6041 = vadd.xlane.f32.xlu0 %v6040_v56 }
0x18c8   :  { %v20277_v9 = vpop.eup %20276 }
0x18c9   :  { %v20279_v41 = vpop.eup %20278  ;;  %v6049_v44 = vsel %vm1045_vm11, %v20277_v9, 0.0 }
0x18ca   :  { %6050 = vadd.xlane.f32.xlu1 %v6049_v44  ;;  %v6046_v43 = vsel %vm1045_vm11, %v20279_v41, 0.0 }
0x18cb   :  { %6047 = vadd.xlane.f32.xlu0 %v6046_v43 }
0x18cc   :  { %v20281_v54 = vpop.eup %20280 }
0x18cd   :  { %v20283_v24 = vpop.eup %20282  ;;  %v6055_v35 = vsel %vm1045_vm11, %v20281_v54, 0.0 }
0x18ce   :  { %6056 = vadd.xlane.f32.xlu1 %v6055_v35  ;;  %v6052_v7 = vsel %vm1045_vm11, %v20283_v24, 0.0 }
0x18cf   :  { %6053 = vadd.xlane.f32.xlu0 %v6052_v7 }
0x194f   :  { %v6039_v13 = vpop.xlane.xlu1 %6038 }
0x1950   :  { %20284 = vrcp.f32 %v6039_v13  ;;  %v6036_v46 = vpop.xlane.xlu0 %6035 }
0x1951   :  { %20286 = vrcp.f32 %v6036_v46 }
0x1953   :  { %v6045_v5 = vpop.xlane.xlu1 %6044 }
0x1954   :  { %20288 = vrcp.f32 %v6045_v5  ;;  %v6042_v52 = vpop.xlane.xlu0 %6041 }
0x1955   :  { %20290 = vrcp.f32 %v6042_v52 }
0x1957   :  { %v6051_v39 = vpop.xlane.xlu1 %6050 }
0x1958   :  { %20292 = vrcp.f32 %v6051_v39  ;;  %v6048_v15 = vpop.xlane.xlu0 %6047 }
0x1959   :  { %20294 = vrcp.f32 %v6048_v15  ;;  %v6847_v15 = vld [vmem:[#allocation2 + $0x400] sm:$0xff] }
0x195a   :  { %v20285_v4 = vpop.eup %20284 }
0x195b   :  { %v20287_v50 = vpop.eup %20286  ;;  %v6057_v48 = vpop.xlane.xlu1 %6056  ;;  %v6067_v1 = vmul.f32 %v20285_v4, %v20269_v25  ;;  %v6484_v25 = vld [vmem:[#allocation2 + $0x3d0] sm:$0xff] }
0x195c   :  { %20296 = vrcp.f32 %v6057_v48  ;;  %v6054_v12 = vpop.xlane.xlu0 %6053  ;;  %v6066_v20 = vmul.f32 %v20287_v50, %v20271_v3  ;;  %v6486_v3 = vld [vmem:[#allocation2 + $0x3e0] sm:$0xff]  ;;  %v19586_v47 = vpack.c.bf16 %v6485_v37, %v6484_v25  ;;  %v6848_v50 = vld [vmem:[#allocation2 + $0x408] sm:$0xff] }
0x195d   :  { %20298 = vrcp.f32 %v6054_v12  ;;  %v19590_v51 = vpack.c.bf16 %v6487_v14, %v6486_v3  ;;  %v16261_v12 = vld [vmem:[#allocation2 + $0x3f0] ss:$0 sm:$0xff] }
0x195e   :  { %v20289_v6 = vpop.eup %20288  ;;  %18185 = vmatprep.mubr.msk.f32.mxu1 %vm1045_vm11, %v6066_v20  ;;  %19587 = vmatprep.subr.bf16.mxu0 %v19586_v47 }
0x195f   :  { %v20291_v31 = vpop.eup %20290  ;;  %18186 = vmatmul.mubr.msk.f32.vlgmr.msra.gmra.mrb[136].mxu1 %vm1045_vm11, %v6067_v1  ;;  %v6069_v32 = vmul.f32 %v20289_v6, %v20273_v27  ;;  %19589 = vmatpush3.bf16.msra.mxu0 %v19586_v47 }
0x1960   :  { %v6068_v10 = vmul.f32 %v20291_v31, %v20275_v22  ;;  %19581 = vmatpush3.bf16.msra.mxu1 %v19578_v49  ;;  %19591 = vmatprep.subr.bf16.mxu0 %v19590_v51 }
0x1961   :  { %19583 = vmatprep.subr.bf16.mxu1 %v19582_v8 }
0x1962   :  { %v20293_v63 = vpop.eup %20292  ;;  %18188 = vmatprep.mubr.msk.f32.mxu1 %vm1045_vm11, %v6068_v10 }
0x1963   :  { %v20295_v33 = vpop.eup %20294  ;;  %18189 = vmatmul.mubr.msk.f32.gmra.mrb[138].mxu1 %vm1045_vm11, %v6069_v32  ;;  %v6071_v16 = vmul.f32 %v20293_v63, %v20277_v9  ;;  %19593 = vmatpush3.bf16.msra.mxu0 %v19590_v51 }
0x1964   :  { %v6070_v19 = vmul.f32 %v20295_v33, %v20279_v41 }
0x1966   :  { %v20297_v0 = vpop.eup %20296  ;;  %18191 = vmatprep.mubr.msk.f32.mxu1 %vm1045_vm11, %v6070_v19 }
0x1967   :  { %v20299_v58 = vpop.eup %20298  ;;  %18192 = vmatmul.mubr.msk.f32.gmra.mrb[140].mxu1 %vm1045_vm11, %v6071_v16  ;;  %v6073_v17 = vmul.f32 %v20297_v0, %v20281_v54  ;;  %v16252_v54 = vld [vmem:[#allocation2 + $0x3c8] ss:$0 sm:$0xff] }
0x1968   :  { %v6072_v18 = vmul.f32 %v20299_v58, %v20283_v24 }
0x196a   :  { %18194 = vmatprep.mubr.msk.f32.mxu1 %vm1045_vm11, %v6072_v18 }
0x196b   :  { %18195 = vmatmul.mubr.msk.f32.gmra.mrb[142].mxu1 %vm1045_vm11, %v6073_v17 }
0x1a32   :  { %v18187_v27 = vpop.f32.mrb[136].mxu1 }
0x1a33   :  { %v6164_v22 = vpop.f32.mrb[137].mxu1 }
0x1a34   :  { %18201 = vmatprep.mubr.msk.f32.mxu1 %vm891_vm9, %v6164_v22 }
0x1a35   :  { %18202 = vmatmul.mubr.msk.f32.vlgmr.msra.gmra.mrb[144].mxu1 %vm891_vm9, %v18187_v27 }
0x1a36   :  { %v18190_v29 = vpop.f32.mrb[138].mxu1  ;;  %19585 = vmatpush3.bf16.msra.mxu1 %v19582_v8 }
0x1a37   :  { %v6174_v56 = vpop.f32.mrb[139].mxu1 }
0x1a38   :  { %18204 = vmatprep.mubr.msk.f32.mxu1 %vm891_vm9, %v6174_v56 }
0x1a39   :  { %18205 = vmatmul.mubr.msk.f32.gmra.mrb[146].mxu1 %vm891_vm9, %v18190_v29 }
0x1a3a   :  { %v18193_v9 = vpop.f32.mrb[140].mxu1 }
0x1a3b   :  { %v6184_v41 = vpop.f32.mrb[141].mxu1 }
0x1a3c   :  { %18207 = vmatprep.mubr.msk.f32.mxu1 %vm891_vm9, %v6184_v41 }
0x1a3d   :  { %18208 = vmatmul.mubr.msk.f32.gmra.mrb[148].mxu1 %vm891_vm9, %v18193_v9 }
0x1a3e   :  { %v18196_v44 = vpop.f32.mrb[142].mxu1 }
0x1a3f   :  { %v6194_v43 = vpop.f32.mrb[143].mxu1 }
0x1a40   :  { %18210 = vmatprep.mubr.msk.f32.mxu1 %vm891_vm9, %v6194_v43 }
0x1a41   :  { %18211 = vmatmul.mubr.msk.f32.gmra.mrb[150].mxu1 %vm891_vm9, %v18196_v44 }
0x1a42   :  { %18217 = vmatprep.mubr.msk.f32.mxu1 %vm891_vm9, %v21956_v21 }
0x1a45   :  { %18218 = vmatmul.mubr.msk.f32.vlgmr.msra.gmra.mrb[144].mxu1 %vm891_vm9, %v21954_v2 }
0x1a46   :  { %18220 = vmatprep.mubr.msk.f32.mxu1 %vm891_vm9, %v21960_v30 }
0x1a49   :  { %18221 = vmatmul.mubr.msk.f32.gmra.mrb[146].mxu1 %vm891_vm9, %v21958_v23 }
0x1a4a   :  { %18223 = vmatprep.mubr.msk.f32.mxu1 %vm891_vm9, %v21964_v59 }
0x1a4d   :  { %18224 = vmatmul.mubr.msk.f32.gmra.mrb[148].mxu1 %vm891_vm9, %v21962_v26 }
0x1a4e   :  { %18226 = vmatprep.mubr.msk.f32.mxu1 %vm891_vm9, %v21968_v42 }
0x1a51   :  { %18227 = vmatmul.mubr.msk.f32.gmra.mrb[150].mxu1 %vm891_vm9, %v21966_v55 }
0x1b18   :  { %v18219_v21 = vpop.f32.mrb[144].mxu1 }
0x1b19   :  { %v6464_v2 = vadd.f32 %v18219_v21, %v21685_v62  ;;  %v6424_v30 = vpop.f32.mrb[145].mxu1 }
0x1b1a   :  { %v6463_v24 = vadd.f32 %v6424_v30, %v21689_v45 }
0x1b1b   :  { %v6477_v7 = vadd.f32 %v16252_v54, %v6464_v2 }
0x1b1c   :  { %v6476_v23 = vadd.f32 %v16252_v54, %v6463_v24  ;;  %v18222_v35 = vpop.f32.mrb[146].mxu1 }
0x1b1d   :  { %v6466_v59 = vadd.f32 %v18222_v35, %v21712_v57  ;;  %v6434_v40 = vpop.f32.mrb[147].mxu1 }
0x1b1e   :  { %v6465_v26 = vadd.f32 %v6434_v40, %v21709_v61  ;;  %18237 = vmatprep.mubr.msk.f32.mxu0 %vm171_vm0, %v6476_v23 }
0x1b1f   :  { %18238 = vmatmul.mubr.msk.f32.vlgmr.msra.gmra.mrb[136].mxu0 %vm171_vm0, %v6477_v7  ;;  %v6479_v34 = vadd.f32 %v16252_v54, %v6466_v59 }
0x1b20   :  { %v6478_v55 = vadd.f32 %v16252_v54, %v6465_v26  ;;  %v18225_v42 = vpop.f32.mrb[148].mxu1 }
0x1b21   :  { %v6468_v62 = vadd.f32 %v18225_v42, %v21734_v60  ;;  %v6444_v49 = vpop.f32.mrb[149].mxu1 }
0x1b22   :  { %v6467_v45 = vadd.f32 %v6444_v49, %v21732_v38  ;;  %18240 = vmatprep.mubr.msk.f32.mxu0 %vm171_vm0, %v6478_v55  ;;  %v6846_v38 = vld [vmem:[#allocation2 + $0x3f8] sm:$0xff] }
0x1b23   :  { %18241 = vmatmul.mubr.msk.f32.gmra.mrb[138].mxu0 %vm171_vm0, %v6479_v34  ;;  %v6481_v46 = vadd.f32 %v16252_v54, %v6468_v62  ;;  %v19594_v4 = vpack.c.bf16 %v6847_v15, %v6846_v38 }
0x1b24   :  { %v6480_v57 = vadd.f32 %v16252_v54, %v6467_v45  ;;  %v18228_v13 = vpop.f32.mrb[150].mxu1 }
0x1b25   :  { %v6470_v61 = vadd.f32 %v18228_v13, %v21750_v11  ;;  %v6454_v5 = vpop.f32.mrb[151].mxu1  ;;  %19595 = vmatprep.subr.bf16.mxu0 %v19594_v4  ;;  %v6849_v11 = vld [vmem:[#allocation2 + $0x410] sm:$0xff] }
0x1b26   :  { %v6469_v52 = vadd.f32 %v6454_v5, %v21748_v28  ;;  %18243 = vmatprep.mubr.msk.f32.mxu0 %vm171_vm0, %v6480_v57  ;;  %19597 = vmatpush3.bf16.msra.mxu0 %v19594_v4  ;;  %v19598_v48 = vpack.c.bf16 %v6849_v11, %v6848_v50 }
0x1b27   :  { %18244 = vmatmul.mubr.msk.f32.gmra.mrb[140].mxu0 %vm171_vm0, %v6481_v46  ;;  %v6483_v39 = vadd.f32 %v16252_v54, %v6470_v61 }
0x1b28   :  { %v6482_v60 = vadd.f32 %v16252_v54, %v6469_v52  ;;  %19599 = vmatprep.subr.bf16.mxu0 %v19598_v48 }
0x1b2a   :  { %18246 = vmatprep.mubr.msk.f32.mxu0 %vm171_vm0, %v6482_v60  ;;  %19601 = vmatpush3.bf16.msra.mxu0 %v19598_v48 }
0x1b2b   :  { %18247 = vmatmul.mubr.msk.f32.gmra.mrb[142].mxu0 %vm171_vm0, %v6483_v39 }
0x1bf2   :  { %v18239_v28 = vpop.f32.mrb[136].mxu0 }
0x1bf3   :  { %v6618_v20 = vadd.f32 %v18239_v28, %v6477_v7  ;;  %v6578_v1 = vpop.f32.mrb[137].mxu0 }
0x1bf4   :  { %v6617_v6 = vadd.f32 %v6578_v1, %v6476_v23 }
0x1bf5   :  { %v6631_v31 = vadd.f32 %v16261_v12, %v6618_v20 }
0x1bf6   :  { %v22050_v10 = vadd.f32 %v16261_v12, %v6617_v6  ;;  %v18242_v32 = vpop.f32.mrb[138].mxu0 }
0x1bf7   :  { %v22052_v63 = vmul.f32 0.70710677, %v6631_v31  ;;  %v6620_v33 = vadd.f32 %v18242_v32, %v6479_v34  ;;  %v6588_v19 = vpop.f32.mrb[139].mxu0  ;;  %v22087_v13 = vmul.f32 0.5, %v6631_v31 }
0x1bf8   :  { %v22055_v16 = vmul.f32 0.70710677, %v22050_v10  ;;  %v6619_v0 = vadd.f32 %v6588_v19, %v6478_v55 }
0x1bf9   :  { %v6655_v58 = vand.u32 2147483647, %v22052_v63  ;;  %v22058_v18 = vadd.f32 %v16261_v12, %v6620_v33  ;;  %vm6807_vm9 = vcmp.ge.f32.partialorder %v22052_v63, 0.0 }
0x1bfa   :  { %v6654_v17 = vand.u32 2147483647, %v22055_v16  ;;  %v22061_v53 = vadd.f32 %v16261_v12, %v6619_v0  ;;  %v18245_v36 = vpop.f32.mrb[140].mxu0  ;;  %vm6806_vm10 = vcmp.ge.f32.partialorder %v22055_v16, 0.0 }
0x1bfb   :  { %v6663_v8 = vmul.f32 0.3275911, %v6655_v58  ;;  %v22064_v25 = vmul.f32 0.70710677, %v22058_v18  ;;  %v6598_v51 = vpop.f32.mrb[141].mxu0  ;;  %v6759_v41 = vsub.f32 0.0, %v6655_v58  ;;  %v6622_v2 = vadd.f32 %v18245_v36, %v6481_v46 }
0x1bfc   :  { %v6662_v37 = vmul.f32 0.3275911, %v6654_v17  ;;  %v22067_v3 = vmul.f32 0.70710677, %v22061_v53  ;;  %v6758_v43 = vsub.f32 0.0, %v6654_v17  ;;  %v6621_v24 = vadd.f32 %v6598_v51, %v6480_v57 }
0x1bfd   :  { %v6671_v47 = vadd.f32 1.0, %v6663_v8  ;;  %v6657_v14 = vand.u32 2147483647, %v22064_v25  ;;  %v22071_v23 = vadd.f32 %v16261_v12, %v6622_v2  ;;  %v6767_v7 = vmul.f32 %v6759_v41, %v6655_v58 }
0x1bfe   :  { %v6670_v27 = vadd.f32 1.0, %v6662_v37  ;;  %v6656_v22 = vand.u32 2147483647, %v22067_v3  ;;  %v18248_v29 = vpop.f32.mrb[142].mxu0  ;;  %v22073_v59 = vadd.f32 %v16261_v12, %v6621_v24  ;;  %v6766_v26 = vmul.f32 %v6758_v43, %v6654_v17 }
0x1bff   :  { %20300 = vrcp.f32 %v6671_v47  ;;  %v6665_v56 = vmul.f32 0.3275911, %v6657_v14  ;;  %v6608_v9 = vpop.f32.mrb[143].mxu0  ;;  %v6761_v54 = vsub.f32 0.0, %v6657_v14  ;;  %v6624_v35 = vadd.f32 %v18248_v29, %v6483_v39 }
0x1c00   :  { %20302 = vrcp.f32 %v6670_v27  ;;  %v6664_v44 = vmul.f32 0.3275911, %v6656_v22  ;;  %v6623_v40 = vadd.f32 %v6608_v9, %v6482_v60  ;;  %v22076_v55 = vmul.f32 0.70710677, %v22071_v23 }
0x1c01   :  { %v6673_v21 = vadd.f32 1.0, %v6665_v56  ;;  %v22078_v42 = vadd.f32 %v16261_v12, %v6624_v35  ;;  %v6769_v34 = vmul.f32 %v6761_v54, %v6657_v14  ;;  %v22081_v62 = vmul.f32 0.70710677, %v22073_v59 }
0x1c02   :  { %v6672_v30 = vadd.f32 1.0, %v6664_v44  ;;  %v6760_v49 = vsub.f32 0.0, %v6656_v22  ;;  %v6659_v45 = vand.u32 2147483647, %v22076_v55  ;;  %v6776_v46 = vmul.f32 1.442695, %v6767_v7 }
0x1c03   :  { %20304 = vrcp.f32 %v6673_v21  ;;  %v22085_v57 = vmul.f32 0.70710677, %v22078_v42  ;;  %v6658_v61 = vand.u32 2147483647, %v22081_v62  ;;  %v22090_v5 = vadd.f32 %v16261_v12, %v6623_v40 }
0x1c04   :  { %20306 = vrcp.f32 %v6672_v30  ;;  %v6774_v60 = vmul.f32 1.442695, %v6766_v26  ;;  %v6667_v39 = vmul.f32 0.3275911, %v6659_v45  ;;  %v6780_v50 = vmul.f32 1.442695, %v6769_v34 }
0x1c05   :  { %v6661_v38 = vand.u32 2147483647, %v22085_v57  ;;  %v6666_v11 = vmul.f32 0.3275911, %v6658_v61  ;;  %v6768_v28 = vmul.f32 %v6760_v49, %v6656_v22  ;;  %20308 = vpow2.f32 %v6776_v46 }
0x1c06   :  { %v6675_v20 = vadd.f32 1.0, %v6667_v39  ;;  %v22100_v31 = vmul.f32 0.70710677, %v22090_v5  ;;  %v6763_v19 = vsub.f32 0.0, %v6659_v45  ;;  %v6762_v8 = vsub.f32 0.0, %v6658_v61 }
0x1c07   :  { %v6669_v1 = vmul.f32 0.3275911, %v6661_v38  ;;  %v6674_v12 = vadd.f32 1.0, %v6666_v11  ;;  %v6778_v14 = vmul.f32 1.442695, %v6768_v28  ;;  %v6765_v51 = vsub.f32 0.0, %v6661_v38 }
0x1c08   :  { %20310 = vrcp.f32 %v6675_v20  ;;  %v6660_v29 = vand.u32 2147483647, %v22100_v31  ;;  %v6771_v41 = vmul.f32 %v6763_v19, %v6659_v45  ;;  %v6770_v21 = vmul.f32 %v6762_v8, %v6658_v61 }
0x1c09   :  { %v22092_v52 = vpop.eup %20300  ;;  %v6677_v0 = vadd.f32 1.0, %v6669_v1  ;;  %20312 = vrcp.f32 %v6674_v12  ;;  %v22114_v54 = vmul.f32 0.5, %v22050_v10  ;;  %v6773_v35 = vmul.f32 %v6765_v51, %v6661_v38 }
0x1c0a   :  { %v22095_v15 = vpop.eup %20302  ;;  %v6687_v4 = vmul.f32 1.0614054, %v22092_v52  ;;  %20314 = vpow2.f32 %v6774_v60  ;;  %v6668_v2 = vmul.f32 0.3275911, %v6660_v29  ;;  %v6784_v45 = vmul.f32 1.442695, %v6771_v41 }
0x1c0b   :  { %v6686_v48 = vmul.f32 1.0614054, %v22095_v15  ;;  %20316 = vrcp.f32 %v6677_v0  ;;  %v6782_v10 = vmul.f32 1.442695, %v6770_v21  ;;  %v6788_v11 = vmul.f32 1.442695, %v6773_v35 }
0x1c0c   :  { %v6695_v6 = vadd.f32 -1.4531521, %v6687_v4  ;;  %20318 = vpow2.f32 %v6780_v50  ;;  %v6676_v26 = vadd.f32 1.0, %v6668_v2  ;;  %v6764_v50 = vsub.f32 0.0, %v6660_v29 }
0x1c0d   :  { %v22102_v32 = vpop.eup %20304  ;;  %v6694_v33 = vadd.f32 -1.4531521, %v6686_v48  ;;  %20320 = vpow2.f32 %v6778_v14  ;;  %vm6809_vm1 = vcmp.ge.f32.partialorder %v22064_v25, 0.0  ;;  %vm6808_vm2 = vcmp.ge.f32.partialorder %v22067_v3, 0.0 }
0x1c0e   :  { %v22104_v58 = vpop.eup %20306  ;;  %v6703_v17 = vmul.f32 %v22092_v52, %v6695_v6  ;;  %v6689_v36 = vmul.f32 1.0614054, %v22102_v32  ;;  %20322 = vrcp.f32 %v6676_v26  ;;  %v6772_v51 = vmul.f32 %v6764_v50, %v6660_v29 }
0x1c0f   :  { %v6702_v37 = vmul.f32 %v22095_v15, %v6694_v33  ;;  %v6688_v47 = vmul.f32 1.0614054, %v22104_v58  ;;  %v20309_v46 = vpop.eup %20308  ;;  %20324 = vpow2.f32 %v6784_v45  ;;  %v6641_v25 = vmul.f32 0.5, %v22058_v18 }
0x1c10   :  { %v6711_v27 = vadd.f32 1.4214138, %v6703_v17  ;;  %v6697_v22 = vadd.f32 -1.4531521, %v6689_v36  ;;  %20326 = vpow2.f32 %v6782_v10  ;;  %vm6811_vm3 = vcmp.ge.f32.partialorder %v22076_v55, 0.0 }
0x1c11   :  { %v6710_v56 = vadd.f32 1.4214138, %v6702_v37  ;;  %v6696_v9 = vadd.f32 -1.4531521, %v6688_v47  ;;  %20328 = vpow2.f32 %v6788_v11  ;;  %vm6810_vm4 = vcmp.ge.f32.partialorder %v22081_v62, 0.0 }
0x1c12   :  { %v6719_v44 = vmul.f32 %v22092_v52, %v6711_v27  ;;  %v6705_v43 = vmul.f32 %v22102_v32, %v6697_v22  ;;  %v22120_v39 = vpop.eup %20310  ;;  %vm6813_vm5 = vcmp.ge.f32.partialorder %v22085_v57, 0.0  ;;  %vm6812_vm6 = vcmp.ge.f32.partialorder %v22100_v31, 0.0 }
0x1c13   :  { %v6718_v30 = vmul.f32 %v22095_v15, %v6710_v56  ;;  %v6704_v24 = vmul.f32 %v22104_v58, %v6696_v9  ;;  %v22124_v48 = vpop.eup %20312  ;;  %v6691_v1 = vmul.f32 1.0614054, %v22120_v39  ;;  %v20505_v57 = vmov 0.0|0.0  }
0x1c14   :  { %v6727_v7 = vadd.f32 -0.28449672, %v6719_v44  ;;  %v6713_v40 = vadd.f32 1.4214138, %v6705_v43  ;;  %v6690_v33 = vmul.f32 1.0614054, %v22124_v48  ;;  %v20315_v19 = vpop.eup %20314  ;;  %19602 = vmatprep.subr.bf16.mxu1 %v20505_v57  ;;  %19620 = vmatprep.subr.bf16.mxu0 %v20505_v57 }
0x1c15   :  { %v6726_v34 = vadd.f32 -0.28449672, %v6718_v30  ;;  %v6712_v49 = vadd.f32 1.4214138, %v6704_v24  ;;  %v6699_v36 = vadd.f32 -1.4531521, %v6691_v1  ;;  %v22132_v8 = vpop.eup %20316 }
0x1c16   :  { %v6735_v61 = vmul.f32 %v22092_v52, %v6727_v7  ;;  %v6721_v60 = vmul.f32 %v22102_v32, %v6713_v40  ;;  %v6698_v14 = vadd.f32 -1.4531521, %v6690_v33  ;;  %v20319_v43 = vpop.eup %20318  ;;  %v6786_v40 = vmul.f32 1.442695, %v6772_v51 }
0x1c17   :  { %v6734_v4 = vmul.f32 %v22095_v15, %v6726_v34  ;;  %v6720_v38 = vmul.f32 %v22104_v58, %v6712_v49  ;;  %v6707_v56 = vmul.f32 %v22120_v39, %v6699_v36  ;;  %v20321_v30 = vpop.eup %20320  ;;  %v20507_v31 = vmov 0.0  }
0x1c18   :  { %v6743_v28 = vadd.f32 0.2548296, %v6735_v61  ;;  %v6729_v20 = vadd.f32 -0.28449672, %v6721_v60  ;;  %v6706_v44 = vmul.f32 %v22124_v48, %v6698_v14  ;;  %v22143_v26 = vpop.eup %20322  ;;  %20330 = vpow2.f32 %v6786_v40  ;;  %18285 = vmatprep.mubr.msk.f32.mxu1 %vm20506_vm7, %v20507_v31 }
0x1c19   :  { %v6742_v6 = vadd.f32 0.2548296, %v6734_v4  ;;  %v6728_v12 = vadd.f32 -0.28449672, %v6720_v38  ;;  %v6715_v29 = vadd.f32 1.4214138, %v6707_v56  ;;  %v20325_v50 = vpop.eup %20324 }
0x1c1a   :  { %v6751_v0 = vmul.f32 %v22092_v52, %v6743_v28  ;;  %v6737_v17 = vmul.f32 %v22102_v32, %v6729_v20  ;;  %v6693_v52 = vmul.f32 1.0614054, %v22132_v8  ;;  %v6714_v7 = vadd.f32 1.4214138, %v6706_v44 }
0x1c1b   :  { %v6750_v37 = vmul.f32 %v22095_v15, %v6742_v6  ;;  %v6736_v47 = vmul.f32 %v22104_v58, %v6728_v12  ;;  %v6723_v45 = vmul.f32 %v22120_v39, %v6715_v29  ;;  %v6692_v10 = vmul.f32 1.0614054, %v22143_v26  ;;  %v20327_v12 = vpop.eup %20326 }
0x1c1c   :  { %v6791_v27 = vmul.f32 %v20309_v46, %v6751_v0  ;;  %v6745_v22 = vadd.f32 0.2548296, %v6737_v17  ;;  %v6701_v2 = vadd.f32 -1.4531521, %v6693_v52  ;;  %v6722_v60 = vmul.f32 %v22124_v48, %v6714_v7 }
0x1c1d   :  { %v6790_v9 = vmul.f32 %v20315_v19, %v6750_v37  ;;  %v6744_v41 = vadd.f32 0.2548296, %v6736_v47  ;;  %v6731_v38 = vadd.f32 -0.28449672, %v6723_v45  ;;  %v6700_v47 = vadd.f32 -1.4531521, %v6692_v10 }
0x1c1e   :  { %v6799_v21 = vsub.f32 1.0, %v6791_v27  ;;  %v6753_v15 = vmul.f32 %v22102_v32, %v6745_v22  ;;  %v6709_v46 = vmul.f32 %v22132_v8, %v6701_v2  ;;  %v6730_v6 = vadd.f32 -0.28449672, %v6722_v60  ;;  %v20329_v22 = vpop.eup %20328 }
0x1c1f   :  { %v6798_v24 = vsub.f32 1.0, %v6790_v9  ;;  %v6752_v35 = vmul.f32 %v22104_v58, %v6744_v41  ;;  %v6739_v0 = vmul.f32 %v22120_v39, %v6731_v38  ;;  %v6708_v41 = vmul.f32 %v22143_v26, %v6700_v47 }
0x1c20   :  { %v6815_v34 = vsub.f32 0.0, %v6799_v21  ;;  %v6793_v49 = vmul.f32 %v20319_v43, %v6753_v15  ;;  %v6717_v11 = vadd.f32 1.4214138, %v6709_v46  ;;  %v6738_v37 = vmul.f32 %v22124_v48, %v6730_v6 }
0x1c21   :  { %v6814_v61 = vsub.f32 0.0, %v6798_v24  ;;  %v6792_v32 = vmul.f32 %v20321_v30, %v6752_v35  ;;  %v6747_v51 = vadd.f32 0.2548296, %v6739_v0  ;;  %v6716_v15 = vadd.f32 1.4214138, %v6708_v41 }
0x1c22   :  { %v6823_v4 = vsel %vm6807_vm9, %v6799_v21, %v6815_v34  ;;  %v6801_v58 = vsub.f32 1.0, %v6793_v49  ;;  %v6725_v17 = vmul.f32 %v22132_v8, %v6717_v11  ;;  %v6746_v9 = vadd.f32 0.2548296, %v6738_v37  ;;  %v20331_v38 = vpop.eup %20330 }
0x1c23   :  { %v6831_v28 = vadd.f32 1.0, %v6823_v4  ;;  %v6822_v20 = vsel %vm6806_vm10, %v6798_v24, %v6814_v61  ;;  %v6800_v1 = vsub.f32 1.0, %v6792_v32  ;;  %v6755_v43 = vmul.f32 %v22120_v39, %v6747_v51 }
0x1c24   :  { %v6830_v33 = vadd.f32 1.0, %v6822_v20  ;;  %v6817_v19 = vsub.f32 0.0, %v6801_v58  ;;  %v6733_v27 = vadd.f32 -0.28449672, %v6725_v17  ;;  %v6754_v21 = vmul.f32 %v22124_v48, %v6746_v9 }
0x1c25   :  { %v6839_v63 = vmul.f32 %v6831_v28, %v22087_v13  ;;  %v6816_v36 = vsub.f32 0.0, %v6800_v1  ;;  %v6640_v13 = vmul.f32 0.5, %v22061_v53  ;;  %v6795_v29 = vmul.f32 %v20325_v50, %v6755_v43 }
0x1c26   :  { %v6838_v14 = vmul.f32 %v6830_v33, %v22114_v54  ;;  %v6825_v16 = vsel %vm6809_vm1, %v6801_v58, %v6817_v19  ;;  %v6741_v54 = vmul.f32 %v22132_v8, %v6733_v27  ;;  %v6794_v53 = vmul.f32 %v20327_v12, %v6754_v21 }
0x1c27   :  { %v6833_v56 = vadd.f32 1.0, %v6825_v16  ;;  %v6824_v52 = vsel %vm6808_vm2, %v6800_v1, %v6816_v36  ;;  %v6724_v24 = vmul.f32 %v22143_v26, %v6716_v15  ;;  %v6803_v39 = vsub.f32 1.0, %v6795_v29 }
0x1c28   :  { %v6832_v44 = vadd.f32 1.0, %v6824_v52  ;;  %18257 = vmatprep.mubr.msk.f32.mxu0 %vm171_vm0, %v6838_v14  ;;  %v6749_v2 = vadd.f32 0.2548296, %v6741_v54  ;;  %v6802_v7 = vsub.f32 1.0, %v6794_v53  ;;  %v6642_v60 = vmul.f32 0.5, %v22073_v59 }
0x1c29   :  { %18258 = vmatmul.mubr.msk.f32.vlgmr.msra.gmra.mrb[144].mxu0 %vm171_vm0, %v6839_v63  ;;  %v6841_v30 = vmul.f32 %v6833_v56, %v6641_v25  ;;  %v6732_v18 = vadd.f32 -0.28449672, %v6724_v24  ;;  %v6819_v48 = vsub.f32 0.0, %v6803_v39  ;;  %v6643_v4 = vmul.f32 0.5, %v22071_v23 }
0x1c2a   :  { %v6840_v3 = vmul.f32 %v6832_v44, %v6640_v13  ;;  %v6757_v35 = vmul.f32 %v22132_v8, %v6749_v2  ;;  %v6818_v49 = vsub.f32 0.0, %v6802_v7  ;;  %v6645_v12 = vmul.f32 0.5, %v22078_v42  ;;  %v22194_v42 = vld [vmem:[#allocation2 + $0x418] ss:$0 sm:$0xff] }
0x1c2b   :  { %v6740_v40 = vmul.f32 %v22143_v26, %v6732_v18  ;;  %v6827_v45 = vsel %vm6811_vm3, %v6803_v39, %v6819_v48  ;;  %vm7698_vm2 = vcmask 64512  }
0x1c2c   :  { %18260 = vmatprep.mubr.msk.f32.mxu0 %vm171_vm0, %v6840_v3  ;;  %v6797_v34 = vmul.f32 %v20329_v22, %v6757_v35  ;;  %v6835_v61 = vadd.f32 1.0, %v6827_v45  ;;  %v6826_v32 = vsel %vm6810_vm4, %v6802_v7, %v6818_v49 }
0x1c2d   :  { %18261 = vmatmul.mubr.msk.f32.gmra.mrb[146].mxu0 %vm171_vm0, %v6841_v30  ;;  %v6748_v8 = vadd.f32 0.2548296, %v6740_v40  ;;  %v6834_v10 = vadd.f32 1.0, %v6826_v32 }
0x1c2e   :  { %v6805_v46 = vsub.f32 1.0, %v6797_v34  ;;  %v6843_v50 = vmul.f32 %v6835_v61, %v6643_v4 }
0x1c2f   :  { %v6756_v58 = vmul.f32 %v22143_v26, %v6748_v8  ;;  %v6842_v11 = vmul.f32 %v6834_v10, %v6642_v60  ;;  %v6644_v26 = vmul.f32 0.5, %v22090_v5 }
0x1c30   :  { %v6821_v55 = vsub.f32 0.0, %v6805_v46 }
0x1c31   :  { %v6796_v28 = vmul.f32 %v20331_v38, %v6756_v58  ;;  %18263 = vmatprep.mubr.msk.f32.mxu0 %vm171_vm0, %v6842_v11 }
0x1c32   :  { %18264 = vmatmul.mubr.msk.f32.gmra.mrb[148].mxu0 %vm171_vm0, %v6843_v50  ;;  %v6829_v20 = vsel %vm6813_vm5, %v6805_v46, %v6821_v55 }
0x1c33   :  { %v6804_v62 = vsub.f32 1.0, %v6796_v28  ;;  %v6837_v59 = vadd.f32 1.0, %v6829_v20 }
0x1c35   :  { %v6820_v1 = vsub.f32 0.0, %v6804_v62  ;;  %v6845_v19 = vmul.f32 %v6837_v59, %v6645_v12 }
0x1c37   :  { %v6828_v23 = vsel %vm6812_vm6, %v6804_v62, %v6820_v1 }
0x1c38   :  { %v6836_v6 = vadd.f32 1.0, %v6828_v23 }
0x1c3a   :  { %v6844_v33 = vmul.f32 %v6836_v6, %v6644_v26 }
0x1c3c   :  { %18266 = vmatprep.mubr.msk.f32.mxu0 %vm171_vm0, %v6844_v33 }
0x1c3d   :  { %18267 = vmatmul.mubr.msk.f32.gmra.mrb[150].mxu0 %vm171_vm0, %v6845_v19 }
0x1c3e   :  { %18307 = vmatprep.mubr.msk.f32.mxu0 %vm20506_vm7, %v20507_v31 }
0x1cfc   :  { %v18259_v5 = vpop.f32.mrb[144].mxu0 }
0x1cfd   :  { %v6951_v0 = vadd.f32 %v18259_v5, %v22194_v42  ;;  %v6945_v17 = vpop.f32.mrb[145].mxu0 }
0x1cfe   :  { %v6946_v63 = vadd.f32 %v22194_v42, %v6945_v17 }
0x1cff   :  { %v22198_v36 = vmul.f32 0.70710677, %v6951_v0  ;;  %v22233_v60 = vmul.f32 0.5, %v6951_v0 }
0x1d00   :  { %v22200_v37 = vmul.f32 0.70710677, %v6946_v63  ;;  %v18262_v47 = vpop.f32.mrb[146].mxu0  ;;  %v22236_v58 = vmul.f32 0.5, %v6946_v63 }
0x1d01   :  { %v7001_v14 = vand.u32 2147483647, %v22198_v36  ;;  %v6961_v16 = vadd.f32 %v18262_v47, %v22194_v42  ;;  %v6955_v51 = vpop.f32.mrb[147].mxu0  ;;  %vm7153_vm8 = vcmp.ge.f32.partialorder %v22198_v36, 0.0 }
0x1d02   :  { %v7000_v27 = vand.u32 2147483647, %v22200_v37  ;;  %v22206_v22 = vadd.f32 %v22194_v42, %v6955_v51  ;;  %vm7152_vm12 = vcmp.ge.f32.partialorder %v22200_v37, 0.0 }
0x1d03   :  { %v7009_v56 = vmul.f32 0.3275911, %v7001_v14  ;;  %v22208_v52 = vmul.f32 0.70710677, %v6961_v16  ;;  %v7105_v21 = vsub.f32 0.0, %v7001_v14  ;;  %v22247_v19 = vmul.f32 0.5, %v6961_v16 }
0x1d04   :  { %v7008_v9 = vmul.f32 0.3275911, %v7000_v27  ;;  %v22211_v41 = vmul.f32 0.70710677, %v22206_v22  ;;  %v7104_v39 = vsub.f32 0.0, %v7000_v27 }
0x1d05   :  { %v7017_v13 = vadd.f32 1.0, %v7009_v56  ;;  %v7003_v44 = vand.u32 2147483647, %v22208_v52  ;;  %v18265_v2 = vpop.f32.mrb[148].mxu0  ;;  %v7113_v24 = vmul.f32 %v7105_v21, %v7001_v14  ;;  %vm7155_vm13 = vcmp.ge.f32.partialorder %v22208_v52, 0.0 }
0x1d06   :  { %v7016_v43 = vadd.f32 1.0, %v7008_v9  ;;  %v7002_v54 = vand.u32 2147483647, %v22211_v41  ;;  %v22216_v30 = vadd.f32 %v18265_v2, %v22194_v42  ;;  %v6965_v53 = vpop.f32.mrb[149].mxu0  ;;  %v7112_v40 = vmul.f32 %v7104_v39, %v7000_v27 }
0x1d07   :  { %20332 = vrcp.f32 %v7017_v13  ;;  %v7011_v25 = vmul.f32 0.3275911, %v7003_v44  ;;  %v22219_v35 = vadd.f32 %v22194_v42, %v6965_v53  ;;  %v7107_v48 = vsub.f32 0.0, %v7003_v44 }
0x1d08   :  { %20334 = vrcp.f32 %v7016_v43  ;;  %v7010_v15 = vmul.f32 0.3275911, %v7002_v54  ;;  %v22222_v7 = vmul.f32 0.70710677, %v22216_v30  ;;  %v7122_v49 = vmul.f32 1.442695, %v7113_v24 }
0x1d09   :  { %v7019_v3 = vadd.f32 1.0, %v7011_v25  ;;  %v22225_v18 = vmul.f32 0.70710677, %v22219_v35  ;;  %v7106_v61 = vsub.f32 0.0, %v7002_v54  ;;  %v7115_v11 = vmul.f32 %v7107_v48, %v7003_v44 }
0x1d0a   :  { %v7018_v29 = vadd.f32 1.0, %v7010_v15  ;;  %v7005_v34 = vand.u32 2147483647, %v22222_v7  ;;  %v7120_v28 = vmul.f32 1.442695, %v7112_v40  ;;  %v22270_v39 = vmul.f32 0.5, %v22206_v22 }
0x1d0b   :  { %20336 = vrcp.f32 %v7019_v3  ;;  %v7004_v45 = vand.u32 2147483647, %v22225_v18  ;;  %v7114_v23 = vmul.f32 %v7106_v61, %v7002_v54  ;;  %v7126_v17 = vmul.f32 1.442695, %v7115_v11 }
0x1d0c   :  { %20338 = vrcp.f32 %v7018_v29  ;;  %v7013_v32 = vmul.f32 0.3275911, %v7005_v34  ;;  %v7109_v47 = vsub.f32 0.0, %v7005_v34  ;;  %vm7154_vm14 = vcmp.ge.f32.partialorder %v22211_v41, 0.0 }
0x1d0d   :  { %v7012_v4 = vmul.f32 0.3275911, %v7004_v45  ;;  %20340 = vpow2.f32 %v7122_v49  ;;  %v7124_v13 = vmul.f32 1.442695, %v7114_v23  ;;  %v7108_v54 = vsub.f32 0.0, %v7004_v45 }
0x1d0e   :  { %v7021_v55 = vadd.f32 1.0, %v7013_v32  ;;  %v7117_v3 = vmul.f32 %v7109_v47, %v7005_v34  ;;  %vm7157_vm15 = vcmp.ge.f32.partialorder %v22222_v7, 0.0  ;;  %vm7156_vm9 = vcmp.ge.f32.partialorder %v22225_v18, 0.0 }
0x1d0f   :  { %v7020_v62 = vadd.f32 1.0, %v7012_v4  ;;  %v7116_v34 = vmul.f32 %v7108_v54, %v7004_v45 }
0x1d10   :  { %v18268_v20 = vpop.f32.mrb[150].mxu0  ;;  %20342 = vrcp.f32 %v7021_v55  ;;  %v7130_v11 = vmul.f32 1.442695, %v7117_v3 }
0x1d11   :  { %v22229_v46 = vpop.eup %20332  ;;  %v22242_v26 = vadd.f32 %v18268_v20, %v22194_v42  ;;  %v6975_v6 = vpop.f32.mrb[151].mxu0  ;;  %20344 = vrcp.f32 %v7020_v62 }
0x1d12   :  { %v22231_v8 = vpop.eup %20334  ;;  %v7033_v10 = vmul.f32 1.0614054, %v22229_v46  ;;  %20346 = vpow2.f32 %v7120_v28  ;;  %v22256_v16 = vadd.f32 %v22194_v42, %v6975_v6 }
0x1d13   :  { %v7032_v38 = vmul.f32 1.0614054, %v22231_v8  ;;  %v22253_v27 = vmul.f32 0.70710677, %v22242_v26  ;;  %20348 = vpow2.f32 %v7126_v17 }
0x1d14   :  { %v7041_v50 = vadd.f32 -1.4531521, %v7033_v10  ;;  %v22266_v29 = vmul.f32 0.70710677, %v22256_v16  ;;  %20350 = vpow2.f32 %v7124_v13 }
0x1d15   :  { %v22239_v1 = vpop.eup %20336  ;;  %v7040_v59 = vadd.f32 -1.4531521, %v7032_v38  ;;  %v22261_v25 = vand.u32 2147483647, %v22253_v27  ;;  %vm7159_vm10 = vcmp.ge.f32.partialorder %v22253_v27, 0.0  ;;  %v7192_v27 = vld [vmem:[#allocation2 + $0x460] sm:$0xff] }
0x1d16   :  { %v22244_v12 = vpop.eup %20338  ;;  %v7049_v33 = vmul.f32 %v22229_v46, %v7041_v50  ;;  %v7035_v5 = vmul.f32 1.0614054, %v22239_v1  ;;  %v22279_v55 = vand.u32 2147483647, %v22266_v29  ;;  %vm7158_vm1 = vcmp.ge.f32.partialorder %v22266_v29, 0.0  ;;  %v7350_v29 = vld [vmem:[#allocation2 + $0x498] sm:$0xff] }
0x1d17   :  { %v7048_v0 = vmul.f32 %v22231_v8, %v7040_v59  ;;  %v7034_v63 = vmul.f32 1.0614054, %v22244_v12  ;;  %v7015_v42 = vmul.f32 0.3275911, %v22261_v25  ;;  %v20341_v49 = vpop.eup %20340  ;;  %v7111_v3 = vsub.f32 0.0, %v22261_v25 }
0x1d18   :  { %v7057_v14 = vadd.f32 1.4214138, %v7049_v33  ;;  %v7043_v51 = vadd.f32 -1.4531521, %v7035_v5 }
0x1d19   :  { %v7056_v56 = vadd.f32 1.4214138, %v7048_v0  ;;  %v7042_v9 = vadd.f32 -1.4531521, %v7034_v63  ;;  %v7023_v32 = vadd.f32 1.0, %v7015_v42 }
0x1d1a   :  { %v7065_v44 = vmul.f32 %v22229_v46, %v7057_v14  ;;  %v7051_v43 = vmul.f32 %v22239_v1, %v7043_v51  ;;  %v22274_v10 = vpop.eup %20342  ;;  %v7128_v0 = vmul.f32 1.442695, %v7116_v34  ;;  %v7014_v14 = vmul.f32 0.3275911, %v22279_v55 }
0x1d1b   :  { %v7064_v21 = vmul.f32 %v22231_v8, %v7056_v56  ;;  %v7050_v15 = vmul.f32 %v22244_v12, %v7042_v9  ;;  %v22281_v22 = vpop.eup %20344  ;;  %v7037_v62 = vmul.f32 1.0614054, %v22274_v10  ;;  %20352 = vrcp.f32 %v7023_v32 }
0x1d1c   :  { %v7073_v2 = vadd.f32 -0.28449672, %v7065_v44  ;;  %v7059_v53 = vadd.f32 1.4214138, %v7051_v43  ;;  %v7036_v59 = vmul.f32 1.0614054, %v22281_v22  ;;  %v20347_v23 = vpop.eup %20346  ;;  %20354 = vpow2.f32 %v7130_v11 }
0x1d1d   :  { %v7072_v24 = vadd.f32 -0.28449672, %v7064_v21  ;;  %v7058_v48 = vadd.f32 1.4214138, %v7050_v15  ;;  %v7045_v5 = vadd.f32 -1.4531521, %v7037_v62  ;;  %v20349_v54 = vpop.eup %20348  ;;  %v7119_v11 = vmul.f32 %v7111_v3, %v22261_v25 }
0x1d1e   :  { %v7081_v40 = vmul.f32 %v22229_v46, %v7073_v2  ;;  %v7067_v61 = vmul.f32 %v22239_v1, %v7059_v53  ;;  %v7044_v47 = vadd.f32 -1.4531521, %v7036_v59  ;;  %v7022_v43 = vadd.f32 1.0, %v7014_v14  ;;  %v20351_v2 = vpop.eup %20350 }
0x1d1f   :  { %v7080_v4 = vmul.f32 %v22231_v8, %v7072_v24  ;;  %v7066_v38 = vmul.f32 %v22244_v12, %v7058_v48  ;;  %v7053_v9 = vmul.f32 %v22274_v10, %v7045_v5 }
0x1d20   :  { %v7089_v50 = vadd.f32 0.2548296, %v7081_v40  ;;  %v7075_v28 = vadd.f32 -0.28449672, %v7067_v61  ;;  %v7052_v44 = vmul.f32 %v22281_v22, %v7044_v47  ;;  %20356 = vrcp.f32 %v7022_v43 }
0x1d21   :  { %v7088_v45 = vadd.f32 0.2548296, %v7080_v4  ;;  %v7074_v20 = vadd.f32 -0.28449672, %v7066_v38  ;;  %v7061_v15 = vadd.f32 1.4214138, %v7053_v9  ;;  %20358 = vpow2.f32 %v7128_v0 }
0x1d22   :  { %v7097_v6 = vmul.f32 %v22229_v46, %v7089_v50  ;;  %v7083_v33 = vmul.f32 %v22239_v1, %v7075_v28  ;;  %v7060_v24 = vadd.f32 1.4214138, %v7052_v44  ;;  %v7110_v0 = vsub.f32 0.0, %v22279_v55 }
0x1d23   :  { %v7096_v17 = vmul.f32 %v22231_v8, %v7088_v45  ;;  %v7082_v63 = vmul.f32 %v22244_v12, %v7074_v20  ;;  %v7069_v40 = vmul.f32 %v22274_v10, %v7061_v15  ;;  %v7134_v9 = vmul.f32 1.442695, %v7119_v11 }
0x1d24   :  { %v7137_v51 = vmul.f32 %v20341_v49, %v7097_v6  ;;  %v7091_v56 = vadd.f32 0.2548296, %v7083_v33 }
0x1d25   :  { %v7136_v13 = vmul.f32 %v20347_v23, %v7096_v17  ;;  %v7090_v46 = vadd.f32 0.2548296, %v7082_v63  ;;  %v22301_v32 = vpop.eup %20352  ;;  %20360 = vpow2.f32 %v7134_v9 }
0x1d26   :  { %v7145_v21 = vsub.f32 1.0, %v7137_v51  ;;  %v7099_v8 = vmul.f32 %v22239_v1, %v7091_v56  ;;  %v7068_v1 = vmul.f32 %v22281_v22, %v7060_v24  ;;  %v7039_v6 = vmul.f32 1.0614054, %v22301_v32  ;;  %v20355_v25 = vpop.eup %20354 }
0x1d27   :  { %v7144_v53 = vsub.f32 1.0, %v7136_v13  ;;  %v7098_v42 = vmul.f32 %v22244_v12, %v7090_v46  ;;  %v7077_v12 = vadd.f32 -0.28449672, %v7069_v40 }
0x1d28   :  { %v7161_v48 = vsub.f32 0.0, %v7145_v21  ;;  %v7139_v49 = vmul.f32 %v20349_v54, %v7099_v8  ;;  %v7076_v45 = vadd.f32 -0.28449672, %v7068_v1  ;;  %v7047_v47 = vadd.f32 -1.4531521, %v7039_v6 }
0x1d29   :  { %v7160_v61 = vsub.f32 0.0, %v7144_v53  ;;  %v7138_v34 = vmul.f32 %v20351_v2, %v7098_v42  ;;  %v7085_v23 = vmul.f32 %v22274_v10, %v7077_v12  ;;  %v7118_v54 = vmul.f32 %v7110_v0, %v22279_v55 }
0x1d2a   :  { %v7169_v4 = vsel %vm7153_vm8, %v7145_v21, %v7161_v48  ;;  %v7147_v38 = vsub.f32 1.0, %v7139_v49  ;;  %v7084_v5 = vmul.f32 %v22281_v22, %v7076_v45  ;;  %v7055_v44 = vmul.f32 %v22301_v32, %v7047_v47  ;;  %v20357_v43 = vpop.eup %20356 }
0x1d2b   :  { %v7177_v50 = vadd.f32 1.0, %v7169_v4  ;;  %v7168_v28 = vsel %vm7152_vm12, %v7144_v53, %v7160_v61  ;;  %v7146_v62 = vsub.f32 1.0, %v7138_v34  ;;  %v7093_v63 = vadd.f32 0.2548296, %v7085_v23  ;;  %v20359_v21 = vpop.eup %20358 }
0x1d2c   :  { %v7176_v20 = vadd.f32 1.0, %v7168_v28  ;;  %v7163_v59 = vsub.f32 0.0, %v7147_v38  ;;  %v7092_v56 = vadd.f32 0.2548296, %v7084_v5  ;;  %v7063_v15 = vadd.f32 1.4214138, %v7055_v44 }
0x1d2d   :  { %v7185_v33 = vmul.f32 %v7177_v50, %v22233_v60  ;;  %v7162_v36 = vsub.f32 0.0, %v7146_v62  ;;  %v7101_v46 = vmul.f32 %v22274_v10, %v7093_v63  ;;  %v7038_v3 = vmul.f32 1.0614054, %v20357_v43 }
0x1d2e   :  { %v7184_v17 = vmul.f32 %v7176_v20, %v22236_v58  ;;  %v7171_v37 = vsel %vm7155_vm13, %v7147_v38, %v7163_v59  ;;  %v7100_v52 = vmul.f32 %v22281_v22, %v7092_v56  ;;  %v7071_v42 = vmul.f32 %v22301_v32, %v7063_v15 }
0x1d2f   :  { %v7179_v14 = vadd.f32 1.0, %v7171_v37  ;;  %v7170_v51 = vsel %vm7154_vm14, %v7146_v62, %v7162_v36  ;;  %v7141_v41 = vmul.f32 %v20355_v25, %v7101_v46  ;;  %v7132_v22 = vmul.f32 1.442695, %v7118_v54  ;;  %v20361_v59 = vpop.eup %20360 }
0x1d30   :  { %v19603_v60 = vpack.c.bf16 %v7185_v33, %v7184_v17  ;;  %v7178_v13 = vadd.f32 1.0, %v7170_v51  ;;  %v7140_v2 = vmul.f32 %v20359_v21, %v7100_v52  ;;  %v7079_v55 = vadd.f32 -0.28449672, %v7071_v42 }
0x1d31   :  { %v7187_v58 = vmul.f32 %v7179_v14, %v22247_v19  ;;  %v7149_v53 = vsub.f32 1.0, %v7141_v41  ;;  %v7046_v19 = vadd.f32 -1.4531521, %v7038_v3  ;;  %v6989_v1 = vmul.f32 0.5, %v22216_v30  ;;  %v7352_v41 = vld [vmem:[#allocation2 + $0x4a8] sm:$0xff] }
0x1d32   :  { %v7186_v8 = vmul.f32 %v7178_v13, %v22270_v39  ;;  %19604 = vmatpush3.bf16.msra.mxu1 %v19603_v60  ;;  %v7148_v24 = vsub.f32 1.0, %v7140_v2  ;;  %v7087_v61 = vmul.f32 %v22301_v32, %v7079_v55  ;;  %20362 = vpow2.f32 %v7132_v22  ;;  %v7266_v60 = vld [vmem:[#allocation2 + $0x468] sm:$0xff]  ;;  %v7267_v13 = vld [vmem:[#allocation2 + $0x470] sm:$0xff]  ;;  %v7540_v55 = vld [vmem:[#allocation2 + $0x4e0] sm:$0xff] }
0x1d33   :  { %19605 = vmatprep.subr.bf16.mxu1 %v20505_v57  ;;  %v7165_v48 = vsub.f32 0.0, %v7149_v53  ;;  %v7054_v49 = vmul.f32 %v20357_v43, %v7046_v19  ;;  %v6988_v12 = vmul.f32 0.5, %v22219_v35  ;;  %v6991_v63 = vmul.f32 0.5, %v22242_v26  ;;  %v16272_v3 = vld [vmem:[#allocation2 + $0x488] ss:$0 sm:$0xff]  ;;  %v7457_v19 = vld [vmem:[#allocation2 + $0x4b8] sm:$0xff] }
0x1d34   :  { %v19606_v10 = vpack.c.bf16 %v7187_v58, %v7186_v8  ;;  %v7164_v39 = vsub.f32 0.0, %v7148_v24  ;;  %v7095_v50 = vadd.f32 0.2548296, %v7087_v61  ;;  %v6990_v51 = vmul.f32 0.5, %v22256_v16  ;;  %v7269_v58 = vld [vmem:[#allocation2 + $0x480] sm:$0xff]  ;;  %v7349_v16 = vld [vmem:[#allocation2 + $0x490] sm:$0xff] }
0x1d35   :  { %v7173_v40 = vsel %vm7157_vm15, %v7149_v53, %v7165_v48  ;;  %v7062_v34 = vadd.f32 1.4214138, %v7054_v49  ;;  %v19615_v44 = vpack.c.bf16 %v7267_v13, %v7266_v60  ;;  %v19621_v52 = vpack.c.bf16 %v7350_v29, %v7349_v16  ;;  %v7351_v8 = vld [vmem:[#allocation2 + $0x4a0] sm:$0xff]  ;;  %v7539_v48 = vld [vmem:[#allocation2 + $0x4d8] sm:$0xff] }
0x1d36   :  { %19607 = vmatpush3.bf16.msra.mxu1 %v19606_v10  ;;  %v7181_v4 = vadd.f32 1.0, %v7173_v40  ;;  %v7172_v38 = vsel %vm7156_vm9, %v7148_v24, %v7164_v39  ;;  %v7103_v45 = vmul.f32 %v22301_v32, %v7095_v50  ;;  %v19624_v15 = vpack.c.bf16 %v7352_v41, %v7351_v8  ;;  %v7458_v24 = vld [vmem:[#allocation2 + $0x4c0] sm:$0xff]  ;;  %v7459_v39 = vld [vmem:[#allocation2 + $0x4c8] sm:$0xff]  ;;  %v7460_v40 = vld [vmem:[#allocation2 + $0x4d0] sm:$0xff] }
0x1d37   :  { %19608 = vmatprep.subr.bf16.mxu1 %v20505_v57  ;;  %v7180_v11 = vadd.f32 1.0, %v7172_v38  ;;  %v7070_v28 = vmul.f32 %v20357_v43, %v7062_v34  ;;  %19622 = vmatpush3.bf16.msra.mxu0 %v19621_v52  ;;  %v19627_v22 = vpack.c.bf16 %v7458_v24, %v7457_v19  ;;  %v19633_v49 = vpack.c.bf16 %v7540_v55, %v7539_v48  ;;  %v7541_v34 = vld [vmem:[#allocation2 + $0x4e8] sm:$0xff]  ;;  %v16274_v38 = vld [vmem:[#allocation2 + $0x4b0] ss:$0 sm:$0xff]  ;;  %v7860_v52 = vld [vmem:[#allocation2 + $0x538] sm:$0xff] }
0x1d38   :  { %v7189_v7 = vmul.f32 %v7181_v4, %v6989_v1  ;;  %v7143_v23 = vmul.f32 %v20361_v59, %v7103_v45  ;;  %19623 = vmatprep.subr.bf16.mxu0 %v20505_v57  ;;  %v19630_v61 = vpack.c.bf16 %v7460_v40, %v7459_v39  ;;  %v7542_v1 = vld [vmem:[#allocation2 + $0x4f0] sm:$0xff]  ;;  %v8019_v48 = vld [vmem:[#allocation2 + $0x580] sm:$0xff]  ;;  %v8020_v40 = vld [vmem:[#allocation2 + $0x588] sm:$0xff]  ;;  %vm15592_vm8 = vcmask 1045504  }
0x1d39   :  { %v7188_v62 = vmul.f32 %v7180_v11, %v6988_v12  ;;  %v7078_v20 = vadd.f32 -0.28449672, %v7070_v28  ;;  %v19636_v4 = vpack.c.bf16 %v7542_v1, %v7541_v34  ;;  %vm20508_vm12 = vmmov 1  }
0x1d3a   :  { %v7151_v33 = vsub.f32 1.0, %v7143_v23  ;;  %vm22929_vm13 = vmpackc.low %vm15592_vm8, %vm20508_vm12  ;;  %vm15861_vm14 = vcmask 171008  }
0x1d3b   :  { %v19609_v18 = vpack.c.bf16 %v7189_v7, %v7188_v62  ;;  %v7086_v6 = vmul.f32 %v20357_v43, %v7078_v20  ;;  %19625 = vmatpush3.bf16.msra.mxu0 %v19624_v15 }
0x1d3c   :  { %v7167_v30 = vsub.f32 0.0, %v7151_v33  ;;  %v20363_v35 = vpop.eup %20362  ;;  %19632 = vmatprep.subr.bf16.mxu0 %v20505_v57 }
0x1d3d   :  { %v7094_v36 = vadd.f32 0.2548296, %v7086_v6  ;;  %19610 = vmatpush3.bf16.msra.mxu1 %v19609_v18 }
0x1d3e   :  { %19611 = vmatprep.subr.bf16.mxu1 %v20505_v57  ;;  %v7175_v0 = vsel %vm7159_vm10, %v7151_v33, %v7167_v30 }
0x1d3f   :  { %v7102_v5 = vmul.f32 %v20357_v43, %v7094_v36  ;;  %v7183_v37 = vadd.f32 1.0, %v7175_v0  ;;  %v7268_v43 = vld [vmem:[#allocation2 + $0x478] sm:$0xff] }
0x1d40   :  { %v19618_v26 = vpack.c.bf16 %v7269_v58, %v7268_v43  ;;  %v16276_v58 = vld [vmem:[#allocation2 + $0x518] ss:$0 sm:$0xff] }
0x1d41   :  { %v7142_v25 = vmul.f32 %v20363_v35, %v7102_v5  ;;  %v7191_v14 = vmul.f32 %v7183_v37, %v6991_v63 }
0x1d43   :  { %v7150_v17 = vsub.f32 1.0, %v7142_v25 }
0x1d45   :  { %v7166_v32 = vsub.f32 0.0, %v7150_v17 }
0x1d47   :  { %v7174_v47 = vsel %vm7158_vm1, %v7150_v17, %v7166_v32 }
0x1d48   :  { %v7182_v56 = vadd.f32 1.0, %v7174_v47 }
0x1d4a   :  { %v7190_v9 = vmul.f32 %v7182_v56, %v6990_v51  ;;  %v7619_v51 = vld [vmem:[#allocation2 + $0x500] sm:$0xff] }
0x1d4c   :  { %v19612_v46 = vpack.c.bf16 %v7191_v14, %v7190_v9  ;;  %v7618_v14 = vld [vmem:[#allocation2 + $0x4f8] sm:$0xff] }
0x1d4d   :  { %v19639_v13 = vpack.c.bf16 %v7619_v51, %v7618_v14 }
0x1d4e   :  { %19613 = vmatpush3.bf16.msra.mxu1 %v19612_v46 }
0x1d4f   :  { %19614 = vmatprep.subr.bf16.mxu1 %v20505_v57 }
0x1d51   :  { %18286 = vmatmul.mubr.msk.f32.vlgmr.msra.gmra.mrb[152].mxu1 %vm1045_vm11, %v7192_v27  ;;  %v7620_v27 = vld [vmem:[#allocation2 + $0x508] sm:$0xff] }
0x1d52   :  { %19616 = vmatpush3.bf16.msra.mxu1 %v19615_v44  ;;  %18296 = vmatprep.mubr.msk.f32.mxu1 %vm20506_vm7, %v20507_v31  ;;  %v7621_v44 = vld [vmem:[#allocation2 + $0x510] sm:$0xff] }
0x1d53   :  { %19617 = vmatprep.subr.bf16.mxu1 %v20505_v57  ;;  %v19642_v43 = vpack.c.bf16 %v7621_v44, %v7620_v27 }
0x1d56   :  { %19619 = vmatpush3.bf16.msra.mxu1 %v19618_v26  ;;  %v16278_v26 = vld [vmem:[#allocation2 + $0x520] ss:$0 sm:$0xff] }
0x1d57   :  { %19626 = vmatprep.subr.bf16.mxu1 %v20505_v57 }
0x1e24   :  { %v7262_v54 = vpop.f32.mrb[152].mxu1 }
0x1e25   :  { %v18287_v21 = vpop.f32.mrb[153].mxu1  ;;  %18297 = vmatmul.mubr.msk.f32.vlgmr.msra.gmra.mrb[154].mxu1 %vm171_vm0, %v7262_v54  ;;  %v7861_v54 = vld [vmem:[#allocation2 + $0x540] sm:$0xff] }
0x1e26   :  { %18318 = vmatprep.mubr.msk.f32.mxu1 %vm20506_vm7, %v20507_v31  ;;  %19628 = vmatpush3.bf16.msra.mxu1 %v19627_v22  ;;  %v8018_v22 = vld [vmem:[#allocation2 + $0x578] sm:$0xff] }
0x1e27   :  { %19629 = vmatprep.subr.bf16.mxu1 %v20505_v57  ;;  %v19657_v39 = vpack.c.bf16 %v8019_v48, %v8018_v22  ;;  %v8407_v48 = vld [vmem:[#allocation2 + $0x5c8] sm:$0xff] }
0x1e2a   :  { %19631 = vmatpush3.bf16.msra.mxu1 %v19630_v61  ;;  %v8021_v61 = vld [vmem:[#allocation2 + $0x590] sm:$0xff] }
0x1e2b   :  { %19638 = vmatprep.subr.bf16.mxu1 %v20505_v57  ;;  %v19660_v34 = vpack.c.bf16 %v8021_v61, %v8020_v40  ;;  %v8563_v61 = vld [vmem:[#allocation2 + $0x5f8] sm:$0xff] }
0x1ef8   :  { %v7344_v2 = vpop.f32.mrb[154].mxu1 }
0x1ef9   :  { %v7345_v10 = vadd.f32 %v16272_v3, %v7344_v2  ;;  %v18298_v53 = vpop.f32.mrb[155].mxu1  ;;  %v19645_v2 = vpack.c.bf16 %v7861_v54, %v7860_v52  ;;  %v8258_v52 = vld [vmem:[#allocation2 + $0x5b0] sm:$0xff] }
0x1efa   :  { %v7863_v53 = vld [vmem:[#allocation2 + $0x550] sm:$0xff] }
0x1efb   :  { %20364 = vtanh.f32 %v7345_v10  ;;  %v7862_v10 = vld [vmem:[#allocation2 + $0x548] sm:$0xff] }
0x1efc   :  { %v19648_v19 = vpack.c.bf16 %v7863_v53, %v7862_v10  ;;  %v8486_v10 = vld [vmem:[#allocation2 + $0x5e8] sm:$0xff]  ;;  %v8487_v53 = vld [vmem:[#allocation2 + $0x5f0] sm:$0xff] }
0x1f05   :  { %v20365_v42 = vpop.eup %20364 }
0x1f06   :  { %18308 = vmatmul.mubr.msk.f32.vlgmr.msra.gmra.mrb[152].mxu0 %vm171_vm0, %v20365_v42  ;;  %v16280_v42 = vld [vmem:[#allocation2 + $0x528] ss:$0 sm:$0xff] }
0x1f07   :  { %18329 = vmatprep.mubr.msk.f32.mxu0 %vm20506_vm7, %v20507_v31  ;;  %19634 = vmatpush3.bf16.msra.mxu0 %v19633_v49 }
0x1f08   :  { %19635 = vmatprep.subr.bf16.mxu0 %v20505_v57 }
0x1f0b   :  { %19637 = vmatpush3.bf16.msra.mxu0 %v19636_v4 }
0x1f0c   :  { %18343 = vmatprep.subr.mxu0 %v20507_v31 }
0x1fd9   :  { %v7427_v12 = vpop.f32.mrb[152].mxu0 }
0x1fda   :  { %v7428_v11 = vadd.f32 %v16274_v38, %v7427_v12  ;;  %v18309_v50 = vpop.f32.mrb[153].mxu0 }
0x1fdc   :  { %v7432_v28 = vmul.f32 0.70710677, %v7428_v11  ;;  %v7431_v9 = vmul.f32 0.5, %v7428_v11 }
0x1fde   :  { %v7433_v7 = vand.u32 2147483647, %v7432_v28  ;;  %vm7452_vm11 = vcmp.ge.f32.partialorder %v7432_v28, 0.0 }
0x1fe0   :  { %v7434_v62 = vmul.f32 0.3275911, %v7433_v7  ;;  %v7446_v20 = vsub.f32 0.0, %v7433_v7 }
0x1fe2   :  { %v7435_v45 = vadd.f32 1.0, %v7434_v62  ;;  %v7447_v18 = vmul.f32 %v7446_v20, %v7433_v7 }
0x1fe4   :  { %20366 = vrcp.f32 %v7435_v45  ;;  %v7448_v33 = vmul.f32 1.442695, %v7447_v18 }
0x1fe6   :  { %20368 = vpow2.f32 %v7448_v33 }
0x1fee   :  { %v20367_v59 = vpop.eup %20366 }
0x1fef   :  { %v7437_v23 = vmul.f32 1.0614054, %v20367_v59 }
0x1ff0   :  { %v20369_v37 = vpop.eup %20368 }
0x1ff1   :  { %v7438_v6 = vadd.f32 -1.4531521, %v7437_v23  ;;  %v7939_v23 = vld [vmem:[#allocation2 + $0x558] sm:$0xff] }
0x1ff3   :  { %v7439_v36 = vmul.f32 %v20367_v59, %v7438_v6  ;;  %v7940_v6 = vld [vmem:[#allocation2 + $0x560] sm:$0xff] }
0x1ff5   :  { %v7440_v30 = vadd.f32 1.4214138, %v7439_v36  ;;  %v19651_v36 = vpack.c.bf16 %v7940_v6, %v7939_v23  ;;  %v16296_v23 = vld [vmem:[#allocation2 + $0x618] ss:$0 sm:$0xff] }
0x1ff7   :  { %v7441_v5 = vmul.f32 %v20367_v59, %v7440_v30 }
0x1ff9   :  { %v7442_v35 = vadd.f32 -0.28449672, %v7441_v5  ;;  %v7941_v5 = vld [vmem:[#allocation2 + $0x568] sm:$0xff] }
0x1ffb   :  { %v7443_v0 = vmul.f32 %v20367_v59, %v7442_v35  ;;  %v7942_v35 = vld [vmem:[#allocation2 + $0x570] sm:$0xff] }
0x1ffd   :  { %v7444_v25 = vadd.f32 0.2548296, %v7443_v0  ;;  %v19654_v0 = vpack.c.bf16 %v7942_v35, %v7941_v5  ;;  %v16300_v5 = vld [vmem:[#allocation2 + $0x628] ss:$0 sm:$0xff] }
0x1fff   :  { %v7445_v17 = vmul.f32 %v20367_v59, %v7444_v25 }
0x2001   :  { %v7450_v32 = vmul.f32 %v20369_v37, %v7445_v17  ;;  %v16285_v37 = vld [vmem:[#allocation2 + $0x598] ss:$0 sm:$0xff] }
0x2003   :  { %v7451_v63 = vsub.f32 1.0, %v7450_v32  ;;  %v16287_v32 = vld [vmem:[#allocation2 + $0x5a0] ss:$0 sm:$0xff] }
0x2005   :  { %v7453_v47 = vsub.f32 0.0, %v7451_v63 }
0x2007   :  { %v7454_v56 = vsel %vm7452_vm11, %v7451_v63, %v7453_v47 }
0x2008   :  { %v7455_v60 = vadd.f32 1.0, %v7454_v56  ;;  %v16289_v56 = vld [vmem:[#allocation2 + $0x5a8] ss:$0 sm:$0xff] }
0x200a   :  { %v22356_v46 = vmul.f32 %v7455_v60, %v7431_v9 }
0x200c   :  { %18319 = vmatmul.mubr.msk.f32.vlgmr.msra.gmra.mrb[156].mxu1 %vm171_vm0, %v22356_v46  ;;  %18330 = vmatmul.mubr.msk.f32.vlgmr.msra.gmra.mrb[154].mxu0 %vm171_vm0, %v22356_v46 }
0x200d   :  { %19640 = vmatpush3.bf16.msra.mxu1 %v19639_v13  ;;  %18340 = vmatprep.mubr.msk.f32.mxu1 %vm20506_vm7, %v20507_v31 }
0x200e   :  { %19641 = vmatprep.subr.bf16.mxu1 %v20505_v57  ;;  %18345 = vmatprep.mubr.msk.f32.mxu0 %vm20506_vm7, %v20507_v31 }
0x2011   :  { %19643 = vmatpush3.bf16.msra.mxu1 %v19642_v43 }
0x2012   :  { %18348 = vmatprep.subr.mxu1 %v20507_v31 }
0x2014   :  { %18341 = vmatmul.mubr.msk.f32.vlgmr.msra.gmra.mrb[158].mxu1 %vm171_vm0, %v22356_v46 }
0x2015   :  { %18350 = vmatprep.mubr.msk.f32.mxu1 %vm20506_vm7, %v20507_v31 }
0x20df   :  { %v7535_v16 = vpop.f32.mrb[156].mxu1  ;;  %v7614_v29 = vpop.f32.mrb[154].mxu0 }
0x20e0   :  { %v7536_v21 = vadd.f32 %v16276_v58, %v7535_v16  ;;  %v7615_v8 = vadd.f32 %v16278_v26, %v7614_v29  ;;  %v18320_v41 = vpop.f32.mrb[157].mxu1  ;;  %v18331_v15 = vpop.f32.mrb[155].mxu0 }
0x20e1   :  { %v7859_v41 = vld [vmem:[#allocation2 + $0x530] sm:$0xff]  ;;  %v8484_v15 = vld [vmem:[#allocation2 + $0x5d8] sm:$0xff] }
0x20e2   :  { %v7697_v3 = vmul.f32 0.35355338, %v7536_v21  ;;  %18344 = vmatpush3.xpose.msk.msra.mxu0 %vm7698_vm2, %v7615_v8 }
0x20e3   :  { %19644 = vmatprep.subr.bf16.mxu0 %v20505_v57 }
0x20e5   :  { %18346 = vmatmul.mubr.msk.f32.vlgmr.msra.gmra.mrb[156].mxu0 %vm7698_vm2, %v7697_v3  ;;  %v8485_v3 = vld [vmem:[#allocation2 + $0x5e0] sm:$0xff] }
0x20e6   :  { %19646 = vmatpush3.bf16.msra.mxu0 %v19645_v2  ;;  %18361 = vmatprep.mubr.msk.f32.mxu0 %vm20506_vm7, %v20507_v31  ;;  %v19669_v2 = vpack.c.bf16 %v8485_v3, %v8484_v15  ;;  %v8957_v3 = vld [vmem:[#allocation2 + $0x658] sm:$0xff] }
0x20e7   :  { %v7693_v24 = vpop.f32.mrb[158].mxu1  ;;  %19647 = vmatprep.subr.bf16.mxu0 %v20505_v57 }
0x20e8   :  { %v7694_v55 = vadd.f32 %v16280_v42, %v7693_v24  ;;  %v18342_v49 = vpop.f32.mrb[159].mxu1  ;;  %v19672_v42 = vpack.c.bf16 %v8487_v53, %v8486_v10  ;;  %v8406_v24 = vld [vmem:[#allocation2 + $0x5c0] sm:$0xff]  ;;  %v8959_v53 = vld [vmem:[#allocation2 + $0x668] sm:$0xff] }
0x20ea   :  { %18349 = vmatpush3.msra.mxu1 %v7694_v55  ;;  %19649 = vmatpush3.bf16.msra.mxu0 %v19648_v19  ;;  %v8405_v19 = vld [vmem:[#allocation2 + $0x5b8] sm:$0xff]  ;;  %v8408_v55 = vld [vmem:[#allocation2 + $0x5d0] sm:$0xff] }
0x20eb   :  { %19656 = vmatprep.subr.bf16.mxu0 %v20505_v57  ;;  %19650 = vmatprep.subr.bf16.mxu1 %v20505_v57  ;;  %v19663_v22 = vpack.c.bf16 %v8406_v24, %v8405_v19  ;;  %v19666_v40 = vpack.c.bf16 %v8408_v55, %v8407_v48 }
0x20ed   :  { %18362 = vmatmul.mubr.msk.f32.vlgmr.msra.gmra.mrb[158].mxu0 %vm171_vm0, %v22356_v46 }
0x20ee   :  { %19658 = vmatpush3.bf16.msra.mxu0 %v19657_v39  ;;  %18383 = vmatprep.mubr.msk.f32.mxu0 %vm20506_vm7, %v20507_v31 }
0x20ef   :  { %19659 = vmatprep.subr.bf16.mxu0 %v20505_v57 }
0x20f2   :  { %19661 = vmatpush3.bf16.msra.mxu0 %v19660_v34  ;;  %v8564_v34 = vld [vmem:[#allocation2 + $0x600] sm:$0xff] }
0x20f3   :  { %18396 = vmatprep.subr.mxu0 %v20507_v31 }
0x20f5   :  { %18384 = vmatmul.mubr.msk.f32.vlgmr.msra.gmra.mrb[160].mxu0 %vm171_vm0, %v22356_v46 }
0x20f6   :  { %18398 = vmatprep.mubr.msk.f32.mxu0 %vm20506_vm7, %v20507_v31  ;;  %18397 = vmatpush3.msra.mxu0 %v8258_v52  ;;  %v9036_v52 = vld [vmem:[#allocation2 + $0x678] sm:$0xff] }
0x20f7   :  { %19662 = vmatprep.subr.bf16.mxu0 %v20505_v57 }
0x21b8   :  { %v7771_v1 = vpop.f32.mrb[156].mxu0 }
0x21b9   :  { %v18347_v4 = vpop.f32.mrb[157].mxu0  ;;  %v7775_v38 = vsel %vm7698_vm2, %v7771_v1, -inf }
0x21ba   :  { %7776 = vmax.xlane.f32.xlu0 %v7775_v38  ;;  %v19675_v38 = vpack.c.bf16 %v8564_v34, %v8563_v61 }
0x21c0   :  { %v7935_v12 = vpop.f32.mrb[158].mxu0 }
0x21c1   :  { %v18363_v11 = vpop.f32.mrb[159].mxu0  ;;  %v7936_v63 = vadd.f32 %v16285_v37, %v7935_v12  ;;  %v8565_v12 = vld [vmem:[#allocation2 + $0x608] sm:$0xff] }
0x21c2   :  { %v8566_v11 = vld [vmem:[#allocation2 + $0x610] sm:$0xff] }
0x21c3   :  { %v8097_v9 = vmul.f32 0.35355338, %v7936_v63 }
0x21c8   :  { %v8093_v50 = vpop.f32.mrb[160].mxu0 }
0x21c9   :  { %v18385_v28 = vpop.f32.mrb[161].mxu0  ;;  %v8094_v60 = vadd.f32 %v16289_v56, %v8093_v50  ;;  %v16298_v50 = vld [vmem:[#allocation2 + $0x620] ss:$0 sm:$0xff] }
0x21ca   :  { %v19678_v28 = vpack.c.bf16 %v8566_v11, %v8565_v12 }
0x2247   :  { %v7777_v7 = vpop.xlane.xlu0 %7776 }
0x2248   :  { %v7778_v62 = vsub.f32 %v7771_v1, %v7777_v7 }
0x224a   :  { %v7779_v45 = vmul.f32 1.442695, %v7778_v62 }
0x224c   :  { %20370 = vpow2.f32 %v7779_v45 }
0x2256   :  { %v20371_v20 = vpop.eup %20370 }
0x2257   :  { %v7781_v59 = vsel %vm7698_vm2, %v20371_v20, 0.0 }
0x2258   :  { %7782 = vadd.xlane.f32.xlu1 %v7781_v59 }
0x22e5   :  { %v7783_v18 = vpop.xlane.xlu1 %7782 }
0x22e6   :  { %20372 = vrcp.f32 %v7783_v18 }
0x22f0   :  { %v20373_v33 = vpop.eup %20372 }
0x22f1   :  { %v7785_v30 = vmul.f32 %v20373_v33, %v20371_v20 }
0x22f3   :  { %18351 = vmatmul.mubr.msk.f32.vlgmr.msra.gmra.mrb[160].mxu1 %vm7698_vm2, %v7785_v30 }
0x22f4   :  { %19652 = vmatpush3.bf16.msra.mxu1 %v19651_v36  ;;  %18372 = vmatprep.mubr.msk.f32.mxu1 %vm20506_vm7, %v20507_v31 }
0x22f5   :  { %19653 = vmatprep.subr.bf16.mxu1 %v20505_v57 }
0x22f8   :  { %19655 = vmatpush3.bf16.msra.mxu1 %v19654_v0 }
0x22f9   :  { %18386 = vmatprep.subr.mxu1 %v20507_v31 }
0x22fb   :  { %18373 = vmatmul.mubr.msk.f32.vlgmr.msra.gmra.mrb[162].mxu1 %vm171_vm0, %v22356_v46 }
0x22fc   :  { %18388 = vmatprep.mubr.msk.f32.mxu1 %vm20506_vm7, %v20507_v31 }
0x23c6   :  { %v7855_v25 = vpop.f32.mrb[160].mxu1 }
0x23c7   :  { %v18352_v17 = vpop.f32.mrb[161].mxu1 }
0x23ce   :  { %v8014_v47 = vpop.f32.mrb[162].mxu1 }
0x23cf   :  { %v8015_v14 = vadd.f32 %v16287_v32, %v8014_v47  ;;  %v18374_v51 = vpop.f32.mrb[163].mxu1 }
0x23d1   :  { %18387 = vmatpush3.xpose.msk.msra.mxu1 %vm7698_vm2, %v8015_v14 }
0x23d2   :  { %18391 = vmatprep.subr.mxu1 %v20507_v31 }
0x23d4   :  { %18389 = vmatmul.mubr.msk.f32.vlgmr.msra.gmra.mrb[164].mxu1 %vm7698_vm2, %v8097_v9  ;;  %v8803_v9 = vld [vmem:[#allocation2 + $0x630] sm:$0xff] }
0x23d5   :  { %18392 = vmatpush3.msra.mxu1 %v8094_v60  ;;  %18393 = vmatprep.mubr.msk.f32.mxu1 %vm20506_vm7, %v20507_v31 }
0x23d6   :  { %18401 = vmatprep.subr.mxu1 %v20507_v31 }
0x24a7   :  { %v8170_v13 = vpop.f32.mrb[164].mxu1 }
0x24a8   :  { %v18390_v27 = vpop.f32.mrb[165].mxu1  ;;  %v8174_v44 = vsel %vm7698_vm2, %v8170_v13, -inf }
0x24a9   :  { %8175 = vmax.xlane.f32.xlu0 %v8174_v44  ;;  %v8879_v27 = vld [vmem:[#allocation2 + $0x640] sm:$0xff] }
0x2536   :  { %v8176_v43 = vpop.xlane.xlu0 %8175 }
0x2537   :  { %v8177_v58 = vsub.f32 %v8170_v13, %v8176_v43  ;;  %v8878_v13 = vld [vmem:[#allocation2 + $0x638] sm:$0xff] }
0x2538   :  { %v19681_v43 = vpack.c.bf16 %v8879_v27, %v8878_v13  ;;  %v16316_v13 = vld [vmem:[#allocation2 + $0x6b8] ss:$0 sm:$0xff] }
0x2539   :  { %v8178_v26 = vmul.f32 1.442695, %v8177_v58 }
0x253b   :  { %20374 = vpow2.f32 %v8178_v26  ;;  %v8880_v26 = vld [vmem:[#allocation2 + $0x648] sm:$0xff] }
0x2545   :  { %v20375_v16 = vpop.eup %20374 }
0x2546   :  { %v8180_v29 = vsel %vm7698_vm2, %v20375_v16, 0.0 }
0x2547   :  { %8181 = vadd.xlane.f32.xlu1 %v8180_v29 }
0x25d4   :  { %v8182_v54 = vpop.xlane.xlu1 %8181 }
0x25d5   :  { %20376 = vrcp.f32 %v8182_v54  ;;  %v9037_v54 = vld [vmem:[#allocation2 + $0x680] sm:$0xff] }
0x25df   :  { %v20377_v21 = vpop.eup %20376 }
0x25e0   :  { %v8184_v8 = vmul.f32 %v20377_v21, %v20375_v16  ;;  %v8881_v16 = vld [vmem:[#allocation2 + $0x650] sm:$0xff]  ;;  %v19693_v21 = vpack.c.bf16 %v9037_v54, %v9036_v52  ;;  %v9470_v54 = vld [vmem:[#allocation2 + $0x6f8] sm:$0xff] }
0x25e1   :  { %v19684_v29 = vpack.c.bf16 %v8881_v16, %v8880_v26  ;;  %v9550_v16 = vld [vmem:[#allocation2 + $0x708] sm:$0xff] }
0x25e2   :  { %18394 = vmatmul.mubr.msk.f32.vlgmr.msra.gmra.mrb[166].mxu1 %vm7698_vm2, %v8184_v8  ;;  %v9038_v8 = vld [vmem:[#allocation2 + $0x688] sm:$0xff] }
0x25e3   :  { %18402 = vmatpush3.msra.mxu1 %v7859_v41  ;;  %18403 = vmatprep.mubr.msk.f32.mxu1 %vm20506_vm7, %v20507_v31  ;;  %v9039_v41 = vld [vmem:[#allocation2 + $0x690] sm:$0xff] }
0x25e4   :  { %19668 = vmatprep.subr.bf16.mxu1 %v20505_v57  ;;  %v19696_v15 = vpack.c.bf16 %v9039_v41, %v9038_v8  ;;  %v9553_v41 = vld [vmem:[#allocation2 + $0x720] sm:$0xff] }
0x25e6   :  { %18404 = vmatmul.mubr.msk.f32.vlgmr.msra.gmra.mrb[168].mxu1 %vm7698_vm2, %v7855_v25 }
0x25e7   :  { %19670 = vmatpush3.bf16.msra.mxu1 %v19669_v2  ;;  %18425 = vmatprep.mubr.msk.f32.mxu1 %vm20506_vm7, %v20507_v31  ;;  %v8958_v2 = vld [vmem:[#allocation2 + $0x660] sm:$0xff] }
0x25e8   :  { %19671 = vmatprep.subr.bf16.mxu1 %v20505_v57  ;;  %v19687_v10 = vpack.c.bf16 %v8958_v2, %v8957_v3  ;;  %v16318_v2 = vld [vmem:[#allocation2 + $0x6e0] ss:$0 sm:$0xff] }
0x25eb   :  { %19673 = vmatpush3.bf16.msra.mxu1 %v19672_v42  ;;  %v8960_v42 = vld [vmem:[#allocation2 + $0x670] sm:$0xff] }
0x25ec   :  { %18439 = vmatprep.subr.mxu1 %v20507_v31 }
0x25ee   :  { %18426 = vmatmul.mubr.msk.f32.vlgmr.msra.gmra.mrb[170].mxu1 %vm171_vm0, %v22356_v46 }
0x25ef   :  { %18441 = vmatprep.mubr.msk.f32.mxu1 %vm20506_vm7, %v20507_v31 }
0x26b5   :  { %v8254_v49 = vpop.f32.mrb[166].mxu1 }
0x26b6   :  { %v18395_v39 = vpop.f32.mrb[167].mxu1  ;;  %18399 = vmatmul.mubr.msk.f32.vlgmr.msra.gmra.mrb[162].mxu0 %vm7698_vm2, %v8254_v49 }
0x26b7   :  { %19664 = vmatpush3.bf16.msra.mxu0 %v19663_v22  ;;  %18414 = vmatprep.mubr.msk.f32.mxu0 %vm20506_vm7, %v20507_v31  ;;  %v19690_v22 = vpack.c.bf16 %v8960_v42, %v8959_v53 }
0x26b8   :  { %19665 = vmatprep.subr.bf16.mxu0 %v20505_v57 }
0x26b9   :  { %v8401_v1 = vpop.f32.mrb[168].mxu1 }
0x26ba   :  { %v18405_v4 = vpop.f32.mrb[169].mxu1 }
0x26bb   :  { %19667 = vmatpush3.bf16.msra.mxu0 %v19666_v40  ;;  %v16308_v4 = vld [vmem:[#allocation2 + $0x6a0] ss:$0 sm:$0xff] }
0x26bc   :  { %19674 = vmatprep.subr.bf16.mxu0 %v20505_v57 }
0x26be   :  { %18415 = vmatmul.mubr.msk.f32.vlgmr.msra.gmra.mrb[164].mxu0 %vm171_vm0, %v22356_v46 }
0x26bf   :  { %19676 = vmatpush3.bf16.msra.mxu0 %v19675_v38  ;;  %18436 = vmatprep.mubr.msk.f32.mxu0 %vm20506_vm7, %v20507_v31 }
0x26c0   :  { %19677 = vmatprep.subr.bf16.mxu0 %v20505_v57 }
0x26c1   :  { %v8559_v7 = vpop.f32.mrb[170].mxu1 }
0x26c2   :  { %v8560_v62 = vadd.f32 %v16298_v50, %v8559_v7  ;;  %v18427_v45 = vpop.f32.mrb[171].mxu1 }
0x26c3   :  { %19679 = vmatpush3.bf16.msra.mxu0 %v19678_v28  ;;  %v16310_v28 = vld [vmem:[#allocation2 + $0x6a8] ss:$0 sm:$0xff] }
0x26c4   :  { %18440 = vmatpush3.xpose.msk.msra.mxu1 %vm7698_vm2, %v8560_v62  ;;  %18449 = vmatprep.subr.mxu0 %v20507_v31 }
0x26c5   :  { %18444 = vmatprep.subr.mxu1 %v20507_v31 }
0x26c6   :  { %18437 = vmatmul.mubr.msk.f32.vlgmr.msra.gmra.mrb[166].mxu0 %vm171_vm0, %v22356_v46 }
0x26c7   :  { %18451 = vmatprep.mubr.msk.f32.mxu0 %vm20506_vm7, %v20507_v31  ;;  %18450 = vmatpush3.msra.mxu0 %v8803_v9 }
0x26c8   :  { %19686 = vmatprep.subr.bf16.mxu0 %v20505_v57 }
0x2789   :  { %v8328_v20 = vpop.f32.mrb[162].mxu0 }
0x278a   :  { %v22440_v59 = vadd.f32 %v8401_v1, %v8328_v20  ;;  %v18400_v18 = vpop.f32.mrb[163].mxu0  ;;  %v16306_v1 = vld [vmem:[#allocation2 + $0x698] ss:$0 sm:$0xff] }
0x2791   :  { %v8480_v6 = vpop.f32.mrb[164].mxu0 }
0x2792   :  { %v8481_v33 = vadd.f32 %v16296_v23, %v8480_v6  ;;  %v18416_v36 = vpop.f32.mrb[165].mxu0 }
0x2794   :  { %v8642_v30 = vmul.f32 0.35355338, %v8481_v33 }
0x2796   :  { %18442 = vmatmul.mubr.msk.f32.vlgmr.msra.gmra.mrb[172].mxu1 %vm7698_vm2, %v8642_v30  ;;  %v9276_v30 = vld [vmem:[#allocation2 + $0x6b0] sm:$0xff] }
0x2797   :  { %18446 = vmatprep.mubr.msk.f32.mxu1 %vm20506_vm7, %v20507_v31 }
0x2799   :  { %v8638_v35 = vpop.f32.mrb[166].mxu0 }
0x279a   :  { %v8639_v0 = vadd.f32 %v16300_v5, %v8638_v35  ;;  %v18438_v25 = vpop.f32.mrb[167].mxu0 }
0x279c   :  { %18445 = vmatpush3.msra.mxu1 %v8639_v0 }
0x279d   :  { %19680 = vmatprep.subr.bf16.mxu1 %v20505_v57 }
0x2869   :  { %v8715_v17 = vpop.f32.mrb[172].mxu1 }
0x286a   :  { %v18443_v37 = vpop.f32.mrb[173].mxu1  ;;  %v8719_v32 = vsel %vm7698_vm2, %v8715_v17, -inf }
0x286b   :  { %8720 = vmax.xlane.f32.xlu0 %v8719_v32  ;;  %v9358_v37 = vld [vmem:[#allocation2 + $0x6c0] sm:$0xff]  ;;  %v9359_v32 = vld [vmem:[#allocation2 + $0x6c8] sm:$0xff] }
0x28f8   :  { %v8721_v63 = vpop.xlane.xlu0 %8720 }
0x28f9   :  { %v8722_v47 = vsub.f32 %v8715_v17, %v8721_v63  ;;  %v19699_v63 = vpack.c.bf16 %v9359_v32, %v9358_v37 }
0x28fb   :  { %v8723_v14 = vmul.f32 1.442695, %v8722_v47  ;;  %v9360_v47 = vld [vmem:[#allocation2 + $0x6d0] sm:$0xff] }
0x28fd   :  { %20378 = vpow2.f32 %v8723_v14  ;;  %v9361_v14 = vld [vmem:[#allocation2 + $0x6d8] sm:$0xff] }
0x2907   :  { %v20379_v51 = vpop.eup %20378 }
0x2908   :  { %v8725_v56 = vsel %vm7698_vm2, %v20379_v51, 0.0 }
0x2909   :  { %8726 = vadd.xlane.f32.xlu1 %v8725_v56 }
0x2996   :  { %v8727_v60 = vpop.xlane.xlu1 %8726 }
0x2997   :  { %20380 = vrcp.f32 %v8727_v60 }
0x29a1   :  { %v20381_v44 = vpop.eup %20380 }
0x29a2   :  { %v8729_v58 = vmul.f32 %v20381_v44, %v20379_v51  ;;  %v19702_v51 = vpack.c.bf16 %v9361_v14, %v9360_v47  ;;  %v9871_v47 = vld [vmem:[#allocation2 + $0x770] sm:$0xff] }
0x29a4   :  { %18447 = vmatmul.mubr.msk.f32.vlgmr.msra.gmra.mrb[174].mxu1 %vm7698_vm2, %v8729_v58  ;;  %v9469_v58 = vld [vmem:[#allocation2 + $0x6f0] sm:$0xff] }
0x29a5   :  { %19682 = vmatpush3.bf16.msra.mxu1 %v19681_v43  ;;  %18462 = vmatprep.mubr.msk.f32.mxu1 %vm20506_vm7, %v20507_v31  ;;  %v9468_v43 = vld [vmem:[#allocation2 + $0x6e8] sm:$0xff] }
0x29a6   :  { %19683 = vmatprep.subr.bf16.mxu1 %v20505_v57  ;;  %v19705_v26 = vpack.c.bf16 %v9469_v58, %v9468_v43  ;;  %v16323_v43 = vld [vmem:[#allocation2 + $0x758] ss:$0 sm:$0xff] }
0x29a9   :  { %19685 = vmatpush3.bf16.msra.mxu1 %v19684_v29  ;;  %v9551_v29 = vld [vmem:[#allocation2 + $0x710] sm:$0xff] }
0x29aa   :  { %19692 = vmatprep.subr.bf16.mxu1 %v20505_v57  ;;  %v19711_v52 = vpack.c.bf16 %v9551_v29, %v9550_v16  ;;  %v10028_v16 = vld [vmem:[#allocation2 + $0x7a8] sm:$0xff]  ;;  %v10029_v29 = vld [vmem:[#allocation2 + $0x7b0] sm:$0xff] }
0x29ac   :  { %18463 = vmatmul.mubr.msk.f32.vlgmr.msra.gmra.mrb[176].mxu1 %vm171_vm0, %v22356_v46 }
0x29ad   :  { %19694 = vmatpush3.bf16.msra.mxu1 %v19693_v21  ;;  %18484 = vmatprep.mubr.msk.f32.mxu1 %vm20506_vm7, %v20507_v31  ;;  %v9471_v21 = vld [vmem:[#allocation2 + $0x700] sm:$0xff] }
0x29ae   :  { %19695 = vmatprep.subr.bf16.mxu1 %v20505_v57  ;;  %v19708_v8 = vpack.c.bf16 %v9471_v21, %v9470_v54  ;;  %v19735_v21 = vpack.c.bf16 %v10029_v29, %v10028_v16  ;;  %v10417_v29 = vld [vmem:[#allocation2 + $0x7f8] sm:$0xff] }
0x29b1   :  { %19697 = vmatpush3.bf16.msra.mxu1 %v19696_v15 }
0x29b2   :  { %18497 = vmatprep.subr.mxu1 %v20507_v31 }
0x29b4   :  { %18485 = vmatmul.mubr.msk.f32.vlgmr.msra.gmra.mrb[178].mxu1 %vm171_vm0, %v22356_v46 }
0x29b5   :  { %18499 = vmatprep.mubr.msk.f32.mxu1 %vm20506_vm7, %v20507_v31  ;;  %18498 = vmatpush3.msra.mxu1 %v9276_v30 }
0x29b6   :  { %19704 = vmatprep.subr.bf16.mxu1 %v20505_v57 }
0x2a77   :  { %v8799_v19 = vpop.f32.mrb[174].mxu1 }
0x2a78   :  { %v18448_v24 = vpop.f32.mrb[175].mxu1  ;;  %18452 = vmatmul.mubr.msk.f32.vlgmr.msra.gmra.mrb[168].mxu0 %vm7698_vm2, %v8799_v19 }
0x2a79   :  { %19688 = vmatpush3.bf16.msra.mxu0 %v19687_v10  ;;  %18473 = vmatprep.mubr.msk.f32.mxu0 %vm20506_vm7, %v20507_v31 }
0x2a7a   :  { %19689 = vmatprep.subr.bf16.mxu0 %v20505_v57 }
0x2a7d   :  { %19691 = vmatpush3.bf16.msra.mxu0 %v19690_v22 }
0x2a7e   :  { %18487 = vmatprep.subr.mxu0 %v20507_v31 }
0x2a7f   :  { %v8953_v48 = vpop.f32.mrb[176].mxu1 }
0x2a80   :  { %v18464_v55 = vpop.f32.mrb[177].mxu1  ;;  %18474 = vmatmul.mubr.msk.f32.vlgmr.msra.gmra.mrb[170].mxu0 %vm171_vm0, %v22356_v46  ;;  %v8954_v38 = vadd.f32 %v16306_v1, %v8953_v48 }
0x2a81   :  { %18489 = vmatprep.mubr.msk.f32.mxu0 %vm20506_vm7, %v20507_v31 }
0x2a82   :  { %v9115_v7 = vmul.f32 0.35355338, %v8954_v38 }
0x2a87   :  { %v9111_v49 = vpop.f32.mrb[178].mxu1 }
0x2a88   :  { %v18486_v39 = vpop.f32.mrb[179].mxu1  ;;  %v9112_v62 = vadd.f32 %v16310_v28, %v9111_v49 }
0x2b4b   :  { %v8873_v40 = vpop.f32.mrb[168].mxu0 }
0x2b4c   :  { %v8877_v61 = vadd.f32 %v8873_v40, %v22440_v59  ;;  %v18453_v34 = vpop.f32.mrb[169].mxu0 }
0x2b53   :  { %v9032_v12 = vpop.f32.mrb[170].mxu0 }
0x2b54   :  { %v9033_v11 = vadd.f32 %v16308_v4, %v9032_v12  ;;  %v18475_v50 = vpop.f32.mrb[171].mxu0 }
0x2b56   :  { %18488 = vmatpush3.xpose.msk.msra.mxu0 %vm7698_vm2, %v9033_v11 }
0x2b57   :  { %18492 = vmatprep.subr.mxu0 %v20507_v31 }
0x2b59   :  { %18490 = vmatmul.mubr.msk.f32.vlgmr.msra.gmra.mrb[172].mxu0 %vm7698_vm2, %v9115_v7 }
0x2b5a   :  { %18493 = vmatpush3.msra.mxu0 %v9112_v62  ;;  %18494 = vmatprep.mubr.msk.f32.mxu0 %vm20506_vm7, %v20507_v31 }
0x2b5b   :  { %19698 = vmatprep.subr.bf16.mxu0 %v20505_v57 }
0x2c2c   :  { %v9188_v45 = vpop.f32.mrb[172].mxu0 }
0x2c2d   :  { %v18491_v20 = vpop.f32.mrb[173].mxu0  ;;  %v9192_v59 = vsel %vm7698_vm2, %v9188_v45, -inf }
0x2c2e   :  { %9193 = vmax.xlane.f32.xlu0 %v9192_v59  ;;  %v9629_v59 = vld [vmem:[#allocation2 + $0x728] sm:$0xff] }
0x2cbb   :  { %v9194_v18 = vpop.xlane.xlu0 %9193 }
0x2cbc   :  { %v9195_v23 = vsub.f32 %v9188_v45, %v9194_v18  ;;  %v9630_v18 = vld [vmem:[#allocation2 + $0x730] sm:$0xff] }
0x2cbe   :  { %v9196_v6 = vmul.f32 1.442695, %v9195_v23 }
0x2cc0   :  { %20382 = vpow2.f32 %v9196_v6 }
0x2cca   :  { %v20383_v33 = vpop.eup %20382 }
0x2ccb   :  { %v9198_v36 = vsel %vm7698_vm2, %v20383_v33, 0.0 }
0x2ccc   :  { %9199 = vadd.xlane.f32.xlu1 %v9198_v36  ;;  %v19717_v36 = vpack.c.bf16 %v9630_v18, %v9629_v59 }
0x2d59   :  { %v9200_v5 = vpop.xlane.xlu1 %9199 }
0x2d5a   :  { %20384 = vrcp.f32 %v9200_v5  ;;  %v9631_v5 = vld [vmem:[#allocation2 + $0x738] sm:$0xff] }
0x2d64   :  { %v20385_v35 = vpop.eup %20384 }
0x2d65   :  { %v9202_v0 = vmul.f32 %v20385_v35, %v20383_v33  ;;  %v9632_v35 = vld [vmem:[#allocation2 + $0x740] sm:$0xff] }
0x2d67   :  { %18495 = vmatmul.mubr.msk.f32.vlgmr.msra.gmra.mrb[174].mxu0 %vm7698_vm2, %v9202_v0  ;;  %v19720_v0 = vpack.c.bf16 %v9632_v35, %v9631_v5 }
0x2d68   :  { %18510 = vmatprep.mubr.msk.f32.mxu0 %vm20506_vm7, %v20507_v31  ;;  %19700 = vmatpush3.bf16.msra.mxu0 %v19699_v63  ;;  %v9870_v63 = vld [vmem:[#allocation2 + $0x768] sm:$0xff] }
0x2d69   :  { %19701 = vmatprep.subr.bf16.mxu0 %v20505_v57 }
0x2d6c   :  { %19703 = vmatpush3.bf16.msra.mxu0 %v19702_v51 }
0x2d6d   :  { %19710 = vmatprep.subr.bf16.mxu0 %v20505_v57 }
0x2e3a   :  { %v9272_v25 = vpop.f32.mrb[174].mxu0 }
0x2e3b   :  { %v18496_v17 = vpop.f32.mrb[175].mxu0  ;;  %18500 = vmatmul.mubr.msk.f32.vlgmr.msra.gmra.mrb[180].mxu1 %vm7698_vm2, %v9272_v25  ;;  %v16319_v25 = vld [vmem:[#allocation2 + $0x748] ss:$0 sm:$0xff] }
0x2e3c   :  { %18521 = vmatprep.mubr.msk.f32.mxu1 %vm20506_vm7, %v20507_v31  ;;  %19706 = vmatpush3.bf16.msra.mxu1 %v19705_v26  ;;  %v16321_v17 = vld [vmem:[#allocation2 + $0x750] ss:$0 sm:$0xff] }
0x2e3d   :  { %19707 = vmatprep.subr.bf16.mxu1 %v20505_v57 }
0x2e40   :  { %19709 = vmatpush3.bf16.msra.mxu1 %v19708_v8  ;;  %v10030_v8 = vld [vmem:[#allocation2 + $0x7b8] sm:$0xff] }
0x2e41   :  { %19716 = vmatprep.subr.bf16.mxu1 %v20505_v57 }
0x2f0e   :  { %v9346_v56 = vpop.f32.mrb[180].mxu1 }
0x2f0f   :  { %v9350_v9 = vadd.f32 %v9346_v56, %v8877_v61  ;;  %v18501_v60 = vpop.f32.mrb[181].mxu1 }
0x2f11   :  { %v9351_v27 = vadd.f32 %v9350_v9, %v22356_v46  ;;  %v9552_v46 = vld [vmem:[#allocation2 + $0x718] sm:$0xff] }
0x2f12   :  { %v19714_v15 = vpack.c.bf16 %v9553_v41, %v9552_v46  ;;  %v10031_v46 = vld [vmem:[#allocation2 + $0x7c0] sm:$0xff] }
0x2f13   :  { %v9357_v44 = vadd.f32 %v16316_v13, %v9351_v27  ;;  %v19723_v13 = vpack.c.bf16 %v9871_v47, %v9870_v63  ;;  %v9872_v27 = vld [vmem:[#allocation2 + $0x778] sm:$0xff]  ;;  %v19738_v41 = vpack.c.bf16 %v10031_v46, %v10030_v8  ;;  %v10268_v63 = vld [vmem:[#allocation2 + $0x7e0] sm:$0xff]  ;;  %v10573_v46 = vld [vmem:[#allocation2 + $0x828] sm:$0xff] }
0x2f15   :  { %18511 = vmatmul.mubr.msk.f32.vlgmr.msra.gmra.mrb[176].mxu0 %vm171_vm0, %v9357_v44 }
0x2f16   :  { %18532 = vmatprep.mubr.msk.f32.mxu0 %vm20506_vm7, %v20507_v31  ;;  %19712 = vmatpush3.bf16.msra.mxu0 %v19711_v52 }
0x2f17   :  { %19713 = vmatprep.subr.bf16.mxu0 %v20505_v57 }
0x2f1a   :  { %19715 = vmatpush3.bf16.msra.mxu0 %v19714_v15 }
0x2f1b   :  { %18546 = vmatprep.subr.mxu0 %v20507_v31 }
0x2fe8   :  { %v9431_v3 = vpop.f32.mrb[176].mxu0 }
0x2fe9   :  { %v9435_v10 = vadd.f32 %v9431_v3, %v9357_v44  ;;  %v18512_v53 = vpop.f32.mrb[177].mxu0  ;;  %v9873_v44 = vld [vmem:[#allocation2 + $0x780] sm:$0xff] }
0x2fea   :  { %v19726_v58 = vpack.c.bf16 %v9873_v44, %v9872_v27  ;;  %v10496_v27 = vld [vmem:[#allocation2 + $0x818] sm:$0xff]  ;;  %v10497_v44 = vld [vmem:[#allocation2 + $0x820] sm:$0xff] }
0x2feb   :  { %v9441_v42 = vadd.f32 %v16318_v2, %v9435_v10 }
0x2fed   :  { %v9443_v19 = vmul.f32 0.70710677, %v9441_v42  ;;  %v9442_v6 = vmul.f32 0.5, %v9441_v42 }
0x2fef   :  { %v9444_v24 = vand.u32 2147483647, %v9443_v19  ;;  %vm9463_vm3 = vcmp.ge.f32.partialorder %v9443_v19, 0.0 }
0x2ff1   :  { %v9445_v22 = vmul.f32 0.3275911, %v9444_v24  ;;  %v9457_v55 = vsub.f32 0.0, %v9444_v24 }
0x2ff3   :  { %v9446_v48 = vadd.f32 1.0, %v9445_v22  ;;  %v9458_v39 = vmul.f32 %v9457_v55, %v9444_v24 }
0x2ff5   :  { %20386 = vrcp.f32 %v9446_v48  ;;  %v9459_v34 = vmul.f32 1.442695, %v9458_v39 }
0x2ff7   :  { %20388 = vpow2.f32 %v9459_v34 }
0x2fff   :  { %v20387_v49 = vpop.eup %20386 }
0x3000   :  { %v9448_v40 = vmul.f32 1.0614054, %v20387_v49 }
0x3001   :  { %v20389_v7 = vpop.eup %20388 }
0x3002   :  { %v9449_v61 = vadd.f32 -1.4531521, %v9448_v40  ;;  %v9949_v40 = vld [vmem:[#allocation2 + $0x788] sm:$0xff] }
0x3004   :  { %v9450_v1 = vmul.f32 %v20387_v49, %v9449_v61  ;;  %v9950_v61 = vld [vmem:[#allocation2 + $0x790] sm:$0xff] }
0x3006   :  { %v9451_v4 = vadd.f32 1.4214138, %v9450_v1  ;;  %v19729_v1 = vpack.c.bf16 %v9950_v61, %v9949_v40  ;;  %v16339_v40 = vld [vmem:[#allocation2 + $0x848] ss:$0 sm:$0xff] }
0x3008   :  { %v9452_v38 = vmul.f32 %v20387_v49, %v9451_v4 }
0x300a   :  { %v9453_v12 = vadd.f32 -0.28449672, %v9452_v38  ;;  %v9951_v38 = vld [vmem:[#allocation2 + $0x798] sm:$0xff] }
0x300c   :  { %v9454_v11 = vmul.f32 %v20387_v49, %v9453_v12  ;;  %v9952_v12 = vld [vmem:[#allocation2 + $0x7a0] sm:$0xff] }
0x300e   :  { %v9455_v50 = vadd.f32 0.2548296, %v9454_v11  ;;  %v19732_v11 = vpack.c.bf16 %v9952_v12, %v9951_v38  ;;  %v16343_v38 = vld [vmem:[#allocation2 + $0x858] ss:$0 sm:$0xff] }
0x3010   :  { %v9456_v28 = vmul.f32 %v20387_v49, %v9455_v50 }
0x3012   :  { %v9461_v62 = vmul.f32 %v20389_v7, %v9456_v28  ;;  %v16328_v7 = vld [vmem:[#allocation2 + $0x7c8] ss:$0 sm:$0xff] }
0x3014   :  { %v9462_v45 = vsub.f32 1.0, %v9461_v62  ;;  %v16330_v62 = vld [vmem:[#allocation2 + $0x7d0] ss:$0 sm:$0xff] }
0x3016   :  { %v9464_v20 = vsub.f32 0.0, %v9462_v45 }
0x3018   :  { %v9465_v23 = vsel %vm9463_vm3, %v9462_v45, %v9464_v20 }
0x3019   :  { %v9466_v33 = vadd.f32 1.0, %v9465_v23  ;;  %v16332_v23 = vld [vmem:[#allocation2 + $0x7d8] ss:$0 sm:$0xff] }
0x301b   :  { %v22499_v30 = vmul.f32 %v9466_v33, %v9442_v6 }
0x301d   :  { %18522 = vmatmul.mubr.msk.f32.vlgmr.msra.gmra.mrb[182].mxu1 %vm171_vm0, %v22499_v30  ;;  %18533 = vmatmul.mubr.msk.f32.vlgmr.msra.gmra.mrb[178].mxu0 %vm171_vm0, %v22499_v30 }
0x301e   :  { %19718 = vmatpush3.bf16.msra.mxu1 %v19717_v36  ;;  %18543 = vmatprep.mubr.msk.f32.mxu1 %vm20506_vm7, %v20507_v31 }
0x301f   :  { %19719 = vmatprep.subr.bf16.mxu1 %v20505_v57  ;;  %18548 = vmatprep.mubr.msk.f32.mxu0 %vm20506_vm7, %v20507_v31 }
0x3022   :  { %19721 = vmatpush3.bf16.msra.mxu1 %v19720_v0 }
0x3023   :  { %18551 = vmatprep.subr.mxu1 %v20507_v31 }
0x3025   :  { %18544 = vmatmul.mubr.msk.f32.vlgmr.msra.gmra.mrb[184].mxu1 %vm171_vm0, %v22499_v30 }
0x3026   :  { %18553 = vmatprep.mubr.msk.f32.mxu1 %vm20506_vm7, %v20507_v31 }
0x30f0   :  { %v9546_v37 = vpop.f32.mrb[182].mxu1  ;;  %v9625_v32 = vpop.f32.mrb[178].mxu0 }
0x30f1   :  { %v9547_v14 = vadd.f32 %v16319_v25, %v9546_v37  ;;  %v9626_v51 = vadd.f32 %v16321_v17, %v9625_v32  ;;  %v18523_v56 = vpop.f32.mrb[183].mxu1  ;;  %v18534_v9 = vpop.f32.mrb[179].mxu0 }
0x30f2   :  { %v9869_v56 = vld [vmem:[#allocation2 + $0x760] sm:$0xff]  ;;  %v10494_v9 = vld [vmem:[#allocation2 + $0x808] sm:$0xff] }
0x30f3   :  { %v9708_v60 = vmul.f32 0.35355338, %v9547_v14  ;;  %18547 = vmatpush3.xpose.msk.msra.mxu0 %vm7698_vm2, %v9626_v51 }
0x30f4   :  { %19722 = vmatprep.subr.bf16.mxu0 %v20505_v57 }
0x30f6   :  { %18549 = vmatmul.mubr.msk.f32.vlgmr.msra.gmra.mrb[180].mxu0 %vm7698_vm2, %v9708_v60  ;;  %v10495_v60 = vld [vmem:[#allocation2 + $0x810] sm:$0xff] }
0x30f7   :  { %19724 = vmatpush3.bf16.msra.mxu0 %v19723_v13  ;;  %18564 = vmatprep.mubr.msk.f32.mxu0 %vm20506_vm7, %v20507_v31  ;;  %v19747_v13 = vpack.c.bf16 %v10495_v60, %v10494_v9  ;;  %v10967_v60 = vld [vmem:[#allocation2 + $0x888] sm:$0xff] }
0x30f8   :  { %v9704_v26 = vpop.f32.mrb[184].mxu1  ;;  %19725 = vmatprep.subr.bf16.mxu0 %v20505_v57 }
0x30f9   :  { %v9705_v52 = vadd.f32 %v16323_v43, %v9704_v26  ;;  %v18545_v54 = vpop.f32.mrb[185].mxu1  ;;  %v19750_v43 = vpack.c.bf16 %v10497_v44, %v10496_v27  ;;  %v10416_v26 = vld [vmem:[#allocation2 + $0x7f0] sm:$0xff]  ;;  %v10969_v44 = vld [vmem:[#allocation2 + $0x898] sm:$0xff] }
0x30fb   :  { %18552 = vmatpush3.msra.mxu1 %v9705_v52  ;;  %19727 = vmatpush3.bf16.msra.mxu0 %v19726_v58  ;;  %v10415_v58 = vld [vmem:[#allocation2 + $0x7e8] sm:$0xff]  ;;  %v10418_v52 = vld [vmem:[#allocation2 + $0x800] sm:$0xff] }
0x30fc   :  { %19734 = vmatprep.subr.bf16.mxu0 %v20505_v57  ;;  %19728 = vmatprep.subr.bf16.mxu1 %v20505_v57  ;;  %v19741_v16 = vpack.c.bf16 %v10416_v26, %v10415_v58  ;;  %v19744_v8 = vpack.c.bf16 %v10418_v52, %v10417_v29 }
0x30fe   :  { %18565 = vmatmul.mubr.msk.f32.vlgmr.msra.gmra.mrb[182].mxu0 %vm171_vm0, %v22499_v30 }
0x30ff   :  { %19736 = vmatpush3.bf16.msra.mxu0 %v19735_v21  ;;  %18586 = vmatprep.mubr.msk.f32.mxu0 %vm20506_vm7, %v20507_v31 }
0x3100   :  { %19737 = vmatprep.subr.bf16.mxu0 %v20505_v57 }
0x3103   :  { %19739 = vmatpush3.bf16.msra.mxu0 %v19738_v41  ;;  %v10574_v41 = vld [vmem:[#allocation2 + $0x830] sm:$0xff] }
0x3104   :  { %18599 = vmatprep.subr.mxu0 %v20507_v31 }
0x3106   :  { %18587 = vmatmul.mubr.msk.f32.vlgmr.msra.gmra.mrb[184].mxu0 %vm171_vm0, %v22499_v30 }
0x3107   :  { %18601 = vmatprep.mubr.msk.f32.mxu0 %vm20506_vm7, %v20507_v31  ;;  %18600 = vmatpush3.msra.mxu0 %v10268_v63  ;;  %v11046_v63 = vld [vmem:[#allocation2 + $0x8a8] sm:$0xff] }
0x3108   :  { %19740 = vmatprep.subr.bf16.mxu0 %v20505_v57 }
0x31c9   :  { %v9781_v15 = vpop.f32.mrb[180].mxu0 }
0x31ca   :  { %v18550_v3 = vpop.f32.mrb[181].mxu0  ;;  %v9785_v2 = vsel %vm7698_vm2, %v9781_v15, -inf }
0x31cb   :  { %9786 = vmax.xlane.f32.xlu0 %v9785_v2  ;;  %v19753_v2 = vpack.c.bf16 %v10574_v41, %v10573_v46 }
0x31d1   :  { %v9945_v10 = vpop.f32.mrb[182].mxu0 }
0x31d2   :  { %v18566_v53 = vpop.f32.mrb[183].mxu0  ;;  %v9946_v45 = vadd.f32 %v16328_v7, %v9945_v10  ;;  %v10575_v10 = vld [vmem:[#allocation2 + $0x838] sm:$0xff] }
0x31d3   :  { %v10576_v53 = vld [vmem:[#allocation2 + $0x840] sm:$0xff] }
0x31d4   :  { %v10107_v6 = vmul.f32 0.35355338, %v9946_v45 }
0x31d9   :  { %v10103_v42 = vpop.f32.mrb[184].mxu0 }
0x31da   :  { %v18588_v19 = vpop.f32.mrb[185].mxu0  ;;  %v10104_v33 = vadd.f32 %v16332_v23, %v10103_v42  ;;  %v16341_v42 = vld [vmem:[#allocation2 + $0x850] ss:$0 sm:$0xff] }
0x31db   :  { %v19756_v19 = vpack.c.bf16 %v10576_v53, %v10575_v10 }
0x3258   :  { %v9787_v24 = vpop.xlane.xlu0 %9786 }
0x3259   :  { %v9788_v22 = vsub.f32 %v9781_v15, %v9787_v24 }
0x325b   :  { %v9789_v48 = vmul.f32 1.442695, %v9788_v22 }
0x325d   :  { %20390 = vpow2.f32 %v9789_v48 }
0x3267   :  { %v20391_v55 = vpop.eup %20390 }
0x3268   :  { %v9791_v49 = vsel %vm7698_vm2, %v20391_v55, 0.0 }
0x3269   :  { %9792 = vadd.xlane.f32.xlu1 %v9791_v49 }
0x32f6   :  { %v9793_v39 = vpop.xlane.xlu1 %9792 }
0x32f7   :  { %20392 = vrcp.f32 %v9793_v39 }
0x3301   :  { %v20393_v34 = vpop.eup %20392 }
0x3302   :  { %v9795_v4 = vmul.f32 %v20393_v34, %v20391_v55 }
0x3304   :  { %18554 = vmatmul.mubr.msk.f32.vlgmr.msra.gmra.mrb[186].mxu1 %vm7698_vm2, %v9795_v4 }
0x3305   :  { %19730 = vmatpush3.bf16.msra.mxu1 %v19729_v1  ;;  %18575 = vmatprep.mubr.msk.f32.mxu1 %vm20506_vm7, %v20507_v31 }
0x3306   :  { %19731 = vmatprep.subr.bf16.mxu1 %v20505_v57 }
0x3309   :  { %19733 = vmatpush3.bf16.msra.mxu1 %v19732_v11 }
0x330a   :  { %18589 = vmatprep.subr.mxu1 %v20507_v31 }
0x330c   :  { %18576 = vmatmul.mubr.msk.f32.vlgmr.msra.gmra.mrb[188].mxu1 %vm171_vm0, %v22499_v30 }
0x330d   :  { %18591 = vmatprep.mubr.msk.f32.mxu1 %vm20506_vm7, %v20507_v31 }
0x33d7   :  { %v9865_v50 = vpop.f32.mrb[186].mxu1 }
0x33d8   :  { %v18555_v28 = vpop.f32.mrb[187].mxu1 }
0x33df   :  { %v10024_v20 = vpop.f32.mrb[188].mxu1 }
0x33e0   :  { %v10025_v59 = vadd.f32 %v16330_v62, %v10024_v20  ;;  %v18577_v18 = vpop.f32.mrb[189].mxu1 }
0x33e2   :  { %18590 = vmatpush3.xpose.msk.msra.mxu1 %vm7698_vm2, %v10025_v59 }
0x33e3   :  { %18594 = vmatprep.subr.mxu1 %v20507_v31 }
0x33e5   :  { %18592 = vmatmul.mubr.msk.f32.vlgmr.msra.gmra.mrb[190].mxu1 %vm7698_vm2, %v10107_v6  ;;  %v10813_v6 = vld [vmem:[#allocation2 + $0x860] sm:$0xff] }
0x33e6   :  { %18595 = vmatpush3.msra.mxu1 %v10104_v33  ;;  %18596 = vmatprep.mubr.msk.f32.mxu1 %vm20506_vm7, %v20507_v31 }
0x33e7   :  { %18604 = vmatprep.subr.mxu1 %v20507_v31 }
0x34b8   :  { %v10180_v36 = vpop.f32.mrb[190].mxu1 }
0x34b9   :  { %v18593_v5 = vpop.f32.mrb[191].mxu1  ;;  %v10184_v35 = vsel %vm7698_vm2, %v10180_v36, -inf }
0x34ba   :  { %10185 = vmax.xlane.f32.xlu0 %v10184_v35  ;;  %v10889_v5 = vld [vmem:[#allocation2 + $0x870] sm:$0xff] }
0x3547   :  { %v10186_v0 = vpop.xlane.xlu0 %10185 }
0x3548   :  { %v10187_v25 = vsub.f32 %v10180_v36, %v10186_v0  ;;  %v10888_v36 = vld [vmem:[#allocation2 + $0x868] sm:$0xff] }
0x3549   :  { %v19759_v0 = vpack.c.bf16 %v10889_v5, %v10888_v36  ;;  %v16359_v36 = vld [vmem:[#allocation2 + $0x8e8] ss:$0 sm:$0xff] }
0x354a   :  { %v10188_v17 = vmul.f32 1.442695, %v10187_v25 }
0x354c   :  { %20394 = vpow2.f32 %v10188_v17  ;;  %v10890_v17 = vld [vmem:[#allocation2 + $0x878] sm:$0xff] }
0x3556   :  { %v20395_v37 = vpop.eup %20394 }
0x3557   :  { %v10190_v32 = vsel %vm7698_vm2, %v20395_v37, 0.0 }
0x3558   :  { %10191 = vadd.xlane.f32.xlu1 %v10190_v32 }
0x35e5   :  { %v10192_v47 = vpop.xlane.xlu1 %10191 }
0x35e6   :  { %20396 = vrcp.f32 %v10192_v47  ;;  %v11047_v47 = vld [vmem:[#allocation2 + $0x8b0] sm:$0xff] }
0x35f0   :  { %v20397_v14 = vpop.eup %20396 }
0x35f1   :  { %v10194_v51 = vmul.f32 %v20397_v14, %v20395_v37  ;;  %v10891_v37 = vld [vmem:[#allocation2 + $0x880] sm:$0xff]  ;;  %v19771_v14 = vpack.c.bf16 %v11047_v47, %v11046_v63  ;;  %v11480_v47 = vld [vmem:[#allocation2 + $0x928] sm:$0xff] }
0x35f2   :  { %v19762_v32 = vpack.c.bf16 %v10891_v37, %v10890_v17  ;;  %v11560_v37 = vld [vmem:[#allocation2 + $0x938] sm:$0xff] }
0x35f3   :  { %18597 = vmatmul.mubr.msk.f32.vlgmr.msra.gmra.mrb[192].mxu1 %vm7698_vm2, %v10194_v51  ;;  %v11048_v51 = vld [vmem:[#allocation2 + $0x8b8] sm:$0xff] }
0x35f4   :  { %18605 = vmatpush3.msra.mxu1 %v9869_v56  ;;  %18606 = vmatprep.mubr.msk.f32.mxu1 %vm20506_vm7, %v20507_v31  ;;  %v11049_v56 = vld [vmem:[#allocation2 + $0x8c0] sm:$0xff] }
0x35f5   :  { %19746 = vmatprep.subr.bf16.mxu1 %v20505_v57  ;;  %v19774_v9 = vpack.c.bf16 %v11049_v56, %v11048_v51  ;;  %v11563_v56 = vld [vmem:[#allocation2 + $0x950] sm:$0xff] }
0x35f7   :  { %18607 = vmatmul.mubr.msk.f32.vlgmr.msra.gmra.mrb[194].mxu1 %vm7698_vm2, %v9865_v50 }
0x35f8   :  { %19748 = vmatpush3.bf16.msra.mxu1 %v19747_v13  ;;  %18628 = vmatprep.mubr.msk.f32.mxu1 %vm20506_vm7, %v20507_v31  ;;  %v10968_v13 = vld [vmem:[#allocation2 + $0x890] sm:$0xff] }
0x35f9   :  { %19749 = vmatprep.subr.bf16.mxu1 %v20505_v57  ;;  %v19765_v27 = vpack.c.bf16 %v10968_v13, %v10967_v60  ;;  %v16361_v13 = vld [vmem:[#allocation2 + $0x910] ss:$0 sm:$0xff] }
0x35fc   :  { %19751 = vmatpush3.bf16.msra.mxu1 %v19750_v43  ;;  %v10970_v43 = vld [vmem:[#allocation2 + $0x8a0] sm:$0xff] }
0x35fd   :  { %18642 = vmatprep.subr.mxu1 %v20507_v31 }
0x35ff   :  { %18629 = vmatmul.mubr.msk.f32.vlgmr.msra.gmra.mrb[196].mxu1 %vm171_vm0, %v22499_v30 }
0x3600   :  { %18644 = vmatprep.mubr.msk.f32.mxu1 %vm20506_vm7, %v20507_v31 }
0x36c6   :  { %v10264_v54 = vpop.f32.mrb[192].mxu1 }
0x36c7   :  { %v18598_v21 = vpop.f32.mrb[193].mxu1  ;;  %18602 = vmatmul.mubr.msk.f32.vlgmr.msra.gmra.mrb[186].mxu0 %vm7698_vm2, %v10264_v54 }
0x36c8   :  { %19742 = vmatpush3.bf16.msra.mxu0 %v19741_v16  ;;  %18617 = vmatprep.mubr.msk.f32.mxu0 %vm20506_vm7, %v20507_v31  ;;  %v19768_v16 = vpack.c.bf16 %v10970_v43, %v10969_v44 }
0x36c9   :  { %19743 = vmatprep.subr.bf16.mxu0 %v20505_v57 }
0x36ca   :  { %v10411_v15 = vpop.f32.mrb[194].mxu1 }
0x36cb   :  { %v18608_v3 = vpop.f32.mrb[195].mxu1 }
0x36cc   :  { %19745 = vmatpush3.bf16.msra.mxu0 %v19744_v8  ;;  %v16351_v3 = vld [vmem:[#allocation2 + $0x8d0] ss:$0 sm:$0xff] }
0x36cd   :  { %19752 = vmatprep.subr.bf16.mxu0 %v20505_v57 }
0x36cf   :  { %18618 = vmatmul.mubr.msk.f32.vlgmr.msra.gmra.mrb[188].mxu0 %vm171_vm0, %v22499_v30 }
0x36d0   :  { %19754 = vmatpush3.bf16.msra.mxu0 %v19753_v2  ;;  %18639 = vmatprep.mubr.msk.f32.mxu0 %vm20506_vm7, %v20507_v31 }
0x36d1   :  { %19755 = vmatprep.subr.bf16.mxu0 %v20505_v57 }
0x36d2   :  { %v10569_v24 = vpop.f32.mrb[196].mxu1 }
0x36d3   :  { %v10570_v22 = vadd.f32 %v16341_v42, %v10569_v24  ;;  %v18630_v48 = vpop.f32.mrb[197].mxu1 }
0x36d4   :  { %19757 = vmatpush3.bf16.msra.mxu0 %v19756_v19  ;;  %v16353_v19 = vld [vmem:[#allocation2 + $0x8d8] ss:$0 sm:$0xff] }
0x36d5   :  { %18643 = vmatpush3.xpose.msk.msra.mxu1 %vm7698_vm2, %v10570_v22  ;;  %18652 = vmatprep.subr.mxu0 %v20507_v31 }
0x36d6   :  { %18647 = vmatprep.subr.mxu1 %v20507_v31 }
0x36d7   :  { %18640 = vmatmul.mubr.msk.f32.vlgmr.msra.gmra.mrb[190].mxu0 %vm171_vm0, %v22499_v30 }
0x36d8   :  { %18654 = vmatprep.mubr.msk.f32.mxu0 %vm20506_vm7, %v20507_v31  ;;  %18653 = vmatpush3.msra.mxu0 %v10813_v6 }
0x36d9   :  { %19764 = vmatprep.subr.bf16.mxu0 %v20505_v57 }
0x379a   :  { %v10338_v55 = vpop.f32.mrb[186].mxu0 }
0x379b   :  { %v22583_v49 = vadd.f32 %v10411_v15, %v10338_v55  ;;  %v18603_v39 = vpop.f32.mrb[187].mxu0  ;;  %v16349_v15 = vld [vmem:[#allocation2 + $0x8c8] ss:$0 sm:$0xff] }
0x37a2   :  { %v10490_v61 = vpop.f32.mrb[188].mxu0 }
0x37a3   :  { %v10491_v34 = vadd.f32 %v16339_v40, %v10490_v61  ;;  %v18619_v1 = vpop.f32.mrb[189].mxu0 }
0x37a5   :  { %v10652_v4 = vmul.f32 0.35355338, %v10491_v34 }
0x37a7   :  { %18645 = vmatmul.mubr.msk.f32.vlgmr.msra.gmra.mrb[198].mxu1 %vm7698_vm2, %v10652_v4  ;;  %v11286_v4 = vld [vmem:[#allocation2 + $0x8e0] sm:$0xff] }
0x37a8   :  { %18649 = vmatprep.mubr.msk.f32.mxu1 %vm20506_vm7, %v20507_v31 }
0x37aa   :  { %v10648_v12 = vpop.f32.mrb[190].mxu0 }
0x37ab   :  { %v10649_v11 = vadd.f32 %v16343_v38, %v10648_v12  ;;  %v18641_v50 = vpop.f32.mrb[191].mxu0 }
0x37ad   :  { %18648 = vmatpush3.msra.mxu1 %v10649_v11 }
0x37ae   :  { %19758 = vmatprep.subr.bf16.mxu1 %v20505_v57 }
0x387a   :  { %v10725_v28 = vpop.f32.mrb[198].mxu1 }
0x387b   :  { %v18646_v7 = vpop.f32.mrb[199].mxu1  ;;  %v10729_v62 = vsel %vm7698_vm2, %v10725_v28, -inf }
0x387c   :  { %10730 = vmax.xlane.f32.xlu0 %v10729_v62  ;;  %v11368_v7 = vld [vmem:[#allocation2 + $0x8f0] sm:$0xff]  ;;  %v11369_v62 = vld [vmem:[#allocation2 + $0x8f8] sm:$0xff] }
0x3909   :  { %v10731_v45 = vpop.xlane.xlu0 %10730 }
0x390a   :  { %v10732_v20 = vsub.f32 %v10725_v28, %v10731_v45  ;;  %v19777_v45 = vpack.c.bf16 %v11369_v62, %v11368_v7 }
0x390c   :  { %v10733_v59 = vmul.f32 1.442695, %v10732_v20  ;;  %v11370_v20 = vld [vmem:[#allocation2 + $0x900] sm:$0xff] }
0x390e   :  { %20398 = vpow2.f32 %v10733_v59  ;;  %v11371_v59 = vld [vmem:[#allocation2 + $0x908] sm:$0xff] }
0x3918   :  { %v20399_v18 = vpop.eup %20398 }
0x3919   :  { %v10735_v23 = vsel %vm7698_vm2, %v20399_v18, 0.0 }
0x391a   :  { %10736 = vadd.xlane.f32.xlu1 %v10735_v23 }
0x39a7   :  { %v10737_v33 = vpop.xlane.xlu1 %10736 }
0x39a8   :  { %20400 = vrcp.f32 %v10737_v33 }
0x39b2   :  { %v20401_v35 = vpop.eup %20400 }
0x39b3   :  { %v10739_v25 = vmul.f32 %v20401_v35, %v20399_v18  ;;  %v19780_v18 = vpack.c.bf16 %v11371_v59, %v11370_v20  ;;  %v11881_v20 = vld [vmem:[#allocation2 + $0x9a0] sm:$0xff] }
0x39b5   :  { %18650 = vmatmul.mubr.msk.f32.vlgmr.msra.gmra.mrb[200].mxu1 %vm7698_vm2, %v10739_v25  ;;  %v11479_v25 = vld [vmem:[#allocation2 + $0x920] sm:$0xff] }
0x39b6   :  { %19760 = vmatpush3.bf16.msra.mxu1 %v19759_v0  ;;  %18665 = vmatprep.mubr.msk.f32.mxu1 %vm20506_vm7, %v20507_v31  ;;  %v11478_v0 = vld [vmem:[#allocation2 + $0x918] sm:$0xff] }
0x39b7   :  { %19761 = vmatprep.subr.bf16.mxu1 %v20505_v57  ;;  %v19783_v17 = vpack.c.bf16 %v11479_v25, %v11478_v0  ;;  %v16366_v0 = vld [vmem:[#allocation2 + $0x988] ss:$0 sm:$0xff] }
0x39ba   :  { %19763 = vmatpush3.bf16.msra.mxu1 %v19762_v32  ;;  %v11561_v32 = vld [vmem:[#allocation2 + $0x940] sm:$0xff] }
0x39bb   :  { %19770 = vmatprep.subr.bf16.mxu1 %v20505_v57  ;;  %v19789_v63 = vpack.c.bf16 %v11561_v32, %v11560_v37  ;;  %v12038_v37 = vld [vmem:[#allocation2 + $0x9d8] sm:$0xff]  ;;  %v12039_v32 = vld [vmem:[#allocation2 + $0x9e0] sm:$0xff] }
0x39bd   :  { %18666 = vmatmul.mubr.msk.f32.vlgmr.msra.gmra.mrb[202].mxu1 %vm171_vm0, %v22499_v30 }
0x39be   :  { %19772 = vmatpush3.bf16.msra.mxu1 %v19771_v14  ;;  %18687 = vmatprep.mubr.msk.f32.mxu1 %vm20506_vm7, %v20507_v31  ;;  %v11481_v14 = vld [vmem:[#allocation2 + $0x930] sm:$0xff] }
0x39bf   :  { %19773 = vmatprep.subr.bf16.mxu1 %v20505_v57  ;;  %v19786_v51 = vpack.c.bf16 %v11481_v14, %v11480_v47  ;;  %v19813_v14 = vpack.c.bf16 %v12039_v32, %v12038_v37  ;;  %v12427_v32 = vld [vmem:[#allocation2 + $0xa28] sm:$0xff] }
0x39c2   :  { %19775 = vmatpush3.bf16.msra.mxu1 %v19774_v9 }
0x39c3   :  { %18700 = vmatprep.subr.mxu1 %v20507_v31 }
0x39c5   :  { %18688 = vmatmul.mubr.msk.f32.vlgmr.msra.gmra.mrb[204].mxu1 %vm171_vm0, %v22499_v30 }
0x39c6   :  { %18702 = vmatprep.mubr.msk.f32.mxu1 %vm20506_vm7, %v20507_v31  ;;  %18701 = vmatpush3.msra.mxu1 %v11286_v4 }
0x39c7   :  { %19782 = vmatprep.subr.bf16.mxu1 %v20505_v57 }
0x3a88   :  { %v10809_v58 = vpop.f32.mrb[200].mxu1 }
0x3a89   :  { %v18651_v26 = vpop.f32.mrb[201].mxu1  ;;  %18655 = vmatmul.mubr.msk.f32.vlgmr.msra.gmra.mrb[192].mxu0 %vm7698_vm2, %v10809_v58 }
0x3a8a   :  { %19766 = vmatpush3.bf16.msra.mxu0 %v19765_v27  ;;  %18676 = vmatprep.mubr.msk.f32.mxu0 %vm20506_vm7, %v20507_v31 }
0x3a8b   :  { %19767 = vmatprep.subr.bf16.mxu0 %v20505_v57 }
0x3a8e   :  { %19769 = vmatpush3.bf16.msra.mxu0 %v19768_v16 }
0x3a8f   :  { %18690 = vmatprep.subr.mxu0 %v20507_v31 }
0x3a90   :  { %v10963_v29 = vpop.f32.mrb[202].mxu1 }
0x3a91   :  { %v18667_v52 = vpop.f32.mrb[203].mxu1  ;;  %18677 = vmatmul.mubr.msk.f32.vlgmr.msra.gmra.mrb[194].mxu0 %vm171_vm0, %v22499_v30  ;;  %v10964_v2 = vadd.f32 %v16349_v15, %v10963_v29 }
0x3a92   :  { %18692 = vmatprep.mubr.msk.f32.mxu0 %vm20506_vm7, %v20507_v31 }
0x3a93   :  { %v11125_v24 = vmul.f32 0.35355338, %v10964_v2 }
0x3a98   :  { %v11121_v54 = vpop.f32.mrb[204].mxu1 }
0x3a99   :  { %v18689_v21 = vpop.f32.mrb[205].mxu1  ;;  %v11122_v22 = vadd.f32 %v16353_v19, %v11121_v54 }
0x3b5c   :  { %v10883_v8 = vpop.f32.mrb[192].mxu0 }
0x3b5d   :  { %v10887_v46 = vadd.f32 %v10883_v8, %v22583_v49  ;;  %v18656_v41 = vpop.f32.mrb[193].mxu0 }
0x3b64   :  { %v11042_v10 = vpop.f32.mrb[194].mxu0 }
0x3b65   :  { %v11043_v53 = vadd.f32 %v16351_v3, %v11042_v10  ;;  %v18678_v42 = vpop.f32.mrb[195].mxu0 }
0x3b67   :  { %18691 = vmatpush3.xpose.msk.msra.mxu0 %vm7698_vm2, %v11043_v53 }
0x3b68   :  { %18695 = vmatprep.subr.mxu0 %v20507_v31 }
0x3b6a   :  { %18693 = vmatmul.mubr.msk.f32.vlgmr.msra.gmra.mrb[196].mxu0 %vm7698_vm2, %v11125_v24 }
0x3b6b   :  { %18696 = vmatpush3.msra.mxu0 %v11122_v22  ;;  %18697 = vmatprep.mubr.msk.f32.mxu0 %vm20506_vm7, %v20507_v31 }
0x3b6c   :  { %19776 = vmatprep.subr.bf16.mxu0 %v20505_v57 }
0x3c3d   :  { %v11198_v48 = vpop.f32.mrb[196].mxu0 }
0x3c3e   :  { %v18694_v55 = vpop.f32.mrb[197].mxu0  ;;  %v11202_v49 = vsel %vm7698_vm2, %v11198_v48, -inf }
0x3c3f   :  { %11203 = vmax.xlane.f32.xlu0 %v11202_v49  ;;  %v11639_v49 = vld [vmem:[#allocation2 + $0x958] sm:$0xff] }
0x3ccc   :  { %v11204_v39 = vpop.xlane.xlu0 %11203 }
0x3ccd   :  { %v11205_v40 = vsub.f32 %v11198_v48, %v11204_v39  ;;  %v11640_v39 = vld [vmem:[#allocation2 + $0x960] sm:$0xff] }
0x3ccf   :  { %v11206_v61 = vmul.f32 1.442695, %v11205_v40 }
0x3cd1   :  { %20402 = vpow2.f32 %v11206_v61 }
0x3cdb   :  { %v20403_v34 = vpop.eup %20402 }
0x3cdc   :  { %v11208_v1 = vsel %vm7698_vm2, %v20403_v34, 0.0 }
0x3cdd   :  { %11209 = vadd.xlane.f32.xlu1 %v11208_v1  ;;  %v19795_v1 = vpack.c.bf16 %v11640_v39, %v11639_v49 }
0x3d6a   :  { %v11210_v38 = vpop.xlane.xlu1 %11209 }
0x3d6b   :  { %20404 = vrcp.f32 %v11210_v38  ;;  %v11641_v38 = vld [vmem:[#allocation2 + $0x968] sm:$0xff] }
0x3d75   :  { %v20405_v12 = vpop.eup %20404 }
0x3d76   :  { %v11212_v11 = vmul.f32 %v20405_v12, %v20403_v34  ;;  %v11642_v12 = vld [vmem:[#allocation2 + $0x970] sm:$0xff] }
0x3d78   :  { %18698 = vmatmul.mubr.msk.f32.vlgmr.msra.gmra.mrb[198].mxu0 %vm7698_vm2, %v11212_v11  ;;  %v19798_v11 = vpack.c.bf16 %v11642_v12, %v11641_v38 }
0x3d79   :  { %18713 = vmatprep.mubr.msk.f32.mxu0 %vm20506_vm7, %v20507_v31  ;;  %19778 = vmatpush3.bf16.msra.mxu0 %v19777_v45  ;;  %v11880_v45 = vld [vmem:[#allocation2 + $0x998] sm:$0xff] }
0x3d7a   :  { %19779 = vmatprep.subr.bf16.mxu0 %v20505_v57 }
0x3d7d   :  { %19781 = vmatpush3.bf16.msra.mxu0 %v19780_v18 }
0x3d7e   :  { %19788 = vmatprep.subr.bf16.mxu0 %v20505_v57 }
0x3e4b   :  { %v11282_v50 = vpop.f32.mrb[198].mxu0 }
0x3e4c   :  { %v18699_v28 = vpop.f32.mrb[199].mxu0  ;;  %18703 = vmatmul.mubr.msk.f32.vlgmr.msra.gmra.mrb[206].mxu1 %vm7698_vm2, %v11282_v50  ;;  %v16362_v50 = vld [vmem:[#allocation2 + $0x978] ss:$0 sm:$0xff] }
0x3e4d   :  { %18724 = vmatprep.mubr.msk.f32.mxu1 %vm20506_vm7, %v20507_v31  ;;  %19784 = vmatpush3.bf16.msra.mxu1 %v19783_v17  ;;  %v16364_v28 = vld [vmem:[#allocation2 + $0x980] ss:$0 sm:$0xff] }
0x3e4e   :  { %19785 = vmatprep.subr.bf16.mxu1 %v20505_v57 }
0x3e51   :  { %19787 = vmatpush3.bf16.msra.mxu1 %v19786_v51  ;;  %v12040_v51 = vld [vmem:[#allocation2 + $0x9e8] sm:$0xff] }
0x3e52   :  { %19794 = vmatprep.subr.bf16.mxu1 %v20505_v57 }
0x3f1f   :  { %v11356_v23 = vpop.f32.mrb[206].mxu1 }
0x3f20   :  { %v11360_v6 = vadd.f32 %v11356_v23, %v10887_v46  ;;  %v18704_v33 = vpop.f32.mrb[207].mxu1 }
0x3f22   :  { %v11361_v5 = vadd.f32 %v11360_v6, %v22499_v30  ;;  %v11562_v30 = vld [vmem:[#allocation2 + $0x948] sm:$0xff] }
0x3f23   :  { %v19792_v9 = vpack.c.bf16 %v11563_v56, %v11562_v30  ;;  %v12041_v30 = vld [vmem:[#allocation2 + $0x9f0] sm:$0xff] }
0x3f24   :  { %v11367_v35 = vadd.f32 %v16359_v36, %v11361_v5  ;;  %v19801_v36 = vpack.c.bf16 %v11881_v20, %v11880_v45  ;;  %v11882_v5 = vld [vmem:[#allocation2 + $0x9a8] sm:$0xff]  ;;  %v19816_v56 = vpack.c.bf16 %v12041_v30, %v12040_v51  ;;  %v12278_v45 = vld [vmem:[#allocation2 + $0xa10] sm:$0xff]  ;;  %v12583_v30 = vld [vmem:[#allocation2 + $0xa58] sm:$0xff] }
0x3f26   :  { %18714 = vmatmul.mubr.msk.f32.vlgmr.msra.gmra.mrb[200].mxu0 %vm171_vm0, %v11367_v35 }
0x3f27   :  { %18735 = vmatprep.mubr.msk.f32.mxu0 %vm20506_vm7, %v20507_v31  ;;  %19790 = vmatpush3.bf16.msra.mxu0 %v19789_v63 }
0x3f28   :  { %19791 = vmatprep.subr.bf16.mxu0 %v20505_v57 }
0x3f2b   :  { %19793 = vmatpush3.bf16.msra.mxu0 %v19792_v9 }
0x3f2c   :  { %18749 = vmatprep.subr.mxu0 %v20507_v31 }
0x3ff9   :  { %v11441_v60 = vpop.f32.mrb[200].mxu0 }
0x3ffa   :  { %v11445_v27 = vadd.f32 %v11441_v60, %v11367_v35  ;;  %v18715_v44 = vpop.f32.mrb[201].mxu0  ;;  %v11883_v35 = vld [vmem:[#allocation2 + $0x9b0] sm:$0xff] }
0x3ffb   :  { %v19804_v25 = vpack.c.bf16 %v11883_v35, %v11882_v5  ;;  %v12506_v5 = vld [vmem:[#allocation2 + $0xa48] sm:$0xff]  ;;  %v12507_v35 = vld [vmem:[#allocation2 + $0xa50] sm:$0xff] }
0x3ffc   :  { %v11451_v43 = vadd.f32 %v16361_v13, %v11445_v27 }
0x3ffe   :  { %v11453_v58 = vmul.f32 0.70710677, %v11451_v43  ;;  %v11452_v61 = vmul.f32 0.5, %v11451_v43 }
0x4000   :  { %v11454_v26 = vand.u32 2147483647, %v11453_v58  ;;  %vm11473_vm4 = vcmp.ge.f32.partialorder %v11453_v58, 0.0 }
0x4002   :  { %v11455_v16 = vmul.f32 0.3275911, %v11454_v26  ;;  %v11467_v52 = vsub.f32 0.0, %v11454_v26 }
0x4004   :  { %v11456_v29 = vadd.f32 1.0, %v11455_v16  ;;  %v11468_v21 = vmul.f32 %v11467_v52, %v11454_v26 }
0x4006   :  { %20406 = vrcp.f32 %v11456_v29  ;;  %v11469_v41 = vmul.f32 1.442695, %v11468_v21 }
0x4008   :  { %20408 = vpow2.f32 %v11469_v41 }
0x4010   :  { %v20407_v54 = vpop.eup %20406 }
0x4011   :  { %v11458_v8 = vmul.f32 1.0614054, %v20407_v54 }
0x4012   :  { %v20409_v24 = vpop.eup %20408 }
0x4013   :  { %v11459_v46 = vadd.f32 -1.4531521, %v11458_v8  ;;  %v11959_v8 = vld [vmem:[#allocation2 + $0x9b8] sm:$0xff] }
0x4015   :  { %v11460_v15 = vmul.f32 %v20407_v54, %v11459_v46  ;;  %v11960_v46 = vld [vmem:[#allocation2 + $0x9c0] sm:$0xff] }
0x4017   :  { %v11461_v3 = vadd.f32 1.4214138, %v11460_v15  ;;  %v19807_v15 = vpack.c.bf16 %v11960_v46, %v11959_v8  ;;  %v16382_v8 = vld [vmem:[#allocation2 + $0xa78] ss:$0 sm:$0xff] }
0x4019   :  { %v11462_v2 = vmul.f32 %v20407_v54, %v11461_v3 }
0x401b   :  { %v11463_v10 = vadd.f32 -0.28449672, %v11462_v2  ;;  %v11961_v2 = vld [vmem:[#allocation2 + $0x9c8] sm:$0xff] }
0x401d   :  { %v11464_v53 = vmul.f32 %v20407_v54, %v11463_v10  ;;  %v11962_v10 = vld [vmem:[#allocation2 + $0x9d0] sm:$0xff] }
0x401f   :  { %v11465_v42 = vadd.f32 0.2548296, %v11464_v53  ;;  %v19810_v53 = vpack.c.bf16 %v11962_v10, %v11961_v2  ;;  %v16386_v2 = vld [vmem:[#allocation2 + $0xa88] ss:$0 sm:$0xff] }
0x4021   :  { %v11466_v19 = vmul.f32 %v20407_v54, %v11465_v42 }
0x4023   :  { %v11471_v22 = vmul.f32 %v20409_v24, %v11466_v19  ;;  %v16371_v24 = vld [vmem:[#allocation2 + $0x9f8] ss:$0 sm:$0xff] }
0x4025   :  { %v11472_v48 = vsub.f32 1.0, %v11471_v22  ;;  %v16373_v22 = vld [vmem:[#allocation2 + $0xa00] ss:$0 sm:$0xff] }
0x4027   :  { %v11474_v55 = vsub.f32 0.0, %v11472_v48 }
0x4029   :  { %v11475_v40 = vsel %vm11473_vm4, %v11472_v48, %v11474_v55 }
0x402a   :  { %v11476_v34 = vadd.f32 1.0, %v11475_v40  ;;  %v16375_v40 = vld [vmem:[#allocation2 + $0xa08] ss:$0 sm:$0xff] }
0x402c   :  { %v22642_v4 = vmul.f32 %v11476_v34, %v11452_v61 }
0x402e   :  { %18725 = vmatmul.mubr.msk.f32.vlgmr.msra.gmra.mrb[208].mxu1 %vm171_vm0, %v22642_v4  ;;  %18736 = vmatmul.mubr.msk.f32.vlgmr.msra.gmra.mrb[202].mxu0 %vm171_vm0, %v22642_v4 }
0x402f   :  { %19796 = vmatpush3.bf16.msra.mxu1 %v19795_v1  ;;  %18746 = vmatprep.mubr.msk.f32.mxu1 %vm20506_vm7, %v20507_v31 }
0x4030   :  { %19797 = vmatprep.subr.bf16.mxu1 %v20505_v57  ;;  %18751 = vmatprep.mubr.msk.f32.mxu0 %vm20506_vm7, %v20507_v31 }
0x4033   :  { %19799 = vmatpush3.bf16.msra.mxu1 %v19798_v11 }
0x4034   :  { %18754 = vmatprep.subr.mxu1 %v20507_v31 }
0x4036   :  { %18747 = vmatmul.mubr.msk.f32.vlgmr.msra.gmra.mrb[210].mxu1 %vm171_vm0, %v22642_v4 }
0x4037   :  { %18756 = vmatprep.mubr.msk.f32.mxu1 %vm20506_vm7, %v20507_v31 }
0x4101   :  { %v11556_v7 = vpop.f32.mrb[208].mxu1  ;;  %v11635_v62 = vpop.f32.mrb[202].mxu0 }
0x4102   :  { %v11557_v59 = vadd.f32 %v16362_v50, %v11556_v7  ;;  %v11636_v18 = vadd.f32 %v16364_v28, %v11635_v62  ;;  %v18726_v23 = vpop.f32.mrb[209].mxu1  ;;  %v18737_v6 = vpop.f32.mrb[203].mxu0 }
0x4103   :  { %v11879_v23 = vld [vmem:[#allocation2 + $0x990] sm:$0xff]  ;;  %v12504_v6 = vld [vmem:[#allocation2 + $0xa38] sm:$0xff] }
0x4104   :  { %v11718_v33 = vmul.f32 0.35355338, %v11557_v59  ;;  %18750 = vmatpush3.xpose.msk.msra.mxu0 %vm7698_vm2, %v11636_v18 }
0x4105   :  { %19800 = vmatprep.subr.bf16.mxu0 %v20505_v57 }
0x4107   :  { %18752 = vmatmul.mubr.msk.f32.vlgmr.msra.gmra.mrb[204].mxu0 %vm7698_vm2, %v11718_v33  ;;  %v12505_v33 = vld [vmem:[#allocation2 + $0xa40] sm:$0xff] }
0x4108   :  { %19802 = vmatpush3.bf16.msra.mxu0 %v19801_v36  ;;  %18767 = vmatprep.mubr.msk.f32.mxu0 %vm20506_vm7, %v20507_v31  ;;  %v19825_v36 = vpack.c.bf16 %v12505_v33, %v12504_v6  ;;  %v12977_v33 = vld [vmem:[#allocation2 + $0xab8] sm:$0xff] }
0x4109   :  { %v11714_v17 = vpop.f32.mrb[210].mxu1  ;;  %19803 = vmatprep.subr.bf16.mxu0 %v20505_v57 }
0x410a   :  { %v11715_v63 = vadd.f32 %v16366_v0, %v11714_v17  ;;  %v18748_v47 = vpop.f32.mrb[211].mxu1  ;;  %v19828_v0 = vpack.c.bf16 %v12507_v35, %v12506_v5  ;;  %v12426_v17 = vld [vmem:[#allocation2 + $0xa20] sm:$0xff]  ;;  %v12979_v35 = vld [vmem:[#allocation2 + $0xac8] sm:$0xff] }
0x410c   :  { %18755 = vmatpush3.msra.mxu1 %v11715_v63  ;;  %19805 = vmatpush3.bf16.msra.mxu0 %v19804_v25  ;;  %v12425_v25 = vld [vmem:[#allocation2 + $0xa18] sm:$0xff]  ;;  %v12428_v63 = vld [vmem:[#allocation2 + $0xa30] sm:$0xff] }
0x410d   :  { %19812 = vmatprep.subr.bf16.mxu0 %v20505_v57  ;;  %19806 = vmatprep.subr.bf16.mxu1 %v20505_v57  ;;  %v19819_v37 = vpack.c.bf16 %v12426_v17, %v12425_v25  ;;  %v19822_v51 = vpack.c.bf16 %v12428_v63, %v12427_v32 }
0x410f   :  { %18768 = vmatmul.mubr.msk.f32.vlgmr.msra.gmra.mrb[206].mxu0 %vm171_vm0, %v22642_v4 }
0x4110   :  { %19814 = vmatpush3.bf16.msra.mxu0 %v19813_v14  ;;  %18789 = vmatprep.mubr.msk.f32.mxu0 %vm20506_vm7, %v20507_v31 }
0x4111   :  { %19815 = vmatprep.subr.bf16.mxu0 %v20505_v57 }
0x4114   :  { %19817 = vmatpush3.bf16.msra.mxu0 %v19816_v56  ;;  %v12584_v56 = vld [vmem:[#allocation2 + $0xa60] sm:$0xff] }
0x4115   :  { %18802 = vmatprep.subr.mxu0 %v20507_v31 }
0x4117   :  { %18790 = vmatmul.mubr.msk.f32.vlgmr.msra.gmra.mrb[208].mxu0 %vm171_vm0, %v22642_v4 }
0x4118   :  { %18804 = vmatprep.mubr.msk.f32.mxu0 %vm20506_vm7, %v20507_v31  ;;  %18803 = vmatpush3.msra.mxu0 %v12278_v45  ;;  %v13056_v45 = vld [vmem:[#allocation2 + $0xad8] sm:$0xff] }
0x4119   :  { %19818 = vmatprep.subr.bf16.mxu0 %v20505_v57 }
0x41da   :  { %v11791_v9 = vpop.f32.mrb[204].mxu0 }
0x41db   :  { %v18753_v60 = vpop.f32.mrb[205].mxu0  ;;  %v11795_v13 = vsel %vm7698_vm2, %v11791_v9, -inf }
0x41dc   :  { %11796 = vmax.xlane.f32.xlu0 %v11795_v13  ;;  %v19831_v13 = vpack.c.bf16 %v12584_v56, %v12583_v30 }
0x41e2   :  { %v11955_v27 = vpop.f32.mrb[206].mxu0 }
0x41e3   :  { %v18769_v44 = vpop.f32.mrb[207].mxu0  ;;  %v11956_v48 = vadd.f32 %v16371_v24, %v11955_v27  ;;  %v12585_v27 = vld [vmem:[#allocation2 + $0xa68] sm:$0xff] }
0x41e4   :  { %v12586_v44 = vld [vmem:[#allocation2 + $0xa70] sm:$0xff] }
0x41e5   :  { %v12117_v61 = vmul.f32 0.35355338, %v11956_v48 }
0x41ea   :  { %v12113_v43 = vpop.f32.mrb[208].mxu0 }
0x41eb   :  { %v18791_v58 = vpop.f32.mrb[209].mxu0  ;;  %v12114_v34 = vadd.f32 %v16375_v40, %v12113_v43  ;;  %v16384_v43 = vld [vmem:[#allocation2 + $0xa80] ss:$0 sm:$0xff] }
0x41ec   :  { %v19834_v58 = vpack.c.bf16 %v12586_v44, %v12585_v27 }
0x4269   :  { %v11797_v26 = vpop.xlane.xlu0 %11796 }
0x426a   :  { %v11798_v16 = vsub.f32 %v11791_v9, %v11797_v26 }
0x426c   :  { %v11799_v29 = vmul.f32 1.442695, %v11798_v16 }
0x426e   :  { %20410 = vpow2.f32 %v11799_v29 }
0x4278   :  { %v20411_v52 = vpop.eup %20410 }
0x4279   :  { %v11801_v54 = vsel %vm7698_vm2, %v20411_v52, 0.0 }
0x427a   :  { %11802 = vadd.xlane.f32.xlu1 %v11801_v54 }
0x4307   :  { %v11803_v21 = vpop.xlane.xlu1 %11802 }
0x4308   :  { %20412 = vrcp.f32 %v11803_v21 }
0x4312   :  { %v20413_v41 = vpop.eup %20412 }
0x4313   :  { %v11805_v3 = vmul.f32 %v20413_v41, %v20411_v52 }
0x4315   :  { %18757 = vmatmul.mubr.msk.f32.vlgmr.msra.gmra.mrb[212].mxu1 %vm7698_vm2, %v11805_v3 }
0x4316   :  { %19808 = vmatpush3.bf16.msra.mxu1 %v19807_v15  ;;  %18778 = vmatprep.mubr.msk.f32.mxu1 %vm20506_vm7, %v20507_v31 }
0x4317   :  { %19809 = vmatprep.subr.bf16.mxu1 %v20505_v57 }
0x431a   :  { %19811 = vmatpush3.bf16.msra.mxu1 %v19810_v53 }
0x431b   :  { %18792 = vmatprep.subr.mxu1 %v20507_v31 }
0x431d   :  { %18779 = vmatmul.mubr.msk.f32.vlgmr.msra.gmra.mrb[214].mxu1 %vm171_vm0, %v22642_v4 }
0x431e   :  { %18794 = vmatprep.mubr.msk.f32.mxu1 %vm20506_vm7, %v20507_v31 }
0x43e8   :  { %v11875_v42 = vpop.f32.mrb[212].mxu1 }
0x43e9   :  { %v18758_v19 = vpop.f32.mrb[213].mxu1 }
0x43f0   :  { %v12034_v55 = vpop.f32.mrb[214].mxu1 }
0x43f1   :  { %v12035_v49 = vadd.f32 %v16373_v22, %v12034_v55  ;;  %v18780_v39 = vpop.f32.mrb[215].mxu1 }
0x43f3   :  { %18793 = vmatpush3.xpose.msk.msra.mxu1 %vm7698_vm2, %v12035_v49 }
0x43f4   :  { %18797 = vmatprep.subr.mxu1 %v20507_v31 }
0x43f6   :  { %18795 = vmatmul.mubr.msk.f32.vlgmr.msra.gmra.mrb[216].mxu1 %vm7698_vm2, %v12117_v61  ;;  %v12823_v61 = vld [vmem:[#allocation2 + $0xa90] sm:$0xff] }
0x43f7   :  { %18798 = vmatpush3.msra.mxu1 %v12114_v34  ;;  %18799 = vmatprep.mubr.msk.f32.mxu1 %vm20506_vm7, %v20507_v31 }
0x43f8   :  { %18807 = vmatprep.subr.mxu1 %v20507_v31 }
0x44c9   :  { %v12190_v1 = vpop.f32.mrb[216].mxu1 }
0x44ca   :  { %v18796_v38 = vpop.f32.mrb[217].mxu1  ;;  %v12194_v12 = vsel %vm7698_vm2, %v12190_v1, -inf }
0x44cb   :  { %12195 = vmax.xlane.f32.xlu0 %v12194_v12  ;;  %v12899_v38 = vld [vmem:[#allocation2 + $0xaa0] sm:$0xff] }
0x4558   :  { %v12196_v11 = vpop.xlane.xlu0 %12195 }
0x4559   :  { %v12197_v50 = vsub.f32 %v12190_v1, %v12196_v11  ;;  %v12898_v1 = vld [vmem:[#allocation2 + $0xa98] sm:$0xff] }
0x455a   :  { %v19837_v11 = vpack.c.bf16 %v12899_v38, %v12898_v1  ;;  %v16402_v1 = vld [vmem:[#allocation2 + $0xb18] ss:$0 sm:$0xff] }
0x455b   :  { %v12198_v28 = vmul.f32 1.442695, %v12197_v50 }
0x455d   :  { %20414 = vpow2.f32 %v12198_v28  ;;  %v12900_v28 = vld [vmem:[#allocation2 + $0xaa8] sm:$0xff] }
0x4567   :  { %v20415_v7 = vpop.eup %20414 }
0x4568   :  { %v12200_v62 = vsel %vm7698_vm2, %v20415_v7, 0.0 }
0x4569   :  { %12201 = vadd.xlane.f32.xlu1 %v12200_v62 }
0x45f6   :  { %v12202_v20 = vpop.xlane.xlu1 %12201 }
0x45f7   :  { %20416 = vrcp.f32 %v12202_v20  ;;  %v13057_v20 = vld [vmem:[#allocation2 + $0xae0] sm:$0xff] }
0x4601   :  { %v20417_v59 = vpop.eup %20416 }
0x4602   :  { %v12204_v18 = vmul.f32 %v20417_v59, %v20415_v7  ;;  %v12901_v7 = vld [vmem:[#allocation2 + $0xab0] sm:$0xff]  ;;  %v19849_v59 = vpack.c.bf16 %v13057_v20, %v13056_v45  ;;  %v13490_v20 = vld [vmem:[#allocation2 + $0xb58] sm:$0xff] }
0x4603   :  { %v19840_v62 = vpack.c.bf16 %v12901_v7, %v12900_v28  ;;  %v13570_v7 = vld [vmem:[#allocation2 + $0xb68] sm:$0xff] }
0x4604   :  { %18800 = vmatmul.mubr.msk.f32.vlgmr.msra.gmra.mrb[218].mxu1 %vm7698_vm2, %v12204_v18  ;;  %v13058_v18 = vld [vmem:[#allocation2 + $0xae8] sm:$0xff] }
0x4605   :  { %18808 = vmatpush3.msra.mxu1 %v11879_v23  ;;  %18809 = vmatprep.mubr.msk.f32.mxu1 %vm20506_vm7, %v20507_v31  ;;  %v13059_v23 = vld [vmem:[#allocation2 + $0xaf0] sm:$0xff] }
0x4606   :  { %19824 = vmatprep.subr.bf16.mxu1 %v20505_v57  ;;  %v19852_v6 = vpack.c.bf16 %v13059_v23, %v13058_v18  ;;  %v13573_v23 = vld [vmem:[#allocation2 + $0xb80] sm:$0xff] }
0x4608   :  { %18810 = vmatmul.mubr.msk.f32.vlgmr.msra.gmra.mrb[220].mxu1 %vm7698_vm2, %v11875_v42 }
0x4609   :  { %19826 = vmatpush3.bf16.msra.mxu1 %v19825_v36  ;;  %18831 = vmatprep.mubr.msk.f32.mxu1 %vm20506_vm7, %v20507_v31  ;;  %v12978_v36 = vld [vmem:[#allocation2 + $0xac0] sm:$0xff] }
0x460a   :  { %19827 = vmatprep.subr.bf16.mxu1 %v20505_v57  ;;  %v19843_v5 = vpack.c.bf16 %v12978_v36, %v12977_v33  ;;  %v16404_v36 = vld [vmem:[#allocation2 + $0xb40] ss:$0 sm:$0xff] }
0x460d   :  { %19829 = vmatpush3.bf16.msra.mxu1 %v19828_v0  ;;  %v12980_v0 = vld [vmem:[#allocation2 + $0xad0] sm:$0xff] }
0x460e   :  { %18845 = vmatprep.subr.mxu1 %v20507_v31 }
0x4610   :  { %18832 = vmatmul.mubr.msk.f32.vlgmr.msra.gmra.mrb[222].mxu1 %vm171_vm0, %v22642_v4 }
0x4611   :  { %18847 = vmatprep.mubr.msk.f32.mxu1 %vm20506_vm7, %v20507_v31 }
0x46d7   :  { %v12274_v47 = vpop.f32.mrb[218].mxu1 }
0x46d8   :  { %v18801_v14 = vpop.f32.mrb[219].mxu1  ;;  %18805 = vmatmul.mubr.msk.f32.vlgmr.msra.gmra.mrb[210].mxu0 %vm7698_vm2, %v12274_v47 }
0x46d9   :  { %19820 = vmatpush3.bf16.msra.mxu0 %v19819_v37  ;;  %18820 = vmatprep.mubr.msk.f32.mxu0 %vm20506_vm7, %v20507_v31  ;;  %v19846_v37 = vpack.c.bf16 %v12980_v0, %v12979_v35 }
0x46da   :  { %19821 = vmatprep.subr.bf16.mxu0 %v20505_v57 }
0x46db   :  { %v12421_v9 = vpop.f32.mrb[220].mxu1 }
0x46dc   :  { %v18811_v60 = vpop.f32.mrb[221].mxu1 }
0x46dd   :  { %19823 = vmatpush3.bf16.msra.mxu0 %v19822_v51  ;;  %v16394_v60 = vld [vmem:[#allocation2 + $0xb00] ss:$0 sm:$0xff] }
0x46de   :  { %19830 = vmatprep.subr.bf16.mxu0 %v20505_v57 }
0x46e0   :  { %18821 = vmatmul.mubr.msk.f32.vlgmr.msra.gmra.mrb[212].mxu0 %vm171_vm0, %v22642_v4 }
0x46e1   :  { %19832 = vmatpush3.bf16.msra.mxu0 %v19831_v13  ;;  %18842 = vmatprep.mubr.msk.f32.mxu0 %vm20506_vm7, %v20507_v31 }
0x46e2   :  { %19833 = vmatprep.subr.bf16.mxu0 %v20505_v57 }
0x46e3   :  { %v12579_v26 = vpop.f32.mrb[222].mxu1 }
0x46e4   :  { %v12580_v16 = vadd.f32 %v16384_v43, %v12579_v26  ;;  %v18833_v29 = vpop.f32.mrb[223].mxu1 }
0x46e5   :  { %19835 = vmatpush3.bf16.msra.mxu0 %v19834_v58  ;;  %v16396_v58 = vld [vmem:[#allocation2 + $0xb08] ss:$0 sm:$0xff] }
0x46e6   :  { %18846 = vmatpush3.xpose.msk.msra.mxu1 %vm7698_vm2, %v12580_v16  ;;  %18855 = vmatprep.subr.mxu0 %v20507_v31 }
0x46e7   :  { %18850 = vmatprep.subr.mxu1 %v20507_v31 }
0x46e8   :  { %18843 = vmatmul.mubr.msk.f32.vlgmr.msra.gmra.mrb[214].mxu0 %vm171_vm0, %v22642_v4 }
0x46e9   :  { %18857 = vmatprep.mubr.msk.f32.mxu0 %vm20506_vm7, %v20507_v31  ;;  %18856 = vmatpush3.msra.mxu0 %v12823_v61 }
0x46ea   :  { %19842 = vmatprep.subr.bf16.mxu0 %v20505_v57 }
0x47ab   :  { %v12348_v52 = vpop.f32.mrb[210].mxu0 }
0x47ac   :  { %v22726_v54 = vadd.f32 %v12421_v9, %v12348_v52  ;;  %v18806_v21 = vpop.f32.mrb[211].mxu0  ;;  %v16392_v9 = vld [vmem:[#allocation2 + $0xaf8] ss:$0 sm:$0xff] }
0x47b3   :  { %v12500_v46 = vpop.f32.mrb[212].mxu0 }
0x47b4   :  { %v12501_v41 = vadd.f32 %v16382_v8, %v12500_v46  ;;  %v18822_v15 = vpop.f32.mrb[213].mxu0 }
0x47b6   :  { %v12662_v3 = vmul.f32 0.35355338, %v12501_v41 }
0x47b8   :  { %18848 = vmatmul.mubr.msk.f32.vlgmr.msra.gmra.mrb[224].mxu1 %vm7698_vm2, %v12662_v3  ;;  %v13296_v3 = vld [vmem:[#allocation2 + $0xb10] sm:$0xff] }
0x47b9   :  { %18852 = vmatprep.mubr.msk.f32.mxu1 %vm20506_vm7, %v20507_v31 }
0x47bb   :  { %v12658_v10 = vpop.f32.mrb[214].mxu0 }
0x47bc   :  { %v12659_v53 = vadd.f32 %v16386_v2, %v12658_v10  ;;  %v18844_v42 = vpop.f32.mrb[215].mxu0 }
0x47be   :  { %18851 = vmatpush3.msra.mxu1 %v12659_v53 }
0x47bf   :  { %19836 = vmatprep.subr.bf16.mxu1 %v20505_v57 }
0x488b   :  { %v12735_v19 = vpop.f32.mrb[224].mxu1 }
0x488c   :  { %v18849_v24 = vpop.f32.mrb[225].mxu1  ;;  %v12739_v22 = vsel %vm7698_vm2, %v12735_v19, -inf }
0x488d   :  { %12740 = vmax.xlane.f32.xlu0 %v12739_v22  ;;  %v13378_v24 = vld [vmem:[#allocation2 + $0xb20] sm:$0xff]  ;;  %v13379_v22 = vld [vmem:[#allocation2 + $0xb28] sm:$0xff] }
0x491a   :  { %v12741_v48 = vpop.xlane.xlu0 %12740 }
0x491b   :  { %v12742_v55 = vsub.f32 %v12735_v19, %v12741_v48  ;;  %v19855_v48 = vpack.c.bf16 %v13379_v22, %v13378_v24 }
0x491d   :  { %v12743_v49 = vmul.f32 1.442695, %v12742_v55  ;;  %v13380_v55 = vld [vmem:[#allocation2 + $0xb30] sm:$0xff] }
0x491f   :  { %20418 = vpow2.f32 %v12743_v49  ;;  %v13381_v49 = vld [vmem:[#allocation2 + $0xb38] sm:$0xff] }
0x4929   :  { %v20419_v39 = vpop.eup %20418 }
0x492a   :  { %v12745_v40 = vsel %vm7698_vm2, %v20419_v39, 0.0 }
0x492b   :  { %12746 = vadd.xlane.f32.xlu1 %v12745_v40 }
0x49b8   :  { %v12747_v34 = vpop.xlane.xlu1 %12746 }
0x49b9   :  { %20420 = vrcp.f32 %v12747_v34 }
0x49c3   :  { %v20421_v12 = vpop.eup %20420 }
0x49c4   :  { %v12749_v50 = vmul.f32 %v20421_v12, %v20419_v39  ;;  %v19858_v39 = vpack.c.bf16 %v13381_v49, %v13380_v55  ;;  %v13891_v55 = vld [vmem:[#allocation2 + $0xbd0] sm:$0xff] }
0x49c6   :  { %18853 = vmatmul.mubr.msk.f32.vlgmr.msra.gmra.mrb[226].mxu1 %vm7698_vm2, %v12749_v50  ;;  %v13489_v50 = vld [vmem:[#allocation2 + $0xb50] sm:$0xff] }
0x49c7   :  { %19838 = vmatpush3.bf16.msra.mxu1 %v19837_v11  ;;  %18868 = vmatprep.mubr.msk.f32.mxu1 %vm20506_vm7, %v20507_v31  ;;  %v13488_v11 = vld [vmem:[#allocation2 + $0xb48] sm:$0xff] }
0x49c8   :  { %19839 = vmatprep.subr.bf16.mxu1 %v20505_v57  ;;  %v19861_v28 = vpack.c.bf16 %v13489_v50, %v13488_v11  ;;  %v16409_v11 = vld [vmem:[#allocation2 + $0xbb8] ss:$0 sm:$0xff] }
0x49cb   :  { %19841 = vmatpush3.bf16.msra.mxu1 %v19840_v62  ;;  %v13571_v62 = vld [vmem:[#allocation2 + $0xb70] sm:$0xff] }
0x49cc   :  { %19848 = vmatprep.subr.bf16.mxu1 %v20505_v57  ;;  %v19867_v45 = vpack.c.bf16 %v13571_v62, %v13570_v7  ;;  %v14048_v7 = vld [vmem:[#allocation2 + $0xc08] sm:$0xff]  ;;  %v14049_v62 = vld [vmem:[#allocation2 + $0xc10] sm:$0xff] }
0x49ce   :  { %18869 = vmatmul.mubr.msk.f32.vlgmr.msra.gmra.mrb[228].mxu1 %vm171_vm0, %v22642_v4 }
0x49cf   :  { %19850 = vmatpush3.bf16.msra.mxu1 %v19849_v59  ;;  %18890 = vmatprep.mubr.msk.f32.mxu1 %vm20506_vm7, %v20507_v31  ;;  %v13491_v59 = vld [vmem:[#allocation2 + $0xb60] sm:$0xff] }
0x49d0   :  { %19851 = vmatprep.subr.bf16.mxu1 %v20505_v57  ;;  %v19864_v18 = vpack.c.bf16 %v13491_v59, %v13490_v20  ;;  %v19891_v59 = vpack.c.bf16 %v14049_v62, %v14048_v7  ;;  %v14437_v62 = vld [vmem:[#allocation2 + $0xc58] sm:$0xff] }
0x49d3   :  { %19853 = vmatpush3.bf16.msra.mxu1 %v19852_v6 }
0x49d4   :  { %18903 = vmatprep.subr.mxu1 %v20507_v31 }
0x49d6   :  { %18891 = vmatmul.mubr.msk.f32.vlgmr.msra.gmra.mrb[230].mxu1 %vm171_vm0, %v22642_v4 }
0x49d7   :  { %18905 = vmatprep.mubr.msk.f32.mxu1 %vm20506_vm7, %v20507_v31  ;;  %18904 = vmatpush3.msra.mxu1 %v13296_v3 }
0x49d8   :  { %19860 = vmatprep.subr.bf16.mxu1 %v20505_v57 }
0x4a99   :  { %v12819_v25 = vpop.f32.mrb[226].mxu1 }
0x4a9a   :  { %v18854_v17 = vpop.f32.mrb[227].mxu1  ;;  %18858 = vmatmul.mubr.msk.f32.vlgmr.msra.gmra.mrb[216].mxu0 %vm7698_vm2, %v12819_v25 }
0x4a9b   :  { %19844 = vmatpush3.bf16.msra.mxu0 %v19843_v5  ;;  %18879 = vmatprep.mubr.msk.f32.mxu0 %vm20506_vm7, %v20507_v31 }
0x4a9c   :  { %19845 = vmatprep.subr.bf16.mxu0 %v20505_v57 }
0x4a9f   :  { %19847 = vmatpush3.bf16.msra.mxu0 %v19846_v37 }
0x4aa0   :  { %18893 = vmatprep.subr.mxu0 %v20507_v31 }
0x4aa1   :  { %v12973_v32 = vpop.f32.mrb[228].mxu1 }
0x4aa2   :  { %v18870_v63 = vpop.f32.mrb[229].mxu1  ;;  %18880 = vmatmul.mubr.msk.f32.vlgmr.msra.gmra.mrb[218].mxu0 %vm171_vm0, %v22642_v4  ;;  %v12974_v13 = vadd.f32 %v16392_v9, %v12973_v32 }
0x4aa3   :  { %18895 = vmatprep.mubr.msk.f32.mxu0 %vm20506_vm7, %v20507_v31 }
0x4aa4   :  { %v13135_v26 = vmul.f32 0.35355338, %v12974_v13 }
0x4aa9   :  { %v13131_v47 = vpop.f32.mrb[230].mxu1 }
0x4aaa   :  { %v18892_v14 = vpop.f32.mrb[231].mxu1  ;;  %v13132_v16 = vadd.f32 %v16396_v58, %v13131_v47 }
0x4b6d   :  { %v12893_v51 = vpop.f32.mrb[216].mxu0 }
0x4b6e   :  { %v12897_v30 = vadd.f32 %v12893_v51, %v22726_v54  ;;  %v18859_v56 = vpop.f32.mrb[217].mxu0 }
0x4b75   :  { %v13052_v27 = vpop.f32.mrb[218].mxu0 }
0x4b76   :  { %v13053_v44 = vadd.f32 %v16394_v60, %v13052_v27  ;;  %v18881_v43 = vpop.f32.mrb[219].mxu0 }
0x4b78   :  { %18894 = vmatpush3.xpose.msk.msra.mxu0 %vm7698_vm2, %v13053_v44 }
0x4b79   :  { %18898 = vmatprep.subr.mxu0 %v20507_v31 }
0x4b7b   :  { %18896 = vmatmul.mubr.msk.f32.vlgmr.msra.gmra.mrb[220].mxu0 %vm7698_vm2, %v13135_v26 }
0x4b7c   :  { %18899 = vmatpush3.msra.mxu0 %v13132_v16  ;;  %18900 = vmatprep.mubr.msk.f32.mxu0 %vm20506_vm7, %v20507_v31 }
0x4b7d   :  { %19854 = vmatprep.subr.bf16.mxu0 %v20505_v57 }
0x4c4e   :  { %v13208_v29 = vpop.f32.mrb[220].mxu0 }
0x4c4f   :  { %v18897_v52 = vpop.f32.mrb[221].mxu0  ;;  %v13212_v54 = vsel %vm7698_vm2, %v13208_v29, -inf }
0x4c50   :  { %13213 = vmax.xlane.f32.xlu0 %v13212_v54  ;;  %v13649_v54 = vld [vmem:[#allocation2 + $0xb88] sm:$0xff] }
0x4cdd   :  { %v13214_v21 = vpop.xlane.xlu0 %13213 }
0x4cde   :  { %v13215_v8 = vsub.f32 %v13208_v29, %v13214_v21  ;;  %v13650_v21 = vld [vmem:[#allocation2 + $0xb90] sm:$0xff] }
0x4ce0   :  { %v13216_v46 = vmul.f32 1.442695, %v13215_v8 }
0x4ce2   :  { %20422 = vpow2.f32 %v13216_v46 }
0x4cec   :  { %v20423_v41 = vpop.eup %20422 }
0x4ced   :  { %v13218_v15 = vsel %vm7698_vm2, %v20423_v41, 0.0 }
0x4cee   :  { %13219 = vadd.xlane.f32.xlu1 %v13218_v15  ;;  %v19873_v15 = vpack.c.bf16 %v13650_v21, %v13649_v54 }
0x4d7b   :  { %v13220_v2 = vpop.xlane.xlu1 %13219 }
0x4d7c   :  { %20424 = vrcp.f32 %v13220_v2  ;;  %v13651_v2 = vld [vmem:[#allocation2 + $0xb98] sm:$0xff] }
0x4d86   :  { %v20425_v10 = vpop.eup %20424 }
0x4d87   :  { %v13222_v53 = vmul.f32 %v20425_v10, %v20423_v41  ;;  %v13652_v10 = vld [vmem:[#allocation2 + $0xba0] sm:$0xff] }
0x4d89   :  { %18901 = vmatmul.mubr.msk.f32.vlgmr.msra.gmra.mrb[222].mxu0 %vm7698_vm2, %v13222_v53  ;;  %v19876_v53 = vpack.c.bf16 %v13652_v10, %v13651_v2 }
0x4d8a   :  { %18916 = vmatprep.mubr.msk.f32.mxu0 %vm20506_vm7, %v20507_v31  ;;  %19856 = vmatpush3.bf16.msra.mxu0 %v19855_v48  ;;  %v13890_v48 = vld [vmem:[#allocation2 + $0xbc8] sm:$0xff] }
0x4d8b   :  { %19857 = vmatprep.subr.bf16.mxu0 %v20505_v57 }
0x4d8e   :  { %19859 = vmatpush3.bf16.msra.mxu0 %v19858_v39 }
0x4d8f   :  { %19866 = vmatprep.subr.bf16.mxu0 %v20505_v57 }
0x4e5c   :  { %v13292_v42 = vpop.f32.mrb[222].mxu0 }
0x4e5d   :  { %v18902_v19 = vpop.f32.mrb[223].mxu0  ;;  %18906 = vmatmul.mubr.msk.f32.vlgmr.msra.gmra.mrb[232].mxu1 %vm7698_vm2, %v13292_v42  ;;  %v16405_v42 = vld [vmem:[#allocation2 + $0xba8] ss:$0 sm:$0xff] }
0x4e5e   :  { %18927 = vmatprep.mubr.msk.f32.mxu1 %vm20506_vm7, %v20507_v31  ;;  %19862 = vmatpush3.bf16.msra.mxu1 %v19861_v28  ;;  %v16407_v19 = vld [vmem:[#allocation2 + $0xbb0] ss:$0 sm:$0xff] }
0x4e5f   :  { %19863 = vmatprep.subr.bf16.mxu1 %v20505_v57 }
0x4e62   :  { %19865 = vmatpush3.bf16.msra.mxu1 %v19864_v18  ;;  %v14050_v18 = vld [vmem:[#allocation2 + $0xc18] sm:$0xff] }
0x4e63   :  { %19872 = vmatprep.subr.bf16.mxu1 %v20505_v57 }
0x4f30   :  { %v13366_v40 = vpop.f32.mrb[232].mxu1 }
0x4f31   :  { %v13370_v61 = vadd.f32 %v13366_v40, %v12897_v30  ;;  %v18907_v34 = vpop.f32.mrb[233].mxu1 }
0x4f33   :  { %v13371_v38 = vadd.f32 %v13370_v61, %v22642_v4  ;;  %v13572_v4 = vld [vmem:[#allocation2 + $0xb78] sm:$0xff] }
0x4f34   :  { %v19870_v6 = vpack.c.bf16 %v13573_v23, %v13572_v4  ;;  %v14051_v4 = vld [vmem:[#allocation2 + $0xc20] sm:$0xff] }
0x4f35   :  { %v13377_v12 = vadd.f32 %v16402_v1, %v13371_v38  ;;  %v19879_v1 = vpack.c.bf16 %v13891_v55, %v13890_v48  ;;  %v13892_v38 = vld [vmem:[#allocation2 + $0xbd8] sm:$0xff]  ;;  %v19894_v23 = vpack.c.bf16 %v14051_v4, %v14050_v18  ;;  %v14288_v48 = vld [vmem:[#allocation2 + $0xc40] sm:$0xff]  ;;  %v14593_v4 = vld [vmem:[#allocation2 + $0xc88] sm:$0xff] }
0x4f37   :  { %18917 = vmatmul.mubr.msk.f32.vlgmr.msra.gmra.mrb[224].mxu0 %vm171_vm0, %v13377_v12 }
0x4f38   :  { %18938 = vmatprep.mubr.msk.f32.mxu0 %vm20506_vm7, %v20507_v31  ;;  %19868 = vmatpush3.bf16.msra.mxu0 %v19867_v45 }
0x4f39   :  { %19869 = vmatprep.subr.bf16.mxu0 %v20505_v57 }
0x4f3c   :  { %19871 = vmatpush3.bf16.msra.mxu0 %v19870_v6 }
0x4f3d   :  { %18952 = vmatprep.subr.mxu0 %v20507_v31 }
0x500a   :  { %v13451_v33 = vpop.f32.mrb[224].mxu0 }
0x500b   :  { %v13455_v5 = vadd.f32 %v13451_v33, %v13377_v12  ;;  %v18918_v35 = vpop.f32.mrb[225].mxu0  ;;  %v13893_v12 = vld [vmem:[#allocation2 + $0xbe0] sm:$0xff] }
0x500c   :  { %v19882_v50 = vpack.c.bf16 %v13893_v12, %v13892_v38  ;;  %v14516_v38 = vld [vmem:[#allocation2 + $0xc78] sm:$0xff]  ;;  %v14517_v12 = vld [vmem:[#allocation2 + $0xc80] sm:$0xff] }
0x500d   :  { %v13461_v0 = vadd.f32 %v16404_v36, %v13455_v5 }
0x500f   :  { %v13463_v25 = vmul.f32 0.70710677, %v13461_v0  ;;  %v13462_v46 = vmul.f32 0.5, %v13461_v0 }
0x5011   :  { %v13464_v17 = vand.u32 2147483647, %v13463_v25  ;;  %vm13483_vm5 = vcmp.ge.f32.partialorder %v13463_v25, 0.0 }
0x5013   :  { %v13465_v37 = vmul.f32 0.3275911, %v13464_v17  ;;  %v13477_v63 = vsub.f32 0.0, %v13464_v17 }
0x5015   :  { %v13466_v32 = vadd.f32 1.0, %v13465_v37  ;;  %v13478_v14 = vmul.f32 %v13477_v63, %v13464_v17 }
0x5017   :  { %20426 = vrcp.f32 %v13466_v32  ;;  %v13479_v56 = vmul.f32 1.442695, %v13478_v14 }
0x5019   :  { %20428 = vpow2.f32 %v13479_v56 }
0x5021   :  { %v20427_v47 = vpop.eup %20426 }
0x5022   :  { %v13468_v51 = vmul.f32 1.0614054, %v20427_v47 }
0x5023   :  { %v20429_v26 = vpop.eup %20428 }
0x5024   :  { %v13469_v30 = vadd.f32 -1.4531521, %v13468_v51  ;;  %v13969_v51 = vld [vmem:[#allocation2 + $0xbe8] sm:$0xff] }
0x5026   :  { %v13470_v9 = vmul.f32 %v20427_v47, %v13469_v30  ;;  %v13970_v30 = vld [vmem:[#allocation2 + $0xbf0] sm:$0xff] }
0x5028   :  { %v13471_v60 = vadd.f32 1.4214138, %v13470_v9  ;;  %v19885_v9 = vpack.c.bf16 %v13970_v30, %v13969_v51  ;;  %v16425_v51 = vld [vmem:[#allocation2 + $0xca8] ss:$0 sm:$0xff] }
0x502a   :  { %v13472_v13 = vmul.f32 %v20427_v47, %v13471_v60 }
0x502c   :  { %v13473_v27 = vadd.f32 -0.28449672, %v13472_v13  ;;  %v13971_v13 = vld [vmem:[#allocation2 + $0xbf8] sm:$0xff] }
0x502e   :  { %v13474_v44 = vmul.f32 %v20427_v47, %v13473_v27  ;;  %v13972_v27 = vld [vmem:[#allocation2 + $0xc00] sm:$0xff] }
0x5030   :  { %v13475_v43 = vadd.f32 0.2548296, %v13474_v44  ;;  %v19888_v44 = vpack.c.bf16 %v13972_v27, %v13971_v13  ;;  %v16429_v13 = vld [vmem:[#allocation2 + $0xcb8] ss:$0 sm:$0xff] }
0x5032   :  { %v13476_v58 = vmul.f32 %v20427_v47, %v13475_v43 }
0x5034   :  { %v13481_v16 = vmul.f32 %v20429_v26, %v13476_v58  ;;  %v16414_v26 = vld [vmem:[#allocation2 + $0xc28] ss:$0 sm:$0xff] }
0x5036   :  { %v13482_v29 = vsub.f32 1.0, %v13481_v16  ;;  %v16416_v16 = vld [vmem:[#allocation2 + $0xc30] ss:$0 sm:$0xff] }
0x5038   :  { %v13484_v52 = vsub.f32 0.0, %v13482_v29 }
0x503a   :  { %v13485_v8 = vsel %vm13483_vm5, %v13482_v29, %v13484_v52 }
0x503b   :  { %v13486_v41 = vadd.f32 1.0, %v13485_v8  ;;  %v16418_v8 = vld [vmem:[#allocation2 + $0xc38] ss:$0 sm:$0xff] }
0x503d   :  { %v22785_v3 = vmul.f32 %v13486_v41, %v13462_v46 }
0x503f   :  { %18928 = vmatmul.mubr.msk.f32.vlgmr.msra.gmra.mrb[234].mxu1 %vm171_vm0, %v22785_v3  ;;  %18939 = vmatmul.mubr.msk.f32.vlgmr.msra.gmra.mrb[226].mxu0 %vm171_vm0, %v22785_v3 }
0x5040   :  { %19874 = vmatpush3.bf16.msra.mxu1 %v19873_v15  ;;  %18949 = vmatprep.mubr.msk.f32.mxu1 %vm20506_vm7, %v20507_v31 }
0x5041   :  { %19875 = vmatprep.subr.bf16.mxu1 %v20505_v57  ;;  %18954 = vmatprep.mubr.msk.f32.mxu0 %vm20506_vm7, %v20507_v31 }
0x5044   :  { %19877 = vmatpush3.bf16.msra.mxu1 %v19876_v53 }
0x5045   :  { %18957 = vmatprep.subr.mxu1 %v20507_v31 }
0x5047   :  { %18950 = vmatmul.mubr.msk.f32.vlgmr.msra.gmra.mrb[236].mxu1 %vm171_vm0, %v22785_v3 }
0x5048   :  { %18959 = vmatprep.mubr.msk.f32.mxu1 %vm20506_vm7, %v20507_v31 }
0x5112   :  { %v13566_v24 = vpop.f32.mrb[234].mxu1  ;;  %v13645_v22 = vpop.f32.mrb[226].mxu0 }
0x5113   :  { %v13567_v49 = vadd.f32 %v16405_v42, %v13566_v24  ;;  %v13646_v39 = vadd.f32 %v16407_v19, %v13645_v22  ;;  %v18929_v40 = vpop.f32.mrb[235].mxu1  ;;  %v18940_v61 = vpop.f32.mrb[227].mxu0 }
0x5114   :  { %v13889_v40 = vld [vmem:[#allocation2 + $0xbc0] sm:$0xff]  ;;  %v14514_v61 = vld [vmem:[#allocation2 + $0xc68] sm:$0xff] }
0x5115   :  { %v13728_v34 = vmul.f32 0.35355338, %v13567_v49  ;;  %18953 = vmatpush3.xpose.msk.msra.mxu0 %vm7698_vm2, %v13646_v39 }
0x5116   :  { %19878 = vmatprep.subr.bf16.mxu0 %v20505_v57 }
0x5118   :  { %18955 = vmatmul.mubr.msk.f32.vlgmr.msra.gmra.mrb[228].mxu0 %vm7698_vm2, %v13728_v34  ;;  %v14515_v34 = vld [vmem:[#allocation2 + $0xc70] sm:$0xff] }
0x5119   :  { %19880 = vmatpush3.bf16.msra.mxu0 %v19879_v1  ;;  %18970 = vmatprep.mubr.msk.f32.mxu0 %vm20506_vm7, %v20507_v31  ;;  %v19903_v1 = vpack.c.bf16 %v14515_v34, %v14514_v61  ;;  %v14987_v34 = vld [vmem:[#allocation2 + $0xce8] sm:$0xff] }
0x511a   :  { %v13724_v28 = vpop.f32.mrb[236].mxu1  ;;  %19881 = vmatprep.subr.bf16.mxu0 %v20505_v57 }
0x511b   :  { %v13725_v45 = vadd.f32 %v16409_v11, %v13724_v28  ;;  %v18951_v20 = vpop.f32.mrb[237].mxu1  ;;  %v19906_v11 = vpack.c.bf16 %v14517_v12, %v14516_v38  ;;  %v14436_v28 = vld [vmem:[#allocation2 + $0xc50] sm:$0xff]  ;;  %v14989_v12 = vld [vmem:[#allocation2 + $0xcf8] sm:$0xff] }
0x511d   :  { %18958 = vmatpush3.msra.mxu1 %v13725_v45  ;;  %19883 = vmatpush3.bf16.msra.mxu0 %v19882_v50  ;;  %v14435_v50 = vld [vmem:[#allocation2 + $0xc48] sm:$0xff]  ;;  %v14438_v45 = vld [vmem:[#allocation2 + $0xc60] sm:$0xff] }
0x511e   :  { %19890 = vmatprep.subr.bf16.mxu0 %v20505_v57  ;;  %19884 = vmatprep.subr.bf16.mxu1 %v20505_v57  ;;  %v19897_v7 = vpack.c.bf16 %v14436_v28, %v14435_v50  ;;  %v19900_v18 = vpack.c.bf16 %v14438_v45, %v14437_v62 }
0x5120   :  { %18971 = vmatmul.mubr.msk.f32.vlgmr.msra.gmra.mrb[230].mxu0 %vm171_vm0, %v22785_v3 }
0x5121   :  { %19892 = vmatpush3.bf16.msra.mxu0 %v19891_v59  ;;  %18992 = vmatprep.mubr.msk.f32.mxu0 %vm20506_vm7, %v20507_v31 }
0x5122   :  { %19893 = vmatprep.subr.bf16.mxu0 %v20505_v57 }
0x5125   :  { %19895 = vmatpush3.bf16.msra.mxu0 %v19894_v23  ;;  %v14594_v23 = vld [vmem:[#allocation2 + $0xc90] sm:$0xff] }
0x5126   :  { %19005 = vmatprep.subr.mxu0 %v20507_v31 }
0x5128   :  { %18993 = vmatmul.mubr.msk.f32.vlgmr.msra.gmra.mrb[232].mxu0 %vm171_vm0, %v22785_v3 }
0x5129   :  { %19007 = vmatprep.mubr.msk.f32.mxu0 %vm20506_vm7, %v20507_v31  ;;  %19006 = vmatpush3.msra.mxu0 %v14288_v48  ;;  %v15066_v48 = vld [vmem:[#allocation2 + $0xd08] sm:$0xff] }
0x512a   :  { %19896 = vmatprep.subr.bf16.mxu0 %v20505_v57 }
0x51eb   :  { %v13801_v6 = vpop.f32.mrb[228].mxu0 }
0x51ec   :  { %v18956_v33 = vpop.f32.mrb[229].mxu0  ;;  %v13805_v36 = vsel %vm7698_vm2, %v13801_v6, -inf }
0x51ed   :  { %13806 = vmax.xlane.f32.xlu0 %v13805_v36  ;;  %v19909_v36 = vpack.c.bf16 %v14594_v23, %v14593_v4 }
0x51f3   :  { %v13965_v5 = vpop.f32.mrb[230].mxu0 }
0x51f4   :  { %v18972_v35 = vpop.f32.mrb[231].mxu0  ;;  %v13966_v29 = vadd.f32 %v16414_v26, %v13965_v5  ;;  %v14595_v5 = vld [vmem:[#allocation2 + $0xc98] sm:$0xff] }
0x51f5   :  { %v14596_v35 = vld [vmem:[#allocation2 + $0xca0] sm:$0xff] }
0x51f6   :  { %v14127_v46 = vmul.f32 0.35355338, %v13966_v29 }
0x51fb   :  { %v14123_v0 = vpop.f32.mrb[232].mxu0 }
0x51fc   :  { %v18994_v25 = vpop.f32.mrb[233].mxu0  ;;  %v14124_v41 = vadd.f32 %v16418_v8, %v14123_v0  ;;  %v16427_v0 = vld [vmem:[#allocation2 + $0xcb0] ss:$0 sm:$0xff] }
0x51fd   :  { %v19912_v25 = vpack.c.bf16 %v14596_v35, %v14595_v5 }
0x527a   :  { %v13807_v17 = vpop.xlane.xlu0 %13806 }
0x527b   :  { %v13808_v37 = vsub.f32 %v13801_v6, %v13807_v17 }
0x527d   :  { %v13809_v32 = vmul.f32 1.442695, %v13808_v37 }
0x527f   :  { %20430 = vpow2.f32 %v13809_v32 }
0x5289   :  { %v20431_v63 = vpop.eup %20430 }
0x528a   :  { %v13811_v47 = vsel %vm7698_vm2, %v20431_v63, 0.0 }
0x528b   :  { %13812 = vadd.xlane.f32.xlu1 %v13811_v47 }
0x5318   :  { %v13813_v14 = vpop.xlane.xlu1 %13812 }
0x5319   :  { %20432 = vrcp.f32 %v13813_v14 }
0x5323   :  { %v20433_v56 = vpop.eup %20432 }
0x5324   :  { %v13815_v60 = vmul.f32 %v20433_v56, %v20431_v63 }
0x5326   :  { %18960 = vmatmul.mubr.msk.f32.vlgmr.msra.gmra.mrb[238].mxu1 %vm7698_vm2, %v13815_v60 }
0x5327   :  { %19886 = vmatpush3.bf16.msra.mxu1 %v19885_v9  ;;  %18981 = vmatprep.mubr.msk.f32.mxu1 %vm20506_vm7, %v20507_v31 }
0x5328   :  { %19887 = vmatprep.subr.bf16.mxu1 %v20505_v57 }
0x532b   :  { %19889 = vmatpush3.bf16.msra.mxu1 %v19888_v44 }
0x532c   :  { %18995 = vmatprep.subr.mxu1 %v20507_v31 }
0x532e   :  { %18982 = vmatmul.mubr.msk.f32.vlgmr.msra.gmra.mrb[240].mxu1 %vm171_vm0, %v22785_v3 }
0x532f   :  { %18997 = vmatprep.mubr.msk.f32.mxu1 %vm20506_vm7, %v20507_v31 }
0x53f9   :  { %v13885_v43 = vpop.f32.mrb[238].mxu1 }
0x53fa   :  { %v18961_v58 = vpop.f32.mrb[239].mxu1 }
0x5401   :  { %v14044_v52 = vpop.f32.mrb[240].mxu1 }
0x5402   :  { %v14045_v54 = vadd.f32 %v16416_v16, %v14044_v52  ;;  %v18983_v21 = vpop.f32.mrb[241].mxu1 }
0x5404   :  { %18996 = vmatpush3.xpose.msk.msra.mxu1 %vm7698_vm2, %v14045_v54 }
0x5405   :  { %19000 = vmatprep.subr.mxu1 %v20507_v31 }
0x5407   :  { %18998 = vmatmul.mubr.msk.f32.vlgmr.msra.gmra.mrb[242].mxu1 %vm7698_vm2, %v14127_v46  ;;  %v14833_v46 = vld [vmem:[#allocation2 + $0xcc0] sm:$0xff] }
0x5408   :  { %19001 = vmatpush3.msra.mxu1 %v14124_v41  ;;  %19002 = vmatprep.mubr.msk.f32.mxu1 %vm20506_vm7, %v20507_v31 }
0x5409   :  { %19010 = vmatprep.subr.mxu1 %v20507_v31 }
0x54da   :  { %v14200_v15 = vpop.f32.mrb[242].mxu1 }
0x54db   :  { %v18999_v2 = vpop.f32.mrb[243].mxu1  ;;  %v14204_v10 = vsel %vm7698_vm2, %v14200_v15, -inf }
0x54dc   :  { %14205 = vmax.xlane.f32.xlu0 %v14204_v10  ;;  %v14909_v2 = vld [vmem:[#allocation2 + $0xcd0] sm:$0xff] }
0x5569   :  { %v14206_v53 = vpop.xlane.xlu0 %14205 }
0x556a   :  { %v14207_v42 = vsub.f32 %v14200_v15, %v14206_v53  ;;  %v14908_v15 = vld [vmem:[#allocation2 + $0xcc8] sm:$0xff] }
0x556b   :  { %v19915_v53 = vpack.c.bf16 %v14909_v2, %v14908_v15  ;;  %v16445_v15 = vld [vmem:[#allocation2 + $0xd48] ss:$0 sm:$0xff] }
0x556c   :  { %v14208_v19 = vmul.f32 1.442695, %v14207_v42 }
0x556e   :  { %20434 = vpow2.f32 %v14208_v19  ;;  %v14910_v19 = vld [vmem:[#allocation2 + $0xcd8] sm:$0xff] }
0x5578   :  { %v20435_v24 = vpop.eup %20434 }
0x5579   :  { %v14210_v22 = vsel %vm7698_vm2, %v20435_v24, 0.0 }
0x557a   :  { %14211 = vadd.xlane.f32.xlu1 %v14210_v22 }
0x5607   :  { %v14212_v55 = vpop.xlane.xlu1 %14211 }
0x5608   :  { %20436 = vrcp.f32 %v14212_v55  ;;  %v15067_v55 = vld [vmem:[#allocation2 + $0xd10] sm:$0xff] }
0x5612   :  { %v20437_v49 = vpop.eup %20436 }
0x5613   :  { %v14214_v39 = vmul.f32 %v20437_v49, %v20435_v24  ;;  %v14911_v24 = vld [vmem:[#allocation2 + $0xce0] sm:$0xff]  ;;  %v19927_v49 = vpack.c.bf16 %v15067_v55, %v15066_v48 }
0x5614   :  { %v19918_v22 = vpack.c.bf16 %v14911_v24, %v14910_v19  ;;  %v15500_v24 = vld [vmem:[#allocation2 + $0xd88] sm:$0xff] }
0x5615   :  { %19003 = vmatmul.mubr.msk.f32.vlgmr.msra.gmra.mrb[244].mxu1 %vm7698_vm2, %v14214_v39  ;;  %v15068_v39 = vld [vmem:[#allocation2 + $0xd18] sm:$0xff] }
0x5616   :  { %19011 = vmatpush3.msra.mxu1 %v13889_v40  ;;  %19012 = vmatprep.mubr.msk.f32.mxu1 %vm20506_vm7, %v20507_v31  ;;  %v15069_v40 = vld [vmem:[#allocation2 + $0xd20] sm:$0xff] }
0x5617   :  { %19902 = vmatprep.subr.bf16.mxu1 %v20505_v57  ;;  %v19930_v61 = vpack.c.bf16 %v15069_v40, %v15068_v39 }
0x5619   :  { %19013 = vmatmul.mubr.msk.f32.vlgmr.msra.gmra.mrb[246].mxu1 %vm7698_vm2, %v13885_v43 }
0x561a   :  { %19904 = vmatpush3.bf16.msra.mxu1 %v19903_v1  ;;  %19034 = vmatprep.mubr.msk.f32.mxu1 %vm20506_vm7, %v20507_v31  ;;  %v14988_v1 = vld [vmem:[#allocation2 + $0xcf0] sm:$0xff] }
0x561b   :  { %19905 = vmatprep.subr.bf16.mxu1 %v20505_v57  ;;  %v19921_v38 = vpack.c.bf16 %v14988_v1, %v14987_v34 }
0x561e   :  { %19907 = vmatpush3.bf16.msra.mxu1 %v19906_v11  ;;  %v14990_v11 = vld [vmem:[#allocation2 + $0xd00] sm:$0xff] }
0x561f   :  { %19048 = vmatprep.subr.mxu1 %v20507_v31 }
0x5621   :  { %19035 = vmatmul.mubr.msk.f32.vlgmr.msra.gmra.mrb[248].mxu1 %vm171_vm0, %v22785_v3 }
0x5622   :  { %19050 = vmatprep.mubr.msk.f32.mxu1 %vm20506_vm7, %v20507_v31 }
0x56e8   :  { %v14284_v20 = vpop.f32.mrb[244].mxu1 }
0x56e9   :  { %v19004_v59 = vpop.f32.mrb[245].mxu1  ;;  %19008 = vmatmul.mubr.msk.f32.vlgmr.msra.gmra.mrb[234].mxu0 %vm7698_vm2, %v14284_v20 }
0x56ea   :  { %19898 = vmatpush3.bf16.msra.mxu0 %v19897_v7  ;;  %19023 = vmatprep.mubr.msk.f32.mxu0 %vm20506_vm7, %v20507_v31  ;;  %v19924_v7 = vpack.c.bf16 %v14990_v11, %v14989_v12 }
0x56eb   :  { %19899 = vmatprep.subr.bf16.mxu0 %v20505_v57 }
0x56ec   :  { %v14431_v6 = vpop.f32.mrb[246].mxu1 }
0x56ed   :  { %v19014_v33 = vpop.f32.mrb[247].mxu1 }
0x56ee   :  { %19901 = vmatpush3.bf16.msra.mxu0 %v19900_v18  ;;  %v16437_v33 = vld [vmem:[#allocation2 + $0xd30] ss:$0 sm:$0xff] }
0x56ef   :  { %19908 = vmatprep.subr.bf16.mxu0 %v20505_v57 }
0x56f1   :  { %19024 = vmatmul.mubr.msk.f32.vlgmr.msra.gmra.mrb[236].mxu0 %vm171_vm0, %v22785_v3 }
0x56f2   :  { %19910 = vmatpush3.bf16.msra.mxu0 %v19909_v36  ;;  %19045 = vmatprep.mubr.msk.f32.mxu0 %vm20506_vm7, %v20507_v31 }
0x56f3   :  { %19911 = vmatprep.subr.bf16.mxu0 %v20505_v57 }
0x56f4   :  { %v14589_v17 = vpop.f32.mrb[248].mxu1 }
0x56f5   :  { %v14590_v37 = vadd.f32 %v16427_v0, %v14589_v17  ;;  %v19036_v32 = vpop.f32.mrb[249].mxu1 }
0x56f6   :  { %19913 = vmatpush3.bf16.msra.mxu0 %v19912_v25  ;;  %v16439_v25 = vld [vmem:[#allocation2 + $0xd38] ss:$0 sm:$0xff] }
0x56f7   :  { %19049 = vmatpush3.xpose.msk.msra.mxu1 %vm7698_vm2, %v14590_v37  ;;  %19058 = vmatprep.subr.mxu0 %v20507_v31 }
0x56f8   :  { %19053 = vmatprep.subr.mxu1 %v20507_v31 }
0x56f9   :  { %19046 = vmatmul.mubr.msk.f32.vlgmr.msra.gmra.mrb[238].mxu0 %vm171_vm0, %v22785_v3 }
0x56fa   :  { %19060 = vmatprep.mubr.msk.f32.mxu0 %vm20506_vm7, %v20507_v31  ;;  %19059 = vmatpush3.msra.mxu0 %v14833_v46 }
0x56fb   :  { %19920 = vmatprep.subr.bf16.mxu0 %v20505_v57 }
0x57bc   :  { %v14358_v63 = vpop.f32.mrb[234].mxu0 }
0x57bd   :  { %v22869_v47 = vadd.f32 %v14431_v6, %v14358_v63  ;;  %v19009_v14 = vpop.f32.mrb[235].mxu0  ;;  %v16435_v6 = vld [vmem:[#allocation2 + $0xd28] ss:$0 sm:$0xff] }
0x57c4   :  { %v14510_v30 = vpop.f32.mrb[236].mxu0 }
0x57c5   :  { %v14511_v56 = vadd.f32 %v16425_v51, %v14510_v30  ;;  %v19025_v9 = vpop.f32.mrb[237].mxu0 }
0x57c7   :  { %v14672_v60 = vmul.f32 0.35355338, %v14511_v56 }
0x57c9   :  { %19051 = vmatmul.mubr.msk.f32.vlgmr.msra.gmra.mrb[250].mxu1 %vm7698_vm2, %v14672_v60  ;;  %v15306_v60 = vld [vmem:[#allocation2 + $0xd40] sm:$0xff] }
0x57ca   :  { %19055 = vmatprep.mubr.msk.f32.mxu1 %vm20506_vm7, %v20507_v31 }
0x57cc   :  { %v14668_v27 = vpop.f32.mrb[238].mxu0 }
0x57cd   :  { %v14669_v44 = vadd.f32 %v16429_v13, %v14668_v27  ;;  %v19047_v43 = vpop.f32.mrb[239].mxu0 }
0x57cf   :  { %19054 = vmatpush3.msra.mxu1 %v14669_v44 }
0x57d0   :  { %19914 = vmatprep.subr.bf16.mxu1 %v20505_v57 }
0x589c   :  { %v14745_v58 = vpop.f32.mrb[250].mxu1 }
0x589d   :  { %v19052_v26 = vpop.f32.mrb[251].mxu1  ;;  %v14749_v16 = vsel %vm7698_vm2, %v14745_v58, -inf }
0x589e   :  { %14750 = vmax.xlane.f32.xlu0 %v14749_v16  ;;  %v15388_v26 = vld [vmem:[#allocation2 + $0xd50] sm:$0xff]  ;;  %v15389_v16 = vld [vmem:[#allocation2 + $0xd58] sm:$0xff] }
0x592b   :  { %v14751_v29 = vpop.xlane.xlu0 %14750 }
0x592c   :  { %v14752_v52 = vsub.f32 %v14745_v58, %v14751_v29  ;;  %v19933_v29 = vpack.c.bf16 %v15389_v16, %v15388_v26 }
0x592e   :  { %v14753_v54 = vmul.f32 1.442695, %v14752_v52  ;;  %v15390_v52 = vld [vmem:[#allocation2 + $0xd60] sm:$0xff] }
0x5930   :  { %20438 = vpow2.f32 %v14753_v54  ;;  %v15391_v54 = vld [vmem:[#allocation2 + $0xd68] sm:$0xff] }
0x593a   :  { %v20439_v21 = vpop.eup %20438 }
0x593b   :  { %v14755_v8 = vsel %vm7698_vm2, %v20439_v21, 0.0 }
0x593c   :  { %14756 = vadd.xlane.f32.xlu1 %v14755_v8 }
0x59c9   :  { %v14757_v41 = vpop.xlane.xlu1 %14756 }
0x59ca   :  { %20440 = vrcp.f32 %v14757_v41 }
0x59d4   :  { %v20441_v10 = vpop.eup %20440 }
0x59d5   :  { %v14759_v42 = vmul.f32 %v20441_v10, %v20439_v21  ;;  %v19936_v21 = vpack.c.bf16 %v15391_v54, %v15390_v52 }
0x59d7   :  { %19056 = vmatmul.mubr.msk.f32.vlgmr.msra.gmra.mrb[252].mxu1 %vm7698_vm2, %v14759_v42  ;;  %v15499_v42 = vld [vmem:[#allocation2 + $0xd80] sm:$0xff] }
0x59d8   :  { %19916 = vmatpush3.bf16.msra.mxu1 %v19915_v53  ;;  %19071 = vmatprep.mubr.msk.f32.mxu1 %vm20506_vm7, %v20507_v31  ;;  %v15498_v53 = vld [vmem:[#allocation2 + $0xd78] sm:$0xff] }
0x59d9   :  { %19917 = vmatprep.subr.bf16.mxu1 %v20505_v57  ;;  %v19939_v19 = vpack.c.bf16 %v15499_v42, %v15498_v53 }
0x59dc   :  { %19919 = vmatpush3.bf16.msra.mxu1 %v19918_v22  ;;  %v15501_v22 = vld [vmem:[#allocation2 + $0xd90] sm:$0xff] }
0x59dd   :  { %19926 = vmatprep.subr.bf16.mxu1 %v20505_v57  ;;  %v19942_v48 = vpack.c.bf16 %v15501_v22, %v15500_v24 }
0x59df   :  { %19072 = vmatmul.mubr.msk.f32.vlgmr.msra.gmra.mrb[254].mxu1 %vm171_vm0, %v22785_v3 }
0x59e0   :  { %19928 = vmatpush3.bf16.msra.mxu1 %v19927_v49  ;;  %19093 = vmatprep.mubr.msk.f32.mxu1 %vm20506_vm7, %v20507_v31 }
0x59e1   :  { %19929 = vmatprep.subr.bf16.mxu1 %v20505_v57 }
0x59e4   :  { %19931 = vmatpush3.bf16.msra.mxu1 %v19930_v61 }
0x59e5   :  { %19106 = vmatprep.subr.mxu1 %v20507_v31 }
0x59e7   :  { %19094 = vmatmul.mubr.msk.f32.vlgmr.msra.gmra.mrb[0].mxu1 %vm171_vm0, %v22785_v3 }
0x59e8   :  { %19108 = vmatprep.mubr.msk.f32.mxu1 %vm20506_vm7, %v20507_v31  ;;  %19107 = vmatpush3.msra.mxu1 %v15306_v60 }
0x59e9   :  { %19938 = vmatprep.subr.bf16.mxu1 %v20505_v57 }
0x5aaa   :  { %v14829_v50 = vpop.f32.mrb[252].mxu1 }
0x5aab   :  { %v19057_v28 = vpop.f32.mrb[253].mxu1  ;;  %19061 = vmatmul.mubr.msk.f32.vlgmr.msra.gmra.mrb[240].mxu0 %vm7698_vm2, %v14829_v50 }
0x5aac   :  { %19922 = vmatpush3.bf16.msra.mxu0 %v19921_v38  ;;  %19082 = vmatprep.mubr.msk.f32.mxu0 %vm20506_vm7, %v20507_v31 }
0x5aad   :  { %19923 = vmatprep.subr.bf16.mxu0 %v20505_v57 }
0x5ab0   :  { %19925 = vmatpush3.bf16.msra.mxu0 %v19924_v7 }
0x5ab1   :  { %19096 = vmatprep.subr.mxu0 %v20507_v31 }
0x5ab2   :  { %v14983_v62 = vpop.f32.mrb[254].mxu1 }
0x5ab3   :  { %v19073_v45 = vpop.f32.mrb[255].mxu1  ;;  %19083 = vmatmul.mubr.msk.f32.vlgmr.msra.gmra.mrb[242].mxu0 %vm171_vm0, %v22785_v3  ;;  %v14984_v36 = vadd.f32 %v16435_v6, %v14983_v62 }
0x5ab4   :  { %19098 = vmatprep.mubr.msk.f32.mxu0 %vm20506_vm7, %v20507_v31 }
0x5ab5   :  { %v15145_v17 = vmul.f32 0.35355338, %v14984_v36 }
0x5aba   :  { %v15141_v20 = vpop.f32.mrb[0].mxu1 }
0x5abb   :  { %v19095_v59 = vpop.f32.mrb[1].mxu1  ;;  %v15142_v37 = vadd.f32 %v16439_v25, %v15141_v20 }
0x5b7e   :  { %v14903_v18 = vpop.f32.mrb[240].mxu0 }
0x5b7f   :  { %v14907_v4 = vadd.f32 %v14903_v18, %v22869_v47  ;;  %v19062_v23 = vpop.f32.mrb[241].mxu0 }
0x5b86   :  { %v15062_v5 = vpop.f32.mrb[242].mxu0 }
0x5b87   :  { %v15063_v35 = vadd.f32 %v16437_v33, %v15062_v5  ;;  %v19084_v0 = vpop.f32.mrb[243].mxu0 }
0x5b89   :  { %19097 = vmatpush3.xpose.msk.msra.mxu0 %vm7698_vm2, %v15063_v35 }
0x5b8a   :  { %19101 = vmatprep.subr.mxu0 %v20507_v31 }
0x5b8c   :  { %19099 = vmatmul.mubr.msk.f32.vlgmr.msra.gmra.mrb[244].mxu0 %vm7698_vm2, %v15145_v17 }
0x5b8d   :  { %19102 = vmatpush3.msra.mxu0 %v15142_v37  ;;  %19103 = vmatprep.mubr.msk.f32.mxu0 %vm20506_vm7, %v20507_v31 }
0x5b8e   :  { %19932 = vmatprep.subr.bf16.mxu0 %v20505_v57 }
0x5c5f   :  { %v15218_v32 = vpop.f32.mrb[244].mxu0 }
0x5c60   :  { %v19100_v63 = vpop.f32.mrb[245].mxu0  ;;  %v15222_v47 = vsel %vm7698_vm2, %v15218_v32, -inf }
0x5c61   :  { %15223 = vmax.xlane.f32.xlu0 %v15222_v47  ;;  %v15582_v63 = vld [vmem:[#allocation2 + $0xda8] sm:$0x3f] }
0x5cee   :  { %v15224_v14 = vpop.xlane.xlu0 %15223 }
0x5cef   :  { %v15225_v51 = vsub.f32 %v15218_v32, %v15224_v14  ;;  %v15581_v32 = vld [vmem:[#allocation2 + $0xda0] sm:$0xff] }
0x5cf0   :  { %v19945_v47 = vpack.c.bf16 %v15582_v63, %v15581_v32 }
0x5cf1   :  { %v15226_v30 = vmul.f32 1.442695, %v15225_v51  ;;  %v16448_v51 = vld [vmem:[#allocation2 + $0xd98] ss:$0 sm:$0xff] }
0x5cf3   :  { %20442 = vpow2.f32 %v15226_v30 }
0x5cfd   :  { %v20443_v56 = vpop.eup %20442 }
0x5cfe   :  { %v15228_v9 = vsel %vm7698_vm2, %v20443_v56, 0.0 }
0x5cff   :  { %15229 = vadd.xlane.f32.xlu1 %v15228_v9 }
0x5d8c   :  { %v15230_v13 = vpop.xlane.xlu1 %15229 }
0x5d8d   :  { %20444 = vrcp.f32 %v15230_v13  ;;  %v15667_v13 = vld [vmem:[#allocation2 + $0xdb8] sm:$0xff] }
0x5d97   :  { %v20445_v27 = vpop.eup %20444 }
0x5d98   :  { %v15232_v44 = vmul.f32 %v20445_v27, %v20443_v56  ;;  %v15668_v27 = vld [vmem:[#allocation2 + $0xdc0] sm:$0x3f] }
0x5d9a   :  { %19104 = vmatmul.mubr.msk.f32.vlgmr.msra.gmra.mrb[246].mxu0 %vm7698_vm2, %v15232_v44  ;;  %v15755_v44 = vld [vmem:[#allocation2 + $0xdd0] sm:$0xff] }
0x5d9b   :  { %19119 = vmatprep.mubr.msk.f32.mxu0 %vm20506_vm7, %v20507_v31  ;;  %19934 = vmatpush3.bf16.msra.mxu0 %v19933_v29 }
0x5d9c   :  { %19935 = vmatprep.subr.bf16.mxu0 %v20505_v57 }
0x5d9f   :  { %19937 = vmatpush3.bf16.msra.mxu0 %v19936_v21 }
0x5da0   :  { %19944 = vmatprep.subr.bf16.mxu0 %v20505_v57 }
0x5e6d   :  { %v15302_v43 = vpop.f32.mrb[246].mxu0 }
0x5e6e   :  { %v19105_v58 = vpop.f32.mrb[247].mxu0  ;;  %19109 = vmatmul.mubr.msk.f32.vlgmr.msra.gmra.mrb[2].mxu1 %vm7698_vm2, %v15302_v43  ;;  %v19949_v43 = vpack.c.bf16 %v15668_v27, %v15667_v13 }
0x5e6f   :  { %19130 = vmatprep.mubr.msk.f32.mxu1 %vm20506_vm7, %v20507_v31  ;;  %19940 = vmatpush3.bf16.msra.mxu1 %v19939_v19  ;;  %v15756_v58 = vld [vmem:[#allocation2 + $0xdd8] sm:$0x3f] }
0x5e70   :  { %19941 = vmatprep.subr.bf16.mxu1 %v20505_v57  ;;  %v19953_v26 = vpack.c.bf16 %v15756_v58, %v15755_v44 }
0x5e73   :  { %19943 = vmatpush3.bf16.msra.mxu1 %v19942_v48 }
0x5e74   :  { %19948 = vmatprep.subr.bf16.mxu1 %v20505_v57 }
0x5f41   :  { %v15376_v8 = vpop.f32.mrb[2].mxu1 }
0x5f42   :  { %v15380_v46 = vadd.f32 %v15376_v8, %v14907_v4  ;;  %v19110_v41 = vpop.f32.mrb[3].mxu1 }
0x5f44   :  { %v15381_v2 = vadd.f32 %v15380_v46, %v22785_v3  ;;  %v16447_v3 = vld [vmem:[#allocation2 + $0xd70] ss:$0 sm:$0xff] }
0x5f46   :  { %v15387_v10 = vadd.f32 %v16445_v15, %v15381_v2 }
0x5f48   :  { %19120 = vmatmul.mubr.msk.f32.vlgmr.msra.gmra.mrb[248].mxu0 %vm171_vm0, %v15387_v10 }
0x5f49   :  { %19137 = vmatprep.mubr.msk.f32.mxu0 %vm20506_vm7, %v20507_v31  ;;  %19947 = vmatpush3.bf16.msk.msra.mxu0 %vm22929_vm13, %v19945_v47 }
0x5f4a   :  { %19952 = vmatprep.subr.bf16.mxu0 %v20505_v57  ;;  %v16450_v57 = vld [vmem:[#allocation2 + $0xdb0] ss:$0 sm:$0xff] }
0x601b   :  { %v15461_v55 = vpop.f32.mrb[248].mxu0 }
0x601c   :  { %v15465_v49 = vadd.f32 %v15461_v55, %v15387_v10  ;;  %v19121_v39 = vpop.f32.mrb[249].mxu0  ;;  %v16453_v10 = vld [vmem:[#allocation2 + $0xdc8] ss:$0 sm:$0xff]  ;;  %v15840_v55 = vld [vmem:[%s22953_s1] sm:$0xff] }
0x601e   :  { %v15471_v40 = vadd.f32 %v16447_v3, %v15465_v49  ;;  %v15846_v3 = vmul.f32 -0.5, %v15840_v55 }
0x6020   :  { %v15473_v61 = vmul.f32 0.70710677, %v15471_v40  ;;  %v15472_v25 = vmul.f32 0.5, %v15471_v40  ;;  %v15847_v39 = vmul.f32 %v15846_v3, %v15840_v55 }
0x6022   :  { %v15474_v34 = vand.u32 2147483647, %v15473_v61  ;;  %vm15493_vm6 = vcmp.ge.f32.partialorder %v15473_v61, 0.0 }
0x6024   :  { %v15475_v1 = vmul.f32 0.3275911, %v15474_v34  ;;  %v15487_v12 = vsub.f32 0.0, %v15474_v34 }
0x6026   :  { %v15476_v38 = vadd.f32 1.0, %v15475_v1  ;;  %v15488_v50 = vmul.f32 %v15487_v12, %v15474_v34 }
0x6028   :  { %20446 = vrcp.f32 %v15476_v38  ;;  %v15489_v62 = vmul.f32 1.442695, %v15488_v50 }
0x602a   :  { %20448 = vpow2.f32 %v15489_v62 }
0x6032   :  { %v20447_v11 = vpop.eup %20446 }
0x6033   :  { %v15478_v28 = vmul.f32 1.0614054, %v20447_v11 }
0x6034   :  { %v20449_v33 = vpop.eup %20448 }
0x6035   :  { %v15479_v7 = vadd.f32 -1.4531521, %v15478_v28 }
0x6037   :  { %v15480_v45 = vmul.f32 %v20447_v11, %v15479_v7 }
0x6039   :  { %v15481_v20 = vadd.f32 1.4214138, %v15480_v45 }
0x603b   :  { %v15482_v59 = vmul.f32 %v20447_v11, %v15481_v20 }
0x603d   :  { %v15483_v18 = vadd.f32 -0.28449672, %v15482_v59 }
0x603f   :  { %v15484_v4 = vmul.f32 %v20447_v11, %v15483_v18 }
0x6041   :  { %v15485_v23 = vadd.f32 0.2548296, %v15484_v4 }
0x6043   :  { %v15486_v6 = vmul.f32 %v20447_v11, %v15485_v23 }
0x6045   :  { %v15491_v36 = vmul.f32 %v20449_v33, %v15486_v6 }
0x6047   :  { %v15492_v5 = vsub.f32 1.0, %v15491_v36 }
0x6049   :  { %v15494_v35 = vsub.f32 0.0, %v15492_v5 }
0x604b   :  { %v15495_v0 = vsel %vm15493_vm6, %v15492_v5, %v15494_v35 }
0x604c   :  { %v15496_v17 = vadd.f32 1.0, %v15495_v0 }
0x604e   :  { %v15497_v37 = vmul.f32 %v15496_v17, %v15472_v25 }
0x6050   :  { %19131 = vmatmul.mubr.msk.f32.vlgmr.msra.gmra.mrb[4].mxu1 %vm171_vm0, %v15497_v37  ;;  %vm15588_vm0 = vcmask 113664  }
0x6051   :  { %19144 = vmatprep.mubr.msk.f32.mxu1 %vm20506_vm7, %v20507_v31  ;;  %19951 = vmatpush3.bf16.msk.msra.mxu1 %vm22929_vm13, %v19949_v43 }
0x6123   :  { %v15576_v30 = vpop.f32.mrb[4].mxu1 }
0x6124   :  { %v15577_v56 = vadd.f32 %v16448_v51, %v15576_v30  ;;  %v19132_v9 = vpop.f32.mrb[5].mxu1 }
0x6126   :  { %v15580_v60 = vmax.f32 %v15577_v56, 0.0 }
0x6128   :  { %19138 = vmatmul.mubr.msk.f32.vlgmr.msra.gmra.mrb[250].mxu0 %vm15588_vm0, %v15580_v60 }
0x6129   :  { %19151 = vmatprep.mubr.msk.f32.mxu0 %vm20506_vm7, %v20507_v31  ;;  %19955 = vmatpush3.bf16.msk.msra.mxu0 %vm22929_vm13, %v19953_v26  ;;  %v16456_v31 = vld [vmem:[#allocation2 + $0xde0] ss:$0 sm:$0xff]  ;;  %vm15858_vm7 = vcmask 56320  }
0x61fb   :  { %v15662_v16 = vpop.f32.mrb[250].mxu0 }
0x61fc   :  { %v15663_v29 = vadd.f32 %v16450_v57, %v15662_v16  ;;  %v19139_v52 = vpop.f32.mrb[251].mxu0 }
0x61fe   :  { %v15666_v54 = vmax.f32 %v15663_v29, 0.0 }
0x6200   :  { %19145 = vmatmul.mubr.msk.f32.vlgmr.msra.gmra.mrb[6].mxu1 %vm15588_vm0, %v15666_v54  ;;  %19152 = vmatmul.mubr.msk.f32.vlgmr.msra.gmra.mrb[252].mxu0 %vm15588_vm0, %v15666_v54 }
0x62d3   :  { %v15746_v21 = vpop.f32.mrb[6].mxu1  ;;  %v15831_v8 = vpop.f32.mrb[252].mxu0 }
0x62d4   :  { %v15832_v46 = vadd.f32 %v16456_v31, %v15831_v8  ;;  %v19146_v41 = vpop.f32.mrb[7].mxu1  ;;  %v19153_v15 = vpop.f32.mrb[253].mxu0  ;;  %v15747_v42 = vadd.f32 %v16453_v10, %v15746_v21 }
0x62d6   :  { %v15835_v2 = vsub.f32 0.0, %v15832_v46  ;;  %v15750_v19 = vsub.f32 0.0, %v15747_v42 }
0x62d8   :  { %v15836_v53 = vmul.f32 1.442695, %v15835_v2  ;;  %v15751_v24 = vmul.f32 1.442695, %v15750_v19 }
0x62da   :  { %20450 = vpow2.f32 %v15836_v53 }
0x62db   :  { %20452 = vpow2.f32 %v15751_v24 }
0x62e4   :  { %v20451_v22 = vpop.eup %20450 }
0x62e5   :  { %v15838_v48 = vadd.f32 1.0, %v20451_v22  ;;  %v20453_v49 = vpop.eup %20452 }
0x62e6   :  { %v15753_v34 = vadd.f32 1.0, %v20453_v49 }
0x62e7   :  { %20454 = vrcp.f32 %v15838_v48 }
0x62f1   :  { %v20455_v40 = vpop.eup %20454 }
0x62f2   :  { %v15841_v61 = vmul.f32 0.5, %v20455_v40 }
0x62f4   :  { %v15842_v1 = vmul.f32 1.442695, %v15841_v61  ;;  %v15848_v38 = vsub.f32 %v15847_v39, %v15841_v61 }
0x62f6   :  { %20456 = vpow2.f32 %v15842_v1  ;;  %v16459_v12 = vadd.f32 -0.9189385, %v15848_v38 }
0x62f7   :  { %20458 = vrcp.f32 %v15753_v34 }
0x62f8   :  { %15851 = vrot.lane.b32.xlu0 %v16459_v12, %s20509_s15 }
0x6300   :  { %v20457_v11 = vpop.eup %20456 }
0x6301   :  { %15855 = vrot.lane.b32.xlu1 %v20457_v11, %s20510_s16  ;;  %v15844_v50 = vmul.f32 %v20457_v11, %v15840_v55  ;;  %v20459_v28 = vpop.eup %20458 }
0x6303   :  { %v15845_v7 = vadd.f32 %v20459_v28, %v15844_v50 }
0x636a   :  { %v15852_v62 = vpop.permute.xlu0 %15851 }
0x636b   :  { %v15859_v45 = vsel %vm15858_vm7, %v15845_v7, %v15852_v62 }
0x6373   :  { %v15856_v20 = vpop.permute.xlu1 %15855 }
0x6374   :  { %v15860_v59 = vsel %vm15588_vm0, %v15859_v45, %v15856_v20 }
0x6375   :  { %15862 = vst.msk [vmem:[%s22955_s3] sm:$0xff] %vm15861_vm14, %v15860_v59 }
0x6376   :  { %15867 = vsyncpa [#allocation3], 1 }

</bundles_post_ra>
